<compile_context>
chip_gen: v7x
topology: tpu7x:2x2x1
jax: 0.10.0
libtpu: 0.0.40
codegen_flags: <defaults>
</compile_context>

<pallas_src>
import math

import jax
import jax.numpy as jnp
from jax.experimental import pallas as pl
from jax.experimental.pallas import tpu as pltpu

D = 768          # hidden size hard-coded by the module (Linear(768, 2))
FFN = 768        # stand-in FFN width (real longformer uses 3072)
NUM_CLASSES = 2
CLS_PAD = 128    # classifier output padded to one full lane group
NEG_INF = -1e9


def _layer_norm(h, g, b, eps=1e-5):
    mu = jnp.mean(h, axis=-1, keepdims=True)
    var = jnp.mean((h - mu) ** 2, axis=-1, keepdims=True)
    return (h - mu) * jax.lax.rsqrt(var + eps) * g + b


def _quantize_per_col(w):
    """Symmetric per-output-column int8 quantization: w ~= w_q * scale."""
    amax = jnp.max(jnp.abs(w), axis=0, keepdims=True)              # (1, N)
    scale = jnp.where(amax > 0.0, amax, 1.0) / 127.0
    wq = jnp.clip(jnp.round(w / scale), -127.0, 127.0).astype(jnp.int8)
    return wq, scale.astype(jnp.float32)


def polarity_kernel(bias_ref, x_ref,
                    wqkv_ref, sqkv_ref, wo_ref, so_ref,
                    w1_ref, s1_ref, b1_ref, w2_ref, s2_ref, b2_ref,
                    g1_ref, be1_ref, g2_ref, be2_ref,
                    wc_ref, bc_ref,
                    logits_ref, cls_ref):
    x_bf = x_ref[...]                      # (BT, S, D) bf16 token+pos embeddings
    bt, s, d = x_bf.shape
    x = x_bf.astype(jnp.float32)           # f32 copy for residual / LayerNorm
    bias = bias_ref[...]                   # (BT, S) f32: 0 = real token, -1e9 = pad

    x2d_bf = x_bf.reshape(bt * s, d)       # bf16 slab for weight matmuls
    x2d = x.reshape(bt * s, d)             # f32 slab for residual

    # ---- longformer stand-in: one full-attention encoder layer ----
    # fused QKV: int8 weight dequantized on the VPU (halves weight HBM DMA),
    # bf16 x bf16 MXU matmul, f32 accumulate, per-output-column scale applied
    # afterwards (q columns were pre-scaled by 1/sqrt(D) in the wrapper).
    wqkv = wqkv_ref[...].astype(jnp.bfloat16)                       # (D, 3D)
    qkv = jnp.dot(x2d_bf, wqkv,
                  preferred_element_type=jnp.float32) * sqkv_ref[...]
    qkv = qkv.astype(jnp.bfloat16)                                  # (BT*S, 3D)
    q = qkv[:, :d].reshape(bt, s, d)
    k = qkv[:, d:2 * d].reshape(bt, s, d)
    v = qkv[:, 2 * d:].reshape(bt, s, d)

    # attention scores: bf16 operands, f32 accumulation (no explicit k transpose)
    scores = jnp.einsum('bqd,bkd->bqk', q, k,
                        preferred_element_type=jnp.float32)         # (BT, S, S)
    scores = scores + bias.reshape(bt, 1, s)                        # mask padded keys

    smax = jnp.max(scores, axis=-1, keepdims=True)
    p = jnp.exp(scores - smax)
    p = p * pl.reciprocal(jnp.sum(p, axis=-1, keepdims=True), approx=True)
    attn = jnp.einsum('bqk,bkd->bqd', p.astype(jnp.bfloat16), v,
                      preferred_element_type=jnp.float32)           # (BT, S, D)

    wo = wo_ref[...].astype(jnp.bfloat16)
    proj = jnp.dot(attn.reshape(bt * s, d).astype(jnp.bfloat16), wo,
                   preferred_element_type=jnp.float32) * so_ref[...]
    h = _layer_norm(x2d + proj, g1_ref[...], be1_ref[...])          # (BT*S, D) f32

    # TODO(synk): HF Longformer uses exact (erf) GELU; tanh approximation kept
    # (backbone weights are synthetic stand-ins, parity is immaterial).
    w1 = w1_ref[...].astype(jnp.bfloat16)
    ffn = jax.nn.gelu(
        jnp.dot(h.astype(jnp.bfloat16), w1,
                preferred_element_type=jnp.float32) * s1_ref[...] + b1_ref[...])
    w2 = w2_ref[...].astype(jnp.bfloat16)
    ffn = (jnp.dot(ffn.astype(jnp.bfloat16), w2,
                   preferred_element_type=jnp.float32) * s2_ref[...] + b2_ref[...])
    emb2d = _layer_norm(h + ffn, g2_ref[...], be2_ref[...])         # last_hidden_state

    # ---- head (matches the PyTorch forward exactly) ----
    emb = emb2d.reshape(bt, s, d)
    cls_rows = emb[:, 0, :]                                         # (BT, D) CLS tokens
    # torch.mean(embeddings[:, 1:, :], dim=1) == (sum over tokens - CLS)/(S-1)
    # (padded positions intentionally included, exactly like the PyTorch code).
    mean_emb = (jnp.sum(emb, axis=1) - cls_rows) * (1.0 / (s - 1))

    cls_ref[...] = cls_rows
    logits_ref[...] = (jnp.dot(mean_emb.astype(jnp.bfloat16), wc_ref[...],
                               preferred_element_type=jnp.float32)
                       + bc_ref[...])                               # (BT, CLS_PAD)


def polarity_longformer_forward(input_ids, params, pad_index=0):
    """Returns (result (B, 2), CLS_token) matching the PyTorch forward (incl. squeeze(0))."""
    B, S = input_ids.shape

    # Tile batch: up to 32 rows per grid step (256-row matmul slab at S=8) so the
    # MXU M-dimension fills and the resident weights amortize over more rows.
    BT = B if B <= 32 else 32
    B_pad = ((B + BT - 1) // BT) * BT
    if B_pad != B:
        # Fully-padded extra rows see an all -1e9 key bias -> uniform softmax:
        # numerically safe, and the rows are sliced off below.
        input_ids = jnp.pad(input_ids, ((0, B_pad - B), (0, 0)),
                            constant_values=pad_index)

    # glue (outside kernel): embedding gather + additive key-mask bias.
    # Embeddings shipped as bf16 (halves activation DMA); upcast inside the kernel.
    x = (params["tok_emb"][input_ids]
         + params["pos_emb"][:S][None, :, :]).astype(jnp.bfloat16)      # (B_pad,S,D)
    bias = jnp.where(input_ids != pad_index, 0.0, NEG_INF).astype(jnp.float32)

    # fused QKV weight (q slice pre-scaled by 1/sqrt(D)); backbone weights int8.
    scale = 1.0 / math.sqrt(D)
    wqkv_f32 = jnp.concatenate(
        [params["wq"] * scale, params["wk"], params["wv"]], axis=1)     # (D, 3D)
    wqkv_q, s_qkv = _quantize_per_col(wqkv_f32)
    wo_q, s_o = _quantize_per_col(params["wo"])
    w1_q, s_1 = _quantize_per_col(params["w1"])
    w2_q, s_2 = _quantize_per_col(params["w2"])

    # pad the 768->2 classifier to a lane-dense 768->128 slab (zeros beyond col 2)
    wc_pad = jnp.zeros((D, CLS_PAD), jnp.float32).at[:, :NUM_CLASSES].set(
        params["wc"]).astype(jnp.bfloat16)
    bc_pad = jnp.zeros((1, CLS_PAD), jnp.float32).at[0, :NUM_CLASSES].set(
        params["bc"])

    def const_spec(shape):
        n = len(shape)
        return pl.BlockSpec(shape, lambda i, n=n: (0,) * n)

    grid_steps = B_pad // BT
    grid = (grid_steps,)
    # "parallel" duplicates the weight DMA on each v7x TensorCore; only worth it
    # once there are enough grid steps of real work per core.
    dim_sem = ("parallel",) if grid_steps >= 4 else ("arbitrary",)

    in_specs = [
        pl.BlockSpec((BT, S), lambda i: (i, 0)),            # mask bias (f32)
        pl.BlockSpec((BT, S, D), lambda i: (i, 0, 0)),      # embeddings (bf16)
        const_spec((D, 3 * D)), const_spec((1, 3 * D)),     # wqkv int8 + scale
        const_spec((D, D)), const_spec((1, D)),             # wo int8 + scale
        const_spec((D, FFN)), const_spec((1, FFN)),         # w1 int8 + scale
        const_spec((1, FFN)),                               # b1
        const_spec((FFN, D)), const_spec((1, D)),           # w2 int8 + scale
        const_spec((1, D)),                                 # b2
        const_spec((1, D)), const_spec((1, D)),             # ln1 gamma/beta
        const_spec((1, D)), const_spec((1, D)),             # ln2 gamma/beta
        const_spec((D, CLS_PAD)), const_spec((1, CLS_PAD)),  # classifier (bf16) + bias
    ]
    out_specs = [
        pl.BlockSpec((BT, CLS_PAD), lambda i: (i, 0)),      # logits (padded)
        pl.BlockSpec((BT, D), lambda i: (i, 0)),            # CLS tokens
    ]
    out_shape = [
        jax.ShapeDtypeStruct((B_pad, CLS_PAD), jnp.float32),
        jax.ShapeDtypeStruct((B_pad, D), jnp.float32),
    ]

    # TODO(synk): P10 cross-pallas_call weight prefetch (pl.ANY weights +
    # make_async_copy into VMEM/semaphore outputs, overlapped with the embedding
    # gather above) is the biggest remaining lever for this weight-DMA-bound
    # kernel; not implemented in this revision.
    logits_pad, cls = pl.pallas_call(
        polarity_kernel,
        grid=grid,
        in_specs=in_specs,
        out_specs=out_specs,
        out_shape=out_shape,
        compiler_params=pltpu.CompilerParams(
            dimension_semantics=dim_sem,
            vmem_limit_bytes=32 * 1024 * 1024),
    )(bias, x,
      wqkv_q, s_qkv, wo_q, s_o,
      w1_q, s_1, params["b1"], w2_q, s_2, params["b2"],
      params["ln1_g"], params["ln1_b"], params["ln2_g"], params["ln2_b"],
      wc_pad, bc_pad)

    result = logits_pad[:B, :NUM_CLASSES]   # (B, 2)
    cls_token = cls[:B, :]                  # (B, 768)
    if B == 1:                              # match PyTorch CLS_token.squeeze(0)
        cls_token = cls_token[0]
    return result, cls_token


def init_params(key, vocab_size=100, max_pos=64):
    ks = jax.random.split(key, 10)

    def init(k, shape, scale=0.02):
        return (scale * jax.random.normal(k, shape)).astype(jnp.float32)

    # TODO(synk): weights are deterministic synthetic stand-ins for the
    # pretrained longformer checkpoint (cannot load HF weights here).
    return {
        "tok_emb": init(ks[0], (vocab_size, D)),
        "pos_emb": init(ks[1], (max_pos, D)),
        "wq": init(ks[2], (D, D)),
        "wk": init(ks[3], (D, D)),
        "wv": init(ks[4], (D, D)),
        "wo": init(ks[5], (D, D)),
        "w1": init(ks[6], (D, FFN)),
        "b1": jnp.zeros((1, FFN), jnp.float32),
        "w2": init(ks[7], (FFN, D)),
        "b2": jnp.zeros((1, D), jnp.float32),
        "ln1_g": jnp.ones((1, D), jnp.float32),
        "ln1_b": jnp.zeros((1, D), jnp.float32),
        "ln2_g": jnp.ones((1, D), jnp.float32),
        "ln2_b": jnp.zeros((1, D), jnp.float32),
        "wc": init(ks[8], (D, NUM_CLASSES)),     # nn.Linear(768, 2) (as x @ W)
        "bc": jnp.zeros((NUM_CLASSES,), jnp.float32),
        # note: nn.Linear(2*768, 768) "encoder" and nn.Sigmoid exist in __init__
        # but are unused in forward, so they are intentionally omitted here.
    }


if __name__ == "__main__":
    key = jax.random.PRNGKey(0)
    pkey, dkey = jax.random.split(key)

    B, S = 2, 8
    params = init_params(pkey)

    input_ids = jax.random.randint(dkey, (B, S), 2, 100, dtype=jnp.int32)
    input_ids = input_ids.at[:, 0].set(1)      # CLS-like token at position 0
    input_ids = input_ids.at[1, -2:].set(0)    # some padding in the second row

    result, cls_token = polarity_longformer_forward(input_ids, params, pad_index=0)
    jax.block_until_ready((result, cls_token))

    assert result.shape == (B, NUM_CLASSES)
    assert cls_token.shape == (B, D)
    assert bool(jnp.all(jnp.isfinite(result))) and bool(jnp.all(jnp.isfinite(cls_token)))
    print("KERNEL_OK")
</pallas_src>

<mosaic_0001>
module attributes {stable_mosaic.version = 11 : i64} {
  func.func @polarity_kernel(%arg0: i32, %arg1: memref<2x8xf32, #tpu.memory_space<vmem>>, %arg2: memref<2x8x768xbf16, #tpu.memory_space<vmem>>, %arg3: memref<768x2304xi8, #tpu.memory_space<vmem>>, %arg4: memref<1x2304xf32, #tpu.memory_space<vmem>>, %arg5: memref<768x768xi8, #tpu.memory_space<vmem>>, %arg6: memref<1x768xf32, #tpu.memory_space<vmem>>, %arg7: memref<768x768xi8, #tpu.memory_space<vmem>>, %arg8: memref<1x768xf32, #tpu.memory_space<vmem>>, %arg9: memref<1x768xf32, #tpu.memory_space<vmem>>, %arg10: memref<768x768xi8, #tpu.memory_space<vmem>>, %arg11: memref<1x768xf32, #tpu.memory_space<vmem>>, %arg12: memref<1x768xf32, #tpu.memory_space<vmem>>, %arg13: memref<1x768xf32, #tpu.memory_space<vmem>>, %arg14: memref<1x768xf32, #tpu.memory_space<vmem>>, %arg15: memref<1x768xf32, #tpu.memory_space<vmem>>, %arg16: memref<1x768xf32, #tpu.memory_space<vmem>>, %arg17: memref<768x128xbf16, #tpu.memory_space<vmem>>, %arg18: memref<1x128xf32, #tpu.memory_space<vmem>>, %arg19: memref<2x128xf32, #tpu.memory_space<vmem>>, %arg20: memref<2x768xf32, #tpu.memory_space<vmem>>) attributes {dimension_semantics = [#tpu.dimension_semantics<arbitrary>], iteration_bounds = array<i64: 1>, scalar_prefetch = 0 : i64, scratch_operands = 0 : i64, tpu.core_type = #tpu.core_type<tc>, window_params = [{transform_indices = @transform_0, window_bounds = array<i64: 2, 8>}, {transform_indices = @transform_1, window_bounds = array<i64: 2, 8, 768>}, {pipeline_mode = #tpu.pipeline_mode<synchronous>, transform_indices = @transform_2, window_bounds = array<i64: 768, 2304>}, {pipeline_mode = #tpu.pipeline_mode<synchronous>, transform_indices = @transform_3, window_bounds = array<i64: 1, 2304>}, {pipeline_mode = #tpu.pipeline_mode<synchronous>, transform_indices = @transform_4, window_bounds = array<i64: 768, 768>}, {pipeline_mode = #tpu.pipeline_mode<synchronous>, transform_indices = @transform_5, window_bounds = array<i64: 1, 768>}, {pipeline_mode = #tpu.pipeline_mode<synchronous>, transform_indices = @transform_6, window_bounds = array<i64: 768, 768>}, {pipeline_mode = #tpu.pipeline_mode<synchronous>, transform_indices = @transform_7, window_bounds = array<i64: 1, 768>}, {pipeline_mode = #tpu.pipeline_mode<synchronous>, transform_indices = @transform_8, window_bounds = array<i64: 1, 768>}, {pipeline_mode = #tpu.pipeline_mode<synchronous>, transform_indices = @transform_9, window_bounds = array<i64: 768, 768>}, {pipeline_mode = #tpu.pipeline_mode<synchronous>, transform_indices = @transform_10, window_bounds = array<i64: 1, 768>}, {pipeline_mode = #tpu.pipeline_mode<synchronous>, transform_indices = @transform_11, window_bounds = array<i64: 1, 768>}, {pipeline_mode = #tpu.pipeline_mode<synchronous>, transform_indices = @transform_12, window_bounds = array<i64: 1, 768>}, {pipeline_mode = #tpu.pipeline_mode<synchronous>, transform_indices = @transform_13, window_bounds = array<i64: 1, 768>}, {pipeline_mode = #tpu.pipeline_mode<synchronous>, transform_indices = @transform_14, window_bounds = array<i64: 1, 768>}, {pipeline_mode = #tpu.pipeline_mode<synchronous>, transform_indices = @transform_15, window_bounds = array<i64: 1, 768>}, {pipeline_mode = #tpu.pipeline_mode<synchronous>, transform_indices = @transform_16, window_bounds = array<i64: 768, 128>}, {pipeline_mode = #tpu.pipeline_mode<synchronous>, transform_indices = @transform_17, window_bounds = array<i64: 1, 128>}, {transform_indices = @transform_18, window_bounds = array<i64: 2, 128>}, {transform_indices = @transform_19, window_bounds = array<i64: 2, 768>}]} {
    %c0 = arith.constant 0 : index
    %c0_0 = arith.constant 0 : index
    %c0_1 = arith.constant 0 : index
    %0 = vector.load %arg2[%c0, %c0_0, %c0_1] : memref<2x8x768xbf16, #tpu.memory_space<vmem>>, vector<2x8x768xbf16>
    %1 = arith.extf %0 : vector<2x8x768xbf16> to vector<2x8x768xf32>
    %c0_2 = arith.constant 0 : index
    %c0_3 = arith.constant 0 : index
    %2 = vector.load %arg1[%c0_2, %c0_3] : memref<2x8xf32, #tpu.memory_space<vmem>>, vector<2x8xf32>
    %3 = vector.shape_cast %0 : vector<2x8x768xbf16> to vector<16x768xbf16>
    %4 = vector.shape_cast %1 : vector<2x8x768xf32> to vector<16x768xf32>
    %c0_4 = arith.constant 0 : index
    %c0_5 = arith.constant 0 : index
    %5 = vector.load %arg3[%c0_4, %c0_5] : memref<768x2304xi8, #tpu.memory_space<vmem>>, vector<768x2304xi8>
    %6 = arith.sitofp %5 : vector<768x2304xi8> to vector<768x2304xbf16>
    %cst = arith.constant dense<0.000000e+00> : vector<16x2304xf32>
    %7 = tpu.matmul %3, %6, %cst {dimension_numbers = #tpu.dot_dimension_numbers<[1], [0], [0], [1], [0, 0, 1, 1], [], []>} : vector<16x768xbf16>, vector<768x2304xbf16>, vector<16x2304xf32> -> vector<16x2304xf32>
    %c0_6 = arith.constant 0 : index
    %c0_7 = arith.constant 0 : index
    %8 = vector.load %arg4[%c0_6, %c0_7] : memref<1x2304xf32, #tpu.memory_space<vmem>>, vector<1x2304xf32>
    %9 = vector.broadcast %8 : vector<1x2304xf32> to vector<16x2304xf32>
    %10 = arith.mulf %7, %9 : vector<16x2304xf32>
    %11 = arith.truncf %10 : vector<16x2304xf32> to vector<16x2304xbf16>
    %12 = vector.extract_strided_slice %11 {offsets = [0, 0], sizes = [16, 768], strides = [1, 1]} : vector<16x2304xbf16> to vector<16x768xbf16>
    %13 = vector.shape_cast %12 : vector<16x768xbf16> to vector<2x8x768xbf16>
    %14 = vector.extract_strided_slice %11 {offsets = [0, 768], sizes = [16, 768], strides = [1, 1]} : vector<16x2304xbf16> to vector<16x768xbf16>
    %15 = vector.shape_cast %14 : vector<16x768xbf16> to vector<2x8x768xbf16>
    %16 = vector.extract_strided_slice %11 {offsets = [0, 1536], sizes = [16, 768], strides = [1, 1]} : vector<16x2304xbf16> to vector<16x768xbf16>
    %17 = vector.shape_cast %16 : vector<16x768xbf16> to vector<2x8x768xbf16>
    "tpu.trace_start"() <{level = 10 : i32, message = "bqd,bkd->bqk"}> : () -> ()
    %cst_8 = arith.constant dense<0.000000e+00> : vector<2x8x8xf32>
    %18 = tpu.matmul %13, %15, %cst_8 {dimension_numbers = #tpu.dot_dimension_numbers<[2], [2], [1], [1], [0, 0, 0, 1, 1, 1], [0], [0]>} : vector<2x8x768xbf16>, vector<2x8x768xbf16>, vector<2x8x8xf32> -> vector<2x8x8xf32>
    "tpu.trace_stop"() : () -> ()
    %19 = vector.shape_cast %2 : vector<2x8xf32> to vector<2x1x8xf32>
    %20 = vector.broadcast %19 : vector<2x1x8xf32> to vector<2x8x8xf32>
    %21 = arith.addf %18, %20 : vector<2x8x8xf32>
    %cst_9 = arith.constant dense<0xFF800000> : vector<2x8xf32>
    %22 = vector.multi_reduction <maximumf>, %21, %cst_9 [2] : vector<2x8x8xf32> to vector<2x8xf32>
    %23 = vector.shape_cast %22 : vector<2x8xf32> to vector<2x8x1xf32>
    %24 = vector.broadcast %23 : vector<2x8x1xf32> to vector<2x8x8xf32>
    %25 = arith.subf %21, %24 : vector<2x8x8xf32>
    %26 = math.exp %25 : vector<2x8x8xf32>
    %cst_10 = arith.constant dense<0.000000e+00> : vector<2x8xf32>
    %27 = vector.multi_reduction <add>, %26, %cst_10 [2] : vector<2x8x8xf32> to vector<2x8xf32>
    %28 = vector.shape_cast %27 : vector<2x8xf32> to vector<2x8x1xf32>
    %29 = tpu.reciprocal %28 {approx = true} : vector<2x8x1xf32> -> vector<2x8x1xf32>
    %30 = vector.broadcast %29 : vector<2x8x1xf32> to vector<2x8x8xf32>
    %31 = arith.mulf %26, %30 : vector<2x8x8xf32>
    %32 = arith.truncf %31 : vector<2x8x8xf32> to vector<2x8x8xbf16>
    "tpu.trace_start"() <{level = 10 : i32, message = "bqk,bkd->bqd"}> : () -> ()
    %cst_11 = arith.constant dense<0.000000e+00> : vector<2x8x768xf32>
    %33 = tpu.matmul %32, %17, %cst_11 {dimension_numbers = #tpu.dot_dimension_numbers<[2], [1], [1], [2], [0, 0, 0, 1, 1, 2], [0], [0]>} : vector<2x8x8xbf16>, vector<2x8x768xbf16>, vector<2x8x768xf32> -> vector<2x8x768xf32>
    "tpu.trace_stop"() : () -> ()
    %c0_12 = arith.constant 0 : index
    %c0_13 = arith.constant 0 : index
    %34 = vector.load %arg5[%c0_12, %c0_13] : memref<768x768xi8, #tpu.memory_space<vmem>>, vector<768x768xi8>
    %35 = arith.sitofp %34 : vector<768x768xi8> to vector<768x768xbf16>
    %36 = vector.shape_cast %33 : vector<2x8x768xf32> to vector<16x768xf32>
    %37 = arith.truncf %36 : vector<16x768xf32> to vector<16x768xbf16>
    %cst_14 = arith.constant dense<0.000000e+00> : vector<16x768xf32>
    %38 = tpu.matmul %37, %35, %cst_14 {dimension_numbers = #tpu.dot_dimension_numbers<[1], [0], [0], [1], [0, 0, 1, 1], [], []>} : vector<16x768xbf16>, vector<768x768xbf16>, vector<16x768xf32> -> vector<16x768xf32>
    %c0_15 = arith.constant 0 : index
    %c0_16 = arith.constant 0 : index
    %39 = vector.load %arg6[%c0_15, %c0_16] : memref<1x768xf32, #tpu.memory_space<vmem>>, vector<1x768xf32>
    %40 = vector.broadcast %39 : vector<1x768xf32> to vector<16x768xf32>
    %41 = arith.mulf %38, %40 : vector<16x768xf32>
    %42 = arith.addf %4, %41 : vector<16x768xf32>
    %c0_17 = arith.constant 0 : index
    %c0_18 = arith.constant 0 : index
    %43 = vector.load %arg13[%c0_17, %c0_18] : memref<1x768xf32, #tpu.memory_space<vmem>>, vector<1x768xf32>
    %c0_19 = arith.constant 0 : index
    %c0_20 = arith.constant 0 : index
    %44 = vector.load %arg14[%c0_19, %c0_20] : memref<1x768xf32, #tpu.memory_space<vmem>>, vector<1x768xf32>
    %cst_21 = arith.constant dense<0.000000e+00> : vector<16xf32>
    %45 = vector.multi_reduction <add>, %42, %cst_21 [1] : vector<16x768xf32> to vector<16xf32>
    %46 = vector.shape_cast %45 : vector<16xf32> to vector<16x1xf32>
    %cst_22 = arith.constant 7.680000e+02 : f32
    %47 = vector.broadcast %cst_22 : f32 to vector<16x1xf32>
    %48 = arith.divf %46, %47 : vector<16x1xf32>
    %49 = vector.broadcast %48 : vector<16x1xf32> to vector<16x768xf32>
    %50 = arith.subf %42, %49 : vector<16x768xf32>
    %51 = arith.mulf %50, %50 : vector<16x768xf32>
    %cst_23 = arith.constant dense<0.000000e+00> : vector<16xf32>
    %52 = vector.multi_reduction <add>, %51, %cst_23 [1] : vector<16x768xf32> to vector<16xf32>
    %53 = vector.shape_cast %52 : vector<16xf32> to vector<16x1xf32>
    %cst_24 = arith.constant 7.680000e+02 : f32
    %54 = vector.broadcast %cst_24 : f32 to vector<16x1xf32>
    %55 = arith.divf %53, %54 : vector<16x1xf32>
    %56 = vector.broadcast %48 : vector<16x1xf32> to vector<16x768xf32>
    %57 = arith.subf %42, %56 : vector<16x768xf32>
    %cst_25 = arith.constant 9.99999974E-6 : f32
    %58 = vector.broadcast %cst_25 : f32 to vector<16x1xf32>
    %59 = arith.addf %55, %58 : vector<16x1xf32>
    %60 = math.rsqrt %59 : vector<16x1xf32>
    %61 = vector.broadcast %60 : vector<16x1xf32> to vector<16x768xf32>
    %62 = arith.mulf %57, %61 : vector<16x768xf32>
    %63 = vector.broadcast %43 : vector<1x768xf32> to vector<16x768xf32>
    %64 = arith.mulf %62, %63 : vector<16x768xf32>
    %65 = vector.broadcast %44 : vector<1x768xf32> to vector<16x768xf32>
    %66 = arith.addf %64, %65 : vector<16x768xf32>
    %c0_26 = arith.constant 0 : index
    %c0_27 = arith.constant 0 : index
    %67 = vector.load %arg7[%c0_26, %c0_27] : memref<768x768xi8, #tpu.memory_space<vmem>>, vector<768x768xi8>
    %68 = arith.sitofp %67 : vector<768x768xi8> to vector<768x768xbf16>
    %69 = arith.truncf %66 : vector<16x768xf32> to vector<16x768xbf16>
    %cst_28 = arith.constant dense<0.000000e+00> : vector<16x768xf32>
    %70 = tpu.matmul %69, %68, %cst_28 {dimension_numbers = #tpu.dot_dimension_numbers<[1], [0], [0], [1], [0, 0, 1, 1], [], []>} : vector<16x768xbf16>, vector<768x768xbf16>, vector<16x768xf32> -> vector<16x768xf32>
    %c0_29 = arith.constant 0 : index
    %c0_30 = arith.constant 0 : index
    %71 = vector.load %arg8[%c0_29, %c0_30] : memref<1x768xf32, #tpu.memory_space<vmem>>, vector<1x768xf32>
    %72 = vector.broadcast %71 : vector<1x768xf32> to vector<16x768xf32>
    %73 = arith.mulf %70, %72 : vector<16x768xf32>
    %c0_31 = arith.constant 0 : index
    %c0_32 = arith.constant 0 : index
    %74 = vector.load %arg9[%c0_31, %c0_32] : memref<1x768xf32, #tpu.memory_space<vmem>>, vector<1x768xf32>
    %75 = vector.broadcast %74 : vector<1x768xf32> to vector<16x768xf32>
    %76 = arith.addf %73, %75 : vector<16x768xf32>
    %77 = arith.mulf %76, %76 : vector<16x768xf32>
    %78 = arith.mulf %76, %77 : vector<16x768xf32>
    %cst_33 = arith.constant 4.471500e-02 : f32
    %79 = vector.broadcast %cst_33 : f32 to vector<16x768xf32>
    %80 = arith.mulf %79, %78 : vector<16x768xf32>
    %81 = arith.addf %76, %80 : vector<16x768xf32>
    %cst_34 = arith.constant 0.797884583 : f32
    %82 = vector.broadcast %cst_34 : f32 to vector<16x768xf32>
    %83 = arith.mulf %82, %81 : vector<16x768xf32>
    %84 = math.tanh %83 : vector<16x768xf32>
    %cst_35 = arith.constant 1.000000e+00 : f32
    %85 = vector.broadcast %cst_35 : f32 to vector<16x768xf32>
    %86 = arith.addf %85, %84 : vector<16x768xf32>
    %cst_36 = arith.constant 5.000000e-01 : f32
    %87 = vector.broadcast %cst_36 : f32 to vector<16x768xf32>
    %88 = arith.mulf %87, %86 : vector<16x768xf32>
    %89 = arith.mulf %76, %88 : vector<16x768xf32>
    %c0_37 = arith.constant 0 : index
    %c0_38 = arith.constant 0 : index
    %90 = vector.load %arg10[%c0_37, %c0_38] : memref<768x768xi8, #tpu.memory_space<vmem>>, vector<768x768xi8>
    %91 = arith.sitofp %90 : vector<768x768xi8> to vector<768x768xbf16>
    %92 = arith.truncf %89 : vector<16x768xf32> to vector<16x768xbf16>
    %cst_39 = arith.constant dense<0.000000e+00> : vector<16x768xf32>
    %93 = tpu.matmul %92, %91, %cst_39 {dimension_numbers = #tpu.dot_dimension_numbers<[1], [0], [0], [1], [0, 0, 1, 1], [], []>} : vector<16x768xbf16>, vector<768x768xbf16>, vector<16x768xf32> -> vector<16x768xf32>
    %c0_40 = arith.constant 0 : index
    %c0_41 = arith.constant 0 : index
    %94 = vector.load %arg11[%c0_40, %c0_41] : memref<1x768xf32, #tpu.memory_space<vmem>>, vector<1x768xf32>
    %95 = vector.broadcast %94 : vector<1x768xf32> to vector<16x768xf32>
    %96 = arith.mulf %93, %95 : vector<16x768xf32>
    %c0_42 = arith.constant 0 : index
    %c0_43 = arith.constant 0 : index
    %97 = vector.load %arg12[%c0_42, %c0_43] : memref<1x768xf32, #tpu.memory_space<vmem>>, vector<1x768xf32>
    %98 = vector.broadcast %97 : vector<1x768xf32> to vector<16x768xf32>
    %99 = arith.addf %96, %98 : vector<16x768xf32>
    %100 = arith.addf %66, %99 : vector<16x768xf32>
    %c0_44 = arith.constant 0 : index
    %c0_45 = arith.constant 0 : index
    %101 = vector.load %arg15[%c0_44, %c0_45] : memref<1x768xf32, #tpu.memory_space<vmem>>, vector<1x768xf32>
    %c0_46 = arith.constant 0 : index
    %c0_47 = arith.constant 0 : index
    %102 = vector.load %arg16[%c0_46, %c0_47] : memref<1x768xf32, #tpu.memory_space<vmem>>, vector<1x768xf32>
    %cst_48 = arith.constant dense<0.000000e+00> : vector<16xf32>
    %103 = vector.multi_reduction <add>, %100, %cst_48 [1] : vector<16x768xf32> to vector<16xf32>
    %104 = vector.shape_cast %103 : vector<16xf32> to vector<16x1xf32>
    %cst_49 = arith.constant 7.680000e+02 : f32
    %105 = vector.broadcast %cst_49 : f32 to vector<16x1xf32>
    %106 = arith.divf %104, %105 : vector<16x1xf32>
    %107 = vector.broadcast %106 : vector<16x1xf32> to vector<16x768xf32>
    %108 = arith.subf %100, %107 : vector<16x768xf32>
    %109 = arith.mulf %108, %108 : vector<16x768xf32>
    %cst_50 = arith.constant dense<0.000000e+00> : vector<16xf32>
    %110 = vector.multi_reduction <add>, %109, %cst_50 [1] : vector<16x768xf32> to vector<16xf32>
    %111 = vector.shape_cast %110 : vector<16xf32> to vector<16x1xf32>
    %cst_51 = arith.constant 7.680000e+02 : f32
    %112 = vector.broadcast %cst_51 : f32 to vector<16x1xf32>
    %113 = arith.divf %111, %112 : vector<16x1xf32>
    %114 = vector.broadcast %106 : vector<16x1xf32> to vector<16x768xf32>
    %115 = arith.subf %100, %114 : vector<16x768xf32>
    %cst_52 = arith.constant 9.99999974E-6 : f32
    %116 = vector.broadcast %cst_52 : f32 to vector<16x1xf32>
    %117 = arith.addf %113, %116 : vector<16x1xf32>
    %118 = math.rsqrt %117 : vector<16x1xf32>
    %119 = vector.broadcast %118 : vector<16x1xf32> to vector<16x768xf32>
    %120 = arith.mulf %115, %119 : vector<16x768xf32>
    %121 = vector.broadcast %101 : vector<1x768xf32> to vector<16x768xf32>
    %122 = arith.mulf %120, %121 : vector<16x768xf32>
    %123 = vector.broadcast %102 : vector<1x768xf32> to vector<16x768xf32>
    %124 = arith.addf %122, %123 : vector<16x768xf32>
    %125 = vector.shape_cast %124 : vector<16x768xf32> to vector<2x8x768xf32>
    %126 = vector.extract_strided_slice %125 {offsets = [0, 0, 0], sizes = [2, 1, 768], strides = [1, 1, 1]} : vector<2x8x768xf32> to vector<2x1x768xf32>
    %127 = vector.shape_cast %126 : vector<2x1x768xf32> to vector<2x768xf32>
    %cst_53 = arith.constant dense<0.000000e+00> : vector<2x768xf32>
    %128 = vector.multi_reduction <add>, %125, %cst_53 [1] : vector<2x8x768xf32> to vector<2x768xf32>
    %129 = arith.subf %128, %127 : vector<2x768xf32>
    %cst_54 = arith.constant 0.142857149 : f32
    %130 = vector.broadcast %cst_54 : f32 to vector<2x768xf32>
    %131 = arith.mulf %129, %130 : vector<2x768xf32>
    %c0_55 = arith.constant 0 : index
    %c0_56 = arith.constant 0 : index
    %132 = vector.load %arg20[%c0_55, %c0_56] : memref<2x768xf32, #tpu.memory_space<vmem>>, vector<2x768xf32>
    tpu.vector_store %arg20[%c0_55, %c0_56], %127 {strides = array<i32>} : memref<2x768xf32, #tpu.memory_space<vmem>>, vector<2x768xf32>,
    %133 = arith.truncf %131 : vector<2x768xf32> to vector<2x768xbf16>
    %c0_57 = arith.constant 0 : index
    %c0_58 = arith.constant 0 : index
    %134 = vector.load %arg17[%c0_57, %c0_58] : memref<768x128xbf16, #tpu.memory_space<vmem>>, vector<768x128xbf16>
    %cst_59 = arith.constant dense<0.000000e+00> : vector<2x128xf32>
    %135 = tpu.matmul %133, %134, %cst_59 {dimension_numbers = #tpu.dot_dimension_numbers<[1], [0], [0], [1], [0, 0, 1, 1], [], []>} : vector<2x768xbf16>, vector<768x128xbf16>, vector<2x128xf32> -> vector<2x128xf32>
    %c0_60 = arith.constant 0 : index
    %c0_61 = arith.constant 0 : index
    %136 = vector.load %arg18[%c0_60, %c0_61] : memref<1x128xf32, #tpu.memory_space<vmem>>, vector<1x128xf32>
    %137 = vector.broadcast %136 : vector<1x128xf32> to vector<2x128xf32>
    %138 = arith.addf %135, %137 : vector<2x128xf32>
    %c0_62 = arith.constant 0 : index
    %c0_63 = arith.constant 0 : index
    %139 = vector.load %arg19[%c0_62, %c0_63] : memref<2x128xf32, #tpu.memory_space<vmem>>, vector<2x128xf32>
    tpu.vector_store %arg19[%c0_62, %c0_63], %138 {strides = array<i32>} : memref<2x128xf32, #tpu.memory_space<vmem>>, vector<2x128xf32>,
    return
  }
  func.func @transform_0(%arg0: i32) -> (i32, i32) {
    %c0_i32 = arith.constant 0 : i32
    %c0_i32_0 = arith.constant 0 : i32
    return %arg0, %c0_i32 : i32, i32
  }
  func.func @transform_1(%arg0: i32) -> (i32, i32, i32) {
    %c0_i32 = arith.constant 0 : i32
    %c0_i32_0 = arith.constant 0 : i32
    %c0_i32_1 = arith.constant 0 : i32
    return %arg0, %c0_i32, %c0_i32_0 : i32, i32, i32
  }
  func.func @transform_2(%arg0: i32) -> (i32, i32) {
    %c0_i32 = arith.constant 0 : i32
    %c0_i32_0 = arith.constant 0 : i32
    %c0_i32_1 = arith.constant 0 : i32
    return %c0_i32, %c0_i32_0 : i32, i32
  }
  func.func @transform_3(%arg0: i32) -> (i32, i32) {
    %c0_i32 = arith.constant 0 : i32
    %c0_i32_0 = arith.constant 0 : i32
    %c0_i32_1 = arith.constant 0 : i32
    return %c0_i32, %c0_i32_0 : i32, i32
  }
  func.func @transform_4(%arg0: i32) -> (i32, i32) {
    %c0_i32 = arith.constant 0 : i32
    %c0_i32_0 = arith.constant 0 : i32
    %c0_i32_1 = arith.constant 0 : i32
    return %c0_i32, %c0_i32_0 : i32, i32
  }
  func.func @transform_5(%arg0: i32) -> (i32, i32) {
    %c0_i32 = arith.constant 0 : i32
    %c0_i32_0 = arith.constant 0 : i32
    %c0_i32_1 = arith.constant 0 : i32
    return %c0_i32, %c0_i32_0 : i32, i32
  }
  func.func @transform_6(%arg0: i32) -> (i32, i32) {
    %c0_i32 = arith.constant 0 : i32
    %c0_i32_0 = arith.constant 0 : i32
    %c0_i32_1 = arith.constant 0 : i32
    return %c0_i32, %c0_i32_0 : i32, i32
  }
  func.func @transform_7(%arg0: i32) -> (i32, i32) {
    %c0_i32 = arith.constant 0 : i32
    %c0_i32_0 = arith.constant 0 : i32
    %c0_i32_1 = arith.constant 0 : i32
    return %c0_i32, %c0_i32_0 : i32, i32
  }
  func.func @transform_8(%arg0: i32) -> (i32, i32) {
    %c0_i32 = arith.constant 0 : i32
    %c0_i32_0 = arith.constant 0 : i32
    %c0_i32_1 = arith.constant 0 : i32
    return %c0_i32, %c0_i32_0 : i32, i32
  }
  func.func @transform_9(%arg0: i32) -> (i32, i32) {
    %c0_i32 = arith.constant 0 : i32
    %c0_i32_0 = arith.constant 0 : i32
    %c0_i32_1 = arith.constant 0 : i32
    return %c0_i32, %c0_i32_0 : i32, i32
  }
  func.func @transform_10(%arg0: i32) -> (i32, i32) {
    %c0_i32 = arith.constant 0 : i32
    %c0_i32_0 = arith.constant 0 : i32
    %c0_i32_1 = arith.constant 0 : i32
    return %c0_i32, %c0_i32_0 : i32, i32
  }
  func.func @transform_11(%arg0: i32) -> (i32, i32) {
    %c0_i32 = arith.constant 0 : i32
    %c0_i32_0 = arith.constant 0 : i32
    %c0_i32_1 = arith.constant 0 : i32
    return %c0_i32, %c0_i32_0 : i32, i32
  }
  func.func @transform_12(%arg0: i32) -> (i32, i32) {
    %c0_i32 = arith.constant 0 : i32
    %c0_i32_0 = arith.constant 0 : i32
    %c0_i32_1 = arith.constant 0 : i32
    return %c0_i32, %c0_i32_0 : i32, i32
  }
  func.func @transform_13(%arg0: i32) -> (i32, i32) {
    %c0_i32 = arith.constant 0 : i32
    %c0_i32_0 = arith.constant 0 : i32
    %c0_i32_1 = arith.constant 0 : i32
    return %c0_i32, %c0_i32_0 : i32, i32
  }
  func.func @transform_14(%arg0: i32) -> (i32, i32) {
    %c0_i32 = arith.constant 0 : i32
    %c0_i32_0 = arith.constant 0 : i32
    %c0_i32_1 = arith.constant 0 : i32
    return %c0_i32, %c0_i32_0 : i32, i32
  }
  func.func @transform_15(%arg0: i32) -> (i32, i32) {
    %c0_i32 = arith.constant 0 : i32
    %c0_i32_0 = arith.constant 0 : i32
    %c0_i32_1 = arith.constant 0 : i32
    return %c0_i32, %c0_i32_0 : i32, i32
  }
  func.func @transform_16(%arg0: i32) -> (i32, i32) {
    %c0_i32 = arith.constant 0 : i32
    %c0_i32_0 = arith.constant 0 : i32
    %c0_i32_1 = arith.constant 0 : i32
    return %c0_i32, %c0_i32_0 : i32, i32
  }
  func.func @transform_17(%arg0: i32) -> (i32, i32) {
    %c0_i32 = arith.constant 0 : i32
    %c0_i32_0 = arith.constant 0 : i32
    %c0_i32_1 = arith.constant 0 : i32
    return %c0_i32, %c0_i32_0 : i32, i32
  }
  func.func @transform_18(%arg0: i32) -> (i32, i32) {
    %c0_i32 = arith.constant 0 : i32
    %c0_i32_0 = arith.constant 0 : i32
    return %arg0, %c0_i32 : i32, i32
  }
  func.func @transform_19(%arg0: i32) -> (i32, i32) {
    %c0_i32 = arith.constant 0 : i32
    %c0_i32_0 = arith.constant 0 : i32
    return %arg0, %c0_i32 : i32, i32
  }
}

</mosaic_0001>

<bundles_post_ra>
// kernel: tpu_custom_call.1
= control target key start
LH: loop header
LB: loop body
LE: loop exit
PB: predicated region body
PF: predicated region fallthrough
CT: control target
= control target key end

     0   :  { %s9846_s0 = inlined_call_operand.hbm [shape: f32[2,8], index: 0, kind: input, shape index: {}]   ;;  %s9847_s1 = inlined_call_operand.hbm [shape: bf16[2,8,768], index: 1, kind: input, shape index: {}]   ;;  %s9848_s2 = inlined_call_operand.hbm [shape: s8[768,2304], index: 2, kind: input, shape index: {}]   ;;  %s9849_s3 = inlined_call_operand.hbm [shape: f32[1,2304], index: 3, kind: input, shape index: {}]   ;;  %s9850_s4 = inlined_call_operand.hbm [shape: s8[768,768], index: 4, kind: input, shape index: {}]   ;;  %s9851_s5 = inlined_call_operand.hbm [shape: f32[1,768], index: 5, kind: input, shape index: {}]   ;;  %s9852_s6 = inlined_call_operand.hbm [shape: s8[768,768], index: 6, kind: input, shape index: {}]   ;;  %s9853_s7 = inlined_call_operand.hbm [shape: f32[1,768], index: 7, kind: input, shape index: {}]   ;;  %s9854_s8 = inlined_call_operand.hbm [shape: f32[1,768], index: 8, kind: input, shape index: {}]   ;;  %s9855_s9 = inlined_call_operand.hbm [shape: s8[768,768], index: 9, kind: input, shape index: {}]   ;;  %s9856_s10 = inlined_call_operand.hbm [shape: f32[1,768], index: 10, kind: input, shape index: {}]   ;;  %s9857_s11 = inlined_call_operand.hbm [shape: f32[1,768], index: 11, kind: input, shape index: {}]   ;;  %s9858_s12 = inlined_call_operand.hbm [shape: f32[1,768], index: 12, kind: input, shape index: {}]   ;;  %s9859_s13 = inlined_call_operand.hbm [shape: f32[1,768], index: 13, kind: input, shape index: {}]   ;;  %s9860_s14 = inlined_call_operand.hbm [shape: f32[1,768], index: 14, kind: input, shape index: {}]   ;;  %s9861_s15 = inlined_call_operand.hbm [shape: f32[1,768], index: 15, kind: input, shape index: {}]   ;;  %s9862_s16 = inlined_call_operand.hbm [shape: bf16[768,128], index: 16, kind: input, shape index: {}]   ;;  %s9863_s17 = inlined_call_operand.hbm [shape: f32[1,128], index: 17, kind: input, shape index: {}]   ;;  %s9864_s18 = inlined_call_operand.hbm [shape: f32[2,128], index: 18, kind: output, shape index: {0}]   ;;  %s9865_s19 = inlined_call_operand.hbm [shape: f32[2,768], index: 19, kind: output, shape index: {1}]  }
   0x1   :  { %9873 = sst [smem:[#allocation46_spill]] %s9846_s0 }
   0x2   :  { %9874 = sst [smem:[#allocation47_spill]] %s9847_s1 }
   0x3   :  { %9875 = sst [smem:[#allocation48_spill]] %s9848_s2 }
   0x4   :  { %9876 = sst [smem:[#allocation49_spill]] %s9849_s3 }
   0x5   :  { %9877 = sst [smem:[#allocation50_spill]] %s9863_s17 }
   0x6   :  { %9878 = sst [smem:[#allocation51_spill]] %s9864_s18 }
   0x7   :  { %9879 = sst [smem:[#allocation52_spill]] %s9865_s19 }
   0x8   :  { %25 = vsyncpa [#allocation3], 0 }
   0x9   :  { %26 = vsyncpa [#allocation6], 0 }
   0xa   :  { %27 = vsyncpa [#allocation9], 0 }
   0xb   :  { %28 = vsyncpa [#allocation12], 0 }
   0xc   :  { %29 = vsyncpa [#allocation15], 0 }
   0xd   :  { %30 = vsyncpa [#allocation18], 0 }
   0xe   :  { %31 = vsyncpa [#allocation21], 0 }
   0xf   :  { %32 = vsyncpa [#allocation24], 0 }
  0x10   :  { %33 = vsyncpa [#allocation27], 0 }
  0x11   :  { %34 = vsyncpa [#allocation30], 0 }
  0x12   :  { %35 = vsyncpa [#allocation4], 0 }
  0x13   :  { %36 = vsyncpa [#allocation33], 0  ;;  %s8544_s0 = smov [#allocation5]   ;;  %s9880_s1 = sld [smem:[#allocation47_spill]] }
  0x14   :  { %s52_s30 = sshll.u32 %s8544_s0, 4  ;;  %s53_s30 = int_to_ptr.vmem [resolvable:$true] %s52_s30 }
  0x19   :  { %s8080_s22 = scalar_lea.hbm %s9880_s1, 768 }
  0x1a   :  { %p8081_p0 = scmp.ne.s32.totalorder %s9880_s1, %s8080_s22  ;;  %p8084_p1 = scmp.lt.u32.totalorder %s8080_s22, %s9880_s1 }
  0x1c   :  { %p8086_p2 = pnand %p8084_p1, %p8081_p0 }
  0x1e   :  { %8089 = shalt.err (!%p8086_p2)
}
  0x1f   :  { %s8090_s3 = scalar_lea.vmem %s53_s30, 768  ;;  %p8095_p4 = scmp.lt.s32.totalorder %s53_s30, %s53_s30 }
  0x20   :  { %p8091_p3 = scmp.ne.s32.totalorder %s53_s30, %s8090_s3  ;;  %p8096_p5 = scmp.lt.s32.totalorder %s8090_s3, %s8090_s3 }
  0x22   :  { %p8097_p6 = por %p8096_p5, %p8095_p4 }
  0x24   :  { %p8098_p7 = pnand %p8097_p6, %p8091_p3 }
  0x26   :  { %8101 = shalt.err (!%p8098_p7)
}
  0x27   :  { %s8545_s26 = smov 384   ;;  %s8546_s27 = smov 24  }
  0x28   :  { %58 = dma.hbm_to_vmem [thread:$0]  %s9880_s1, 768, %s53_s30, [#allocation6], %s8545_s26, %s8545_s26, %s8546_s27  }
  0x29   :  { %s8547_s0 = smov [#allocation8]   ;;  %s8548_s21 = smov [#allocation11]  }
  0x2a   :  { %s77_s20 = sshll.u32 %s8547_s0, 4  ;;  %s99_s22 = sshll.u32 %s8548_s21, 4  ;;  %s78_s20 = int_to_ptr.vmem [resolvable:$true] %s77_s20  ;;  %s100_s22 = int_to_ptr.vmem [resolvable:$true] %s99_s22 }
  0x2b   :  { %s9881_s24 = sld [smem:[#allocation49_spill]] }
  0x31   :  { %s8102_s25 = scalar_lea.hbm %s9881_s24, 288 }
  0x32   :  { %p8103_p8 = scmp.ne.s32.totalorder %s9881_s24, %s8102_s25  ;;  %p8106_p9 = scmp.lt.u32.totalorder %s8102_s25, %s9881_s24 }
  0x34   :  { %p8108_p10 = pnand %p8106_p9, %p8103_p8 }
  0x36   :  { %8111 = shalt.err (!%p8108_p10)
}
  0x37   :  { %s8112_s30 = scalar_lea.vmem %s78_s20, 288  ;;  %p8117_p12 = scmp.lt.s32.totalorder %s78_s20, %s78_s20 }
  0x38   :  { %p8113_p11 = scmp.ne.s32.totalorder %s78_s20, %s8112_s30  ;;  %p8118_p13 = scmp.lt.s32.totalorder %s8112_s30, %s8112_s30 }
  0x3a   :  { %p8119_p0 = por %p8118_p13, %p8117_p12 }
  0x3c   :  { %p8120_p1 = pnand %p8119_p0, %p8113_p11 }
  0x3e   :  { %8123 = shalt.err (!%p8120_p1)
}
  0x3f   :  { %80 = dma.hbm_to_vmem [thread:$0]  %s9881_s24, 288, %s78_s20, [#allocation9]  }
  0x40   :  { %s8124_s28 = scalar_lea.hbm %s9851_s5, 96 }
  0x41   :  { %p8125_p2 = scmp.ne.s32.totalorder %s9851_s5, %s8124_s28  ;;  %p8128_p3 = scmp.lt.u32.totalorder %s8124_s28, %s9851_s5 }
  0x43   :  { %p8130_p4 = pnand %p8128_p3, %p8125_p2 }
  0x45   :  { %8133 = shalt.err (!%p8130_p4)
}
  0x46   :  { %s8134_s21 = scalar_lea.vmem %s100_s22, 96  ;;  %p8139_p6 = scmp.lt.s32.totalorder %s100_s22, %s100_s22 }
  0x47   :  { %p8135_p5 = scmp.ne.s32.totalorder %s100_s22, %s8134_s21  ;;  %p8140_p7 = scmp.lt.s32.totalorder %s8134_s21, %s8134_s21 }
  0x49   :  { %p8141_p8 = por %p8140_p7, %p8139_p6 }
  0x4b   :  { %p8142_p9 = pnand %p8141_p8, %p8135_p5 }
  0x4d   :  { %8145 = shalt.err (!%p8142_p9)
}
  0x4e   :  { %102 = dma.hbm_to_vmem [thread:$0]  %s9851_s5, 96, %s100_s22, [#allocation12]  }
  0x4f   :  { %s8549_s23 = smov [#allocation14]   ;;  %s8146_s30 = scalar_lea.hbm %s9853_s7, 96 }
  0x50   :  { %s121_s24 = sshll.u32 %s8549_s23, 4  ;;  %p8147_p10 = scmp.ne.s32.totalorder %s9853_s7, %s8146_s30  ;;  %s122_s24 = int_to_ptr.vmem [resolvable:$true] %s121_s24 }
  0x51   :  { %p8150_p11 = scmp.lt.u32.totalorder %s8146_s30, %s9853_s7 }
  0x53   :  { %p8152_p12 = pnand %p8150_p11, %p8147_p10 }
  0x55   :  { %8155 = shalt.err (!%p8152_p12)
}
  0x56   :  { %s8156_s28 = scalar_lea.vmem %s122_s24, 96  ;;  %p8161_p0 = scmp.lt.s32.totalorder %s122_s24, %s122_s24 }
  0x57   :  { %p8157_p13 = scmp.ne.s32.totalorder %s122_s24, %s8156_s28  ;;  %p8162_p1 = scmp.lt.s32.totalorder %s8156_s28, %s8156_s28 }
  0x59   :  { %p8163_p2 = por %p8162_p1, %p8161_p0 }
  0x5b   :  { %p8164_p3 = pnand %p8163_p2, %p8157_p13 }
  0x5d   :  { %8167 = shalt.err (!%p8164_p3)
}
  0x5e   :  { %124 = dma.hbm_to_vmem [thread:$0]  %s9853_s7, 96, %s122_s24, [#allocation15]  }
  0x5f   :  { %s8550_s17 = smov [#allocation17]   ;;  %s8551_s29 = smov [#allocation20]  }
  0x60   :  { %s140_s19 = sshll.u32 %s8550_s17, 4  ;;  %s163_s0 = sshll.u32 %s8551_s29, 4  ;;  %s141_s19 = int_to_ptr.vmem [resolvable:$true] %s140_s19  ;;  %s164_s0 = int_to_ptr.vmem [resolvable:$true] %s163_s0 }
  0x61   :  { %s8168_s2 = scalar_lea.hbm %s9855_s9, 18432 }
  0x62   :  { %p8169_p4 = scmp.ne.s32.totalorder %s9855_s9, %s8168_s2  ;;  %p8172_p5 = scmp.lt.u32.totalorder %s8168_s2, %s9855_s9 }
  0x64   :  { %p8174_p6 = pnand %p8172_p5, %p8169_p4 }
  0x66   :  { %8177 = shalt.err (!%p8174_p6)
}
  0x67   :  { %s8178_s7 = scalar_lea.vmem %s141_s19, 18432  ;;  %p8183_p8 = scmp.lt.s32.totalorder %s141_s19, %s141_s19 }
  0x68   :  { %p8179_p7 = scmp.ne.s32.totalorder %s141_s19, %s8178_s7  ;;  %p8184_p9 = scmp.lt.s32.totalorder %s8178_s7, %s8178_s7 }
  0x6a   :  { %p8185_p10 = por %p8184_p9, %p8183_p8 }
  0x6c   :  { %p8186_p11 = pnand %p8185_p10, %p8179_p7 }
  0x6e   :  { %8189 = shalt.err (!%p8186_p11)
}
  0x6f   :  { %s8552_s24 = smov 768   ;;  %s8553_s1 = smov 48  }
  0x70   :  { %146 = dma.hbm_to_vmem [thread:$0]  %s9855_s9, 18432, %s141_s19, [#allocation18], %s8552_s24, %s8552_s24, %s8553_s1  }
  0x71   :  { %s8190_s5 = scalar_lea.hbm %s9857_s11, 96 }
  0x72   :  { %p8191_p12 = scmp.ne.s32.totalorder %s9857_s11, %s8190_s5  ;;  %p8194_p13 = scmp.lt.u32.totalorder %s8190_s5, %s9857_s11 }
  0x74   :  { %p8196_p0 = pnand %p8194_p13, %p8191_p12 }
  0x76   :  { %8199 = shalt.err (!%p8196_p0)
}
  0x77   :  { %s8200_s20 = scalar_lea.vmem %s164_s0, 96  ;;  %p8205_p2 = scmp.lt.s32.totalorder %s164_s0, %s164_s0 }
  0x78   :  { %p8201_p1 = scmp.ne.s32.totalorder %s164_s0, %s8200_s20  ;;  %p8206_p3 = scmp.lt.s32.totalorder %s8200_s20, %s8200_s20 }
  0x7a   :  { %p8207_p4 = por %p8206_p3, %p8205_p2 }
  0x7c   :  { %p8208_p5 = pnand %p8207_p4, %p8201_p1 }
  0x7e   :  { %8211 = shalt.err (!%p8208_p5)
}
  0x7f   :  { %166 = dma.hbm_to_vmem [thread:$0]  %s9857_s11, 96, %s164_s0, [#allocation21]  }
  0x80   :  { %s8554_s2 = smov [#allocation23]   ;;  %s8555_s25 = smov [#allocation26]  }
  0x81   :  { %s183_s23 = sshll.u32 %s8554_s2, 4  ;;  %s203_s3 = sshll.u32 %s8555_s25, 4  ;;  %s184_s23 = int_to_ptr.vmem [resolvable:$true] %s183_s23  ;;  %s204_s3 = int_to_ptr.vmem [resolvable:$true] %s203_s3 }
  0x82   :  { %s8212_s26 = scalar_lea.hbm %s9859_s13, 96 }
  0x83   :  { %p8213_p6 = scmp.ne.s32.totalorder %s9859_s13, %s8212_s26  ;;  %p8216_p7 = scmp.lt.u32.totalorder %s8212_s26, %s9859_s13 }
  0x85   :  { %p8218_p8 = pnand %p8216_p7, %p8213_p6 }
  0x87   :  { %8221 = shalt.err (!%p8218_p8)
}
  0x88   :  { %s8222_s11 = scalar_lea.vmem %s184_s23, 96  ;;  %p8227_p10 = scmp.lt.s32.totalorder %s184_s23, %s184_s23 }
  0x89   :  { %p8223_p9 = scmp.ne.s32.totalorder %s184_s23, %s8222_s11  ;;  %p8228_p11 = scmp.lt.s32.totalorder %s8222_s11, %s8222_s11 }
  0x8b   :  { %p8229_p12 = por %p8228_p11, %p8227_p10 }
  0x8d   :  { %p8230_p13 = pnand %p8229_p12, %p8223_p9 }
  0x8f   :  { %8233 = shalt.err (!%p8230_p13)
}
  0x90   :  { %186 = dma.hbm_to_vmem [thread:$0]  %s9859_s13, 96, %s184_s23, [#allocation24]  }
  0x91   :  { %s8234_s21 = scalar_lea.hbm %s9861_s15, 96 }
  0x92   :  { %p8235_p0 = scmp.ne.s32.totalorder %s9861_s15, %s8234_s21  ;;  %p8238_p1 = scmp.lt.u32.totalorder %s8234_s21, %s9861_s15 }
  0x94   :  { %p8240_p2 = pnand %p8238_p1, %p8235_p0 }
  0x96   :  { %8243 = shalt.err (!%p8240_p2)
}
  0x97   :  { %s8244_s25 = scalar_lea.vmem %s204_s3, 96  ;;  %p8249_p4 = scmp.lt.s32.totalorder %s204_s3, %s204_s3 }
  0x98   :  { %p8245_p3 = scmp.ne.s32.totalorder %s204_s3, %s8244_s25  ;;  %p8250_p5 = scmp.lt.s32.totalorder %s8244_s25, %s8244_s25 }
  0x9a   :  { %p8251_p6 = por %p8250_p5, %p8249_p4 }
  0x9c   :  { %p8252_p7 = pnand %p8251_p6, %p8245_p3 }
  0x9e   :  { %8255 = shalt.err (!%p8252_p7)
}
  0x9f   :  { %206 = dma.hbm_to_vmem [thread:$0]  %s9861_s15, 96, %s204_s3, [#allocation27]  }
  0xa0   :  { %s8556_s30 = smov [#allocation2]   ;;  %s8557_s26 = smov [#allocation7]  }
  0xa1   :  { %s43_s7 = sshll.u32 %s8556_s30, 4  ;;  %s64_s18 = sshll.u32 %s8557_s26, 4  ;;  %s44_s7 = int_to_ptr.vmem [resolvable:$true] %s43_s7  ;;  %s8774_s18 = int_to_ptr.vmem [resolvable:$true] %s64_s18 }
  0xa2   :  { %s9882_s5 = sld [smem:[#allocation46_spill]] }
  0xa8   :  { %s8256_s11 = scalar_lea.hbm %s9882_s5, 32 }
  0xa9   :  { %p8257_p8 = scmp.ne.s32.totalorder %s9882_s5, %s8256_s11  ;;  %p8260_p9 = scmp.lt.u32.totalorder %s8256_s11, %s9882_s5 }
  0xab   :  { %p8262_p10 = pnand %p8260_p9, %p8257_p8 }
  0xad   :  { %8265 = shalt.err (!%p8262_p10)
}
  0xae   :  { %s8266_s15 = scalar_lea.vmem %s44_s7, 32  ;;  %p8271_p12 = scmp.lt.s32.totalorder %s44_s7, %s44_s7 }
  0xaf   :  { %p8267_p11 = scmp.ne.s32.totalorder %s44_s7, %s8266_s15  ;;  %p8272_p13 = scmp.lt.s32.totalorder %s8266_s15, %s8266_s15 }
  0xb1   :  { %p8273_p0 = por %p8272_p13, %p8271_p12 }
  0xb3   :  { %p8274_p1 = pnand %p8273_p0, %p8267_p11 }
  0xb5   :  { %8277 = shalt.err (!%p8274_p1)
}
  0xb6   :  { %46 = dma.hbm_to_vmem [thread:$0]  %s9882_s5, 32, %s44_s7, [#allocation3]  }
  0xb7   :  { %s9883_s19 = sld [smem:[#allocation48_spill]] }
  0xbd   :  { %s8278_s2 = scalar_lea.hbm %s9883_s19, 55296 }
  0xbe   :  { %p8279_p2 = scmp.ne.s32.totalorder %s9883_s19, %s8278_s2  ;;  %p8282_p3 = scmp.lt.u32.totalorder %s8278_s2, %s9883_s19 }
  0xc0   :  { %p8284_p4 = pnand %p8282_p3, %p8279_p2 }
  0xc2   :  { %8287 = shalt.err (!%p8284_p4)
}
  0xc3   :  { %s8288_s26 = scalar_lea.vmem %s8774_s18, 55296  ;;  %p8293_p6 = scmp.lt.s32.totalorder %s8774_s18, %s8774_s18 }
  0xc4   :  { %p8289_p5 = scmp.ne.s32.totalorder %s8774_s18, %s8288_s26  ;;  %p8294_p7 = scmp.lt.s32.totalorder %s8288_s26, %s8288_s26 }
  0xc6   :  { %p8295_p8 = por %p8294_p7, %p8293_p6 }
  0xc8   :  { %p8296_p9 = pnand %p8295_p8, %p8289_p5 }
  0xca   :  { %8299 = shalt.err (!%p8296_p9)
}
  0xcb   :  { %s8558_s7 = smov 2304   ;;  %s8559_s27 = smov 144  }
  0xcc   :  { %70 = dma.hbm_to_vmem [thread:$0]  %s9883_s19, 55296, %s8774_s18, [#allocation6], %s8558_s7, %s8558_s7, %s8559_s27  }
  0xcd   :  { %s8560_s11 = smov [#allocation10]   ;;  %s8561_s22 = smov [#allocation13]  }
  0xce   :  { %s86_s0 = sshll.u32 %s8560_s11, 4  ;;  %s108_s17 = sshll.u32 %s8561_s22, 4  ;;  %s87_s0 = int_to_ptr.vmem [resolvable:$true] %s86_s0  ;;  %s8805_s17 = int_to_ptr.vmem [resolvable:$true] %s108_s17 }
  0xcf   :  { %s8300_s3 = scalar_lea.hbm %s9850_s4, 18432 }
  0xd0   :  { %p8301_p10 = scmp.ne.s32.totalorder %s9850_s4, %s8300_s3  ;;  %p8304_p11 = scmp.lt.u32.totalorder %s8300_s3, %s9850_s4 }
  0xd2   :  { %p8306_p12 = pnand %p8304_p11, %p8301_p10 }
  0xd4   :  { %8309 = shalt.err (!%p8306_p12)
}
  0xd5   :  { %s8310_s18 = scalar_lea.vmem %s87_s0, 18432  ;;  %p8315_p0 = scmp.lt.s32.totalorder %s87_s0, %s87_s0 }
  0xd6   :  { %p8311_p13 = scmp.ne.s32.totalorder %s87_s0, %s8310_s18  ;;  %p8316_p1 = scmp.lt.s32.totalorder %s8310_s18, %s8310_s18 }
  0xd8   :  { %p8317_p2 = por %p8316_p1, %p8315_p0 }
  0xda   :  { %p8318_p3 = pnand %p8317_p2, %p8311_p13 }
  0xdc   :  { %8321 = shalt.err (!%p8318_p3)
}
  0xdd   :  { %92 = dma.hbm_to_vmem [thread:$0]  %s9850_s4, 18432, %s87_s0, [#allocation9], %s8552_s24, %s8552_s24, %s8553_s1  }
  0xde   :  { %s8322_s30 = scalar_lea.hbm %s9852_s6, 18432 }
  0xdf   :  { %p8323_p4 = scmp.ne.s32.totalorder %s9852_s6, %s8322_s30  ;;  %p8326_p5 = scmp.lt.u32.totalorder %s8322_s30, %s9852_s6 }
  0xe1   :  { %p8328_p6 = pnand %p8326_p5, %p8323_p4 }
  0xe3   :  { %8331 = shalt.err (!%p8328_p6)
}
  0xe4   :  { %s8332_s5 = scalar_lea.vmem %s8805_s17, 18432  ;;  %p8337_p8 = scmp.lt.s32.totalorder %s8805_s17, %s8805_s17 }
  0xe5   :  { %p8333_p7 = scmp.ne.s32.totalorder %s8805_s17, %s8332_s5  ;;  %p8338_p9 = scmp.lt.s32.totalorder %s8332_s5, %s8332_s5 }
  0xe7   :  { %p8339_p10 = por %p8338_p9, %p8337_p8 }
  0xe9   :  { %p8340_p11 = pnand %p8339_p10, %p8333_p7 }
  0xeb   :  { %8343 = shalt.err (!%p8340_p11)
}
  0xec   :  { %114 = dma.hbm_to_vmem [thread:$0]  %s9852_s6, 18432, %s8805_s17, [#allocation12], %s8552_s24, %s8552_s24, %s8553_s1  }
  0xed   :  { %s8562_s0 = smov [#allocation16]   ;;  %s8563_s29 = smov [#allocation19]  }
  0xee   :  { %s131_s22 = sshll.u32 %s8562_s0, 4  ;;  %s153_s15 = sshll.u32 %s8563_s29, 4  ;;  %s132_s22 = int_to_ptr.vmem [resolvable:$true] %s131_s22  ;;  %s154_s15 = int_to_ptr.vmem [resolvable:$true] %s153_s15 }
  0xef   :  { %s8344_s20 = scalar_lea.hbm %s9854_s8, 96 }
  0xf0   :  { %p8345_p12 = scmp.ne.s32.totalorder %s9854_s8, %s8344_s20  ;;  %p8348_p13 = scmp.lt.u32.totalorder %s8344_s20, %s9854_s8 }
  0xf2   :  { %p8350_p0 = pnand %p8348_p13, %p8345_p12 }
  0xf4   :  { %8353 = shalt.err (!%p8350_p0)
}
  0xf5   :  { %s8354_s6 = scalar_lea.vmem %s132_s22, 96  ;;  %p8359_p2 = scmp.lt.s32.totalorder %s132_s22, %s132_s22 }
  0xf6   :  { %p8355_p1 = scmp.ne.s32.totalorder %s132_s22, %s8354_s6  ;;  %p8360_p3 = scmp.lt.s32.totalorder %s8354_s6, %s8354_s6 }
  0xf8   :  { %p8361_p4 = por %p8360_p3, %p8359_p2 }
  0xfa   :  { %p8362_p5 = pnand %p8361_p4, %p8355_p1 }
  0xfc   :  { %8365 = shalt.err (!%p8362_p5)
}
  0xfd   :  { %134 = dma.hbm_to_vmem [thread:$0]  %s9854_s8, 96, %s132_s22, [#allocation15]  }
  0xfe   :  { %s8366_s13 = scalar_lea.hbm %s9856_s10, 96 }
  0xff   :  { %p8367_p6 = scmp.ne.s32.totalorder %s9856_s10, %s8366_s13  ;;  %p8370_p7 = scmp.lt.u32.totalorder %s8366_s13, %s9856_s10 }
 0x101   :  { %p8372_p8 = pnand %p8370_p7, %p8367_p6 }
 0x103   :  { %8375 = shalt.err (!%p8372_p8)
}
 0x104   :  { %s8376_s27 = scalar_lea.vmem %s154_s15, 96  ;;  %p8381_p10 = scmp.lt.s32.totalorder %s154_s15, %s154_s15 }
 0x105   :  { %p8377_p9 = scmp.ne.s32.totalorder %s154_s15, %s8376_s27  ;;  %p8382_p11 = scmp.lt.s32.totalorder %s8376_s27, %s8376_s27 }
 0x107   :  { %p8383_p12 = por %p8382_p11, %p8381_p10 }
 0x109   :  { %p8384_p13 = pnand %p8383_p12, %p8377_p9 }
 0x10b   :  { %8387 = shalt.err (!%p8384_p13)
}
 0x10c   :  { %156 = dma.hbm_to_vmem [thread:$0]  %s9856_s10, 96, %s154_s15, [#allocation18]  }
 0x10d   :  { %s8564_s5 = smov [#allocation22]   ;;  %s8565_s11 = smov [#allocation25]  }
 0x10e   :  { %s173_s4 = sshll.u32 %s8564_s5, 4  ;;  %s193_s0 = sshll.u32 %s8565_s11, 4  ;;  %s174_s4 = int_to_ptr.vmem [resolvable:$true] %s173_s4  ;;  %s194_s0 = int_to_ptr.vmem [resolvable:$true] %s193_s0 }
 0x10f   :  { %s8388_s3 = scalar_lea.hbm %s9858_s12, 96 }
 0x110   :  { %p8389_p0 = scmp.ne.s32.totalorder %s9858_s12, %s8388_s3  ;;  %p8392_p1 = scmp.lt.u32.totalorder %s8388_s3, %s9858_s12 }
 0x112   :  { %p8394_p2 = pnand %p8392_p1, %p8389_p0 }
 0x114   :  { %8397 = shalt.err (!%p8394_p2)
}
 0x115   :  { %s8398_s10 = scalar_lea.vmem %s174_s4, 96  ;;  %p8403_p4 = scmp.lt.s32.totalorder %s174_s4, %s174_s4 }
 0x116   :  { %p8399_p3 = scmp.ne.s32.totalorder %s174_s4, %s8398_s10  ;;  %p8404_p5 = scmp.lt.s32.totalorder %s8398_s10, %s8398_s10 }
 0x118   :  { %p8405_p6 = por %p8404_p5, %p8403_p4 }
 0x11a   :  { %p8406_p7 = pnand %p8405_p6, %p8399_p3 }
 0x11c   :  { %8409 = shalt.err (!%p8406_p7)
}
 0x11d   :  { %176 = dma.hbm_to_vmem [thread:$0]  %s9858_s12, 96, %s174_s4, [#allocation21]  }
 0x11e   :  { %s8410_s24 = scalar_lea.hbm %s9860_s14, 96 }
 0x11f   :  { %p8411_p8 = scmp.ne.s32.totalorder %s9860_s14, %s8410_s24  ;;  %p8414_p9 = scmp.lt.u32.totalorder %s8410_s24, %s9860_s14 }
 0x121   :  { %p8416_p10 = pnand %p8414_p9, %p8411_p8 }
 0x123   :  { %8419 = shalt.err (!%p8416_p10)
}
 0x124   :  { %s8420_s23 = scalar_lea.vmem %s194_s0, 96  ;;  %p8425_p12 = scmp.lt.s32.totalorder %s194_s0, %s194_s0 }
 0x125   :  { %p8421_p11 = scmp.ne.s32.totalorder %s194_s0, %s8420_s23  ;;  %p8426_p13 = scmp.lt.s32.totalorder %s8420_s23, %s8420_s23 }
 0x127   :  { %p8427_p0 = por %p8426_p13, %p8425_p12 }
 0x129   :  { %p8428_p1 = pnand %p8427_p0, %p8421_p11 }
 0x12b   :  { %8431 = shalt.err (!%p8428_p1)
}
 0x12c   :  { %196 = dma.hbm_to_vmem [thread:$0]  %s9860_s14, 96, %s194_s0, [#allocation24]  }
 0x12d   :  { %s8566_s26 = smov [#allocation28]   ;;  %s8432_s28 = scalar_lea.hbm %s9862_s16, 6144 }
 0x12e   :  { %s212_s7 = sshll.u32 %s8566_s26, 4  ;;  %p8433_p2 = scmp.ne.s32.totalorder %s9862_s16, %s8432_s28  ;;  %s213_s7 = int_to_ptr.vmem [resolvable:$true] %s212_s7 }
 0x12f   :  { %p8436_p3 = scmp.lt.u32.totalorder %s8432_s28, %s9862_s16 }
 0x131   :  { %p8438_p4 = pnand %p8436_p3, %p8433_p2 }
 0x133   :  { %8441 = shalt.err (!%p8438_p4)
}
 0x134   :  { %s8442_s29 = scalar_lea.vmem %s213_s7, 6144  ;;  %p8447_p6 = scmp.lt.s32.totalorder %s213_s7, %s213_s7 }
 0x135   :  { %p8443_p5 = scmp.ne.s32.totalorder %s213_s7, %s8442_s29  ;;  %p8448_p7 = scmp.lt.s32.totalorder %s8442_s29, %s8442_s29 }
 0x137   :  { %p8449_p8 = por %p8448_p7, %p8447_p6 }
 0x139   :  { %p8450_p9 = pnand %p8449_p8, %p8443_p5 }
 0x13b   :  { %8453 = shalt.err (!%p8450_p9)
}
 0x13c   :  { %s8567_s14 = smov 64   ;;  %s8568_s0 = smov 4  }
 0x13d   :  { %218 = dma.hbm_to_vmem [thread:$0]  %s9862_s16, 6144, %s213_s7, [#allocation27], %s8567_s14, %s8567_s14, %s8568_s0  }
 0x13e   :  { %s8569_s20 = smov [#allocation29]   ;;  %s9884_s15 = sld [smem:[#allocation50_spill]] }
 0x13f   :  { %s225_s9 = sshll.u32 %s8569_s20, 4  ;;  %s226_s9 = int_to_ptr.vmem [resolvable:$true] %s225_s9 }
 0x144   :  { %s8454_s18 = scalar_lea.hbm %s9884_s15, 16 }
 0x145   :  { %p8455_p10 = scmp.ne.s32.totalorder %s9884_s15, %s8454_s18  ;;  %p8458_p11 = scmp.lt.u32.totalorder %s8454_s18, %s9884_s15 }
 0x147   :  { %p8460_p12 = pnand %p8458_p11, %p8455_p10 }
 0x149   :  { %8463 = shalt.err (!%p8460_p12)
}
 0x14a   :  { %s8464_s17 = scalar_lea.vmem %s226_s9, 16  ;;  %s8468_s16 = scalar_lea.vmem %s226_s9, 32 }
 0x14b   :  { %p8465_p13 = scmp.ne.s32.totalorder %s226_s9, %s8464_s17  ;;  %p8469_p0 = scmp.lt.s32.totalorder %s226_s9, %s226_s9 }
 0x14c   :  { %p8470_p1 = scmp.lt.s32.totalorder %s8468_s16, %s8464_s17 }
 0x14e   :  { %p8471_p2 = por %p8470_p1, %p8469_p0 }
 0x150   :  { %p8472_p3 = pnand %p8471_p2, %p8465_p13 }
 0x152   :  { %8475 = shalt.err (!%p8472_p3)
}
 0x153   :  { %228 = dma.hbm_to_vmem [thread:$0]  %s9884_s15, 16, %s226_s9, [#allocation30]  }
 0x154   :  { %8520 = dma.done.wait [#allocation3], 32  }
 0x155   :  { %8521 = vsyncadd [#allocation3], 4294967264 }
 0x156   :  { %8522 = dma.done.wait [#allocation6], 56064  }
 0x157   :  { %8523 = vsyncadd [#allocation6], 4294911232 }
 0x158   :  { %8524 = dma.done.wait [#allocation9], 18720  }
 0x159   :  { %8525 = vsyncadd [#allocation9], 4294948576 }
 0x15a   :  { %8526 = dma.done.wait [#allocation12], 18528  }
 0x15b   :  { %8527 = vsyncadd [#allocation12], 4294948768 }
 0x15c   :  { %8528 = dma.done.wait [#allocation15], 192  }
 0x15d   :  { %8529 = vsyncadd [#allocation15], 4294967104 }
 0x15e   :  { %8530 = dma.done.wait [#allocation18], 18528  }
 0x15f   :  { %8531 = vsyncadd [#allocation18], 4294948768 }
 0x160   :  { %8532 = dma.done.wait [#allocation21], 192  }
 0x161   :  { %8533 = vsyncadd [#allocation21], 4294967104 }
 0x162   :  { %8534 = dma.done.wait [#allocation24], 192  }
 0x163   :  { %8535 = vsyncadd [#allocation24], 4294967104 }
 0x164   :  { %8536 = dma.done.wait [#allocation27], 6240  }
 0x165   :  { %8537 = vsyncadd [#allocation27], 4294961056 }
 0x166   :  { %8538 = dma.done.wait [#allocation30], 16  }
 0x167   :  { %8539 = vsyncadd [#allocation30], 4294967280  ;;  %v304_v0 = vld [vmem:[#allocation7 + $0x8] sm:$0xff]  ;;  %v306_v1 = vld [vmem:[#allocation7 + $0x18] sm:$0xff]  ;;  %vm3349_vm0 = vcmask 1043456   ;;  %vm3315_vm1 = vcmask 64512  }
 0x168   :  { %v303_v2 = vld [vmem:[#allocation7] sm:$0xff]  ;;  %v736_v3 = vunpack.c.l.s8.bf16 %v304_v0  ;;  %v754_v4 = vunpack.c.h.s8.bf16 %v304_v0  ;;  %v738_v5 = vunpack.c.l.s8.bf16 %v306_v1  ;;  %v756_v6 = vunpack.c.h.s8.bf16 %v306_v1  ;;  %v305_v7 = vld [vmem:[#allocation7 + $0x10] sm:$0xff]  ;;  %v322_v10 = vld [vmem:[#allocation7 + $0x98] sm:$0xff]  ;;  %s8573_s23 = smov [#allocation32]  }
 0x169   :  { %v735_v8 = vunpack.c.l.s8.bf16 %v303_v2  ;;  %v737_v9 = vunpack.c.l.s8.bf16 %v305_v7  ;;  %v324_v11 = vld [vmem:[#allocation7 + $0xa8] sm:$0xff]  ;;  %v753_v12 = vunpack.c.h.s8.bf16 %v303_v2  ;;  %v755_v13 = vunpack.c.h.s8.bf16 %v305_v7  ;;  %v321_v16 = vld [vmem:[#allocation7 + $0x90] sm:$0xff]  ;;  %v323_v17 = vld [vmem:[#allocation7 + $0xa0] sm:$0xff]  ;;  %s7559_s12 = sshll.u32 %s8573_s23, 4  ;;  %s7560_s12 = int_to_ptr.vmem [resolvable:$true] %s7559_s12 }
 0x16a   :  { %1629 = vmatprep.subr.bf16.mxu0 %v736_v3  ;;  %1758 = vmatprep.subr.bf16.mxu1 %v738_v5  ;;  %v772_v14 = vunpack.c.l.s8.bf16 %v322_v10  ;;  %v774_v15 = vunpack.c.l.s8.bf16 %v324_v11  ;;  %v771_v18 = vunpack.c.l.s8.bf16 %v321_v16  ;;  %v773_v19 = vunpack.c.l.s8.bf16 %v323_v17  ;;  %v340_v22 = vld [vmem:[#allocation7 + $0x128] sm:$0xff]  ;;  %v342_v23 = vld [vmem:[#allocation7 + $0x138] sm:$0xff]  ;;  %v339_v28 = vld [vmem:[#allocation7 + $0x120] sm:$0xff]  ;;  %s8476_s30 = scalar_lea.vmem %s7560_s12, 192  ;;  %p8481_p5 = scmp.lt.s32.totalorder %s7560_s12, %s7560_s12 }
 0x16b   :  { %1630 = vmatpush1.bf16.msra.mxu0 %v735_v8  ;;  %1759 = vmatpush1.bf16.msra.mxu1 %v737_v9  ;;  %v790_v20 = vunpack.c.h.s8.bf16 %v322_v10  ;;  %v792_v21 = vunpack.c.h.s8.bf16 %v324_v11  ;;  %v789_v24 = vunpack.c.h.s8.bf16 %v321_v16  ;;  %v791_v25 = vunpack.c.h.s8.bf16 %v323_v17  ;;  %v341_v29 = vld [vmem:[#allocation7 + $0x130] sm:$0xff]  ;;  %v8916_v31 = vld [vmem:[#allocation5 + $0x18] sm:$0xff]  ;;  %v358_v37 = vld [vmem:[#allocation7 + $0x1b8] sm:$0xff]  ;;  %p8477_p4 = scmp.ne.s32.totalorder %s7560_s12, %s8476_s30  ;;  %p8482_p6 = scmp.lt.s32.totalorder %s8476_s30, %s8476_s30 }
 0x16c   :  { %1631 = vmatprep.subr.bf16.mxu0 %v754_v4  ;;  %1760 = vmatprep.subr.bf16.mxu1 %v756_v6  ;;  %v808_v26 = vunpack.c.l.s8.bf16 %v340_v22  ;;  %v810_v27 = vunpack.c.l.s8.bf16 %v342_v23  ;;  %v8914_v30 = vld [vmem:[#allocation5] sm:$0xff]  ;;  %v807_v32 = vunpack.c.l.s8.bf16 %v339_v28  ;;  %v809_v33 = vunpack.c.l.s8.bf16 %v341_v29  ;;  %v360_v38 = vld [vmem:[#allocation7 + $0x1c8] sm:$0xff]  ;;  %v359_v44 = vld [vmem:[#allocation7 + $0x1c0] sm:$0xff] }
 0x16d   :  { %v826_v34 = vunpack.c.h.s8.bf16 %v340_v22  ;;  %v828_v35 = vunpack.c.h.s8.bf16 %v342_v23  ;;  %v8920_v36 = vcombine.high %v8914_v30, %v8916_v31  ;;  %v825_v39 = vunpack.c.h.s8.bf16 %v339_v28  ;;  %v357_v43 = vld [vmem:[#allocation7 + $0x1b0] sm:$0xff]  ;;  %v376_v49 = vld [vmem:[#allocation7 + $0x248] sm:$0xff]  ;;  %v378_v50 = vld [vmem:[#allocation7 + $0x258] sm:$0xff]  ;;  %p8483_p7 = por %p8482_p6, %p8481_p5 }
 0x16e   :  { %v827_v40 = vunpack.c.h.s8.bf16 %v341_v29  ;;  %v844_v41 = vunpack.c.l.s8.bf16 %v358_v37  ;;  %v846_v42 = vunpack.c.l.s8.bf16 %v360_v38  ;;  %v843_v45 = vunpack.c.l.s8.bf16 %v357_v43  ;;  %v375_v51 = vld [vmem:[#allocation7 + $0x240] sm:$0xff]  ;;  %v377_v52 = vld [vmem:[#allocation7 + $0x250] sm:$0xff]  ;;  %v394_v61 = vld [vmem:[#allocation7 + $0x2d8] sm:$0xff] }
 0x16f   :  { %1632 = vmatpush1.bf16.msra.mxu0 %v753_v12  ;;  %1761 = vmatpush1.bf16.msra.mxu1 %v755_v13  ;;  %v845_v46 = vunpack.c.l.s8.bf16 %v359_v44  ;;  %v862_v47 = vunpack.c.h.s8.bf16 %v358_v37  ;;  %v864_v48 = vunpack.c.h.s8.bf16 %v360_v38  ;;  %v861_v53 = vunpack.c.h.s8.bf16 %v357_v43  ;;  %v396_v62 = vld [vmem:[#allocation7 + $0x2e8] sm:$0xff]  ;;  %v393_v63 = vld [vmem:[#allocation7 + $0x2d0] sm:$0xff]  ;;  %v395_v0 = vld [vmem:[#allocation7 + $0x2e0] sm:$0xff]  ;;  %p8484_p8 = pnand %p8483_p7, %p8477_p4 }
 0x170   :  { %1633 = vmatprep.subr.bf16.mxu0 %v772_v14  ;;  %1762 = vmatprep.subr.bf16.mxu1 %v774_v15  ;;  %v863_v54 = vunpack.c.h.s8.bf16 %v359_v44  ;;  %v880_v55 = vunpack.c.l.s8.bf16 %v376_v49  ;;  %v882_v56 = vunpack.c.l.s8.bf16 %v378_v50  ;;  %v879_v57 = vunpack.c.l.s8.bf16 %v375_v51  ;;  %v412_v9 = vld [vmem:[#allocation7 + $0x368] sm:$0xff]  ;;  %v414_v10 = vld [vmem:[#allocation7 + $0x378] sm:$0xff]  ;;  %v411_v11 = vld [vmem:[#allocation7 + $0x360] sm:$0xff] }
 0x171   :  { %1661 = vmatprep.mubr.bf16.mxu0 %v8920_v36  ;;  %1790 = vmatprep.mubr.bf16.mxu1 %v8920_v36  ;;  %v881_v58 = vunpack.c.l.s8.bf16 %v377_v52  ;;  %v898_v59 = vunpack.c.h.s8.bf16 %v376_v49  ;;  %v900_v60 = vunpack.c.h.s8.bf16 %v378_v50  ;;  %v897_v1 = vunpack.c.h.s8.bf16 %v375_v51  ;;  %v413_v12 = vld [vmem:[#allocation7 + $0x370] sm:$0xff]  ;;  %v432_v22 = vld [vmem:[#allocation7 + $0x408] sm:$0xff]  ;;  %v450_v37 = vld [vmem:[#allocation7 + $0x498] sm:$0xff] }
 0x172   :  { %v899_v2 = vunpack.c.h.s8.bf16 %v377_v52  ;;  %v916_v3 = vunpack.c.l.s8.bf16 %v394_v61  ;;  %v918_v4 = vunpack.c.l.s8.bf16 %v396_v62  ;;  %v915_v5 = vunpack.c.l.s8.bf16 %v393_v63  ;;  %v429_v23 = vld [vmem:[#allocation7 + $0x3f0] sm:$0xff]  ;;  %v447_v38 = vld [vmem:[#allocation7 + $0x480] sm:$0xff]  ;;  %v466_v51 = vld [vmem:[#allocation7 + $0x518] sm:$0xff] }
 0x173   :  { %1634 = vmatpush1.bf16.msra.mxu0 %v771_v18  ;;  %1763 = vmatpush1.bf16.msra.mxu1 %v773_v19  ;;  %v917_v6 = vunpack.c.l.s8.bf16 %v395_v0  ;;  %v934_v7 = vunpack.c.h.s8.bf16 %v394_v61  ;;  %v936_v8 = vunpack.c.h.s8.bf16 %v396_v62  ;;  %v933_v13 = vunpack.c.h.s8.bf16 %v393_v63  ;;  %v468_v52 = vld [vmem:[#allocation7 + $0x528] sm:$0xff]  ;;  %v486_v63 = vld [vmem:[#allocation7 + $0x5b8] sm:$0xff] }
 0x174   :  { %1635 = vmatprep.subr.bf16.mxu0 %v790_v20  ;;  %1764 = vmatprep.subr.bf16.mxu1 %v792_v21  ;;  %v935_v14 = vunpack.c.h.s8.bf16 %v395_v0  ;;  %v952_v15 = vunpack.c.l.s8.bf16 %v412_v9  ;;  %v954_v16 = vunpack.c.l.s8.bf16 %v414_v10  ;;  %v951_v17 = vunpack.c.l.s8.bf16 %v411_v11  ;;  %v430_v21 = vld [vmem:[#allocation7 + $0x3f8] sm:$0xff]  ;;  %v484_v62 = vld [vmem:[#allocation7 + $0x5a8] sm:$0xff] }
 0x175   :  { %v953_v18 = vunpack.c.l.s8.bf16 %v413_v12  ;;  %v970_v19 = vunpack.c.h.s8.bf16 %v412_v9  ;;  %v972_v20 = vunpack.c.h.s8.bf16 %v414_v10  ;;  %v990_v28 = vunpack.c.l.s8.bf16 %v432_v22  ;;  %v502_v10 = vld [vmem:[#allocation7 + $0x638] sm:$0xff] }
 0x176   :  { %v987_v29 = vunpack.c.l.s8.bf16 %v429_v23  ;;  %v1026_v43 = vunpack.c.l.s8.bf16 %v450_v37  ;;  %v8926_v44 = vcombine.low %v8914_v30, %v8916_v31  ;;  %v1044_v50 = vunpack.c.h.s8.bf16 %v450_v37  ;;  %v538_v37 = vld [vmem:[#allocation7 + $0x758] sm:$0xff] }
 0x177   :  { %1636 = vmatpush1.bf16.msra.mxu0 %v789_v24  ;;  %1765 = vmatpush1.bf16.msra.mxu1 %v791_v25  ;;  %v431_v24 = vld [vmem:[#allocation7 + $0x400] sm:$0xff]  ;;  %v969_v25 = vunpack.c.h.s8.bf16 %v411_v11  ;;  %v1041_v30 = vunpack.c.h.s8.bf16 %v447_v38  ;;  %v1080_v61 = vunpack.c.h.s8.bf16 %v468_v52  ;;  %v1116_v9 = vunpack.c.h.s8.bf16 %v486_v63  ;;  %v504_v11 = vld [vmem:[#allocation7 + $0x648] sm:$0xff] }
 0x178   :  { %1637 = vmatprep.subr.bf16.mxu0 %v808_v26  ;;  %1766 = vmatprep.subr.bf16.mxu1 %v810_v27  ;;  %v971_v26 = vunpack.c.h.s8.bf16 %v413_v12  ;;  %v988_v27 = vunpack.c.l.s8.bf16 %v430_v21  ;;  %vm6952_vm2 = vcmask 1041409   ;;  %vm6954_vm3 = vcmask 1043459  }
 0x179   :  { %vm6956_vm4 = vcmask 1045509   ;;  %vm6958_vm5 = vcmask 1047559  }
 0x17b   :  { %1638 = vmatpush1.bf16.msra.mxu0 %v807_v32  ;;  %1767 = vmatpush1.bf16.msra.mxu1 %v809_v33  ;;  %v989_v32 = vunpack.c.l.s8.bf16 %v431_v24  ;;  %v1006_v33 = vunpack.c.h.s8.bf16 %v430_v21  ;;  %v1152_v21 = vunpack.c.h.s8.bf16 %v504_v11 }
 0x17c   :  { %1639 = vmatprep.subr.bf16.mxu0 %v826_v34  ;;  %1768 = vmatprep.subr.bf16.mxu1 %v828_v35  ;;  %v1008_v34 = vunpack.c.h.s8.bf16 %v432_v22  ;;  %v448_v35 = vld [vmem:[#allocation7 + $0x488] sm:$0xff] }
 0x17d   :  { %v1042_v49 = vunpack.c.h.s8.bf16 %v448_v35  ;;  %v520_v22 = vld [vmem:[#allocation7 + $0x6c8] sm:$0xff] }
 0x17f   :  { %1640 = vmatpush1.bf16.msra.mxu0 %v825_v39  ;;  %1769 = vmatpush1.bf16.msra.mxu1 %v827_v40  ;;  %v449_v39 = vld [vmem:[#allocation7 + $0x490] sm:$0xff]  ;;  %v1005_v40 = vunpack.c.h.s8.bf16 %v429_v23  ;;  %v522_v23 = vld [vmem:[#allocation7 + $0x6d8] sm:$0xff] }
 0x180   :  { %1641 = vmatprep.subr.bf16.mxu0 %v844_v41  ;;  %1770 = vmatprep.subr.bf16.mxu1 %v846_v42  ;;  %v1007_v41 = vunpack.c.h.s8.bf16 %v431_v24  ;;  %v1024_v42 = vunpack.c.l.s8.bf16 %v448_v35  ;;  %v1043_v31 = vunpack.c.h.s8.bf16 %v449_v39  ;;  %v1188_v35 = vunpack.c.h.s8.bf16 %v522_v23 }
 0x183   :  { %1642 = vmatpush1.bf16.msra.mxu0 %v843_v45  ;;  %1771 = vmatpush1.bf16.msra.mxu1 %v845_v46  ;;  %v8928_v45 = vld [vmem:[#allocation5 + $0x8] sm:$0xff]  ;;  %v8930_v46 = vld [vmem:[#allocation5 + $0x20] sm:$0xff] }
 0x184   :  { %1643 = vmatprep.subr.bf16.mxu0 %v862_v47  ;;  %1772 = vmatprep.subr.bf16.mxu1 %v864_v48  ;;  %v1023_v47 = vunpack.c.l.s8.bf16 %v447_v38  ;;  %v1025_v48 = vunpack.c.l.s8.bf16 %v449_v39  ;;  %v540_v38 = vld [vmem:[#allocation7 + $0x768] sm:$0xff] }
 0x187   :  { %1644 = vmatpush1.bf16.msra.mxu0 %v861_v53  ;;  %1773 = vmatpush1.bf16.msra.mxu1 %v863_v54  ;;  %v8934_v53 = vcombine.high %v8928_v45, %v8930_v46  ;;  %v1060_v54 = vunpack.c.l.s8.bf16 %v466_v51 }
 0x188   :  { %1645 = vmatprep.subr.bf16.mxu0 %v880_v55  ;;  %1774 = vmatprep.subr.bf16.mxu1 %v882_v56  ;;  %v1062_v55 = vunpack.c.l.s8.bf16 %v468_v52  ;;  %v465_v56 = vld [vmem:[#allocation7 + $0x510] sm:$0xff]  ;;  %v556_v52 = vld [vmem:[#allocation7 + $0x7e8] sm:$0xff] }
 0x189   :  { %v1077_v0 = vunpack.c.h.s8.bf16 %v465_v56 }
 0x18b   :  { %1646 = vmatpush1.bf16.msra.mxu0 %v879_v57  ;;  %1775 = vmatpush1.bf16.msra.mxu1 %v881_v58  ;;  %v467_v57 = vld [vmem:[#allocation7 + $0x520] sm:$0xff]  ;;  %v1059_v58 = vunpack.c.l.s8.bf16 %v465_v56 }
 0x18c   :  { %1647 = vmatprep.subr.bf16.mxu0 %v898_v59  ;;  %1776 = vmatprep.subr.bf16.mxu1 %v900_v60  ;;  %v1061_v59 = vunpack.c.l.s8.bf16 %v467_v57  ;;  %v1078_v60 = vunpack.c.h.s8.bf16 %v466_v51  ;;  %v1224_v51 = vunpack.c.h.s8.bf16 %v540_v38 }
 0x18f   :  { %1648 = vmatpush1.bf16.msra.mxu0 %v897_v1  ;;  %1777 = vmatpush1.bf16.msra.mxu1 %v899_v2  ;;  %v1079_v1 = vunpack.c.h.s8.bf16 %v467_v57  ;;  %v1096_v2 = vunpack.c.l.s8.bf16 %v484_v62  ;;  %v555_v57 = vld [vmem:[#allocation7 + $0x7e0] sm:$0xff] }
 0x190   :  { %1649 = vmatprep.subr.bf16.mxu0 %v916_v3  ;;  %1778 = vmatprep.subr.bf16.mxu1 %v918_v4  ;;  %v1098_v3 = vunpack.c.l.s8.bf16 %v486_v63  ;;  %v483_v4 = vld [vmem:[#allocation7 + $0x5a0] sm:$0xff]  ;;  %v574_v63 = vld [vmem:[#allocation7 + $0x878] sm:$0xff] }
 0x191   :  { %v1113_v12 = vunpack.c.h.s8.bf16 %v483_v4 }
 0x193   :  { %1650 = vmatpush1.bf16.msra.mxu0 %v915_v5  ;;  %1779 = vmatpush1.bf16.msra.mxu1 %v917_v6  ;;  %v485_v5 = vld [vmem:[#allocation7 + $0x5b0] sm:$0xff]  ;;  %v1095_v6 = vunpack.c.l.s8.bf16 %v483_v4 }
 0x194   :  { %1651 = vmatprep.subr.bf16.mxu0 %v934_v7  ;;  %1780 = vmatprep.subr.bf16.mxu1 %v936_v8  ;;  %v1097_v7 = vunpack.c.l.s8.bf16 %v485_v5  ;;  %v1114_v8 = vunpack.c.h.s8.bf16 %v484_v62 }
 0x197   :  { %1652 = vmatpush1.bf16.msra.mxu0 %v933_v13  ;;  %1781 = vmatpush1.bf16.msra.mxu1 %v935_v14  ;;  %v1115_v13 = vunpack.c.h.s8.bf16 %v485_v5  ;;  %v1132_v14 = vunpack.c.l.s8.bf16 %v502_v10  ;;  %v573_v5 = vld [vmem:[#allocation7 + $0x870] sm:$0xff] }
 0x198   :  { %1653 = vmatprep.subr.bf16.mxu0 %v952_v15  ;;  %1782 = vmatprep.subr.bf16.mxu1 %v954_v16  ;;  %v1134_v15 = vunpack.c.l.s8.bf16 %v504_v11  ;;  %v501_v16 = vld [vmem:[#allocation7 + $0x630] sm:$0xff]  ;;  %v592_v11 = vld [vmem:[#allocation7 + $0x908] sm:$0xff] }
 0x199   :  { %v1149_v24 = vunpack.c.h.s8.bf16 %v501_v16 }
 0x19b   :  { %1654 = vmatpush1.bf16.msra.mxu0 %v951_v17  ;;  %1783 = vmatpush1.bf16.msra.mxu1 %v953_v18  ;;  %v503_v17 = vld [vmem:[#allocation7 + $0x640] sm:$0xff]  ;;  %v1131_v18 = vunpack.c.l.s8.bf16 %v501_v16 }
 0x19c   :  { %1655 = vmatprep.subr.bf16.mxu0 %v970_v19  ;;  %1784 = vmatprep.subr.bf16.mxu1 %v972_v20  ;;  %v1133_v19 = vunpack.c.l.s8.bf16 %v503_v17  ;;  %v1150_v20 = vunpack.c.h.s8.bf16 %v502_v10 }
 0x19f   :  { %1656 = vmatpush1.bf16.msra.mxu0 %v969_v25  ;;  %1785 = vmatpush1.bf16.msra.mxu1 %v971_v26  ;;  %v1151_v25 = vunpack.c.h.s8.bf16 %v503_v17  ;;  %v1168_v26 = vunpack.c.l.s8.bf16 %v520_v22  ;;  %v591_v17 = vld [vmem:[#allocation7 + $0x900] sm:$0xff] }
 0x1a0   :  { %1657 = vmatprep.subr.bf16.mxu0 %v988_v27  ;;  %1786 = vmatprep.subr.bf16.mxu1 %v990_v28  ;;  %v1170_v27 = vunpack.c.l.s8.bf16 %v522_v23  ;;  %v519_v28 = vld [vmem:[#allocation7 + $0x6c0] sm:$0xff] }
 0x1a1   :  { %v1185_v39 = vunpack.c.h.s8.bf16 %v519_v28 }
 0x1a3   :  { %1658 = vmatpush1.bf16.msra.mxu0 %v987_v29  ;;  %1787 = vmatpush1.bf16.msra.mxu1 %v989_v32  ;;  %v521_v29 = vld [vmem:[#allocation7 + $0x6d0] sm:$0xff]  ;;  %v1167_v32 = vunpack.c.l.s8.bf16 %v519_v28 }
 0x1a4   :  { %1659 = vmatprep.subr.bf16.mxu0 %v1006_v33  ;;  %1788 = vmatprep.subr.bf16.mxu1 %v1008_v34  ;;  %v1169_v33 = vunpack.c.l.s8.bf16 %v521_v29  ;;  %v1186_v34 = vunpack.c.h.s8.bf16 %v520_v22  ;;  %v1311_v22 = vunpack.c.l.s8.bf16 %v591_v17 }
 0x1a7   :  { %1660 = vmatpush1.bf16.msra.mxu0 %v1005_v40  ;;  %1789 = vmatpush1.bf16.msra.mxu1 %v1007_v41  ;;  %v1187_v40 = vunpack.c.h.s8.bf16 %v521_v29  ;;  %v1204_v41 = vunpack.c.l.s8.bf16 %v538_v37 }
 0x1a8   :  { %1672 = vmatprep.subr.bf16.mxu0 %v1024_v42  ;;  %1801 = vmatprep.subr.bf16.mxu1 %v1026_v43  ;;  %v1206_v42 = vunpack.c.l.s8.bf16 %v540_v38  ;;  %v537_v43 = vld [vmem:[#allocation7 + $0x750] sm:$0xff] }
 0x1aa   :  { %1662 = vmatmul.mubr.bf16.vlgmr.msra.gmra.mrb[0].mxu0 %v8926_v44  ;;  %1791 = vmatmul.mubr.bf16.vlgmr.msra.gmra.mrb[0].mxu1 %v8926_v44 }
 0x1ab   :  { %1673 = vmatpush1.bf16.msra.mxu0 %v1023_v47  ;;  %1802 = vmatpush1.bf16.msra.mxu1 %v1025_v48  ;;  %v539_v47 = vld [vmem:[#allocation7 + $0x760] sm:$0xff]  ;;  %v1203_v48 = vunpack.c.l.s8.bf16 %v537_v43 }
 0x1ac   :  { %1674 = vmatprep.subr.bf16.mxu0 %v1042_v49  ;;  %1803 = vmatprep.subr.bf16.mxu1 %v1044_v50  ;;  %v1205_v49 = vunpack.c.l.s8.bf16 %v539_v47  ;;  %v1222_v50 = vunpack.c.h.s8.bf16 %v538_v37 }
 0x1ad   :  { %1704 = vmatprep.mubr.bf16.mxu0 %v8934_v53  ;;  %1833 = vmatprep.mubr.bf16.mxu1 %v8934_v53 }
 0x1af   :  { %1675 = vmatpush1.bf16.msra.mxu0 %v1041_v30  ;;  %1804 = vmatpush1.bf16.msra.mxu1 %v1043_v31  ;;  %v558_v30 = vld [vmem:[#allocation7 + $0x7f8] sm:$0xff]  ;;  %v1221_v31 = vunpack.c.h.s8.bf16 %v537_v43 }
 0x1b0   :  { %1676 = vmatprep.subr.bf16.mxu0 %v1060_v54  ;;  %1805 = vmatprep.subr.bf16.mxu1 %v1062_v55  ;;  %v1223_v54 = vunpack.c.h.s8.bf16 %v539_v47  ;;  %v1240_v55 = vunpack.c.l.s8.bf16 %v556_v52  ;;  %v1242_v56 = vunpack.c.l.s8.bf16 %v558_v30  ;;  %v1260_v62 = vunpack.c.h.s8.bf16 %v558_v30 }
 0x1b3   :  { %1677 = vmatpush1.bf16.msra.mxu0 %v1059_v58  ;;  %1806 = vmatpush1.bf16.msra.mxu1 %v1061_v59  ;;  %v557_v58 = vld [vmem:[#allocation7 + $0x7f0] sm:$0xff]  ;;  %v1239_v59 = vunpack.c.l.s8.bf16 %v555_v57 }
 0x1b4   :  { %1678 = vmatprep.subr.bf16.mxu0 %v1078_v60  ;;  %1807 = vmatprep.subr.bf16.mxu1 %v1080_v61  ;;  %v1241_v60 = vunpack.c.l.s8.bf16 %v557_v58  ;;  %v1258_v61 = vunpack.c.h.s8.bf16 %v556_v52 }
 0x1b7   :  { %1679 = vmatpush1.bf16.msra.mxu0 %v1077_v0  ;;  %1808 = vmatpush1.bf16.msra.mxu1 %v1079_v1  ;;  %v576_v0 = vld [vmem:[#allocation7 + $0x888] sm:$0xff]  ;;  %v1257_v1 = vunpack.c.h.s8.bf16 %v555_v57 }
 0x1b8   :  { %1680 = vmatprep.subr.bf16.mxu0 %v1096_v2  ;;  %1809 = vmatprep.subr.bf16.mxu1 %v1098_v3  ;;  %v1259_v2 = vunpack.c.h.s8.bf16 %v557_v58  ;;  %v1276_v3 = vunpack.c.l.s8.bf16 %v574_v63  ;;  %v1278_v4 = vunpack.c.l.s8.bf16 %v576_v0  ;;  %v1296_v10 = vunpack.c.h.s8.bf16 %v576_v0 }
 0x1bb   :  { %1681 = vmatpush1.bf16.msra.mxu0 %v1095_v6  ;;  %1810 = vmatpush1.bf16.msra.mxu1 %v1097_v7  ;;  %v575_v6 = vld [vmem:[#allocation7 + $0x880] sm:$0xff]  ;;  %v1275_v7 = vunpack.c.l.s8.bf16 %v573_v5 }
 0x1bc   :  { %1682 = vmatprep.subr.bf16.mxu0 %v1114_v8  ;;  %1811 = vmatprep.subr.bf16.mxu1 %v1116_v9  ;;  %v1277_v8 = vunpack.c.l.s8.bf16 %v575_v6  ;;  %v1294_v9 = vunpack.c.h.s8.bf16 %v574_v63 }
 0x1bf   :  { %1683 = vmatpush1.bf16.msra.mxu0 %v1113_v12  ;;  %1812 = vmatpush1.bf16.msra.mxu1 %v1115_v13  ;;  %v594_v12 = vld [vmem:[#allocation7 + $0x918] sm:$0xff]  ;;  %v1293_v13 = vunpack.c.h.s8.bf16 %v573_v5 }
 0x1c0   :  { %1684 = vmatprep.subr.bf16.mxu0 %v1132_v14  ;;  %1813 = vmatprep.subr.bf16.mxu1 %v1134_v15  ;;  %v1295_v14 = vunpack.c.h.s8.bf16 %v575_v6  ;;  %v1312_v15 = vunpack.c.l.s8.bf16 %v592_v11  ;;  %v1314_v16 = vunpack.c.l.s8.bf16 %v594_v12 }
 0x1c3   :  { %1685 = vmatpush1.bf16.msra.mxu0 %v1131_v18  ;;  %1814 = vmatpush1.bf16.msra.mxu1 %v1133_v19  ;;  %v593_v18 = vld [vmem:[#allocation7 + $0x910] sm:$0xff]  ;;  %v8942_v19 = vcombine.low %v8928_v45, %v8930_v46  ;;  %v1329_v45 = vunpack.c.h.s8.bf16 %v591_v17 }
 0x1c4   :  { %1686 = vmatprep.subr.bf16.mxu0 %v1150_v20  ;;  %1815 = vmatprep.subr.bf16.mxu1 %v1152_v21  ;;  %v8944_v20 = vld [vmem:[#allocation5 + $0x10] sm:$0xff]  ;;  %v8946_v21 = vld [vmem:[#allocation5 + $0x28] sm:$0xff]  ;;  %v1313_v23 = vunpack.c.l.s8.bf16 %v593_v18  ;;  %v1331_v46 = vunpack.c.h.s8.bf16 %v593_v18 }
 0x1c5   :  { %v8950_v28 = vcombine.high %v8944_v20, %v8946_v21 }
 0x1c7   :  { %1687 = vmatpush1.bf16.msra.mxu0 %v1149_v24  ;;  %1816 = vmatpush1.bf16.msra.mxu1 %v1151_v25  ;;  %v1330_v24 = vunpack.c.h.s8.bf16 %v592_v11  ;;  %v1332_v25 = vunpack.c.h.s8.bf16 %v594_v12 }
 0x1c8   :  { %1688 = vmatprep.subr.bf16.mxu0 %v1168_v26  ;;  %1817 = vmatprep.subr.bf16.mxu1 %v1170_v27  ;;  %v610_v26 = vld [vmem:[#allocation7 + $0x998] sm:$0xff]  ;;  %v612_v27 = vld [vmem:[#allocation7 + $0x9a8] sm:$0xff] }
 0x1c9   :  { %v1348_v29 = vunpack.c.l.s8.bf16 %v610_v26  ;;  %v1366_v38 = vunpack.c.h.s8.bf16 %v610_v26 }
 0x1cb   :  { %1689 = vmatpush1.bf16.msra.mxu0 %v1167_v32  ;;  %1818 = vmatpush1.bf16.msra.mxu1 %v1169_v33  ;;  %v1350_v32 = vunpack.c.l.s8.bf16 %v612_v27  ;;  %v609_v33 = vld [vmem:[#allocation7 + $0x990] sm:$0xff] }
 0x1cc   :  { %1690 = vmatprep.subr.bf16.mxu0 %v1186_v34  ;;  %1819 = vmatprep.subr.bf16.mxu1 %v1188_v35  ;;  %v611_v34 = vld [vmem:[#allocation7 + $0x9a0] sm:$0xff]  ;;  %v1347_v35 = vunpack.c.l.s8.bf16 %v609_v33 }
 0x1cd   :  { %v1349_v37 = vunpack.c.l.s8.bf16 %v611_v34  ;;  %v1367_v43 = vunpack.c.h.s8.bf16 %v611_v34 }
 0x1cf   :  { %1691 = vmatpush1.bf16.msra.mxu0 %v1185_v39  ;;  %1820 = vmatpush1.bf16.msra.mxu1 %v1187_v40  ;;  %v1368_v39 = vunpack.c.h.s8.bf16 %v612_v27  ;;  %v628_v40 = vld [vmem:[#allocation7 + $0xa28] sm:$0xff] }
 0x1d0   :  { %1692 = vmatprep.subr.bf16.mxu0 %v1204_v41  ;;  %1821 = vmatprep.subr.bf16.mxu1 %v1206_v42  ;;  %v630_v41 = vld [vmem:[#allocation7 + $0xa38] sm:$0xff]  ;;  %v1365_v42 = vunpack.c.h.s8.bf16 %v609_v33  ;;  %v1384_v47 = vunpack.c.l.s8.bf16 %v628_v40  ;;  %v1402_v30 = vunpack.c.h.s8.bf16 %v628_v40 }
 0x1d3   :  { %1693 = vmatpush1.bf16.msra.mxu0 %v1203_v48  ;;  %1822 = vmatpush1.bf16.msra.mxu1 %v1205_v49  ;;  %v1386_v48 = vunpack.c.l.s8.bf16 %v630_v41  ;;  %v627_v49 = vld [vmem:[#allocation7 + $0xa20] sm:$0xff] }
 0x1d4   :  { %1694 = vmatprep.subr.bf16.mxu0 %v1222_v50  ;;  %1823 = vmatprep.subr.bf16.mxu1 %v1224_v51  ;;  %v629_v50 = vld [vmem:[#allocation7 + $0xa30] sm:$0xff]  ;;  %v1383_v51 = vunpack.c.l.s8.bf16 %v627_v49 }
 0x1d5   :  { %v1385_v52 = vunpack.c.l.s8.bf16 %v629_v50  ;;  %v1403_v57 = vunpack.c.h.s8.bf16 %v629_v50 }
 0x1d7   :  { %1695 = vmatpush1.bf16.msra.mxu0 %v1221_v31  ;;  %1824 = vmatpush1.bf16.msra.mxu1 %v1223_v54  ;;  %v1404_v31 = vunpack.c.h.s8.bf16 %v630_v41  ;;  %v646_v54 = vld [vmem:[#allocation7 + $0xab8] sm:$0xff] }
 0x1d8   :  { %1696 = vmatprep.subr.bf16.mxu0 %v1240_v55  ;;  %1825 = vmatprep.subr.bf16.mxu1 %v1242_v56  ;;  %v648_v55 = vld [vmem:[#allocation7 + $0xac8] sm:$0xff]  ;;  %v1401_v56 = vunpack.c.h.s8.bf16 %v627_v49  ;;  %v1420_v58 = vunpack.c.l.s8.bf16 %v646_v54  ;;  %v1438_v0 = vunpack.c.h.s8.bf16 %v646_v54 }
 0x1db   :  { %1697 = vmatpush1.bf16.msra.mxu0 %v1239_v59  ;;  %1826 = vmatpush1.bf16.msra.mxu1 %v1241_v60  ;;  %v1422_v59 = vunpack.c.l.s8.bf16 %v648_v55  ;;  %v645_v60 = vld [vmem:[#allocation7 + $0xab0] sm:$0xff] }
 0x1dc   :  { %1698 = vmatprep.subr.bf16.mxu0 %v1258_v61  ;;  %1827 = vmatprep.subr.bf16.mxu1 %v1260_v62  ;;  %v647_v61 = vld [vmem:[#allocation7 + $0xac0] sm:$0xff]  ;;  %v1419_v62 = vunpack.c.l.s8.bf16 %v645_v60 }
 0x1dd   :  { %v1421_v63 = vunpack.c.l.s8.bf16 %v647_v61  ;;  %v1439_v5 = vunpack.c.h.s8.bf16 %v647_v61 }
 0x1df   :  { %1699 = vmatpush1.bf16.msra.mxu0 %v1257_v1  ;;  %1828 = vmatpush1.bf16.msra.mxu1 %v1259_v2  ;;  %v1440_v1 = vunpack.c.h.s8.bf16 %v648_v55  ;;  %v664_v2 = vld [vmem:[#allocation7 + $0xb48] sm:$0xff] }
 0x1e0   :  { %1700 = vmatprep.subr.bf16.mxu0 %v1276_v3  ;;  %1829 = vmatprep.subr.bf16.mxu1 %v1278_v4  ;;  %v666_v3 = vld [vmem:[#allocation7 + $0xb58] sm:$0xff]  ;;  %v1437_v4 = vunpack.c.h.s8.bf16 %v645_v60  ;;  %v1456_v6 = vunpack.c.l.s8.bf16 %v664_v2  ;;  %v1474_v12 = vunpack.c.h.s8.bf16 %v664_v2 }
 0x1e3   :  { %1701 = vmatpush1.bf16.msra.mxu0 %v1275_v7  ;;  %1830 = vmatpush1.bf16.msra.mxu1 %v1277_v8  ;;  %v1458_v7 = vunpack.c.l.s8.bf16 %v666_v3  ;;  %v663_v8 = vld [vmem:[#allocation7 + $0xb40] sm:$0xff] }
 0x1e4   :  { %1702 = vmatprep.subr.bf16.mxu0 %v1294_v9  ;;  %1831 = vmatprep.subr.bf16.mxu1 %v1296_v10  ;;  %v665_v9 = vld [vmem:[#allocation7 + $0xb50] sm:$0xff]  ;;  %v1455_v10 = vunpack.c.l.s8.bf16 %v663_v8 }
 0x1e5   :  { %v1457_v11 = vunpack.c.l.s8.bf16 %v665_v9  ;;  %v1475_v17 = vunpack.c.h.s8.bf16 %v665_v9 }
 0x1e7   :  { %1703 = vmatpush1.bf16.msra.mxu0 %v1293_v13  ;;  %1832 = vmatpush1.bf16.msra.mxu1 %v1295_v14  ;;  %v1476_v13 = vunpack.c.h.s8.bf16 %v666_v3  ;;  %v682_v14 = vld [vmem:[#allocation7 + $0xbd8] sm:$0xff] }
 0x1e8   :  { %1715 = vmatprep.subr.bf16.mxu0 %v1312_v15  ;;  %1844 = vmatprep.subr.bf16.mxu1 %v1314_v16  ;;  %v684_v15 = vld [vmem:[#allocation7 + $0xbe8] sm:$0xff]  ;;  %v1473_v16 = vunpack.c.h.s8.bf16 %v663_v8  ;;  %v1492_v18 = vunpack.c.l.s8.bf16 %v682_v14  ;;  %v1510_v27 = vunpack.c.h.s8.bf16 %v682_v14 }
 0x1ea   :  { %1705 = vmatmul.mubr.bf16.vlgmr.msra.gmra.mrb[0].mxu0 %v8942_v19  ;;  %1834 = vmatmul.mubr.bf16.vlgmr.msra.gmra.mrb[0].mxu1 %v8942_v19 }
 0x1eb   :  { %1716 = vmatpush1.bf16.msra.mxu0 %v1311_v22  ;;  %1845 = vmatpush1.bf16.msra.mxu1 %v1313_v23  ;;  %v1494_v22 = vunpack.c.l.s8.bf16 %v684_v15  ;;  %v681_v23 = vld [vmem:[#allocation7 + $0xbd0] sm:$0xff] }
 0x1ec   :  { %1717 = vmatprep.subr.bf16.mxu0 %v1330_v24  ;;  %1846 = vmatprep.subr.bf16.mxu1 %v1332_v25  ;;  %v683_v24 = vld [vmem:[#allocation7 + $0xbe0] sm:$0xff]  ;;  %v1491_v25 = vunpack.c.l.s8.bf16 %v681_v23 }
 0x1ed   :  { %1747 = vmatprep.mubr.bf16.mxu0 %v8950_v28  ;;  %1876 = vmatprep.mubr.bf16.mxu1 %v8950_v28  ;;  %v1493_v26 = vunpack.c.l.s8.bf16 %v683_v24  ;;  %v1511_v33 = vunpack.c.h.s8.bf16 %v683_v24 }
 0x1ef   :  { %1718 = vmatpush1.bf16.msra.mxu0 %v1329_v45  ;;  %1847 = vmatpush1.bf16.msra.mxu1 %v1331_v46  ;;  %v1512_v45 = vunpack.c.h.s8.bf16 %v684_v15  ;;  %v700_v46 = vld [vmem:[#allocation7 + $0xc68] sm:$0xff] }
 0x1f0   :  { %1719 = vmatprep.subr.bf16.mxu0 %v1348_v29  ;;  %1848 = vmatprep.subr.bf16.mxu1 %v1350_v32  ;;  %v702_v29 = vld [vmem:[#allocation7 + $0xc78] sm:$0xff]  ;;  %v1509_v32 = vunpack.c.h.s8.bf16 %v681_v23  ;;  %v1528_v34 = vunpack.c.l.s8.bf16 %v700_v46  ;;  %v1546_v41 = vunpack.c.h.s8.bf16 %v700_v46 }
 0x1f3   :  { %1720 = vmatpush1.bf16.msra.mxu0 %v1347_v35  ;;  %1849 = vmatpush1.bf16.msra.mxu1 %v1349_v37  ;;  %v1530_v35 = vunpack.c.l.s8.bf16 %v702_v29  ;;  %v699_v37 = vld [vmem:[#allocation7 + $0xc60] sm:$0xff] }
 0x1f4   :  { %1721 = vmatprep.subr.bf16.mxu0 %v1366_v38  ;;  %1850 = vmatprep.subr.bf16.mxu1 %v1368_v39  ;;  %v701_v38 = vld [vmem:[#allocation7 + $0xc70] sm:$0xff]  ;;  %v1527_v39 = vunpack.c.l.s8.bf16 %v699_v37 }
 0x1f5   :  { %v1529_v40 = vunpack.c.l.s8.bf16 %v701_v38  ;;  %v1547_v49 = vunpack.c.h.s8.bf16 %v701_v38 }
 0x1f7   :  { %1722 = vmatpush1.bf16.msra.mxu0 %v1365_v42  ;;  %1851 = vmatpush1.bf16.msra.mxu1 %v1367_v43  ;;  %v1548_v42 = vunpack.c.h.s8.bf16 %v702_v29  ;;  %v718_v43 = vld [vmem:[#allocation7 + $0xcf8] sm:$0xff] }
 0x1f8   :  { %1723 = vmatprep.subr.bf16.mxu0 %v1384_v47  ;;  %1852 = vmatprep.subr.bf16.mxu1 %v1386_v48  ;;  %v720_v47 = vld [vmem:[#allocation7 + $0xd08] sm:$0xff]  ;;  %v1545_v48 = vunpack.c.h.s8.bf16 %v699_v37  ;;  %v1564_v50 = vunpack.c.l.s8.bf16 %v718_v43  ;;  %v1582_v55 = vunpack.c.h.s8.bf16 %v718_v43 }
 0x1fb   :  { %1724 = vmatpush1.bf16.msra.mxu0 %v1383_v51  ;;  %1853 = vmatpush1.bf16.msra.mxu1 %v1385_v52  ;;  %v1566_v51 = vunpack.c.l.s8.bf16 %v720_v47  ;;  %v717_v52 = vld [vmem:[#allocation7 + $0xcf0] sm:$0xff] }
 0x1fc   :  { %1725 = vmatprep.subr.bf16.mxu0 %v1402_v30  ;;  %1854 = vmatprep.subr.bf16.mxu1 %v1404_v31  ;;  %v719_v30 = vld [vmem:[#allocation7 + $0xd00] sm:$0xff]  ;;  %v1563_v31 = vunpack.c.l.s8.bf16 %v717_v52 }
 0x1fd   :  { %v1565_v54 = vunpack.c.l.s8.bf16 %v719_v30  ;;  %v1583_v60 = vunpack.c.h.s8.bf16 %v719_v30 }
 0x1ff   :  { %1726 = vmatpush1.bf16.msra.mxu0 %v1401_v56  ;;  %1855 = vmatpush1.bf16.msra.mxu1 %v1403_v57  ;;  %v1584_v56 = vunpack.c.h.s8.bf16 %v720_v47  ;;  %v308_v57 = vld [vmem:[#allocation7 + $0x28] sm:$0xff] }
 0x200   :  { %1727 = vmatprep.subr.bf16.mxu0 %v1420_v58  ;;  %1856 = vmatprep.subr.bf16.mxu1 %v1422_v59  ;;  %v310_v58 = vld [vmem:[#allocation7 + $0x38] sm:$0xff]  ;;  %v1581_v59 = vunpack.c.h.s8.bf16 %v717_v52  ;;  %v740_v61 = vunpack.c.l.s8.bf16 %v308_v57 }
 0x203   :  { %1728 = vmatpush1.bf16.msra.mxu0 %v1419_v62  ;;  %1857 = vmatpush1.bf16.msra.mxu1 %v1421_v63  ;;  %v742_v62 = vunpack.c.l.s8.bf16 %v310_v58  ;;  %v307_v63 = vld [vmem:[#allocation7 + $0x20] sm:$0xff] }
 0x204   :  { %1729 = vmatprep.subr.bf16.mxu0 %v1438_v0  ;;  %1858 = vmatprep.subr.bf16.mxu1 %v1440_v1  ;;  %v309_v0 = vld [vmem:[#allocation7 + $0x30] sm:$0xff]  ;;  %v8958_v1 = vcombine.low %v8944_v20, %v8946_v21  ;;  %v739_v2 = vunpack.c.l.s8.bf16 %v307_v63  ;;  %v757_v8 = vunpack.c.h.s8.bf16 %v307_v63 }
 0x205   :  { %v741_v3 = vunpack.c.l.s8.bf16 %v309_v0  ;;  %v759_v9 = vunpack.c.h.s8.bf16 %v309_v0 }
 0x207   :  { %1730 = vmatpush1.bf16.msra.mxu0 %v1437_v4  ;;  %1859 = vmatpush1.bf16.msra.mxu1 %v1439_v5  ;;  %v758_v4 = vunpack.c.h.s8.bf16 %v308_v57  ;;  %v760_v5 = vunpack.c.h.s8.bf16 %v310_v58 }
 0x208   :  { %1731 = vmatprep.subr.bf16.mxu0 %v1456_v6  ;;  %1860 = vmatprep.subr.bf16.mxu1 %v1458_v7  ;;  %v326_v6 = vld [vmem:[#allocation7 + $0xb8] sm:$0xff]  ;;  %v328_v7 = vld [vmem:[#allocation7 + $0xc8] sm:$0xff] }
 0x209   :  { %v776_v20 = vunpack.c.l.s8.bf16 %v326_v6  ;;  %v778_v21 = vunpack.c.l.s8.bf16 %v328_v7  ;;  %v794_v14 = vunpack.c.h.s8.bf16 %v326_v6  ;;  %v796_v15 = vunpack.c.h.s8.bf16 %v328_v7 }
 0x20b   :  { %1732 = vmatpush1.bf16.msra.mxu0 %v1455_v10  ;;  %1861 = vmatpush1.bf16.msra.mxu1 %v1457_v11  ;;  %v325_v10 = vld [vmem:[#allocation7 + $0xb0] sm:$0xff]  ;;  %v327_v11 = vld [vmem:[#allocation7 + $0xc0] sm:$0xff] }
 0x20c   :  { %1733 = vmatprep.subr.bf16.mxu0 %v1474_v12  ;;  %1862 = vmatprep.subr.bf16.mxu1 %v1476_v13  ;;  %v775_v12 = vunpack.c.l.s8.bf16 %v325_v10  ;;  %v777_v13 = vunpack.c.l.s8.bf16 %v327_v11 }
 0x20f   :  { %1734 = vmatpush1.bf16.msra.mxu0 %v1473_v16  ;;  %1863 = vmatpush1.bf16.msra.mxu1 %v1475_v17  ;;  %v344_v16 = vld [vmem:[#allocation7 + $0x148] sm:$0xff]  ;;  %v346_v17 = vld [vmem:[#allocation7 + $0x158] sm:$0xff] }
 0x210   :  { %1735 = vmatprep.subr.bf16.mxu0 %v1492_v18  ;;  %1864 = vmatprep.subr.bf16.mxu1 %v1494_v22  ;;  %v793_v18 = vunpack.c.h.s8.bf16 %v325_v10  ;;  %v795_v22 = vunpack.c.h.s8.bf16 %v327_v11  ;;  %v812_v23 = vunpack.c.l.s8.bf16 %v344_v16  ;;  %v814_v24 = vunpack.c.l.s8.bf16 %v346_v17 }
 0x211   :  { %v830_v46 = vunpack.c.h.s8.bf16 %v344_v16  ;;  %v832_v29 = vunpack.c.h.s8.bf16 %v346_v17 }
 0x213   :  { %1736 = vmatpush1.bf16.msra.mxu0 %v1491_v25  ;;  %1865 = vmatpush1.bf16.msra.mxu1 %v1493_v26  ;;  %v343_v25 = vld [vmem:[#allocation7 + $0x140] sm:$0xff]  ;;  %v345_v26 = vld [vmem:[#allocation7 + $0x150] sm:$0xff] }
 0x214   :  { %1737 = vmatprep.subr.bf16.mxu0 %v1510_v27  ;;  %1866 = vmatprep.subr.bf16.mxu1 %v1512_v45  ;;  %v811_v27 = vunpack.c.l.s8.bf16 %v343_v25  ;;  %v813_v45 = vunpack.c.l.s8.bf16 %v345_v26 }
 0x217   :  { %1738 = vmatpush1.bf16.msra.mxu0 %v1509_v32  ;;  %1867 = vmatpush1.bf16.msra.mxu1 %v1511_v33  ;;  %v362_v32 = vld [vmem:[#allocation7 + $0x1d8] sm:$0xff]  ;;  %v364_v33 = vld [vmem:[#allocation7 + $0x1e8] sm:$0xff] }
 0x218   :  { %1739 = vmatprep.subr.bf16.mxu0 %v1528_v34  ;;  %1868 = vmatprep.subr.bf16.mxu1 %v1530_v35  ;;  %v829_v34 = vunpack.c.h.s8.bf16 %v343_v25  ;;  %v831_v35 = vunpack.c.h.s8.bf16 %v345_v26  ;;  %v848_v37 = vunpack.c.l.s8.bf16 %v362_v32  ;;  %v850_v38 = vunpack.c.l.s8.bf16 %v364_v33 }
 0x219   :  { %v866_v43 = vunpack.c.h.s8.bf16 %v362_v32  ;;  %v868_v47 = vunpack.c.h.s8.bf16 %v364_v33 }
 0x21b   :  { %1740 = vmatpush1.bf16.msra.mxu0 %v1527_v39  ;;  %1869 = vmatpush1.bf16.msra.mxu1 %v1529_v40  ;;  %v361_v39 = vld [vmem:[#allocation7 + $0x1d0] sm:$0xff]  ;;  %v363_v40 = vld [vmem:[#allocation7 + $0x1e0] sm:$0xff] }
 0x21c   :  { %1741 = vmatprep.subr.bf16.mxu0 %v1546_v41  ;;  %1870 = vmatprep.subr.bf16.mxu1 %v1548_v42  ;;  %v847_v41 = vunpack.c.l.s8.bf16 %v361_v39  ;;  %v849_v42 = vunpack.c.l.s8.bf16 %v363_v40 }
 0x21f   :  { %1742 = vmatpush1.bf16.msra.mxu0 %v1545_v48  ;;  %1871 = vmatpush1.bf16.msra.mxu1 %v1547_v49  ;;  %v380_v48 = vld [vmem:[#allocation7 + $0x268] sm:$0xff]  ;;  %v382_v49 = vld [vmem:[#allocation7 + $0x278] sm:$0xff] }
 0x220   :  { %1743 = vmatprep.subr.bf16.mxu0 %v1564_v50  ;;  %1872 = vmatprep.subr.bf16.mxu1 %v1566_v51  ;;  %v865_v50 = vunpack.c.h.s8.bf16 %v361_v39  ;;  %v867_v51 = vunpack.c.h.s8.bf16 %v363_v40  ;;  %v884_v52 = vunpack.c.l.s8.bf16 %v380_v48  ;;  %v886_v30 = vunpack.c.l.s8.bf16 %v382_v49 }
 0x221   :  { %v902_v57 = vunpack.c.h.s8.bf16 %v380_v48  ;;  %v904_v58 = vunpack.c.h.s8.bf16 %v382_v49 }
 0x223   :  { %1744 = vmatpush1.bf16.msra.mxu0 %v1563_v31  ;;  %1873 = vmatpush1.bf16.msra.mxu1 %v1565_v54  ;;  %v379_v31 = vld [vmem:[#allocation7 + $0x260] sm:$0xff]  ;;  %v381_v54 = vld [vmem:[#allocation7 + $0x270] sm:$0xff] }
 0x224   :  { %1745 = vmatprep.subr.bf16.mxu0 %v1582_v55  ;;  %1874 = vmatprep.subr.bf16.mxu1 %v1584_v56  ;;  %v883_v55 = vunpack.c.l.s8.bf16 %v379_v31  ;;  %v885_v56 = vunpack.c.l.s8.bf16 %v381_v54 }
 0x227   :  { %1746 = vmatpush1.bf16.msra.mxu0 %v1581_v59  ;;  %1875 = vmatpush1.bf16.msra.mxu1 %v1583_v60  ;;  %v398_v59 = vld [vmem:[#allocation7 + $0x2f8] sm:$0xff]  ;;  %v400_v60 = vld [vmem:[#allocation7 + $0x308] sm:$0xff] }
 0x228   :  { %1887 = vmatprep.subr.bf16.mxu0 %v740_v61  ;;  %2016 = vmatprep.subr.bf16.mxu1 %v742_v62  ;;  %v901_v61 = vunpack.c.h.s8.bf16 %v379_v31  ;;  %v903_v62 = vunpack.c.h.s8.bf16 %v381_v54  ;;  %v920_v63 = vunpack.c.l.s8.bf16 %v398_v59  ;;  %v922_v0 = vunpack.c.l.s8.bf16 %v400_v60 }
 0x229   :  { %v938_v6 = vunpack.c.h.s8.bf16 %v398_v59  ;;  %v940_v7 = vunpack.c.h.s8.bf16 %v400_v60 }
 0x22a   :  { %1748 = vmatmul.mubr.bf16.vlgmr.msra.gmra.mrb[0].mxu0 %v8958_v1  ;;  %1877 = vmatmul.mubr.bf16.vlgmr.msra.gmra.mrb[0].mxu1 %v8958_v1 }
 0x22b   :  { %1888 = vmatpush1.bf16.msra.mxu0 %v739_v2  ;;  %2017 = vmatpush1.bf16.msra.mxu1 %v741_v3  ;;  %v397_v2 = vld [vmem:[#allocation7 + $0x2f0] sm:$0xff]  ;;  %v399_v3 = vld [vmem:[#allocation7 + $0x300] sm:$0xff] }
 0x22c   :  { %1889 = vmatprep.subr.bf16.mxu0 %v758_v4  ;;  %2018 = vmatprep.subr.bf16.mxu1 %v760_v5  ;;  %v919_v4 = vunpack.c.l.s8.bf16 %v397_v2  ;;  %v921_v5 = vunpack.c.l.s8.bf16 %v399_v3 }
 0x22d   :  { %1919 = vmatprep.mubr.bf16.mxu0 %v8920_v36  ;;  %2048 = vmatprep.mubr.bf16.mxu1 %v8920_v36 }
 0x22f   :  { %1890 = vmatpush1.bf16.msra.mxu0 %v757_v8  ;;  %2019 = vmatpush1.bf16.msra.mxu1 %v759_v9  ;;  %v416_v8 = vld [vmem:[#allocation7 + $0x388] sm:$0xff]  ;;  %v418_v9 = vld [vmem:[#allocation7 + $0x398] sm:$0xff] }
 0x230   :  { %1891 = vmatprep.subr.bf16.mxu0 %v776_v20  ;;  %2020 = vmatprep.subr.bf16.mxu1 %v778_v21  ;;  %v937_v20 = vunpack.c.h.s8.bf16 %v397_v2  ;;  %v939_v21 = vunpack.c.h.s8.bf16 %v399_v3  ;;  %v956_v10 = vunpack.c.l.s8.bf16 %v416_v8  ;;  %v958_v11 = vunpack.c.l.s8.bf16 %v418_v9 }
 0x231   :  { %v974_v16 = vunpack.c.h.s8.bf16 %v416_v8  ;;  %v976_v17 = vunpack.c.h.s8.bf16 %v418_v9 }
 0x233   :  { %1892 = vmatpush1.bf16.msra.mxu0 %v775_v12  ;;  %2021 = vmatpush1.bf16.msra.mxu1 %v777_v13  ;;  %v415_v12 = vld [vmem:[#allocation7 + $0x380] sm:$0xff]  ;;  %v417_v13 = vld [vmem:[#allocation7 + $0x390] sm:$0xff] }
 0x234   :  { %1893 = vmatprep.subr.bf16.mxu0 %v794_v14  ;;  %2022 = vmatprep.subr.bf16.mxu1 %v796_v15  ;;  %v955_v14 = vunpack.c.l.s8.bf16 %v415_v12  ;;  %v957_v15 = vunpack.c.l.s8.bf16 %v417_v13 }
 0x237   :  { %1894 = vmatpush1.bf16.msra.mxu0 %v793_v18  ;;  %2023 = vmatpush1.bf16.msra.mxu1 %v795_v22  ;;  %v434_v18 = vld [vmem:[#allocation7 + $0x418] sm:$0xff]  ;;  %v436_v22 = vld [vmem:[#allocation7 + $0x428] sm:$0xff] }
 0x238   :  { %1895 = vmatprep.subr.bf16.mxu0 %v812_v23  ;;  %2024 = vmatprep.subr.bf16.mxu1 %v814_v24  ;;  %v973_v23 = vunpack.c.h.s8.bf16 %v415_v12  ;;  %v975_v24 = vunpack.c.h.s8.bf16 %v417_v13  ;;  %v992_v25 = vunpack.c.l.s8.bf16 %v434_v18  ;;  %v994_v26 = vunpack.c.l.s8.bf16 %v436_v22 }
 0x239   :  { %v1010_v32 = vunpack.c.h.s8.bf16 %v434_v18  ;;  %v1012_v33 = vunpack.c.h.s8.bf16 %v436_v22 }
 0x23b   :  { %1896 = vmatpush1.bf16.msra.mxu0 %v811_v27  ;;  %2025 = vmatpush1.bf16.msra.mxu1 %v813_v45  ;;  %v433_v27 = vld [vmem:[#allocation7 + $0x410] sm:$0xff]  ;;  %v435_v45 = vld [vmem:[#allocation7 + $0x420] sm:$0xff] }
 0x23c   :  { %1897 = vmatprep.subr.bf16.mxu0 %v830_v46  ;;  %2026 = vmatprep.subr.bf16.mxu1 %v832_v29  ;;  %v991_v46 = vunpack.c.l.s8.bf16 %v433_v27  ;;  %v993_v29 = vunpack.c.l.s8.bf16 %v435_v45 }
 0x23f   :  { %1898 = vmatpush1.bf16.msra.mxu0 %v829_v34  ;;  %2027 = vmatpush1.bf16.msra.mxu1 %v831_v35  ;;  %v452_v34 = vld [vmem:[#allocation7 + $0x4a8] sm:$0xff]  ;;  %v454_v35 = vld [vmem:[#allocation7 + $0x4b8] sm:$0xff] }
 0x240   :  { %1899 = vmatprep.subr.bf16.mxu0 %v848_v37  ;;  %2028 = vmatprep.subr.bf16.mxu1 %v850_v38  ;;  %v1009_v37 = vunpack.c.h.s8.bf16 %v433_v27  ;;  %v1011_v38 = vunpack.c.h.s8.bf16 %v435_v45  ;;  %v1028_v39 = vunpack.c.l.s8.bf16 %v452_v34  ;;  %v1030_v40 = vunpack.c.l.s8.bf16 %v454_v35 }
 0x241   :  { %v1046_v48 = vunpack.c.h.s8.bf16 %v452_v34  ;;  %v1048_v49 = vunpack.c.h.s8.bf16 %v454_v35 }
 0x243   :  { %1900 = vmatpush1.bf16.msra.mxu0 %v847_v41  ;;  %2029 = vmatpush1.bf16.msra.mxu1 %v849_v42  ;;  %v451_v41 = vld [vmem:[#allocation7 + $0x4a0] sm:$0xff]  ;;  %v453_v42 = vld [vmem:[#allocation7 + $0x4b0] sm:$0xff] }
 0x244   :  { %1901 = vmatprep.subr.bf16.mxu0 %v866_v43  ;;  %2030 = vmatprep.subr.bf16.mxu1 %v868_v47  ;;  %v1027_v43 = vunpack.c.l.s8.bf16 %v451_v41  ;;  %v1029_v47 = vunpack.c.l.s8.bf16 %v453_v42 }
 0x247   :  { %1902 = vmatpush1.bf16.msra.mxu0 %v865_v50  ;;  %2031 = vmatpush1.bf16.msra.mxu1 %v867_v51  ;;  %v470_v50 = vld [vmem:[#allocation7 + $0x538] sm:$0xff]  ;;  %v472_v51 = vld [vmem:[#allocation7 + $0x548] sm:$0xff] }
 0x248   :  { %1903 = vmatprep.subr.bf16.mxu0 %v884_v52  ;;  %2032 = vmatprep.subr.bf16.mxu1 %v886_v30  ;;  %v1045_v52 = vunpack.c.h.s8.bf16 %v451_v41  ;;  %v1047_v30 = vunpack.c.h.s8.bf16 %v453_v42  ;;  %v1064_v31 = vunpack.c.l.s8.bf16 %v470_v50  ;;  %v1066_v54 = vunpack.c.l.s8.bf16 %v472_v51 }
 0x249   :  { %v1082_v59 = vunpack.c.h.s8.bf16 %v470_v50  ;;  %v1084_v60 = vunpack.c.h.s8.bf16 %v472_v51 }
 0x24b   :  { %1904 = vmatpush1.bf16.msra.mxu0 %v883_v55  ;;  %2033 = vmatpush1.bf16.msra.mxu1 %v885_v56  ;;  %v469_v55 = vld [vmem:[#allocation7 + $0x530] sm:$0xff]  ;;  %v471_v56 = vld [vmem:[#allocation7 + $0x540] sm:$0xff] }
 0x24c   :  { %1905 = vmatprep.subr.bf16.mxu0 %v902_v57  ;;  %2034 = vmatprep.subr.bf16.mxu1 %v904_v58  ;;  %v1063_v57 = vunpack.c.l.s8.bf16 %v469_v55  ;;  %v1065_v58 = vunpack.c.l.s8.bf16 %v471_v56 }
 0x24f   :  { %1906 = vmatpush1.bf16.msra.mxu0 %v901_v61  ;;  %2035 = vmatpush1.bf16.msra.mxu1 %v903_v62  ;;  %v488_v61 = vld [vmem:[#allocation7 + $0x5c8] sm:$0xff]  ;;  %v490_v62 = vld [vmem:[#allocation7 + $0x5d8] sm:$0xff] }
 0x250   :  { %1907 = vmatprep.subr.bf16.mxu0 %v920_v63  ;;  %2036 = vmatprep.subr.bf16.mxu1 %v922_v0  ;;  %v1081_v63 = vunpack.c.h.s8.bf16 %v469_v55  ;;  %v1083_v0 = vunpack.c.h.s8.bf16 %v471_v56  ;;  %v1100_v2 = vunpack.c.l.s8.bf16 %v488_v61  ;;  %v1102_v3 = vunpack.c.l.s8.bf16 %v490_v62 }
 0x251   :  { %v1118_v8 = vunpack.c.h.s8.bf16 %v488_v61  ;;  %v1120_v9 = vunpack.c.h.s8.bf16 %v490_v62 }
 0x253   :  { %1908 = vmatpush1.bf16.msra.mxu0 %v919_v4  ;;  %2037 = vmatpush1.bf16.msra.mxu1 %v921_v5  ;;  %v487_v4 = vld [vmem:[#allocation7 + $0x5c0] sm:$0xff]  ;;  %v489_v5 = vld [vmem:[#allocation7 + $0x5d0] sm:$0xff] }
 0x254   :  { %1909 = vmatprep.subr.bf16.mxu0 %v938_v6  ;;  %2038 = vmatprep.subr.bf16.mxu1 %v940_v7  ;;  %v1099_v6 = vunpack.c.l.s8.bf16 %v487_v4  ;;  %v1101_v7 = vunpack.c.l.s8.bf16 %v489_v5 }
 0x257   :  { %1910 = vmatpush1.bf16.msra.mxu0 %v937_v20  ;;  %2039 = vmatpush1.bf16.msra.mxu1 %v939_v21  ;;  %v506_v20 = vld [vmem:[#allocation7 + $0x658] sm:$0xff]  ;;  %v508_v21 = vld [vmem:[#allocation7 + $0x668] sm:$0xff] }
 0x258   :  { %1911 = vmatprep.subr.bf16.mxu0 %v956_v10  ;;  %2040 = vmatprep.subr.bf16.mxu1 %v958_v11  ;;  %v1117_v10 = vunpack.c.h.s8.bf16 %v487_v4  ;;  %v1119_v11 = vunpack.c.h.s8.bf16 %v489_v5  ;;  %v1136_v12 = vunpack.c.l.s8.bf16 %v506_v20  ;;  %v1138_v13 = vunpack.c.l.s8.bf16 %v508_v21 }
 0x259   :  { %v1154_v18 = vunpack.c.h.s8.bf16 %v506_v20  ;;  %v1156_v22 = vunpack.c.h.s8.bf16 %v508_v21 }
 0x25b   :  { %1912 = vmatpush1.bf16.msra.mxu0 %v955_v14  ;;  %2041 = vmatpush1.bf16.msra.mxu1 %v957_v15  ;;  %v505_v14 = vld [vmem:[#allocation7 + $0x650] sm:$0xff]  ;;  %v507_v15 = vld [vmem:[#allocation7 + $0x660] sm:$0xff] }
 0x25c   :  { %1913 = vmatprep.subr.bf16.mxu0 %v974_v16  ;;  %2042 = vmatprep.subr.bf16.mxu1 %v976_v17  ;;  %v1135_v16 = vunpack.c.l.s8.bf16 %v505_v14  ;;  %v1137_v17 = vunpack.c.l.s8.bf16 %v507_v15 }
 0x25f   :  { %1914 = vmatpush1.bf16.msra.mxu0 %v973_v23  ;;  %2043 = vmatpush1.bf16.msra.mxu1 %v975_v24  ;;  %v524_v23 = vld [vmem:[#allocation7 + $0x6e8] sm:$0xff]  ;;  %v526_v24 = vld [vmem:[#allocation7 + $0x6f8] sm:$0xff] }
 0x260   :  { %1915 = vmatprep.subr.bf16.mxu0 %v992_v25  ;;  %2044 = vmatprep.subr.bf16.mxu1 %v994_v26  ;;  %v1153_v25 = vunpack.c.h.s8.bf16 %v505_v14  ;;  %v1155_v26 = vunpack.c.h.s8.bf16 %v507_v15  ;;  %v1172_v27 = vunpack.c.l.s8.bf16 %v524_v23  ;;  %v1174_v45 = vunpack.c.l.s8.bf16 %v526_v24 }
 0x261   :  { %v1190_v34 = vunpack.c.h.s8.bf16 %v524_v23  ;;  %v1192_v35 = vunpack.c.h.s8.bf16 %v526_v24 }
 0x263   :  { %1916 = vmatpush1.bf16.msra.mxu0 %v991_v46  ;;  %2045 = vmatpush1.bf16.msra.mxu1 %v993_v29  ;;  %v523_v46 = vld [vmem:[#allocation7 + $0x6e0] sm:$0xff]  ;;  %v525_v29 = vld [vmem:[#allocation7 + $0x6f0] sm:$0xff] }
 0x264   :  { %1917 = vmatprep.subr.bf16.mxu0 %v1010_v32  ;;  %2046 = vmatprep.subr.bf16.mxu1 %v1012_v33  ;;  %v1171_v32 = vunpack.c.l.s8.bf16 %v523_v46  ;;  %v1173_v33 = vunpack.c.l.s8.bf16 %v525_v29 }
 0x267   :  { %1918 = vmatpush1.bf16.msra.mxu0 %v1009_v37  ;;  %2047 = vmatpush1.bf16.msra.mxu1 %v1011_v38  ;;  %v542_v37 = vld [vmem:[#allocation7 + $0x778] sm:$0xff]  ;;  %v544_v38 = vld [vmem:[#allocation7 + $0x788] sm:$0xff] }
 0x268   :  { %1930 = vmatprep.subr.bf16.mxu0 %v1028_v39  ;;  %2059 = vmatprep.subr.bf16.mxu1 %v1030_v40  ;;  %v1189_v39 = vunpack.c.h.s8.bf16 %v523_v46  ;;  %v1191_v40 = vunpack.c.h.s8.bf16 %v525_v29  ;;  %v1208_v41 = vunpack.c.l.s8.bf16 %v542_v37  ;;  %v1210_v42 = vunpack.c.l.s8.bf16 %v544_v38 }
 0x269   :  { %v1226_v50 = vunpack.c.h.s8.bf16 %v542_v37  ;;  %v1228_v51 = vunpack.c.h.s8.bf16 %v544_v38 }
 0x26a   :  { %1920 = vmatmul.mubr.bf16.vlgmr.msra.gmra.mrb[4].mxu0 %v8926_v44  ;;  %2049 = vmatmul.mubr.bf16.vlgmr.msra.gmra.mrb[4].mxu1 %v8926_v44 }
 0x26b   :  { %1931 = vmatpush1.bf16.msra.mxu0 %v1027_v43  ;;  %2060 = vmatpush1.bf16.msra.mxu1 %v1029_v47  ;;  %v541_v43 = vld [vmem:[#allocation7 + $0x770] sm:$0xff]  ;;  %v543_v47 = vld [vmem:[#allocation7 + $0x780] sm:$0xff] }
 0x26c   :  { %1932 = vmatprep.subr.bf16.mxu0 %v1046_v48  ;;  %2061 = vmatprep.subr.bf16.mxu1 %v1048_v49  ;;  %v1207_v48 = vunpack.c.l.s8.bf16 %v541_v43  ;;  %v1209_v49 = vunpack.c.l.s8.bf16 %v543_v47 }
 0x26d   :  { %1962 = vmatprep.mubr.bf16.mxu0 %v8934_v53  ;;  %2091 = vmatprep.mubr.bf16.mxu1 %v8934_v53 }
 0x26f   :  { %1933 = vmatpush1.bf16.msra.mxu0 %v1045_v52  ;;  %2062 = vmatpush1.bf16.msra.mxu1 %v1047_v30  ;;  %v560_v52 = vld [vmem:[#allocation7 + $0x808] sm:$0xff]  ;;  %v562_v30 = vld [vmem:[#allocation7 + $0x818] sm:$0xff] }
 0x270   :  { %1934 = vmatprep.subr.bf16.mxu0 %v1064_v31  ;;  %2063 = vmatprep.subr.bf16.mxu1 %v1066_v54  ;;  %v1225_v31 = vunpack.c.h.s8.bf16 %v541_v43  ;;  %v1227_v54 = vunpack.c.h.s8.bf16 %v543_v47  ;;  %v1244_v55 = vunpack.c.l.s8.bf16 %v560_v52  ;;  %v1246_v56 = vunpack.c.l.s8.bf16 %v562_v30 }
 0x271   :  { %v1262_v61 = vunpack.c.h.s8.bf16 %v560_v52  ;;  %v1264_v62 = vunpack.c.h.s8.bf16 %v562_v30 }
 0x273   :  { %1935 = vmatpush1.bf16.msra.mxu0 %v1063_v57  ;;  %2064 = vmatpush1.bf16.msra.mxu1 %v1065_v58  ;;  %v559_v57 = vld [vmem:[#allocation7 + $0x800] sm:$0xff]  ;;  %v561_v58 = vld [vmem:[#allocation7 + $0x810] sm:$0xff] }
 0x274   :  { %1936 = vmatprep.subr.bf16.mxu0 %v1082_v59  ;;  %2065 = vmatprep.subr.bf16.mxu1 %v1084_v60  ;;  %v1243_v59 = vunpack.c.l.s8.bf16 %v559_v57  ;;  %v1245_v60 = vunpack.c.l.s8.bf16 %v561_v58 }
 0x277   :  { %1937 = vmatpush1.bf16.msra.mxu0 %v1081_v63  ;;  %2066 = vmatpush1.bf16.msra.mxu1 %v1083_v0  ;;  %v578_v63 = vld [vmem:[#allocation7 + $0x898] sm:$0xff]  ;;  %v580_v0 = vld [vmem:[#allocation7 + $0x8a8] sm:$0xff] }
 0x278   :  { %1938 = vmatprep.subr.bf16.mxu0 %v1100_v2  ;;  %2067 = vmatprep.subr.bf16.mxu1 %v1102_v3  ;;  %v1261_v2 = vunpack.c.h.s8.bf16 %v559_v57  ;;  %v1263_v3 = vunpack.c.h.s8.bf16 %v561_v58  ;;  %v1280_v4 = vunpack.c.l.s8.bf16 %v578_v63  ;;  %v1282_v5 = vunpack.c.l.s8.bf16 %v580_v0 }
 0x279   :  { %v1298_v20 = vunpack.c.h.s8.bf16 %v578_v63  ;;  %v1300_v21 = vunpack.c.h.s8.bf16 %v580_v0 }
 0x27b   :  { %1939 = vmatpush1.bf16.msra.mxu0 %v1099_v6  ;;  %2068 = vmatpush1.bf16.msra.mxu1 %v1101_v7  ;;  %v577_v6 = vld [vmem:[#allocation7 + $0x890] sm:$0xff]  ;;  %v579_v7 = vld [vmem:[#allocation7 + $0x8a0] sm:$0xff] }
 0x27c   :  { %1940 = vmatprep.subr.bf16.mxu0 %v1118_v8  ;;  %2069 = vmatprep.subr.bf16.mxu1 %v1120_v9  ;;  %v1279_v8 = vunpack.c.l.s8.bf16 %v577_v6  ;;  %v1281_v9 = vunpack.c.l.s8.bf16 %v579_v7 }
 0x27f   :  { %1941 = vmatpush1.bf16.msra.mxu0 %v1117_v10  ;;  %2070 = vmatpush1.bf16.msra.mxu1 %v1119_v11  ;;  %v596_v10 = vld [vmem:[#allocation7 + $0x928] sm:$0xff]  ;;  %v598_v11 = vld [vmem:[#allocation7 + $0x938] sm:$0xff] }
 0x280   :  { %1942 = vmatprep.subr.bf16.mxu0 %v1136_v12  ;;  %2071 = vmatprep.subr.bf16.mxu1 %v1138_v13  ;;  %v1297_v12 = vunpack.c.h.s8.bf16 %v577_v6  ;;  %v1299_v13 = vunpack.c.h.s8.bf16 %v579_v7  ;;  %v1316_v14 = vunpack.c.l.s8.bf16 %v596_v10  ;;  %v1318_v15 = vunpack.c.l.s8.bf16 %v598_v11 }
 0x281   :  { %v1334_v23 = vunpack.c.h.s8.bf16 %v596_v10  ;;  %v1336_v24 = vunpack.c.h.s8.bf16 %v598_v11 }
 0x283   :  { %1943 = vmatpush1.bf16.msra.mxu0 %v1135_v16  ;;  %2072 = vmatpush1.bf16.msra.mxu1 %v1137_v17  ;;  %v595_v16 = vld [vmem:[#allocation7 + $0x920] sm:$0xff]  ;;  %v597_v17 = vld [vmem:[#allocation7 + $0x930] sm:$0xff] }
 0x284   :  { %1944 = vmatprep.subr.bf16.mxu0 %v1154_v18  ;;  %2073 = vmatprep.subr.bf16.mxu1 %v1156_v22  ;;  %v1315_v18 = vunpack.c.l.s8.bf16 %v595_v16  ;;  %v1317_v22 = vunpack.c.l.s8.bf16 %v597_v17 }
 0x287   :  { %1945 = vmatpush1.bf16.msra.mxu0 %v1153_v25  ;;  %2074 = vmatpush1.bf16.msra.mxu1 %v1155_v26  ;;  %v614_v25 = vld [vmem:[#allocation7 + $0x9b8] sm:$0xff]  ;;  %v616_v26 = vld [vmem:[#allocation7 + $0x9c8] sm:$0xff] }
 0x288   :  { %1946 = vmatprep.subr.bf16.mxu0 %v1172_v27  ;;  %2075 = vmatprep.subr.bf16.mxu1 %v1174_v45  ;;  %v1333_v27 = vunpack.c.h.s8.bf16 %v595_v16  ;;  %v1335_v45 = vunpack.c.h.s8.bf16 %v597_v17  ;;  %v1352_v46 = vunpack.c.l.s8.bf16 %v614_v25  ;;  %v1354_v29 = vunpack.c.l.s8.bf16 %v616_v26 }
 0x289   :  { %v1370_v37 = vunpack.c.h.s8.bf16 %v614_v25  ;;  %v1372_v38 = vunpack.c.h.s8.bf16 %v616_v26 }
 0x28b   :  { %1947 = vmatpush1.bf16.msra.mxu0 %v1171_v32  ;;  %2076 = vmatpush1.bf16.msra.mxu1 %v1173_v33  ;;  %v613_v32 = vld [vmem:[#allocation7 + $0x9b0] sm:$0xff]  ;;  %v615_v33 = vld [vmem:[#allocation7 + $0x9c0] sm:$0xff] }
 0x28c   :  { %1948 = vmatprep.subr.bf16.mxu0 %v1190_v34  ;;  %2077 = vmatprep.subr.bf16.mxu1 %v1192_v35  ;;  %v1351_v34 = vunpack.c.l.s8.bf16 %v613_v32  ;;  %v1353_v35 = vunpack.c.l.s8.bf16 %v615_v33 }
 0x28f   :  { %1949 = vmatpush1.bf16.msra.mxu0 %v1189_v39  ;;  %2078 = vmatpush1.bf16.msra.mxu1 %v1191_v40  ;;  %v632_v39 = vld [vmem:[#allocation7 + $0xa48] sm:$0xff]  ;;  %v634_v40 = vld [vmem:[#allocation7 + $0xa58] sm:$0xff] }
 0x290   :  { %1950 = vmatprep.subr.bf16.mxu0 %v1208_v41  ;;  %2079 = vmatprep.subr.bf16.mxu1 %v1210_v42  ;;  %v1369_v41 = vunpack.c.h.s8.bf16 %v613_v32  ;;  %v1371_v42 = vunpack.c.h.s8.bf16 %v615_v33  ;;  %v1388_v43 = vunpack.c.l.s8.bf16 %v632_v39  ;;  %v1390_v47 = vunpack.c.l.s8.bf16 %v634_v40 }
 0x291   :  { %v1406_v52 = vunpack.c.h.s8.bf16 %v632_v39  ;;  %v1408_v30 = vunpack.c.h.s8.bf16 %v634_v40 }
 0x293   :  { %1951 = vmatpush1.bf16.msra.mxu0 %v1207_v48  ;;  %2080 = vmatpush1.bf16.msra.mxu1 %v1209_v49  ;;  %v631_v48 = vld [vmem:[#allocation7 + $0xa40] sm:$0xff]  ;;  %v633_v49 = vld [vmem:[#allocation7 + $0xa50] sm:$0xff] }
 0x294   :  { %1952 = vmatprep.subr.bf16.mxu0 %v1226_v50  ;;  %2081 = vmatprep.subr.bf16.mxu1 %v1228_v51  ;;  %v1387_v50 = vunpack.c.l.s8.bf16 %v631_v48  ;;  %v1389_v51 = vunpack.c.l.s8.bf16 %v633_v49 }
 0x297   :  { %1953 = vmatpush1.bf16.msra.mxu0 %v1225_v31  ;;  %2082 = vmatpush1.bf16.msra.mxu1 %v1227_v54  ;;  %v650_v31 = vld [vmem:[#allocation7 + $0xad8] sm:$0xff]  ;;  %v652_v54 = vld [vmem:[#allocation7 + $0xae8] sm:$0xff] }
 0x298   :  { %1954 = vmatprep.subr.bf16.mxu0 %v1244_v55  ;;  %2083 = vmatprep.subr.bf16.mxu1 %v1246_v56  ;;  %v1405_v55 = vunpack.c.h.s8.bf16 %v631_v48  ;;  %v1407_v56 = vunpack.c.h.s8.bf16 %v633_v49  ;;  %v1424_v57 = vunpack.c.l.s8.bf16 %v650_v31  ;;  %v1426_v58 = vunpack.c.l.s8.bf16 %v652_v54 }
 0x299   :  { %v1442_v63 = vunpack.c.h.s8.bf16 %v650_v31  ;;  %v1444_v0 = vunpack.c.h.s8.bf16 %v652_v54 }
 0x29b   :  { %1955 = vmatpush1.bf16.msra.mxu0 %v1243_v59  ;;  %2084 = vmatpush1.bf16.msra.mxu1 %v1245_v60  ;;  %v649_v59 = vld [vmem:[#allocation7 + $0xad0] sm:$0xff]  ;;  %v651_v60 = vld [vmem:[#allocation7 + $0xae0] sm:$0xff] }
 0x29c   :  { %1956 = vmatprep.subr.bf16.mxu0 %v1262_v61  ;;  %2085 = vmatprep.subr.bf16.mxu1 %v1264_v62  ;;  %v1423_v61 = vunpack.c.l.s8.bf16 %v649_v59  ;;  %v1425_v62 = vunpack.c.l.s8.bf16 %v651_v60 }
 0x29f   :  { %1957 = vmatpush1.bf16.msra.mxu0 %v1261_v2  ;;  %2086 = vmatpush1.bf16.msra.mxu1 %v1263_v3  ;;  %v668_v2 = vld [vmem:[#allocation7 + $0xb68] sm:$0xff]  ;;  %v670_v3 = vld [vmem:[#allocation7 + $0xb78] sm:$0xff] }
 0x2a0   :  { %1958 = vmatprep.subr.bf16.mxu0 %v1280_v4  ;;  %2087 = vmatprep.subr.bf16.mxu1 %v1282_v5  ;;  %v1441_v4 = vunpack.c.h.s8.bf16 %v649_v59  ;;  %v1443_v5 = vunpack.c.h.s8.bf16 %v651_v60  ;;  %v1460_v6 = vunpack.c.l.s8.bf16 %v668_v2  ;;  %v1462_v7 = vunpack.c.l.s8.bf16 %v670_v3 }
 0x2a1   :  { %v1478_v10 = vunpack.c.h.s8.bf16 %v668_v2  ;;  %v1480_v11 = vunpack.c.h.s8.bf16 %v670_v3 }
 0x2a3   :  { %1959 = vmatpush1.bf16.msra.mxu0 %v1279_v8  ;;  %2088 = vmatpush1.bf16.msra.mxu1 %v1281_v9  ;;  %v667_v8 = vld [vmem:[#allocation7 + $0xb60] sm:$0xff]  ;;  %v669_v9 = vld [vmem:[#allocation7 + $0xb70] sm:$0xff] }
 0x2a4   :  { %1960 = vmatprep.subr.bf16.mxu0 %v1298_v20  ;;  %2089 = vmatprep.subr.bf16.mxu1 %v1300_v21  ;;  %v1459_v20 = vunpack.c.l.s8.bf16 %v667_v8  ;;  %v1461_v21 = vunpack.c.l.s8.bf16 %v669_v9 }
 0x2a7   :  { %1961 = vmatpush1.bf16.msra.mxu0 %v1297_v12  ;;  %2090 = vmatpush1.bf16.msra.mxu1 %v1299_v13  ;;  %v686_v12 = vld [vmem:[#allocation7 + $0xbf8] sm:$0xff]  ;;  %v688_v13 = vld [vmem:[#allocation7 + $0xc08] sm:$0xff] }
 0x2a8   :  { %1973 = vmatprep.subr.bf16.mxu0 %v1316_v14  ;;  %2102 = vmatprep.subr.bf16.mxu1 %v1318_v15  ;;  %v1477_v14 = vunpack.c.h.s8.bf16 %v667_v8  ;;  %v1479_v15 = vunpack.c.h.s8.bf16 %v669_v9  ;;  %v1496_v16 = vunpack.c.l.s8.bf16 %v686_v12  ;;  %v1498_v17 = vunpack.c.l.s8.bf16 %v688_v13 }
 0x2a9   :  { %v1514_v25 = vunpack.c.h.s8.bf16 %v686_v12  ;;  %v1516_v26 = vunpack.c.h.s8.bf16 %v688_v13 }
 0x2aa   :  { %1963 = vmatmul.mubr.bf16.vlgmr.msra.gmra.mrb[4].mxu0 %v8942_v19  ;;  %2092 = vmatmul.mubr.bf16.vlgmr.msra.gmra.mrb[4].mxu1 %v8942_v19 }
 0x2ab   :  { %1974 = vmatpush1.bf16.msra.mxu0 %v1315_v18  ;;  %2103 = vmatpush1.bf16.msra.mxu1 %v1317_v22  ;;  %v685_v18 = vld [vmem:[#allocation7 + $0xbf0] sm:$0xff]  ;;  %v687_v22 = vld [vmem:[#allocation7 + $0xc00] sm:$0xff] }
 0x2ac   :  { %1975 = vmatprep.subr.bf16.mxu0 %v1334_v23  ;;  %2104 = vmatprep.subr.bf16.mxu1 %v1336_v24  ;;  %v1495_v23 = vunpack.c.l.s8.bf16 %v685_v18  ;;  %v1497_v24 = vunpack.c.l.s8.bf16 %v687_v22 }
 0x2ad   :  { %2005 = vmatprep.mubr.bf16.mxu0 %v8950_v28  ;;  %2134 = vmatprep.mubr.bf16.mxu1 %v8950_v28 }
 0x2af   :  { %1976 = vmatpush1.bf16.msra.mxu0 %v1333_v27  ;;  %2105 = vmatpush1.bf16.msra.mxu1 %v1335_v45  ;;  %v704_v27 = vld [vmem:[#allocation7 + $0xc88] sm:$0xff]  ;;  %v706_v45 = vld [vmem:[#allocation7 + $0xc98] sm:$0xff] }
 0x2b0   :  { %1977 = vmatprep.subr.bf16.mxu0 %v1352_v46  ;;  %2106 = vmatprep.subr.bf16.mxu1 %v1354_v29  ;;  %v1513_v46 = vunpack.c.h.s8.bf16 %v685_v18  ;;  %v1515_v29 = vunpack.c.h.s8.bf16 %v687_v22  ;;  %v1532_v32 = vunpack.c.l.s8.bf16 %v704_v27  ;;  %v1534_v33 = vunpack.c.l.s8.bf16 %v706_v45 }
 0x2b1   :  { %v1550_v39 = vunpack.c.h.s8.bf16 %v704_v27  ;;  %v1552_v40 = vunpack.c.h.s8.bf16 %v706_v45 }
 0x2b3   :  { %1978 = vmatpush1.bf16.msra.mxu0 %v1351_v34  ;;  %2107 = vmatpush1.bf16.msra.mxu1 %v1353_v35  ;;  %v703_v34 = vld [vmem:[#allocation7 + $0xc80] sm:$0xff]  ;;  %v705_v35 = vld [vmem:[#allocation7 + $0xc90] sm:$0xff] }
 0x2b4   :  { %1979 = vmatprep.subr.bf16.mxu0 %v1370_v37  ;;  %2108 = vmatprep.subr.bf16.mxu1 %v1372_v38  ;;  %v1531_v37 = vunpack.c.l.s8.bf16 %v703_v34  ;;  %v1533_v38 = vunpack.c.l.s8.bf16 %v705_v35 }
 0x2b7   :  { %1980 = vmatpush1.bf16.msra.mxu0 %v1369_v41  ;;  %2109 = vmatpush1.bf16.msra.mxu1 %v1371_v42  ;;  %v722_v41 = vld [vmem:[#allocation7 + $0xd18] sm:$0xff]  ;;  %v724_v42 = vld [vmem:[#allocation7 + $0xd28] sm:$0xff] }
 0x2b8   :  { %1981 = vmatprep.subr.bf16.mxu0 %v1388_v43  ;;  %2110 = vmatprep.subr.bf16.mxu1 %v1390_v47  ;;  %v1549_v43 = vunpack.c.h.s8.bf16 %v703_v34  ;;  %v1551_v47 = vunpack.c.h.s8.bf16 %v705_v35  ;;  %v1568_v48 = vunpack.c.l.s8.bf16 %v722_v41  ;;  %v1570_v49 = vunpack.c.l.s8.bf16 %v724_v42  ;;  %v365_v35 = vld [vmem:[#allocation7 + $0x1f0] sm:$0xff] }
 0x2b9   :  { %v1586_v31 = vunpack.c.h.s8.bf16 %v722_v41  ;;  %v1588_v54 = vunpack.c.h.s8.bf16 %v724_v42 }
 0x2bb   :  { %1982 = vmatpush1.bf16.msra.mxu0 %v1387_v50  ;;  %2111 = vmatpush1.bf16.msra.mxu1 %v1389_v51  ;;  %v721_v50 = vld [vmem:[#allocation7 + $0xd10] sm:$0xff]  ;;  %v723_v51 = vld [vmem:[#allocation7 + $0xd20] sm:$0xff] }
 0x2bc   :  { %1983 = vmatprep.subr.bf16.mxu0 %v1406_v52  ;;  %2112 = vmatprep.subr.bf16.mxu1 %v1408_v30  ;;  %v1567_v52 = vunpack.c.l.s8.bf16 %v721_v50  ;;  %v1569_v30 = vunpack.c.l.s8.bf16 %v723_v51 }
 0x2bf   :  { %1984 = vmatpush1.bf16.msra.mxu0 %v1405_v55  ;;  %2113 = vmatpush1.bf16.msra.mxu1 %v1407_v56  ;;  %v312_v55 = vld [vmem:[#allocation7 + $0x48] sm:$0xff]  ;;  %v314_v56 = vld [vmem:[#allocation7 + $0x58] sm:$0xff] }
 0x2c0   :  { %1985 = vmatprep.subr.bf16.mxu0 %v1424_v57  ;;  %2114 = vmatprep.subr.bf16.mxu1 %v1426_v58  ;;  %v1585_v57 = vunpack.c.h.s8.bf16 %v721_v50  ;;  %v1587_v58 = vunpack.c.h.s8.bf16 %v723_v51  ;;  %v744_v59 = vunpack.c.l.s8.bf16 %v312_v55  ;;  %v746_v60 = vunpack.c.l.s8.bf16 %v314_v56 }
 0x2c1   :  { %v762_v2 = vunpack.c.h.s8.bf16 %v312_v55  ;;  %v764_v3 = vunpack.c.h.s8.bf16 %v314_v56  ;;  %v869_v55 = vunpack.c.h.s8.bf16 %v365_v35 }
 0x2c3   :  { %1986 = vmatpush1.bf16.msra.mxu0 %v1423_v61  ;;  %2115 = vmatpush1.bf16.msra.mxu1 %v1425_v62  ;;  %v311_v61 = vld [vmem:[#allocation7 + $0x40] sm:$0xff]  ;;  %v313_v62 = vld [vmem:[#allocation7 + $0x50] sm:$0xff] }
 0x2c4   :  { %1987 = vmatprep.subr.bf16.mxu0 %v1442_v63  ;;  %2116 = vmatprep.subr.bf16.mxu1 %v1444_v0  ;;  %v743_v63 = vunpack.c.l.s8.bf16 %v311_v61  ;;  %v745_v0 = vunpack.c.l.s8.bf16 %v313_v62 }
 0x2c7   :  { %1988 = vmatpush1.bf16.msra.mxu0 %v1441_v4  ;;  %2117 = vmatpush1.bf16.msra.mxu1 %v1443_v5  ;;  %v330_v4 = vld [vmem:[#allocation7 + $0xd8] sm:$0xff]  ;;  %v332_v5 = vld [vmem:[#allocation7 + $0xe8] sm:$0xff] }
 0x2c8   :  { %1989 = vmatprep.subr.bf16.mxu0 %v1460_v6  ;;  %2118 = vmatprep.subr.bf16.mxu1 %v1462_v7  ;;  %v761_v6 = vunpack.c.h.s8.bf16 %v311_v61  ;;  %v763_v7 = vunpack.c.h.s8.bf16 %v313_v62  ;;  %v780_v8 = vunpack.c.l.s8.bf16 %v330_v4  ;;  %v782_v9 = vunpack.c.l.s8.bf16 %v332_v5 }
 0x2c9   :  { %v798_v12 = vunpack.c.h.s8.bf16 %v330_v4  ;;  %v800_v13 = vunpack.c.h.s8.bf16 %v332_v5 }
 0x2cb   :  { %1990 = vmatpush1.bf16.msra.mxu0 %v1459_v20  ;;  %2119 = vmatpush1.bf16.msra.mxu1 %v1461_v21  ;;  %v329_v20 = vld [vmem:[#allocation7 + $0xd0] sm:$0xff]  ;;  %v331_v21 = vld [vmem:[#allocation7 + $0xe0] sm:$0xff] }
 0x2cc   :  { %1991 = vmatprep.subr.bf16.mxu0 %v1478_v10  ;;  %2120 = vmatprep.subr.bf16.mxu1 %v1480_v11  ;;  %v779_v10 = vunpack.c.l.s8.bf16 %v329_v20  ;;  %v781_v11 = vunpack.c.l.s8.bf16 %v331_v21 }
 0x2cf   :  { %1992 = vmatpush1.bf16.msra.mxu0 %v1477_v14  ;;  %2121 = vmatpush1.bf16.msra.mxu1 %v1479_v15  ;;  %v348_v14 = vld [vmem:[#allocation7 + $0x168] sm:$0xff]  ;;  %v350_v15 = vld [vmem:[#allocation7 + $0x178] sm:$0xff] }
 0x2d0   :  { %1993 = vmatprep.subr.bf16.mxu0 %v1496_v16  ;;  %2122 = vmatprep.subr.bf16.mxu1 %v1498_v17  ;;  %v797_v16 = vunpack.c.h.s8.bf16 %v329_v20  ;;  %v799_v17 = vunpack.c.h.s8.bf16 %v331_v21  ;;  %v816_v18 = vunpack.c.l.s8.bf16 %v348_v14  ;;  %v818_v22 = vunpack.c.l.s8.bf16 %v350_v15 }
 0x2d1   :  { %v834_v27 = vunpack.c.h.s8.bf16 %v348_v14  ;;  %v836_v45 = vunpack.c.h.s8.bf16 %v350_v15 }
 0x2d3   :  { %1994 = vmatpush1.bf16.msra.mxu0 %v1495_v23  ;;  %2123 = vmatpush1.bf16.msra.mxu1 %v1497_v24  ;;  %v347_v23 = vld [vmem:[#allocation7 + $0x160] sm:$0xff]  ;;  %v349_v24 = vld [vmem:[#allocation7 + $0x170] sm:$0xff] }
 0x2d4   :  { %1995 = vmatprep.subr.bf16.mxu0 %v1514_v25  ;;  %2124 = vmatprep.subr.bf16.mxu1 %v1516_v26  ;;  %v815_v25 = vunpack.c.l.s8.bf16 %v347_v23  ;;  %v817_v26 = vunpack.c.l.s8.bf16 %v349_v24 }
 0x2d7   :  { %1996 = vmatpush1.bf16.msra.mxu0 %v1513_v46  ;;  %2125 = vmatpush1.bf16.msra.mxu1 %v1515_v29  ;;  %v366_v46 = vld [vmem:[#allocation7 + $0x1f8] sm:$0xff]  ;;  %v368_v29 = vld [vmem:[#allocation7 + $0x208] sm:$0xff] }
 0x2d8   :  { %1997 = vmatprep.subr.bf16.mxu0 %v1532_v32  ;;  %2126 = vmatprep.subr.bf16.mxu1 %v1534_v33  ;;  %v833_v32 = vunpack.c.h.s8.bf16 %v347_v23  ;;  %v835_v33 = vunpack.c.h.s8.bf16 %v349_v24  ;;  %v852_v34 = vunpack.c.l.s8.bf16 %v366_v46 }
 0x2db   :  { %1998 = vmatpush1.bf16.msra.mxu0 %v1531_v37  ;;  %2127 = vmatpush1.bf16.msra.mxu1 %v1533_v38  ;;  %v367_v37 = vld [vmem:[#allocation7 + $0x200] sm:$0xff] }
 0x2dc   :  { %1999 = vmatprep.subr.bf16.mxu0 %v1550_v39  ;;  %2128 = vmatprep.subr.bf16.mxu1 %v1552_v40  ;;  %v854_v40 = vunpack.c.l.s8.bf16 %v368_v29  ;;  %v871_v56 = vunpack.c.h.s8.bf16 %v367_v37 }
 0x2df   :  { %2000 = vmatpush1.bf16.msra.mxu0 %v1549_v43  ;;  %2129 = vmatpush1.bf16.msra.mxu1 %v1551_v47 }
 0x2e0   :  { %2001 = vmatprep.subr.bf16.mxu0 %v1568_v48  ;;  %2130 = vmatprep.subr.bf16.mxu1 %v1570_v49  ;;  %v851_v48 = vunpack.c.l.s8.bf16 %v365_v35  ;;  %v853_v49 = vunpack.c.l.s8.bf16 %v367_v37  ;;  %v439_v35 = vld [vmem:[#allocation7 + $0x440] sm:$0xff] }
 0x2e3   :  { %2002 = vmatpush1.bf16.msra.mxu0 %v1567_v52  ;;  %2131 = vmatpush1.bf16.msra.mxu1 %v1569_v30  ;;  %v870_v52 = vunpack.c.h.s8.bf16 %v366_v46  ;;  %v872_v30 = vunpack.c.h.s8.bf16 %v368_v29 }
 0x2e4   :  { %2003 = vmatprep.subr.bf16.mxu0 %v1586_v31  ;;  %2132 = vmatprep.subr.bf16.mxu1 %v1588_v54  ;;  %v384_v31 = vld [vmem:[#allocation7 + $0x288] sm:$0xff]  ;;  %v386_v54 = vld [vmem:[#allocation7 + $0x298] sm:$0xff] }
 0x2e7   :  { %2004 = vmatpush1.bf16.msra.mxu0 %v1585_v57  ;;  %2133 = vmatpush1.bf16.msra.mxu1 %v1587_v58  ;;  %v888_v57 = vunpack.c.l.s8.bf16 %v384_v31  ;;  %v890_v58 = vunpack.c.l.s8.bf16 %v386_v54 }
 0x2e8   :  { %2145 = vmatprep.subr.bf16.mxu0 %v744_v59  ;;  %2274 = vmatprep.subr.bf16.mxu1 %v746_v60  ;;  %v383_v59 = vld [vmem:[#allocation7 + $0x280] sm:$0xff]  ;;  %v385_v60 = vld [vmem:[#allocation7 + $0x290] sm:$0xff] }
 0x2e9   :  { %v887_v61 = vunpack.c.l.s8.bf16 %v383_v59  ;;  %v889_v62 = vunpack.c.l.s8.bf16 %v385_v60  ;;  %v905_v4 = vunpack.c.h.s8.bf16 %v383_v59  ;;  %v907_v5 = vunpack.c.h.s8.bf16 %v385_v60 }
 0x2ea   :  { %2006 = vmatmul.mubr.bf16.vlgmr.msra.gmra.mrb[4].mxu0 %v8958_v1  ;;  %2135 = vmatmul.mubr.bf16.vlgmr.msra.gmra.mrb[4].mxu1 %v8958_v1 }
 0x2eb   :  { %2146 = vmatpush1.bf16.msra.mxu0 %v743_v63  ;;  %2275 = vmatpush1.bf16.msra.mxu1 %v745_v0  ;;  %v906_v63 = vunpack.c.h.s8.bf16 %v384_v31  ;;  %v908_v0 = vunpack.c.h.s8.bf16 %v386_v54  ;;  %v1015_v54 = vunpack.c.h.s8.bf16 %v439_v35 }
 0x2ec   :  { %2147 = vmatprep.subr.bf16.mxu0 %v762_v2  ;;  %2276 = vmatprep.subr.bf16.mxu1 %v764_v3  ;;  %v402_v2 = vld [vmem:[#allocation7 + $0x318] sm:$0xff]  ;;  %v404_v3 = vld [vmem:[#allocation7 + $0x328] sm:$0xff] }
 0x2ed   :  { %2177 = vmatprep.mubr.bf16.mxu0 %v8920_v36  ;;  %2306 = vmatprep.mubr.bf16.mxu1 %v8920_v36 }
 0x2ef   :  { %2148 = vmatpush1.bf16.msra.mxu0 %v761_v6  ;;  %2277 = vmatpush1.bf16.msra.mxu1 %v763_v7  ;;  %v924_v6 = vunpack.c.l.s8.bf16 %v402_v2  ;;  %v926_v7 = vunpack.c.l.s8.bf16 %v404_v3 }
 0x2f0   :  { %2149 = vmatprep.subr.bf16.mxu0 %v780_v8  ;;  %2278 = vmatprep.subr.bf16.mxu1 %v782_v9  ;;  %v401_v8 = vld [vmem:[#allocation7 + $0x310] sm:$0xff]  ;;  %v403_v9 = vld [vmem:[#allocation7 + $0x320] sm:$0xff] }
 0x2f1   :  { %v923_v20 = vunpack.c.l.s8.bf16 %v401_v8  ;;  %v925_v21 = vunpack.c.l.s8.bf16 %v403_v9  ;;  %v941_v14 = vunpack.c.h.s8.bf16 %v401_v8  ;;  %v943_v15 = vunpack.c.h.s8.bf16 %v403_v9 }
 0x2f3   :  { %2150 = vmatpush1.bf16.msra.mxu0 %v779_v10  ;;  %2279 = vmatpush1.bf16.msra.mxu1 %v781_v11  ;;  %v942_v10 = vunpack.c.h.s8.bf16 %v402_v2  ;;  %v944_v11 = vunpack.c.h.s8.bf16 %v404_v3 }
 0x2f4   :  { %2151 = vmatprep.subr.bf16.mxu0 %v798_v12  ;;  %2280 = vmatprep.subr.bf16.mxu1 %v800_v13  ;;  %v420_v12 = vld [vmem:[#allocation7 + $0x3a8] sm:$0xff]  ;;  %v422_v13 = vld [vmem:[#allocation7 + $0x3b8] sm:$0xff] }
 0x2f7   :  { %2152 = vmatpush1.bf16.msra.mxu0 %v797_v16  ;;  %2281 = vmatpush1.bf16.msra.mxu1 %v799_v17  ;;  %v960_v16 = vunpack.c.l.s8.bf16 %v420_v12  ;;  %v962_v17 = vunpack.c.l.s8.bf16 %v422_v13 }
 0x2f8   :  { %2153 = vmatprep.subr.bf16.mxu0 %v816_v18  ;;  %2282 = vmatprep.subr.bf16.mxu1 %v818_v22  ;;  %v419_v18 = vld [vmem:[#allocation7 + $0x3a0] sm:$0xff]  ;;  %v421_v22 = vld [vmem:[#allocation7 + $0x3b0] sm:$0xff] }
 0x2f9   :  { %v959_v23 = vunpack.c.l.s8.bf16 %v419_v18  ;;  %v961_v24 = vunpack.c.l.s8.bf16 %v421_v22  ;;  %v977_v46 = vunpack.c.h.s8.bf16 %v419_v18  ;;  %v979_v29 = vunpack.c.h.s8.bf16 %v421_v22 }
 0x2fb   :  { %2154 = vmatpush1.bf16.msra.mxu0 %v815_v25  ;;  %2283 = vmatpush1.bf16.msra.mxu1 %v817_v26  ;;  %v978_v25 = vunpack.c.h.s8.bf16 %v420_v12  ;;  %v980_v26 = vunpack.c.h.s8.bf16 %v422_v13 }
 0x2fc   :  { %2155 = vmatprep.subr.bf16.mxu0 %v834_v27  ;;  %2284 = vmatprep.subr.bf16.mxu1 %v836_v45  ;;  %v438_v27 = vld [vmem:[#allocation7 + $0x438] sm:$0xff]  ;;  %v440_v45 = vld [vmem:[#allocation7 + $0x448] sm:$0xff] }
 0x2fd   :  { %v8976_v38 = vpop.f32.mrb[0].mxu0  ;;  %v8978_v39 = vpop.f32.mrb[0].mxu1 }
 0x2fe   :  { %v8980_v41 = vpop.f32.mrb[1].mxu0  ;;  %v8982_v42 = vpop.f32.mrb[1].mxu1 }
 0x2ff   :  { %v8984_v43 = vpop.f32.mrb[2].mxu0  ;;  %v8986_v47 = vpop.f32.mrb[2].mxu1  ;;  %2156 = vmatpush1.bf16.msra.mxu0 %v833_v32  ;;  %2285 = vmatpush1.bf16.msra.mxu1 %v835_v33  ;;  %v996_v32 = vunpack.c.l.s8.bf16 %v438_v27  ;;  %v998_v33 = vunpack.c.l.s8.bf16 %v440_v45 }
 0x300   :  { %v8988_v50 = vpop.f32.mrb[3].mxu0  ;;  %v8990_v51 = vpop.f32.mrb[3].mxu1  ;;  %2157 = vmatprep.subr.bf16.mxu0 %v852_v34  ;;  %2286 = vmatprep.subr.bf16.mxu1 %v854_v40  ;;  %v437_v34 = vld [vmem:[#allocation7 + $0x430] sm:$0xff]  ;;  %v997_v40 = vunpack.c.l.s8.bf16 %v439_v35 }
 0x301   :  { %v995_v37 = vunpack.c.l.s8.bf16 %v437_v34  ;;  %v1013_v31 = vunpack.c.h.s8.bf16 %v437_v34 }
 0x303   :  { %2158 = vmatpush1.bf16.msra.mxu0 %v851_v48  ;;  %2287 = vmatpush1.bf16.msra.mxu1 %v853_v49  ;;  %v1014_v48 = vunpack.c.h.s8.bf16 %v438_v27  ;;  %v1016_v49 = vunpack.c.h.s8.bf16 %v440_v45 }
 0x304   :  { %2159 = vmatprep.subr.bf16.mxu0 %v870_v52  ;;  %2288 = vmatprep.subr.bf16.mxu1 %v872_v30  ;;  %v456_v52 = vld [vmem:[#allocation7 + $0x4c8] sm:$0xff]  ;;  %v458_v30 = vld [vmem:[#allocation7 + $0x4d8] sm:$0xff] }
 0x307   :  { %2160 = vmatpush1.bf16.msra.mxu0 %v869_v55  ;;  %2289 = vmatpush1.bf16.msra.mxu1 %v871_v56  ;;  %v1032_v55 = vunpack.c.l.s8.bf16 %v456_v52  ;;  %v1034_v56 = vunpack.c.l.s8.bf16 %v458_v30 }
 0x308   :  { %2161 = vmatprep.subr.bf16.mxu0 %v888_v57  ;;  %2290 = vmatprep.subr.bf16.mxu1 %v890_v58  ;;  %v455_v57 = vld [vmem:[#allocation7 + $0x4c0] sm:$0xff]  ;;  %v457_v58 = vld [vmem:[#allocation7 + $0x4d0] sm:$0xff] }
 0x309   :  { %v1031_v59 = vunpack.c.l.s8.bf16 %v455_v57  ;;  %v1033_v60 = vunpack.c.l.s8.bf16 %v457_v58  ;;  %v1049_v2 = vunpack.c.h.s8.bf16 %v455_v57  ;;  %v1051_v3 = vunpack.c.h.s8.bf16 %v457_v58 }
 0x30b   :  { %2162 = vmatpush1.bf16.msra.mxu0 %v887_v61  ;;  %2291 = vmatpush1.bf16.msra.mxu1 %v889_v62  ;;  %v1050_v61 = vunpack.c.h.s8.bf16 %v456_v52  ;;  %v1052_v62 = vunpack.c.h.s8.bf16 %v458_v30 }
 0x30c   :  { %2163 = vmatprep.subr.bf16.mxu0 %v906_v63  ;;  %2292 = vmatprep.subr.bf16.mxu1 %v908_v0  ;;  %v474_v63 = vld [vmem:[#allocation7 + $0x558] sm:$0xff]  ;;  %v476_v0 = vld [vmem:[#allocation7 + $0x568] sm:$0xff] }
 0x30f   :  { %2164 = vmatpush1.bf16.msra.mxu0 %v905_v4  ;;  %2293 = vmatpush1.bf16.msra.mxu1 %v907_v5  ;;  %v1068_v4 = vunpack.c.l.s8.bf16 %v474_v63  ;;  %v1070_v5 = vunpack.c.l.s8.bf16 %v476_v0 }
 0x310   :  { %2165 = vmatprep.subr.bf16.mxu0 %v924_v6  ;;  %2294 = vmatprep.subr.bf16.mxu1 %v926_v7  ;;  %v473_v6 = vld [vmem:[#allocation7 + $0x550] sm:$0xff]  ;;  %v475_v7 = vld [vmem:[#allocation7 + $0x560] sm:$0xff] }
 0x311   :  { %v1067_v8 = vunpack.c.l.s8.bf16 %v473_v6  ;;  %v1069_v9 = vunpack.c.l.s8.bf16 %v475_v7  ;;  %v1085_v12 = vunpack.c.h.s8.bf16 %v473_v6  ;;  %v1087_v13 = vunpack.c.h.s8.bf16 %v475_v7 }
 0x313   :  { %2166 = vmatpush1.bf16.msra.mxu0 %v923_v20  ;;  %2295 = vmatpush1.bf16.msra.mxu1 %v925_v21  ;;  %v1086_v20 = vunpack.c.h.s8.bf16 %v474_v63  ;;  %v1088_v21 = vunpack.c.h.s8.bf16 %v476_v0 }
 0x314   :  { %2167 = vmatprep.subr.bf16.mxu0 %v942_v10  ;;  %2296 = vmatprep.subr.bf16.mxu1 %v944_v11  ;;  %v492_v10 = vld [vmem:[#allocation7 + $0x5e8] sm:$0xff]  ;;  %v494_v11 = vld [vmem:[#allocation7 + $0x5f8] sm:$0xff] }
 0x317   :  { %2168 = vmatpush1.bf16.msra.mxu0 %v941_v14  ;;  %2297 = vmatpush1.bf16.msra.mxu1 %v943_v15  ;;  %v1104_v14 = vunpack.c.l.s8.bf16 %v492_v10  ;;  %v1106_v15 = vunpack.c.l.s8.bf16 %v494_v11 }
 0x318   :  { %2169 = vmatprep.subr.bf16.mxu0 %v960_v16  ;;  %2298 = vmatprep.subr.bf16.mxu1 %v962_v17  ;;  %v491_v16 = vld [vmem:[#allocation7 + $0x5e0] sm:$0xff]  ;;  %v493_v17 = vld [vmem:[#allocation7 + $0x5f0] sm:$0xff] }
 0x319   :  { %v1103_v18 = vunpack.c.l.s8.bf16 %v491_v16  ;;  %v1105_v22 = vunpack.c.l.s8.bf16 %v493_v17  ;;  %v1121_v27 = vunpack.c.h.s8.bf16 %v491_v16  ;;  %v1123_v45 = vunpack.c.h.s8.bf16 %v493_v17 }
 0x31b   :  { %2170 = vmatpush1.bf16.msra.mxu0 %v959_v23  ;;  %2299 = vmatpush1.bf16.msra.mxu1 %v961_v24  ;;  %v1122_v23 = vunpack.c.h.s8.bf16 %v492_v10  ;;  %v1124_v24 = vunpack.c.h.s8.bf16 %v494_v11 }
 0x31c   :  { %2171 = vmatprep.subr.bf16.mxu0 %v978_v25  ;;  %2300 = vmatprep.subr.bf16.mxu1 %v980_v26  ;;  %v510_v25 = vld [vmem:[#allocation7 + $0x678] sm:$0xff]  ;;  %v512_v26 = vld [vmem:[#allocation7 + $0x688] sm:$0xff] }
 0x31f   :  { %2172 = vmatpush1.bf16.msra.mxu0 %v977_v46  ;;  %2301 = vmatpush1.bf16.msra.mxu1 %v979_v29  ;;  %v1140_v46 = vunpack.c.l.s8.bf16 %v510_v25  ;;  %v1142_v29 = vunpack.c.l.s8.bf16 %v512_v26 }
 0x320   :  { %2173 = vmatprep.subr.bf16.mxu0 %v996_v32  ;;  %2302 = vmatprep.subr.bf16.mxu1 %v998_v33  ;;  %v509_v32 = vld [vmem:[#allocation7 + $0x670] sm:$0xff]  ;;  %v511_v33 = vld [vmem:[#allocation7 + $0x680] sm:$0xff] }
 0x321   :  { %v1139_v34 = vunpack.c.l.s8.bf16 %v509_v32  ;;  %v1141_v35 = vunpack.c.l.s8.bf16 %v511_v33  ;;  %v1157_v52 = vunpack.c.h.s8.bf16 %v509_v32  ;;  %v1159_v30 = vunpack.c.h.s8.bf16 %v511_v33 }
 0x323   :  { %2174 = vmatpush1.bf16.msra.mxu0 %v995_v37  ;;  %2303 = vmatpush1.bf16.msra.mxu1 %v997_v40  ;;  %v1158_v37 = vunpack.c.h.s8.bf16 %v510_v25  ;;  %v1160_v40 = vunpack.c.h.s8.bf16 %v512_v26 }
 0x324   :  { %2175 = vmatprep.subr.bf16.mxu0 %v1014_v48  ;;  %2304 = vmatprep.subr.bf16.mxu1 %v1016_v49  ;;  %v528_v48 = vld [vmem:[#allocation7 + $0x708] sm:$0xff]  ;;  %v530_v49 = vld [vmem:[#allocation7 + $0x718] sm:$0xff] }
 0x327   :  { %2176 = vmatpush1.bf16.msra.mxu0 %v1013_v31  ;;  %2305 = vmatpush1.bf16.msra.mxu1 %v1015_v54  ;;  %v1176_v31 = vunpack.c.l.s8.bf16 %v528_v48  ;;  %v1178_v54 = vunpack.c.l.s8.bf16 %v530_v49 }
 0x328   :  { %2188 = vmatprep.subr.bf16.mxu0 %v1032_v55  ;;  %2317 = vmatprep.subr.bf16.mxu1 %v1034_v56  ;;  %v527_v55 = vld [vmem:[#allocation7 + $0x700] sm:$0xff]  ;;  %v529_v56 = vld [vmem:[#allocation7 + $0x710] sm:$0xff] }
 0x329   :  { %v1175_v57 = vunpack.c.l.s8.bf16 %v527_v55  ;;  %v1177_v58 = vunpack.c.l.s8.bf16 %v529_v56  ;;  %v1193_v63 = vunpack.c.h.s8.bf16 %v527_v55  ;;  %v1195_v0 = vunpack.c.h.s8.bf16 %v529_v56 }
 0x32a   :  { %2178 = vmatmul.mubr.bf16.vlgmr.msra.gmra.mrb[8].mxu0 %v8926_v44  ;;  %2307 = vmatmul.mubr.bf16.vlgmr.msra.gmra.mrb[8].mxu1 %v8926_v44 }
 0x32b   :  { %2189 = vmatpush1.bf16.msra.mxu0 %v1031_v59  ;;  %2318 = vmatpush1.bf16.msra.mxu1 %v1033_v60  ;;  %v1194_v59 = vunpack.c.h.s8.bf16 %v528_v48  ;;  %v1196_v60 = vunpack.c.h.s8.bf16 %v530_v49 }
 0x32c   :  { %2190 = vmatprep.subr.bf16.mxu0 %v1050_v61  ;;  %2319 = vmatprep.subr.bf16.mxu1 %v1052_v62  ;;  %v546_v61 = vld [vmem:[#allocation7 + $0x798] sm:$0xff]  ;;  %v548_v62 = vld [vmem:[#allocation7 + $0x7a8] sm:$0xff] }
 0x32d   :  { %2220 = vmatprep.mubr.bf16.mxu0 %v8934_v53  ;;  %2349 = vmatprep.mubr.bf16.mxu1 %v8934_v53 }
 0x32f   :  { %2191 = vmatpush1.bf16.msra.mxu0 %v1049_v2  ;;  %2320 = vmatpush1.bf16.msra.mxu1 %v1051_v3  ;;  %v1212_v2 = vunpack.c.l.s8.bf16 %v546_v61  ;;  %v1214_v3 = vunpack.c.l.s8.bf16 %v548_v62 }
 0x330   :  { %2192 = vmatprep.subr.bf16.mxu0 %v1068_v4  ;;  %2321 = vmatprep.subr.bf16.mxu1 %v1070_v5  ;;  %v545_v4 = vld [vmem:[#allocation7 + $0x790] sm:$0xff]  ;;  %v547_v5 = vld [vmem:[#allocation7 + $0x7a0] sm:$0xff] }
 0x331   :  { %v1211_v6 = vunpack.c.l.s8.bf16 %v545_v4  ;;  %v1213_v7 = vunpack.c.l.s8.bf16 %v547_v5  ;;  %v1229_v10 = vunpack.c.h.s8.bf16 %v545_v4  ;;  %v1231_v11 = vunpack.c.h.s8.bf16 %v547_v5 }
 0x333   :  { %2193 = vmatpush1.bf16.msra.mxu0 %v1067_v8  ;;  %2322 = vmatpush1.bf16.msra.mxu1 %v1069_v9  ;;  %v1230_v8 = vunpack.c.h.s8.bf16 %v546_v61  ;;  %v1232_v9 = vunpack.c.h.s8.bf16 %v548_v62 }
 0x334   :  { %2194 = vmatprep.subr.bf16.mxu0 %v1086_v20  ;;  %2323 = vmatprep.subr.bf16.mxu1 %v1088_v21  ;;  %v564_v20 = vld [vmem:[#allocation7 + $0x828] sm:$0xff]  ;;  %v566_v21 = vld [vmem:[#allocation7 + $0x838] sm:$0xff] }
 0x337   :  { %2195 = vmatpush1.bf16.msra.mxu0 %v1085_v12  ;;  %2324 = vmatpush1.bf16.msra.mxu1 %v1087_v13  ;;  %v1248_v12 = vunpack.c.l.s8.bf16 %v564_v20  ;;  %v1250_v13 = vunpack.c.l.s8.bf16 %v566_v21 }
 0x338   :  { %2196 = vmatprep.subr.bf16.mxu0 %v1104_v14  ;;  %2325 = vmatprep.subr.bf16.mxu1 %v1106_v15  ;;  %v563_v14 = vld [vmem:[#allocation7 + $0x820] sm:$0xff]  ;;  %v565_v15 = vld [vmem:[#allocation7 + $0x830] sm:$0xff] }
 0x339   :  { %v1247_v16 = vunpack.c.l.s8.bf16 %v563_v14  ;;  %v1249_v17 = vunpack.c.l.s8.bf16 %v565_v15  ;;  %v1265_v25 = vunpack.c.h.s8.bf16 %v563_v14  ;;  %v1267_v26 = vunpack.c.h.s8.bf16 %v565_v15 }
 0x33b   :  { %2197 = vmatpush1.bf16.msra.mxu0 %v1103_v18  ;;  %2326 = vmatpush1.bf16.msra.mxu1 %v1105_v22  ;;  %v1266_v18 = vunpack.c.h.s8.bf16 %v564_v20  ;;  %v1268_v22 = vunpack.c.h.s8.bf16 %v566_v21 }
 0x33c   :  { %2198 = vmatprep.subr.bf16.mxu0 %v1122_v23  ;;  %2327 = vmatprep.subr.bf16.mxu1 %v1124_v24  ;;  %v582_v23 = vld [vmem:[#allocation7 + $0x8b8] sm:$0xff]  ;;  %v584_v24 = vld [vmem:[#allocation7 + $0x8c8] sm:$0xff] }
 0x33f   :  { %2199 = vmatpush1.bf16.msra.mxu0 %v1121_v27  ;;  %2328 = vmatpush1.bf16.msra.mxu1 %v1123_v45  ;;  %v1284_v27 = vunpack.c.l.s8.bf16 %v582_v23  ;;  %v1286_v45 = vunpack.c.l.s8.bf16 %v584_v24 }
 0x340   :  { %2200 = vmatprep.subr.bf16.mxu0 %v1140_v46  ;;  %2329 = vmatprep.subr.bf16.mxu1 %v1142_v29  ;;  %v581_v46 = vld [vmem:[#allocation7 + $0x8b0] sm:$0xff]  ;;  %v583_v29 = vld [vmem:[#allocation7 + $0x8c0] sm:$0xff] }
 0x341   :  { %v1283_v32 = vunpack.c.l.s8.bf16 %v581_v46  ;;  %v1285_v33 = vunpack.c.l.s8.bf16 %v583_v29  ;;  %v1301_v48 = vunpack.c.h.s8.bf16 %v581_v46  ;;  %v1303_v49 = vunpack.c.h.s8.bf16 %v583_v29 }
 0x343   :  { %2201 = vmatpush1.bf16.msra.mxu0 %v1139_v34  ;;  %2330 = vmatpush1.bf16.msra.mxu1 %v1141_v35  ;;  %v1302_v34 = vunpack.c.h.s8.bf16 %v582_v23  ;;  %v1304_v35 = vunpack.c.h.s8.bf16 %v584_v24 }
 0x344   :  { %2202 = vmatprep.subr.bf16.mxu0 %v1158_v37  ;;  %2331 = vmatprep.subr.bf16.mxu1 %v1160_v40  ;;  %v600_v37 = vld [vmem:[#allocation7 + $0x948] sm:$0xff]  ;;  %v602_v40 = vld [vmem:[#allocation7 + $0x958] sm:$0xff] }
 0x347   :  { %2203 = vmatpush1.bf16.msra.mxu0 %v1157_v52  ;;  %2332 = vmatpush1.bf16.msra.mxu1 %v1159_v30  ;;  %v1320_v52 = vunpack.c.l.s8.bf16 %v600_v37  ;;  %v1322_v30 = vunpack.c.l.s8.bf16 %v602_v40 }
 0x348   :  { %2204 = vmatprep.subr.bf16.mxu0 %v1176_v31  ;;  %2333 = vmatprep.subr.bf16.mxu1 %v1178_v54  ;;  %v599_v31 = vld [vmem:[#allocation7 + $0x940] sm:$0xff]  ;;  %v601_v54 = vld [vmem:[#allocation7 + $0x950] sm:$0xff] }
 0x349   :  { %v1319_v55 = vunpack.c.l.s8.bf16 %v599_v31  ;;  %v1321_v56 = vunpack.c.l.s8.bf16 %v601_v54  ;;  %v1337_v61 = vunpack.c.h.s8.bf16 %v599_v31  ;;  %v1339_v62 = vunpack.c.h.s8.bf16 %v601_v54 }
 0x34b   :  { %2205 = vmatpush1.bf16.msra.mxu0 %v1175_v57  ;;  %2334 = vmatpush1.bf16.msra.mxu1 %v1177_v58  ;;  %v1338_v57 = vunpack.c.h.s8.bf16 %v600_v37  ;;  %v1340_v58 = vunpack.c.h.s8.bf16 %v602_v40 }
 0x34c   :  { %2206 = vmatprep.subr.bf16.mxu0 %v1194_v59  ;;  %2335 = vmatprep.subr.bf16.mxu1 %v1196_v60  ;;  %v618_v59 = vld [vmem:[#allocation7 + $0x9d8] sm:$0xff]  ;;  %v620_v60 = vld [vmem:[#allocation7 + $0x9e8] sm:$0xff] }
 0x34f   :  { %2207 = vmatpush1.bf16.msra.mxu0 %v1193_v63  ;;  %2336 = vmatpush1.bf16.msra.mxu1 %v1195_v0  ;;  %v1356_v63 = vunpack.c.l.s8.bf16 %v618_v59  ;;  %v1358_v0 = vunpack.c.l.s8.bf16 %v620_v60 }
 0x350   :  { %2208 = vmatprep.subr.bf16.mxu0 %v1212_v2  ;;  %2337 = vmatprep.subr.bf16.mxu1 %v1214_v3  ;;  %v617_v2 = vld [vmem:[#allocation7 + $0x9d0] sm:$0xff]  ;;  %v619_v3 = vld [vmem:[#allocation7 + $0x9e0] sm:$0xff] }
 0x351   :  { %v1355_v4 = vunpack.c.l.s8.bf16 %v617_v2  ;;  %v1357_v5 = vunpack.c.l.s8.bf16 %v619_v3  ;;  %v1373_v20 = vunpack.c.h.s8.bf16 %v617_v2  ;;  %v1375_v21 = vunpack.c.h.s8.bf16 %v619_v3 }
 0x353   :  { %2209 = vmatpush1.bf16.msra.mxu0 %v1211_v6  ;;  %2338 = vmatpush1.bf16.msra.mxu1 %v1213_v7  ;;  %v1374_v6 = vunpack.c.h.s8.bf16 %v618_v59  ;;  %v1376_v7 = vunpack.c.h.s8.bf16 %v620_v60 }
 0x354   :  { %2210 = vmatprep.subr.bf16.mxu0 %v1230_v8  ;;  %2339 = vmatprep.subr.bf16.mxu1 %v1232_v9  ;;  %v636_v8 = vld [vmem:[#allocation7 + $0xa68] sm:$0xff]  ;;  %v638_v9 = vld [vmem:[#allocation7 + $0xa78] sm:$0xff] }
 0x357   :  { %2211 = vmatpush1.bf16.msra.mxu0 %v1229_v10  ;;  %2340 = vmatpush1.bf16.msra.mxu1 %v1231_v11  ;;  %v1392_v10 = vunpack.c.l.s8.bf16 %v636_v8  ;;  %v1394_v11 = vunpack.c.l.s8.bf16 %v638_v9 }
 0x358   :  { %2212 = vmatprep.subr.bf16.mxu0 %v1248_v12  ;;  %2341 = vmatprep.subr.bf16.mxu1 %v1250_v13  ;;  %v635_v12 = vld [vmem:[#allocation7 + $0xa60] sm:$0xff]  ;;  %v637_v13 = vld [vmem:[#allocation7 + $0xa70] sm:$0xff] }
 0x359   :  { %v1391_v14 = vunpack.c.l.s8.bf16 %v635_v12  ;;  %v1393_v15 = vunpack.c.l.s8.bf16 %v637_v13  ;;  %v1409_v23 = vunpack.c.h.s8.bf16 %v635_v12  ;;  %v1411_v24 = vunpack.c.h.s8.bf16 %v637_v13 }
 0x35b   :  { %2213 = vmatpush1.bf16.msra.mxu0 %v1247_v16  ;;  %2342 = vmatpush1.bf16.msra.mxu1 %v1249_v17  ;;  %v1410_v16 = vunpack.c.h.s8.bf16 %v636_v8  ;;  %v1412_v17 = vunpack.c.h.s8.bf16 %v638_v9 }
 0x35c   :  { %2214 = vmatprep.subr.bf16.mxu0 %v1266_v18  ;;  %2343 = vmatprep.subr.bf16.mxu1 %v1268_v22  ;;  %v654_v18 = vld [vmem:[#allocation7 + $0xaf8] sm:$0xff]  ;;  %v656_v22 = vld [vmem:[#allocation7 + $0xb08] sm:$0xff] }
 0x35f   :  { %2215 = vmatpush1.bf16.msra.mxu0 %v1265_v25  ;;  %2344 = vmatpush1.bf16.msra.mxu1 %v1267_v26  ;;  %v1428_v25 = vunpack.c.l.s8.bf16 %v654_v18  ;;  %v1430_v26 = vunpack.c.l.s8.bf16 %v656_v22 }
 0x360   :  { %2216 = vmatprep.subr.bf16.mxu0 %v1284_v27  ;;  %2345 = vmatprep.subr.bf16.mxu1 %v1286_v45  ;;  %v653_v27 = vld [vmem:[#allocation7 + $0xaf0] sm:$0xff]  ;;  %v655_v45 = vld [vmem:[#allocation7 + $0xb00] sm:$0xff] }
 0x361   :  { %v1427_v46 = vunpack.c.l.s8.bf16 %v653_v27  ;;  %v1429_v29 = vunpack.c.l.s8.bf16 %v655_v45  ;;  %v1445_v37 = vunpack.c.h.s8.bf16 %v653_v27  ;;  %v1447_v40 = vunpack.c.h.s8.bf16 %v655_v45 }
 0x363   :  { %2217 = vmatpush1.bf16.msra.mxu0 %v1283_v32  ;;  %2346 = vmatpush1.bf16.msra.mxu1 %v1285_v33  ;;  %v1446_v32 = vunpack.c.h.s8.bf16 %v654_v18  ;;  %v1448_v33 = vunpack.c.h.s8.bf16 %v656_v22 }
 0x364   :  { %2218 = vmatprep.subr.bf16.mxu0 %v1302_v34  ;;  %2347 = vmatprep.subr.bf16.mxu1 %v1304_v35  ;;  %v672_v34 = vld [vmem:[#allocation7 + $0xb88] sm:$0xff]  ;;  %v674_v35 = vld [vmem:[#allocation7 + $0xb98] sm:$0xff] }
 0x367   :  { %2219 = vmatpush1.bf16.msra.mxu0 %v1301_v48  ;;  %2348 = vmatpush1.bf16.msra.mxu1 %v1303_v49  ;;  %v1464_v48 = vunpack.c.l.s8.bf16 %v672_v34  ;;  %v1466_v49 = vunpack.c.l.s8.bf16 %v674_v35 }
 0x368   :  { %2231 = vmatprep.subr.bf16.mxu0 %v1320_v52  ;;  %2360 = vmatprep.subr.bf16.mxu1 %v1322_v30  ;;  %v671_v52 = vld [vmem:[#allocation7 + $0xb80] sm:$0xff]  ;;  %v673_v30 = vld [vmem:[#allocation7 + $0xb90] sm:$0xff] }
 0x369   :  { %v1463_v31 = vunpack.c.l.s8.bf16 %v671_v52  ;;  %v1465_v54 = vunpack.c.l.s8.bf16 %v673_v30  ;;  %v1481_v59 = vunpack.c.h.s8.bf16 %v671_v52  ;;  %v1483_v60 = vunpack.c.h.s8.bf16 %v673_v30 }
 0x36a   :  { %2221 = vmatmul.mubr.bf16.vlgmr.msra.gmra.mrb[8].mxu0 %v8942_v19  ;;  %2350 = vmatmul.mubr.bf16.vlgmr.msra.gmra.mrb[8].mxu1 %v8942_v19 }
 0x36b   :  { %2232 = vmatpush1.bf16.msra.mxu0 %v1319_v55  ;;  %2361 = vmatpush1.bf16.msra.mxu1 %v1321_v56  ;;  %v1482_v55 = vunpack.c.h.s8.bf16 %v672_v34  ;;  %v1484_v56 = vunpack.c.h.s8.bf16 %v674_v35 }
 0x36c   :  { %2233 = vmatprep.subr.bf16.mxu0 %v1338_v57  ;;  %2362 = vmatprep.subr.bf16.mxu1 %v1340_v58  ;;  %v690_v57 = vld [vmem:[#allocation7 + $0xc18] sm:$0xff]  ;;  %v692_v58 = vld [vmem:[#allocation7 + $0xc28] sm:$0xff] }
 0x36d   :  { %2263 = vmatprep.mubr.bf16.mxu0 %v8950_v28  ;;  %2392 = vmatprep.mubr.bf16.mxu1 %v8950_v28 }
 0x36f   :  { %2234 = vmatpush1.bf16.msra.mxu0 %v1337_v61  ;;  %2363 = vmatpush1.bf16.msra.mxu1 %v1339_v62  ;;  %v1500_v61 = vunpack.c.l.s8.bf16 %v690_v57  ;;  %v1502_v62 = vunpack.c.l.s8.bf16 %v692_v58 }
 0x370   :  { %2235 = vmatprep.subr.bf16.mxu0 %v1356_v63  ;;  %2364 = vmatprep.subr.bf16.mxu1 %v1358_v0  ;;  %v689_v63 = vld [vmem:[#allocation7 + $0xc10] sm:$0xff]  ;;  %v691_v0 = vld [vmem:[#allocation7 + $0xc20] sm:$0xff] }
 0x371   :  { %v1499_v2 = vunpack.c.l.s8.bf16 %v689_v63  ;;  %v1501_v3 = vunpack.c.l.s8.bf16 %v691_v0  ;;  %v1517_v8 = vunpack.c.h.s8.bf16 %v689_v63  ;;  %v1519_v9 = vunpack.c.h.s8.bf16 %v691_v0 }
 0x373   :  { %2236 = vmatpush1.bf16.msra.mxu0 %v1355_v4  ;;  %2365 = vmatpush1.bf16.msra.mxu1 %v1357_v5  ;;  %v1518_v4 = vunpack.c.h.s8.bf16 %v690_v57  ;;  %v1520_v5 = vunpack.c.h.s8.bf16 %v692_v58 }
 0x374   :  { %2237 = vmatprep.subr.bf16.mxu0 %v1374_v6  ;;  %2366 = vmatprep.subr.bf16.mxu1 %v1376_v7  ;;  %v708_v6 = vld [vmem:[#allocation7 + $0xca8] sm:$0xff]  ;;  %v710_v7 = vld [vmem:[#allocation7 + $0xcb8] sm:$0xff] }
 0x377   :  { %2238 = vmatpush1.bf16.msra.mxu0 %v1373_v20  ;;  %2367 = vmatpush1.bf16.msra.mxu1 %v1375_v21  ;;  %v1536_v20 = vunpack.c.l.s8.bf16 %v708_v6  ;;  %v1538_v21 = vunpack.c.l.s8.bf16 %v710_v7 }
 0x378   :  { %2239 = vmatprep.subr.bf16.mxu0 %v1392_v10  ;;  %2368 = vmatprep.subr.bf16.mxu1 %v1394_v11  ;;  %v707_v10 = vld [vmem:[#allocation7 + $0xca0] sm:$0xff]  ;;  %v709_v11 = vld [vmem:[#allocation7 + $0xcb0] sm:$0xff] }
 0x379   :  { %v1535_v12 = vunpack.c.l.s8.bf16 %v707_v10  ;;  %v1537_v13 = vunpack.c.l.s8.bf16 %v709_v11  ;;  %v1553_v18 = vunpack.c.h.s8.bf16 %v707_v10  ;;  %v1555_v22 = vunpack.c.h.s8.bf16 %v709_v11 }
 0x37b   :  { %2240 = vmatpush1.bf16.msra.mxu0 %v1391_v14  ;;  %2369 = vmatpush1.bf16.msra.mxu1 %v1393_v15  ;;  %v1554_v14 = vunpack.c.h.s8.bf16 %v708_v6  ;;  %v1556_v15 = vunpack.c.h.s8.bf16 %v710_v7 }
 0x37c   :  { %2241 = vmatprep.subr.bf16.mxu0 %v1410_v16  ;;  %2370 = vmatprep.subr.bf16.mxu1 %v1412_v17  ;;  %v726_v16 = vld [vmem:[#allocation7 + $0xd38] sm:$0xff]  ;;  %v728_v17 = vld [vmem:[#allocation7 + $0xd48] sm:$0xff] }
 0x37f   :  { %2242 = vmatpush1.bf16.msra.mxu0 %v1409_v23  ;;  %2371 = vmatpush1.bf16.msra.mxu1 %v1411_v24  ;;  %v1572_v23 = vunpack.c.l.s8.bf16 %v726_v16  ;;  %v1574_v24 = vunpack.c.l.s8.bf16 %v728_v17 }
 0x380   :  { %2243 = vmatprep.subr.bf16.mxu0 %v1428_v25  ;;  %2372 = vmatprep.subr.bf16.mxu1 %v1430_v26  ;;  %v725_v25 = vld [vmem:[#allocation7 + $0xd30] sm:$0xff]  ;;  %v727_v26 = vld [vmem:[#allocation7 + $0xd40] sm:$0xff] }
 0x381   :  { %v1571_v27 = vunpack.c.l.s8.bf16 %v725_v25  ;;  %v1573_v45 = vunpack.c.l.s8.bf16 %v727_v26  ;;  %v1589_v34 = vunpack.c.h.s8.bf16 %v725_v25  ;;  %v1591_v35 = vunpack.c.h.s8.bf16 %v727_v26 }
 0x383   :  { %2244 = vmatpush1.bf16.msra.mxu0 %v1427_v46  ;;  %2373 = vmatpush1.bf16.msra.mxu1 %v1429_v29  ;;  %v1590_v46 = vunpack.c.h.s8.bf16 %v726_v16  ;;  %v1592_v29 = vunpack.c.h.s8.bf16 %v728_v17 }
 0x384   :  { %2245 = vmatprep.subr.bf16.mxu0 %v1446_v32  ;;  %2374 = vmatprep.subr.bf16.mxu1 %v1448_v33  ;;  %v316_v32 = vld [vmem:[#allocation7 + $0x68] sm:$0xff]  ;;  %v318_v33 = vld [vmem:[#allocation7 + $0x78] sm:$0xff] }
 0x387   :  { %2246 = vmatpush1.bf16.msra.mxu0 %v1445_v37  ;;  %2375 = vmatpush1.bf16.msra.mxu1 %v1447_v40  ;;  %v748_v37 = vunpack.c.l.s8.bf16 %v316_v32  ;;  %v750_v40 = vunpack.c.l.s8.bf16 %v318_v33 }
 0x388   :  { %2247 = vmatprep.subr.bf16.mxu0 %v1464_v48  ;;  %2376 = vmatprep.subr.bf16.mxu1 %v1466_v49  ;;  %v315_v48 = vld [vmem:[#allocation7 + $0x60] sm:$0xff]  ;;  %v317_v49 = vld [vmem:[#allocation7 + $0x70] sm:$0xff] }
 0x389   :  { %v747_v52 = vunpack.c.l.s8.bf16 %v315_v48  ;;  %v749_v30 = vunpack.c.l.s8.bf16 %v317_v49  ;;  %v765_v57 = vunpack.c.h.s8.bf16 %v315_v48  ;;  %v767_v58 = vunpack.c.h.s8.bf16 %v317_v49  ;;  %v388_v48 = vld [vmem:[#allocation7 + $0x2a8] sm:$0xff]  ;;  %v390_v49 = vld [vmem:[#allocation7 + $0x2b8] sm:$0xff] }
 0x38b   :  { %2248 = vmatpush1.bf16.msra.mxu0 %v1463_v31  ;;  %2377 = vmatpush1.bf16.msra.mxu1 %v1465_v54  ;;  %v766_v31 = vunpack.c.h.s8.bf16 %v316_v32  ;;  %v768_v54 = vunpack.c.h.s8.bf16 %v318_v33 }
 0x38c   :  { %2249 = vmatprep.subr.bf16.mxu0 %v1482_v55  ;;  %2378 = vmatprep.subr.bf16.mxu1 %v1484_v56  ;;  %v334_v55 = vld [vmem:[#allocation7 + $0xf8] sm:$0xff]  ;;  %v336_v56 = vld [vmem:[#allocation7 + $0x108] sm:$0xff] }
 0x38f   :  { %2250 = vmatpush1.bf16.msra.mxu0 %v1481_v59  ;;  %2379 = vmatpush1.bf16.msra.mxu1 %v1483_v60  ;;  %v784_v59 = vunpack.c.l.s8.bf16 %v334_v55  ;;  %v786_v60 = vunpack.c.l.s8.bf16 %v336_v56 }
 0x390   :  { %2251 = vmatprep.subr.bf16.mxu0 %v1500_v61  ;;  %2380 = vmatprep.subr.bf16.mxu1 %v1502_v62  ;;  %v333_v61 = vld [vmem:[#allocation7 + $0xf0] sm:$0xff]  ;;  %v335_v62 = vld [vmem:[#allocation7 + $0x100] sm:$0xff] }
 0x391   :  { %v783_v63 = vunpack.c.l.s8.bf16 %v333_v61  ;;  %v785_v0 = vunpack.c.l.s8.bf16 %v335_v62  ;;  %v801_v6 = vunpack.c.h.s8.bf16 %v333_v61  ;;  %v803_v7 = vunpack.c.h.s8.bf16 %v335_v62  ;;  %v406_v61 = vld [vmem:[#allocation7 + $0x338] sm:$0xff]  ;;  %v408_v62 = vld [vmem:[#allocation7 + $0x348] sm:$0xff] }
 0x393   :  { %2252 = vmatpush1.bf16.msra.mxu0 %v1499_v2  ;;  %2381 = vmatpush1.bf16.msra.mxu1 %v1501_v3  ;;  %v802_v2 = vunpack.c.h.s8.bf16 %v334_v55  ;;  %v804_v3 = vunpack.c.h.s8.bf16 %v336_v56  ;;  %v387_v55 = vld [vmem:[#allocation7 + $0x2a0] sm:$0xff]  ;;  %v389_v56 = vld [vmem:[#allocation7 + $0x2b0] sm:$0xff] }
 0x394   :  { %2253 = vmatprep.subr.bf16.mxu0 %v1518_v4  ;;  %2382 = vmatprep.subr.bf16.mxu1 %v1520_v5  ;;  %v352_v4 = vld [vmem:[#allocation7 + $0x188] sm:$0xff]  ;;  %v354_v5 = vld [vmem:[#allocation7 + $0x198] sm:$0xff] }
 0x397   :  { %2254 = vmatpush1.bf16.msra.mxu0 %v1517_v8  ;;  %2383 = vmatpush1.bf16.msra.mxu1 %v1519_v9  ;;  %v820_v8 = vunpack.c.l.s8.bf16 %v352_v4  ;;  %v822_v9 = vunpack.c.l.s8.bf16 %v354_v5 }
 0x398   :  { %2255 = vmatprep.subr.bf16.mxu0 %v1536_v20  ;;  %2384 = vmatprep.subr.bf16.mxu1 %v1538_v21  ;;  %v351_v20 = vld [vmem:[#allocation7 + $0x180] sm:$0xff]  ;;  %v353_v21 = vld [vmem:[#allocation7 + $0x190] sm:$0xff] }
 0x399   :  { %v819_v10 = vunpack.c.l.s8.bf16 %v351_v20  ;;  %v821_v11 = vunpack.c.l.s8.bf16 %v353_v21  ;;  %v837_v16 = vunpack.c.h.s8.bf16 %v351_v20  ;;  %v839_v17 = vunpack.c.h.s8.bf16 %v353_v21  ;;  %v424_v20 = vld [vmem:[#allocation7 + $0x3c8] sm:$0xff]  ;;  %v426_v21 = vld [vmem:[#allocation7 + $0x3d8] sm:$0xff] }
 0x39b   :  { %2256 = vmatpush1.bf16.msra.mxu0 %v1535_v12  ;;  %2385 = vmatpush1.bf16.msra.mxu1 %v1537_v13  ;;  %v838_v12 = vunpack.c.h.s8.bf16 %v352_v4  ;;  %v840_v13 = vunpack.c.h.s8.bf16 %v354_v5  ;;  %v405_v4 = vld [vmem:[#allocation7 + $0x330] sm:$0xff]  ;;  %v407_v5 = vld [vmem:[#allocation7 + $0x340] sm:$0xff] }
 0x39c   :  { %2257 = vmatprep.subr.bf16.mxu0 %v1554_v14  ;;  %2386 = vmatprep.subr.bf16.mxu1 %v1556_v15  ;;  %v370_v14 = vld [vmem:[#allocation7 + $0x218] sm:$0xff]  ;;  %v372_v15 = vld [vmem:[#allocation7 + $0x228] sm:$0xff] }
 0x39d   :  { %v858_v26 = vunpack.c.l.s8.bf16 %v372_v15 }
 0x39f   :  { %2258 = vmatpush1.bf16.msra.mxu0 %v1553_v18  ;;  %2387 = vmatpush1.bf16.msra.mxu1 %v1555_v22  ;;  %v856_v18 = vunpack.c.l.s8.bf16 %v370_v14  ;;  %v369_v22 = vld [vmem:[#allocation7 + $0x210] sm:$0xff] }
 0x3a0   :  { %2259 = vmatprep.subr.bf16.mxu0 %v1572_v23  ;;  %2388 = vmatprep.subr.bf16.mxu1 %v1574_v24  ;;  %v371_v23 = vld [vmem:[#allocation7 + $0x220] sm:$0xff]  ;;  %v855_v32 = vunpack.c.l.s8.bf16 %v369_v22 }
 0x3a1   :  { %v857_v33 = vunpack.c.l.s8.bf16 %v371_v23 }
 0x3a3   :  { %2260 = vmatpush1.bf16.msra.mxu0 %v1571_v27  ;;  %2389 = vmatpush1.bf16.msra.mxu1 %v1573_v45 }
 0x3a4   :  { %2261 = vmatprep.subr.bf16.mxu0 %v1590_v46  ;;  %2390 = vmatprep.subr.bf16.mxu1 %v1592_v29 }
 0x3a7   :  { %2262 = vmatpush1.bf16.msra.mxu0 %v1589_v34  ;;  %2391 = vmatpush1.bf16.msra.mxu1 %v1591_v35 }
 0x3a8   :  { %2403 = vmatprep.subr.bf16.mxu0 %v748_v37  ;;  %2532 = vmatprep.subr.bf16.mxu1 %v750_v40  ;;  %v874_v37 = vunpack.c.h.s8.bf16 %v370_v14  ;;  %v876_v40 = vunpack.c.h.s8.bf16 %v372_v15  ;;  %v423_v14 = vld [vmem:[#allocation7 + $0x3c0] sm:$0xff]  ;;  %v425_v15 = vld [vmem:[#allocation7 + $0x3d0] sm:$0xff] }
 0x3aa   :  { %2264 = vmatmul.mubr.bf16.vlgmr.msra.gmra.mrb[8].mxu0 %v8958_v1  ;;  %2393 = vmatmul.mubr.bf16.vlgmr.msra.gmra.mrb[8].mxu1 %v8958_v1 }
 0x3ab   :  { %2404 = vmatpush1.bf16.msra.mxu0 %v747_v52  ;;  %2533 = vmatpush1.bf16.msra.mxu1 %v749_v30  ;;  %v873_v52 = vunpack.c.h.s8.bf16 %v369_v22  ;;  %v875_v30 = vunpack.c.h.s8.bf16 %v371_v23  ;;  %v984_v22 = vunpack.c.h.s8.bf16 %v426_v21  ;;  %v442_v23 = vld [vmem:[#allocation7 + $0x458] sm:$0xff] }
 0x3ac   :  { %2405 = vmatprep.subr.bf16.mxu0 %v766_v31  ;;  %2534 = vmatprep.subr.bf16.mxu1 %v768_v54  ;;  %v892_v31 = vunpack.c.l.s8.bf16 %v388_v48  ;;  %v894_v54 = vunpack.c.l.s8.bf16 %v390_v49 }
 0x3ad   :  { %2435 = vmatprep.mubr.bf16.mxu0 %v8920_v36  ;;  %2564 = vmatprep.mubr.bf16.mxu1 %v8920_v36 }
 0x3af   :  { %2406 = vmatpush1.bf16.msra.mxu0 %v765_v57  ;;  %2535 = vmatpush1.bf16.msra.mxu1 %v767_v58  ;;  %v891_v57 = vunpack.c.l.s8.bf16 %v387_v55  ;;  %v893_v58 = vunpack.c.l.s8.bf16 %v389_v56 }
 0x3b0   :  { %2407 = vmatprep.subr.bf16.mxu0 %v784_v59  ;;  %2536 = vmatprep.subr.bf16.mxu1 %v786_v60  ;;  %v910_v59 = vunpack.c.h.s8.bf16 %v388_v48  ;;  %v912_v60 = vunpack.c.h.s8.bf16 %v390_v49  ;;  %v441_v48 = vld [vmem:[#allocation7 + $0x450] sm:$0xff]  ;;  %v443_v49 = vld [vmem:[#allocation7 + $0x460] sm:$0xff] }
 0x3b3   :  { %2408 = vmatpush1.bf16.msra.mxu0 %v783_v63  ;;  %2537 = vmatpush1.bf16.msra.mxu1 %v785_v0  ;;  %v909_v63 = vunpack.c.h.s8.bf16 %v387_v55  ;;  %v911_v0 = vunpack.c.h.s8.bf16 %v389_v56  ;;  %v460_v55 = vld [vmem:[#allocation7 + $0x4e8] sm:$0xff]  ;;  %v462_v56 = vld [vmem:[#allocation7 + $0x4f8] sm:$0xff] }
 0x3b4   :  { %2409 = vmatprep.subr.bf16.mxu0 %v802_v2  ;;  %2538 = vmatprep.subr.bf16.mxu1 %v804_v3  ;;  %v928_v2 = vunpack.c.l.s8.bf16 %v406_v61  ;;  %v930_v3 = vunpack.c.l.s8.bf16 %v408_v62 }
 0x3b7   :  { %2410 = vmatpush1.bf16.msra.mxu0 %v801_v6  ;;  %2539 = vmatpush1.bf16.msra.mxu1 %v803_v7  ;;  %v927_v6 = vunpack.c.l.s8.bf16 %v405_v4  ;;  %v929_v7 = vunpack.c.l.s8.bf16 %v407_v5 }
 0x3b8   :  { %2411 = vmatprep.subr.bf16.mxu0 %v820_v8  ;;  %2540 = vmatprep.subr.bf16.mxu1 %v822_v9  ;;  %v946_v8 = vunpack.c.h.s8.bf16 %v406_v61  ;;  %v948_v9 = vunpack.c.h.s8.bf16 %v408_v62  ;;  %v459_v61 = vld [vmem:[#allocation7 + $0x4e0] sm:$0xff]  ;;  %v461_v62 = vld [vmem:[#allocation7 + $0x4f0] sm:$0xff] }
 0x3bb   :  { %2412 = vmatpush1.bf16.msra.mxu0 %v819_v10  ;;  %2541 = vmatpush1.bf16.msra.mxu1 %v821_v11  ;;  %v945_v10 = vunpack.c.h.s8.bf16 %v405_v4  ;;  %v947_v11 = vunpack.c.h.s8.bf16 %v407_v5  ;;  %v478_v4 = vld [vmem:[#allocation7 + $0x578] sm:$0xff]  ;;  %v480_v5 = vld [vmem:[#allocation7 + $0x588] sm:$0xff] }
 0x3bc   :  { %2413 = vmatprep.subr.bf16.mxu0 %v838_v12  ;;  %2542 = vmatprep.subr.bf16.mxu1 %v840_v13  ;;  %v964_v12 = vunpack.c.l.s8.bf16 %v424_v20  ;;  %v966_v13 = vunpack.c.l.s8.bf16 %v426_v21  ;;  %v479_v21 = vld [vmem:[#allocation7 + $0x580] sm:$0xff] }
 0x3bd   :  { %v9004_v24 = vpop.f32.mrb[4].mxu0  ;;  %v9006_v25 = vpop.f32.mrb[4].mxu1 }
 0x3be   :  { %v9008_v27 = vpop.f32.mrb[5].mxu0  ;;  %v9010_v45 = vpop.f32.mrb[5].mxu1 }
 0x3bf   :  { %v9012_v46 = vpop.f32.mrb[6].mxu0  ;;  %v9014_v29 = vpop.f32.mrb[6].mxu1  ;;  %2414 = vmatpush1.bf16.msra.mxu0 %v837_v16  ;;  %2543 = vmatpush1.bf16.msra.mxu1 %v839_v17  ;;  %v963_v16 = vunpack.c.l.s8.bf16 %v423_v14  ;;  %v965_v17 = vunpack.c.l.s8.bf16 %v425_v15 }
 0x3c0   :  { %v9016_v34 = vpop.f32.mrb[7].mxu0  ;;  %v9018_v35 = vpop.f32.mrb[7].mxu1  ;;  %2415 = vmatprep.subr.bf16.mxu0 %v856_v18  ;;  %2544 = vmatprep.subr.bf16.mxu1 %v858_v26  ;;  %v982_v18 = vunpack.c.h.s8.bf16 %v424_v20  ;;  %v444_v26 = vld [vmem:[#allocation7 + $0x468] sm:$0xff]  ;;  %v477_v20 = vld [vmem:[#allocation7 + $0x570] sm:$0xff] }
 0x3c3   :  { %2416 = vmatpush1.bf16.msra.mxu0 %v855_v32  ;;  %2545 = vmatpush1.bf16.msra.mxu1 %v857_v33  ;;  %v981_v32 = vunpack.c.h.s8.bf16 %v423_v14  ;;  %v983_v33 = vunpack.c.h.s8.bf16 %v425_v15  ;;  %v496_v14 = vld [vmem:[#allocation7 + $0x608] sm:$0xff]  ;;  %v498_v15 = vld [vmem:[#allocation7 + $0x618] sm:$0xff] }
 0x3c4   :  { %2417 = vmatprep.subr.bf16.mxu0 %v874_v37  ;;  %2546 = vmatprep.subr.bf16.mxu1 %v876_v40  ;;  %v1000_v37 = vunpack.c.l.s8.bf16 %v442_v23  ;;  %v1002_v40 = vunpack.c.l.s8.bf16 %v444_v26 }
 0x3c7   :  { %2418 = vmatpush1.bf16.msra.mxu0 %v873_v52  ;;  %2547 = vmatpush1.bf16.msra.mxu1 %v875_v30  ;;  %v999_v52 = vunpack.c.l.s8.bf16 %v441_v48  ;;  %v1001_v30 = vunpack.c.l.s8.bf16 %v443_v49 }
 0x3c8   :  { %2419 = vmatprep.subr.bf16.mxu0 %v892_v31  ;;  %2548 = vmatprep.subr.bf16.mxu1 %v894_v54  ;;  %v1018_v31 = vunpack.c.h.s8.bf16 %v442_v23  ;;  %v1020_v54 = vunpack.c.h.s8.bf16 %v444_v26  ;;  %v495_v23 = vld [vmem:[#allocation7 + $0x600] sm:$0xff]  ;;  %v497_v26 = vld [vmem:[#allocation7 + $0x610] sm:$0xff] }
 0x3cb   :  { %2420 = vmatpush1.bf16.msra.mxu0 %v891_v57  ;;  %2549 = vmatpush1.bf16.msra.mxu1 %v893_v58  ;;  %v1017_v57 = vunpack.c.h.s8.bf16 %v441_v48  ;;  %v1019_v58 = vunpack.c.h.s8.bf16 %v443_v49  ;;  %v514_v48 = vld [vmem:[#allocation7 + $0x698] sm:$0xff]  ;;  %v516_v49 = vld [vmem:[#allocation7 + $0x6a8] sm:$0xff] }
 0x3cc   :  { %2421 = vmatprep.subr.bf16.mxu0 %v910_v59  ;;  %2550 = vmatprep.subr.bf16.mxu1 %v912_v60  ;;  %v1036_v59 = vunpack.c.l.s8.bf16 %v460_v55  ;;  %v1038_v60 = vunpack.c.l.s8.bf16 %v462_v56 }
 0x3cf   :  { %2422 = vmatpush1.bf16.msra.mxu0 %v909_v63  ;;  %2551 = vmatpush1.bf16.msra.mxu1 %v911_v0  ;;  %v1035_v63 = vunpack.c.l.s8.bf16 %v459_v61  ;;  %v1037_v0 = vunpack.c.l.s8.bf16 %v461_v62 }
 0x3d0   :  { %2423 = vmatprep.subr.bf16.mxu0 %v928_v2  ;;  %2552 = vmatprep.subr.bf16.mxu1 %v930_v3  ;;  %v1054_v2 = vunpack.c.h.s8.bf16 %v460_v55  ;;  %v1056_v3 = vunpack.c.h.s8.bf16 %v462_v56  ;;  %v513_v55 = vld [vmem:[#allocation7 + $0x690] sm:$0xff]  ;;  %v515_v56 = vld [vmem:[#allocation7 + $0x6a0] sm:$0xff] }
 0x3d3   :  { %2424 = vmatpush1.bf16.msra.mxu0 %v927_v6  ;;  %2553 = vmatpush1.bf16.msra.mxu1 %v929_v7  ;;  %v1053_v6 = vunpack.c.h.s8.bf16 %v459_v61  ;;  %v1055_v7 = vunpack.c.h.s8.bf16 %v461_v62  ;;  %v532_v61 = vld [vmem:[#allocation7 + $0x728] sm:$0xff]  ;;  %v534_v62 = vld [vmem:[#allocation7 + $0x738] sm:$0xff] }
 0x3d4   :  { %2425 = vmatprep.subr.bf16.mxu0 %v946_v8  ;;  %2554 = vmatprep.subr.bf16.mxu1 %v948_v9  ;;  %v1072_v8 = vunpack.c.l.s8.bf16 %v478_v4  ;;  %v1074_v9 = vunpack.c.l.s8.bf16 %v480_v5 }
 0x3d7   :  { %2426 = vmatpush1.bf16.msra.mxu0 %v945_v10  ;;  %2555 = vmatpush1.bf16.msra.mxu1 %v947_v11  ;;  %v1071_v10 = vunpack.c.l.s8.bf16 %v477_v20  ;;  %v1073_v11 = vunpack.c.l.s8.bf16 %v479_v21 }
 0x3d8   :  { %2427 = vmatprep.subr.bf16.mxu0 %v964_v12  ;;  %2556 = vmatprep.subr.bf16.mxu1 %v966_v13  ;;  %v1090_v12 = vunpack.c.h.s8.bf16 %v478_v4  ;;  %v1092_v13 = vunpack.c.h.s8.bf16 %v480_v5  ;;  %v531_v4 = vld [vmem:[#allocation7 + $0x720] sm:$0xff]  ;;  %v533_v5 = vld [vmem:[#allocation7 + $0x730] sm:$0xff] }
 0x3db   :  { %2428 = vmatpush1.bf16.msra.mxu0 %v963_v16  ;;  %2557 = vmatpush1.bf16.msra.mxu1 %v965_v17  ;;  %v1089_v16 = vunpack.c.h.s8.bf16 %v477_v20  ;;  %v1091_v17 = vunpack.c.h.s8.bf16 %v479_v21  ;;  %v550_v20 = vld [vmem:[#allocation7 + $0x7b8] sm:$0xff]  ;;  %v552_v21 = vld [vmem:[#allocation7 + $0x7c8] sm:$0xff] }
 0x3dc   :  { %2429 = vmatprep.subr.bf16.mxu0 %v982_v18  ;;  %2558 = vmatprep.subr.bf16.mxu1 %v984_v22  ;;  %v1108_v18 = vunpack.c.l.s8.bf16 %v496_v14  ;;  %v1110_v22 = vunpack.c.l.s8.bf16 %v498_v15 }
 0x3df   :  { %2430 = vmatpush1.bf16.msra.mxu0 %v981_v32  ;;  %2559 = vmatpush1.bf16.msra.mxu1 %v983_v33  ;;  %v1107_v32 = vunpack.c.l.s8.bf16 %v495_v23  ;;  %v1109_v33 = vunpack.c.l.s8.bf16 %v497_v26 }
 0x3e0   :  { %2431 = vmatprep.subr.bf16.mxu0 %v1000_v37  ;;  %2560 = vmatprep.subr.bf16.mxu1 %v1002_v40  ;;  %v1126_v37 = vunpack.c.h.s8.bf16 %v496_v14  ;;  %v1128_v40 = vunpack.c.h.s8.bf16 %v498_v15  ;;  %v549_v14 = vld [vmem:[#allocation7 + $0x7b0] sm:$0xff]  ;;  %v551_v15 = vld [vmem:[#allocation7 + $0x7c0] sm:$0xff] }
 0x3e3   :  { %2432 = vmatpush1.bf16.msra.mxu0 %v999_v52  ;;  %2561 = vmatpush1.bf16.msra.mxu1 %v1001_v30  ;;  %v1125_v52 = vunpack.c.h.s8.bf16 %v495_v23  ;;  %v1127_v30 = vunpack.c.h.s8.bf16 %v497_v26  ;;  %v568_v23 = vld [vmem:[#allocation7 + $0x848] sm:$0xff]  ;;  %v570_v26 = vld [vmem:[#allocation7 + $0x858] sm:$0xff] }
 0x3e4   :  { %2433 = vmatprep.subr.bf16.mxu0 %v1018_v31  ;;  %2562 = vmatprep.subr.bf16.mxu1 %v1020_v54  ;;  %v1144_v31 = vunpack.c.l.s8.bf16 %v514_v48  ;;  %v1146_v54 = vunpack.c.l.s8.bf16 %v516_v49 }
 0x3e7   :  { %2434 = vmatpush1.bf16.msra.mxu0 %v1017_v57  ;;  %2563 = vmatpush1.bf16.msra.mxu1 %v1019_v58  ;;  %v1143_v57 = vunpack.c.l.s8.bf16 %v513_v55  ;;  %v1145_v58 = vunpack.c.l.s8.bf16 %v515_v56 }
 0x3e8   :  { %2446 = vmatprep.subr.bf16.mxu0 %v1036_v59  ;;  %2575 = vmatprep.subr.bf16.mxu1 %v1038_v60  ;;  %v1162_v59 = vunpack.c.h.s8.bf16 %v514_v48  ;;  %v1164_v60 = vunpack.c.h.s8.bf16 %v516_v49  ;;  %v567_v48 = vld [vmem:[#allocation7 + $0x840] sm:$0xff]  ;;  %v569_v49 = vld [vmem:[#allocation7 + $0x850] sm:$0xff] }
 0x3ea   :  { %2436 = vmatmul.mubr.bf16.vlgmr.msra.gmra.mrb[12].mxu0 %v8926_v44  ;;  %2565 = vmatmul.mubr.bf16.vlgmr.msra.gmra.mrb[12].mxu1 %v8926_v44 }
 0x3eb   :  { %2447 = vmatpush1.bf16.msra.mxu0 %v1035_v63  ;;  %2576 = vmatpush1.bf16.msra.mxu1 %v1037_v0  ;;  %v1161_v63 = vunpack.c.h.s8.bf16 %v513_v55  ;;  %v1163_v0 = vunpack.c.h.s8.bf16 %v515_v56  ;;  %v586_v55 = vld [vmem:[#allocation7 + $0x8d8] sm:$0xff]  ;;  %v588_v56 = vld [vmem:[#allocation7 + $0x8e8] sm:$0xff] }
 0x3ec   :  { %2448 = vmatprep.subr.bf16.mxu0 %v1054_v2  ;;  %2577 = vmatprep.subr.bf16.mxu1 %v1056_v3  ;;  %v1180_v2 = vunpack.c.l.s8.bf16 %v532_v61  ;;  %v1182_v3 = vunpack.c.l.s8.bf16 %v534_v62 }
 0x3ed   :  { %2478 = vmatprep.mubr.bf16.mxu0 %v8934_v53  ;;  %2607 = vmatprep.mubr.bf16.mxu1 %v8934_v53 }
 0x3ef   :  { %2449 = vmatpush1.bf16.msra.mxu0 %v1053_v6  ;;  %2578 = vmatpush1.bf16.msra.mxu1 %v1055_v7  ;;  %v1179_v6 = vunpack.c.l.s8.bf16 %v531_v4  ;;  %v1181_v7 = vunpack.c.l.s8.bf16 %v533_v5 }
 0x3f0   :  { %2450 = vmatprep.subr.bf16.mxu0 %v1072_v8  ;;  %2579 = vmatprep.subr.bf16.mxu1 %v1074_v9  ;;  %v1198_v8 = vunpack.c.h.s8.bf16 %v532_v61  ;;  %v1200_v9 = vunpack.c.h.s8.bf16 %v534_v62  ;;  %v585_v61 = vld [vmem:[#allocation7 + $0x8d0] sm:$0xff]  ;;  %v587_v62 = vld [vmem:[#allocation7 + $0x8e0] sm:$0xff] }
 0x3f3   :  { %2451 = vmatpush1.bf16.msra.mxu0 %v1071_v10  ;;  %2580 = vmatpush1.bf16.msra.mxu1 %v1073_v11  ;;  %v1197_v10 = vunpack.c.h.s8.bf16 %v531_v4  ;;  %v1199_v11 = vunpack.c.h.s8.bf16 %v533_v5  ;;  %v604_v4 = vld [vmem:[#allocation7 + $0x968] sm:$0xff]  ;;  %v606_v5 = vld [vmem:[#allocation7 + $0x978] sm:$0xff] }
 0x3f4   :  { %2452 = vmatprep.subr.bf16.mxu0 %v1090_v12  ;;  %2581 = vmatprep.subr.bf16.mxu1 %v1092_v13  ;;  %v1216_v12 = vunpack.c.l.s8.bf16 %v550_v20  ;;  %v1218_v13 = vunpack.c.l.s8.bf16 %v552_v21 }
 0x3f7   :  { %2453 = vmatpush1.bf16.msra.mxu0 %v1089_v16  ;;  %2582 = vmatpush1.bf16.msra.mxu1 %v1091_v17  ;;  %v1215_v16 = vunpack.c.l.s8.bf16 %v549_v14  ;;  %v1217_v17 = vunpack.c.l.s8.bf16 %v551_v15 }
 0x3f8   :  { %2454 = vmatprep.subr.bf16.mxu0 %v1108_v18  ;;  %2583 = vmatprep.subr.bf16.mxu1 %v1110_v22  ;;  %v1234_v18 = vunpack.c.h.s8.bf16 %v550_v20  ;;  %v1236_v22 = vunpack.c.h.s8.bf16 %v552_v21  ;;  %v603_v20 = vld [vmem:[#allocation7 + $0x960] sm:$0xff]  ;;  %v605_v21 = vld [vmem:[#allocation7 + $0x970] sm:$0xff] }
 0x3fb   :  { %2455 = vmatpush1.bf16.msra.mxu0 %v1107_v32  ;;  %2584 = vmatpush1.bf16.msra.mxu1 %v1109_v33  ;;  %v1233_v32 = vunpack.c.h.s8.bf16 %v549_v14  ;;  %v1235_v33 = vunpack.c.h.s8.bf16 %v551_v15  ;;  %v622_v14 = vld [vmem:[#allocation7 + $0x9f8] sm:$0xff]  ;;  %v624_v15 = vld [vmem:[#allocation7 + $0xa08] sm:$0xff] }
 0x3fc   :  { %2456 = vmatprep.subr.bf16.mxu0 %v1126_v37  ;;  %2585 = vmatprep.subr.bf16.mxu1 %v1128_v40  ;;  %v1252_v37 = vunpack.c.l.s8.bf16 %v568_v23  ;;  %v1254_v40 = vunpack.c.l.s8.bf16 %v570_v26 }
 0x3ff   :  { %2457 = vmatpush1.bf16.msra.mxu0 %v1125_v52  ;;  %2586 = vmatpush1.bf16.msra.mxu1 %v1127_v30  ;;  %v1251_v52 = vunpack.c.l.s8.bf16 %v567_v48  ;;  %v1253_v30 = vunpack.c.l.s8.bf16 %v569_v49 }
 0x400   :  { %2458 = vmatprep.subr.bf16.mxu0 %v1144_v31  ;;  %2587 = vmatprep.subr.bf16.mxu1 %v1146_v54  ;;  %v1270_v31 = vunpack.c.h.s8.bf16 %v568_v23  ;;  %v1272_v54 = vunpack.c.h.s8.bf16 %v570_v26  ;;  %v621_v23 = vld [vmem:[#allocation7 + $0x9f0] sm:$0xff]  ;;  %v623_v26 = vld [vmem:[#allocation7 + $0xa00] sm:$0xff] }
 0x403   :  { %2459 = vmatpush1.bf16.msra.mxu0 %v1143_v57  ;;  %2588 = vmatpush1.bf16.msra.mxu1 %v1145_v58  ;;  %v1269_v57 = vunpack.c.h.s8.bf16 %v567_v48  ;;  %v1271_v58 = vunpack.c.h.s8.bf16 %v569_v49  ;;  %v640_v48 = vld [vmem:[#allocation7 + $0xa88] sm:$0xff]  ;;  %v642_v49 = vld [vmem:[#allocation7 + $0xa98] sm:$0xff] }
 0x404   :  { %2460 = vmatprep.subr.bf16.mxu0 %v1162_v59  ;;  %2589 = vmatprep.subr.bf16.mxu1 %v1164_v60  ;;  %v1288_v59 = vunpack.c.l.s8.bf16 %v586_v55  ;;  %v1290_v60 = vunpack.c.l.s8.bf16 %v588_v56 }
 0x407   :  { %2461 = vmatpush1.bf16.msra.mxu0 %v1161_v63  ;;  %2590 = vmatpush1.bf16.msra.mxu1 %v1163_v0  ;;  %v1287_v63 = vunpack.c.l.s8.bf16 %v585_v61  ;;  %v1289_v0 = vunpack.c.l.s8.bf16 %v587_v62 }
 0x408   :  { %2462 = vmatprep.subr.bf16.mxu0 %v1180_v2  ;;  %2591 = vmatprep.subr.bf16.mxu1 %v1182_v3  ;;  %v1306_v2 = vunpack.c.h.s8.bf16 %v586_v55  ;;  %v1308_v3 = vunpack.c.h.s8.bf16 %v588_v56  ;;  %v639_v55 = vld [vmem:[#allocation7 + $0xa80] sm:$0xff]  ;;  %v641_v56 = vld [vmem:[#allocation7 + $0xa90] sm:$0xff] }
 0x40b   :  { %2463 = vmatpush1.bf16.msra.mxu0 %v1179_v6  ;;  %2592 = vmatpush1.bf16.msra.mxu1 %v1181_v7  ;;  %v1305_v6 = vunpack.c.h.s8.bf16 %v585_v61  ;;  %v1307_v7 = vunpack.c.h.s8.bf16 %v587_v62  ;;  %v658_v61 = vld [vmem:[#allocation7 + $0xb18] sm:$0xff]  ;;  %v660_v62 = vld [vmem:[#allocation7 + $0xb28] sm:$0xff] }
 0x40c   :  { %2464 = vmatprep.subr.bf16.mxu0 %v1198_v8  ;;  %2593 = vmatprep.subr.bf16.mxu1 %v1200_v9  ;;  %v1324_v8 = vunpack.c.l.s8.bf16 %v604_v4  ;;  %v1326_v9 = vunpack.c.l.s8.bf16 %v606_v5 }
 0x40f   :  { %2465 = vmatpush1.bf16.msra.mxu0 %v1197_v10  ;;  %2594 = vmatpush1.bf16.msra.mxu1 %v1199_v11  ;;  %v1323_v10 = vunpack.c.l.s8.bf16 %v603_v20  ;;  %v1325_v11 = vunpack.c.l.s8.bf16 %v605_v21 }
 0x410   :  { %2466 = vmatprep.subr.bf16.mxu0 %v1216_v12  ;;  %2595 = vmatprep.subr.bf16.mxu1 %v1218_v13  ;;  %v1342_v12 = vunpack.c.h.s8.bf16 %v604_v4  ;;  %v1344_v13 = vunpack.c.h.s8.bf16 %v606_v5  ;;  %v657_v4 = vld [vmem:[#allocation7 + $0xb10] sm:$0xff]  ;;  %v659_v5 = vld [vmem:[#allocation7 + $0xb20] sm:$0xff] }
 0x413   :  { %2467 = vmatpush1.bf16.msra.mxu0 %v1215_v16  ;;  %2596 = vmatpush1.bf16.msra.mxu1 %v1217_v17  ;;  %v1341_v16 = vunpack.c.h.s8.bf16 %v603_v20  ;;  %v1343_v17 = vunpack.c.h.s8.bf16 %v605_v21  ;;  %v676_v20 = vld [vmem:[#allocation7 + $0xba8] sm:$0xff]  ;;  %v678_v21 = vld [vmem:[#allocation7 + $0xbb8] sm:$0xff] }
 0x414   :  { %2468 = vmatprep.subr.bf16.mxu0 %v1234_v18  ;;  %2597 = vmatprep.subr.bf16.mxu1 %v1236_v22  ;;  %v1360_v18 = vunpack.c.l.s8.bf16 %v622_v14  ;;  %v1362_v22 = vunpack.c.l.s8.bf16 %v624_v15 }
 0x417   :  { %2469 = vmatpush1.bf16.msra.mxu0 %v1233_v32  ;;  %2598 = vmatpush1.bf16.msra.mxu1 %v1235_v33  ;;  %v1359_v32 = vunpack.c.l.s8.bf16 %v621_v23  ;;  %v1361_v33 = vunpack.c.l.s8.bf16 %v623_v26 }
 0x418   :  { %2470 = vmatprep.subr.bf16.mxu0 %v1252_v37  ;;  %2599 = vmatprep.subr.bf16.mxu1 %v1254_v40  ;;  %v1378_v37 = vunpack.c.h.s8.bf16 %v622_v14  ;;  %v1380_v40 = vunpack.c.h.s8.bf16 %v624_v15  ;;  %v675_v14 = vld [vmem:[#allocation7 + $0xba0] sm:$0xff]  ;;  %v677_v15 = vld [vmem:[#allocation7 + $0xbb0] sm:$0xff] }
 0x41b   :  { %2471 = vmatpush1.bf16.msra.mxu0 %v1251_v52  ;;  %2600 = vmatpush1.bf16.msra.mxu1 %v1253_v30  ;;  %v1377_v52 = vunpack.c.h.s8.bf16 %v621_v23  ;;  %v1379_v30 = vunpack.c.h.s8.bf16 %v623_v26  ;;  %v694_v23 = vld [vmem:[#allocation7 + $0xc38] sm:$0xff]  ;;  %v696_v26 = vld [vmem:[#allocation7 + $0xc48] sm:$0xff] }
 0x41c   :  { %2472 = vmatprep.subr.bf16.mxu0 %v1270_v31  ;;  %2601 = vmatprep.subr.bf16.mxu1 %v1272_v54  ;;  %v1396_v31 = vunpack.c.l.s8.bf16 %v640_v48  ;;  %v1398_v54 = vunpack.c.l.s8.bf16 %v642_v49 }
 0x41f   :  { %2473 = vmatpush1.bf16.msra.mxu0 %v1269_v57  ;;  %2602 = vmatpush1.bf16.msra.mxu1 %v1271_v58  ;;  %v1395_v57 = vunpack.c.l.s8.bf16 %v639_v55  ;;  %v1397_v58 = vunpack.c.l.s8.bf16 %v641_v56 }
 0x420   :  { %2474 = vmatprep.subr.bf16.mxu0 %v1288_v59  ;;  %2603 = vmatprep.subr.bf16.mxu1 %v1290_v60  ;;  %v1414_v59 = vunpack.c.h.s8.bf16 %v640_v48  ;;  %v1416_v60 = vunpack.c.h.s8.bf16 %v642_v49  ;;  %v693_v48 = vld [vmem:[#allocation7 + $0xc30] sm:$0xff]  ;;  %v695_v49 = vld [vmem:[#allocation7 + $0xc40] sm:$0xff] }
 0x423   :  { %2475 = vmatpush1.bf16.msra.mxu0 %v1287_v63  ;;  %2604 = vmatpush1.bf16.msra.mxu1 %v1289_v0  ;;  %v1413_v63 = vunpack.c.h.s8.bf16 %v639_v55  ;;  %v1415_v0 = vunpack.c.h.s8.bf16 %v641_v56  ;;  %v712_v55 = vld [vmem:[#allocation7 + $0xcc8] sm:$0xff]  ;;  %v714_v56 = vld [vmem:[#allocation7 + $0xcd8] sm:$0xff] }
 0x424   :  { %2476 = vmatprep.subr.bf16.mxu0 %v1306_v2  ;;  %2605 = vmatprep.subr.bf16.mxu1 %v1308_v3  ;;  %v1432_v2 = vunpack.c.l.s8.bf16 %v658_v61  ;;  %v1434_v3 = vunpack.c.l.s8.bf16 %v660_v62 }
 0x427   :  { %2477 = vmatpush1.bf16.msra.mxu0 %v1305_v6  ;;  %2606 = vmatpush1.bf16.msra.mxu1 %v1307_v7  ;;  %v1431_v6 = vunpack.c.l.s8.bf16 %v657_v4  ;;  %v1433_v7 = vunpack.c.l.s8.bf16 %v659_v5 }
 0x428   :  { %2489 = vmatprep.subr.bf16.mxu0 %v1324_v8  ;;  %2618 = vmatprep.subr.bf16.mxu1 %v1326_v9  ;;  %v1450_v8 = vunpack.c.h.s8.bf16 %v658_v61  ;;  %v1452_v9 = vunpack.c.h.s8.bf16 %v660_v62  ;;  %v1542_v61 = vunpack.c.l.s8.bf16 %v714_v56  ;;  %v711_v62 = vld [vmem:[#allocation7 + $0xcc0] sm:$0xff] }
 0x42a   :  { %2479 = vmatmul.mubr.bf16.vlgmr.msra.gmra.mrb[12].mxu0 %v8942_v19  ;;  %2608 = vmatmul.mubr.bf16.vlgmr.msra.gmra.mrb[12].mxu1 %v8942_v19 }
 0x42b   :  { %2490 = vmatpush1.bf16.msra.mxu0 %v1323_v10  ;;  %2619 = vmatpush1.bf16.msra.mxu1 %v1325_v11  ;;  %v1449_v10 = vunpack.c.h.s8.bf16 %v657_v4  ;;  %v1451_v11 = vunpack.c.h.s8.bf16 %v659_v5  ;;  %v1558_v4 = vunpack.c.h.s8.bf16 %v712_v55  ;;  %v1560_v5 = vunpack.c.h.s8.bf16 %v714_v56 }
 0x42c   :  { %2491 = vmatprep.subr.bf16.mxu0 %v1342_v12  ;;  %2620 = vmatprep.subr.bf16.mxu1 %v1344_v13  ;;  %v1468_v12 = vunpack.c.l.s8.bf16 %v676_v20  ;;  %v1470_v13 = vunpack.c.l.s8.bf16 %v678_v21 }
 0x42d   :  { %2521 = vmatprep.mubr.bf16.mxu0 %v8950_v28  ;;  %2650 = vmatprep.mubr.bf16.mxu1 %v8950_v28 }
 0x42f   :  { %2492 = vmatpush1.bf16.msra.mxu0 %v1341_v16  ;;  %2621 = vmatpush1.bf16.msra.mxu1 %v1343_v17  ;;  %v1467_v16 = vunpack.c.l.s8.bf16 %v675_v14  ;;  %v1469_v17 = vunpack.c.l.s8.bf16 %v677_v15 }
 0x430   :  { %2493 = vmatprep.subr.bf16.mxu0 %v1360_v18  ;;  %2622 = vmatprep.subr.bf16.mxu1 %v1362_v22  ;;  %v1486_v18 = vunpack.c.h.s8.bf16 %v676_v20  ;;  %v1488_v22 = vunpack.c.h.s8.bf16 %v678_v21 }
 0x433   :  { %2494 = vmatpush1.bf16.msra.mxu0 %v1359_v32  ;;  %2623 = vmatpush1.bf16.msra.mxu1 %v1361_v33  ;;  %v1485_v32 = vunpack.c.h.s8.bf16 %v675_v14  ;;  %v1487_v33 = vunpack.c.h.s8.bf16 %v677_v15 }
 0x434   :  { %2495 = vmatprep.subr.bf16.mxu0 %v1378_v37  ;;  %2624 = vmatprep.subr.bf16.mxu1 %v1380_v40  ;;  %v1504_v37 = vunpack.c.l.s8.bf16 %v694_v23  ;;  %v1506_v40 = vunpack.c.l.s8.bf16 %v696_v26 }
 0x437   :  { %2496 = vmatpush1.bf16.msra.mxu0 %v1377_v52  ;;  %2625 = vmatpush1.bf16.msra.mxu1 %v1379_v30  ;;  %v1503_v52 = vunpack.c.l.s8.bf16 %v693_v48  ;;  %v1505_v30 = vunpack.c.l.s8.bf16 %v695_v49 }
 0x438   :  { %2497 = vmatprep.subr.bf16.mxu0 %v1396_v31  ;;  %2626 = vmatprep.subr.bf16.mxu1 %v1398_v54  ;;  %v1522_v31 = vunpack.c.h.s8.bf16 %v694_v23  ;;  %v1524_v54 = vunpack.c.h.s8.bf16 %v696_v26  ;;  %v320_v26 = vld [vmem:[#allocation7 + $0x88] sm:$0xff] }
 0x43b   :  { %2498 = vmatpush1.bf16.msra.mxu0 %v1395_v57  ;;  %2627 = vmatpush1.bf16.msra.mxu1 %v1397_v58  ;;  %v1521_v57 = vunpack.c.h.s8.bf16 %v693_v48  ;;  %v1523_v58 = vunpack.c.h.s8.bf16 %v695_v49  ;;  %v752_v48 = vunpack.c.l.s8.bf16 %v320_v26  ;;  %v319_v49 = vld [vmem:[#allocation7 + $0x80] sm:$0xff] }
 0x43c   :  { %2499 = vmatprep.subr.bf16.mxu0 %v1414_v59  ;;  %2628 = vmatprep.subr.bf16.mxu1 %v1416_v60  ;;  %v2796_v59 = vlaneseq  ;;  %v1540_v60 = vunpack.c.l.s8.bf16 %v712_v55 }
 0x43f   :  { %2500 = vmatpush1.bf16.msra.mxu0 %v1413_v63  ;;  %2629 = vmatpush1.bf16.msra.mxu1 %v1415_v0  ;;  %v713_v63 = vld [vmem:[#allocation7 + $0xcd0] sm:$0xff]  ;;  %v1539_v0 = vunpack.c.l.s8.bf16 %v711_v62 }
 0x440   :  { %2501 = vmatprep.subr.bf16.mxu0 %v1432_v2  ;;  %2630 = vmatprep.subr.bf16.mxu1 %v1434_v3  ;;  %v1541_v2 = vunpack.c.l.s8.bf16 %v713_v63  ;;  %v9028_v3 = vshrl.u32 %v2796_v59, 7  ;;  %v1559_v20 = vunpack.c.h.s8.bf16 %v713_v63  ;;  %v769_v59 = vunpack.c.h.s8.bf16 %v319_v49 }
 0x442   :  { %v9034_v14 = vsub.s32 1, %v9028_v3  ;;  %v9056_v55 = vsub.s32 0, %v9028_v3 }
 0x443   :  { %2502 = vmatpush1.bf16.msra.mxu0 %v1431_v6  ;;  %2631 = vmatpush1.bf16.msra.mxu1 %v1433_v7  ;;  %v730_v6 = vld [vmem:[#allocation7 + $0xd58] sm:$0xff]  ;;  %v732_v7 = vld [vmem:[#allocation7 + $0xd68] sm:$0xff] }
 0x444   :  { %2503 = vmatprep.subr.bf16.mxu0 %v1450_v8  ;;  %2632 = vmatprep.subr.bf16.mxu1 %v1452_v9  ;;  %v2826_v8 = vsub.s32 7, %v9028_v3  ;;  %v1557_v9 = vunpack.c.h.s8.bf16 %v711_v62  ;;  %v1576_v21 = vunpack.c.l.s8.bf16 %v730_v6 }
 0x447   :  { %2504 = vmatpush1.bf16.msra.mxu0 %v1449_v10  ;;  %2633 = vmatpush1.bf16.msra.mxu1 %v1451_v11  ;;  %v1578_v10 = vunpack.c.l.s8.bf16 %v732_v7  ;;  %v729_v11 = vld [vmem:[#allocation7 + $0xd50] sm:$0xff] }
 0x448   :  { %2505 = vmatprep.subr.bf16.mxu0 %v1468_v12  ;;  %2634 = vmatprep.subr.bf16.mxu1 %v1470_v13  ;;  %v731_v12 = vld [vmem:[#allocation7 + $0xd60] sm:$0xff] }
 0x449   :  { %v9031_v13 = vld [vmem:[#allocation8] sm:$0xff] }
 0x44a   :  { %v9039_v15 = vrot.slane %v9031_v13, %v2826_v8  ;;  %v9043_v23 = vrot.slane %v9031_v13, %v9034_v14  ;;  %v9068_v62 = vrot.slane %v9031_v13, %v9056_v55 }
 0x44b   :  { %2506 = vmatpush1.bf16.msra.mxu0 %v1467_v16  ;;  %2635 = vmatpush1.bf16.msra.mxu1 %v1469_v17  ;;  %v1575_v16 = vunpack.c.l.s8.bf16 %v729_v11  ;;  %v1577_v17 = vunpack.c.l.s8.bf16 %v731_v12 }
 0x44c   :  { %2507 = vmatprep.subr.bf16.mxu0 %v1486_v18  ;;  %2636 = vmatprep.subr.bf16.mxu1 %v1488_v22  ;;  %v1594_v18 = vunpack.c.h.s8.bf16 %v730_v6  ;;  %v1596_v22 = vunpack.c.h.s8.bf16 %v732_v7 }
 0x44f   :  { %2508 = vmatpush1.bf16.msra.mxu0 %v1485_v32  ;;  %2637 = vmatpush1.bf16.msra.mxu1 %v1487_v33  ;;  %v2822_v32 = vsub.s32 6, %v9028_v3  ;;  %v2893_v33 = vmul.f32 %v9039_v15, %v9010_v45  ;;  %v751_v45 = vunpack.c.l.s8.bf16 %v319_v49 }
 0x450   :  { %2509 = vmatprep.subr.bf16.mxu0 %v1504_v37  ;;  %2638 = vmatprep.subr.bf16.mxu1 %v1506_v40  ;;  %v1593_v37 = vunpack.c.h.s8.bf16 %v729_v11  ;;  %v1595_v40 = vunpack.c.h.s8.bf16 %v731_v12 }
 0x453   :  { %2510 = vmatpush1.bf16.msra.mxu0 %v1503_v52  ;;  %2639 = vmatpush1.bf16.msra.mxu1 %v1505_v30  ;;  %v2887_v52 = vmul.f32 %v9043_v23, %v8980_v41  ;;  %v9053_v30 = vrot.slane %v9031_v13, %v2822_v32 }
 0x454   :  { %2511 = vmatprep.subr.bf16.mxu0 %v1522_v31  ;;  %2640 = vmatprep.subr.bf16.mxu1 %v1524_v54  ;;  %v7692_v31 = vpack.c.bf16 %v2893_v33, %v2893_v33  ;;  %v770_v54 = vunpack.c.h.s8.bf16 %v320_v26  ;;  %v373_v26 = vld [vmem:[#allocation7 + $0x230] sm:$0xff]  ;;  %v9093_v33 = vsub.s32 2, %v9028_v3 }
 0x455   :  { %v7686_v56 = vpack.c.bf16 %v2887_v52, %v2887_v52  ;;  %v2892_v41 = vmul.f32 %v9053_v30, %v9006_v25 }
 0x457   :  { %2512 = vmatpush1.bf16.msra.mxu0 %v1521_v57  ;;  %2641 = vmatpush1.bf16.msra.mxu1 %v1523_v58  ;;  %v338_v57 = vld [vmem:[#allocation7 + $0x118] sm:$0xff]  ;;  %v9059_v58 = vsub.s32 3, %v9028_v3  ;;  %v7691_v25 = vpack.c.bf16 %v2892_v41, %v2892_v41  ;;  %v859_v41 = vunpack.c.l.s8.bf16 %v373_v26 }
 0x458   :  { %2513 = vmatprep.subr.bf16.mxu0 %v1540_v60  ;;  %2642 = vmatprep.subr.bf16.mxu1 %v1542_v61  ;;  %v788_v60 = vunpack.c.l.s8.bf16 %v338_v57  ;;  %v337_v61 = vld [vmem:[#allocation7 + $0x110] sm:$0xff] }
 0x459   :  { %v9072_v63 = vrot.slane %v9031_v13, %v9059_v58  ;;  %v805_v6 = vunpack.c.h.s8.bf16 %v337_v61 }
 0x45b   :  { %2514 = vmatpush1.bf16.msra.mxu0 %v1539_v0  ;;  %2643 = vmatpush1.bf16.msra.mxu1 %v1541_v2  ;;  %v787_v0 = vunpack.c.l.s8.bf16 %v337_v61  ;;  %v806_v2 = vunpack.c.h.s8.bf16 %v338_v57 }
 0x45c   :  { %2515 = vmatprep.subr.bf16.mxu0 %v1558_v4  ;;  %2644 = vmatprep.subr.bf16.mxu1 %v1560_v5  ;;  %v2886_v4 = vmul.f32 %v9068_v62, %v8976_v38  ;;  %v356_v5 = vld [vmem:[#allocation7 + $0x1a8] sm:$0xff]  ;;  %v374_v38 = vld [vmem:[#allocation7 + $0x238] sm:$0xff] }
 0x45d   :  { %v824_v7 = vunpack.c.l.s8.bf16 %v356_v5  ;;  %v842_v12 = vunpack.c.h.s8.bf16 %v356_v5  ;;  %v878_v61 = vunpack.c.h.s8.bf16 %v374_v38 }
 0x45f   :  { %2516 = vmatpush1.bf16.msra.mxu0 %v1557_v9  ;;  %2645 = vmatpush1.bf16.msra.mxu1 %v1559_v20  ;;  %v355_v9 = vld [vmem:[#allocation7 + $0x1a0] sm:$0xff]  ;;  %v7685_v20 = vpack.c.bf16 %v2886_v4, %v2886_v4 }
 0x460   :  { %2517 = vmatprep.subr.bf16.mxu0 %v1576_v21  ;;  %2646 = vmatprep.subr.bf16.mxu1 %v1578_v10  ;;  %v9078_v10 = vld [vmem:[#allocation8 + $0x8] sm:$0xff]  ;;  %v823_v11 = vunpack.c.l.s8.bf16 %v355_v9 }
 0x463   :  { %2518 = vmatpush1.bf16.msra.mxu0 %v1575_v16  ;;  %2647 = vmatpush1.bf16.msra.mxu1 %v1577_v17  ;;  %v9082_v16 = vrot.slane %v9078_v10, %v9056_v55  ;;  %v9090_v17 = vrot.slane %v9078_v10, %v9059_v58 }
 0x464   :  { %2519 = vmatprep.subr.bf16.mxu0 %v1594_v18  ;;  %2648 = vmatprep.subr.bf16.mxu1 %v1596_v22  ;;  %v841_v18 = vunpack.c.h.s8.bf16 %v355_v9  ;;  %v860_v22 = vunpack.c.l.s8.bf16 %v374_v38  ;;  %v2911_v38 = vmul.f32 %v9039_v15, %v9018_v35 }
 0x467   :  { %2520 = vmatpush1.bf16.msra.mxu0 %v1593_v37  ;;  %2649 = vmatpush1.bf16.msra.mxu1 %v1595_v40 }
 0x468   :  { %3051 = vmatprep.subr.bf16.mxu1 %v7692_v31  ;;  %2661 = vmatprep.subr.bf16.mxu0 %v752_v48  ;;  %v9096_v48 = vsub.s32 5, %v9028_v3 }
 0x46a   :  { %2522 = vmatmul.mubr.bf16.vlgmr.msra.gmra.mrb[12].mxu0 %v8958_v1  ;;  %2651 = vmatmul.mubr.bf16.vlgmr.msra.gmra.mrb[12].mxu1 %v8958_v1  ;;  %v9113_v4 = vrot.slane %v9031_v13, %v9096_v48 }
 0x46b   :  { %3083 = vmatprep.mubr.bf16.mxu1 %v7686_v56  ;;  %2662 = vmatpush1.bf16.msra.mxu0 %v751_v45 }
 0x46c   :  { %2663 = vmatprep.subr.bf16.mxu0 %v770_v54  ;;  %2693 = vmatprep.mubr.bf16.mxu0 %v8920_v36  ;;  %v2889_v36 = vmul.f32 %v9072_v63, %v8982_v42  ;;  %v9086_v42 = vrot.slane %v9078_v10, %v9034_v14 }
 0x46e   :  { %v7688_v21 = vpack.c.bf16 %v2889_v36, %v2889_v36  ;;  %v9117_v36 = vrot.slane %v9078_v10, %v9093_v33 }
 0x46f   :  { %2664 = vmatpush1.bf16.msra.mxu0 %v769_v59 }
 0x470   :  { %3052 = vmatpush1.bf16.xpose.msra.mxu1 %v7691_v25  ;;  %2665 = vmatprep.subr.bf16.mxu0 %v788_v60  ;;  %v9109_v25 = vrot.slane %v9031_v13, %v9093_v33 }
 0x473   :  { %2666 = vmatpush1.bf16.msra.mxu0 %v787_v0 }
 0x474   :  { %2667 = vmatprep.subr.bf16.mxu0 %v806_v2  ;;  %v392_v2 = vld [vmem:[#allocation7 + $0x2c8] sm:$0xff] }
 0x475   :  { %v896_v9 = vunpack.c.l.s8.bf16 %v392_v2 }
 0x477   :  { %3084 = vmatmul.mubr.bf16.vlgmr.msra.gmra.mrb[16].mxu1 %v7685_v20  ;;  %2668 = vmatpush1.bf16.msra.mxu0 %v805_v6  ;;  %v391_v20 = vld [vmem:[#allocation7 + $0x2c0] sm:$0xff] }
 0x478   :  { %3123 = vmatprep.mubr.bf16.mxu1 %v7688_v21  ;;  %2669 = vmatprep.subr.bf16.mxu0 %v824_v7  ;;  %v877_v7 = vunpack.c.h.s8.bf16 %v373_v26  ;;  %v2888_v21 = vmul.f32 %v9109_v25, %v8978_v39  ;;  %v9127_v26 = vsub.s32 4, %v9028_v3 }
 0x47a   :  { %v9131_v35 = vrot.slane %v9031_v13, %v9127_v26 }
 0x47b   :  { %2670 = vmatpush1.bf16.msra.mxu0 %v823_v11  ;;  %v2891_v11 = vmul.f32 %v9113_v4, %v9008_v27  ;;  %v913_v27 = vunpack.c.h.s8.bf16 %v391_v20 }
 0x47c   :  { %2671 = vmatprep.subr.bf16.mxu0 %v842_v12 }
 0x47d   :  { %v2265_v37 = vpop.f32.mrb[8].mxu0  ;;  %v2394_v40 = vpop.f32.mrb[8].mxu1 }
 0x47e   :  { %v2894_v49 = vmul.f32 %v9082_v16, %v2265_v37  ;;  %v2267_v52 = vpop.f32.mrb[9].mxu0  ;;  %v2396_v31 = vpop.f32.mrb[9].mxu1  ;;  %v2896_v12 = vmul.f32 %v9117_v36, %v2394_v40  ;;  %v914_v37 = vunpack.c.h.s8.bf16 %v392_v2  ;;  %v428_v2 = vld [vmem:[#allocation7 + $0x3e8] sm:$0xff] }
 0x47f   :  { %v2895_v45 = vmul.f32 %v9086_v42, %v2267_v52  ;;  %v2897_v54 = vmul.f32 %v9090_v17, %v2396_v31  ;;  %v9101_v56 = vpop.f32.mrb[10].mxu0  ;;  %v9103_v57 = vpop.f32.mrb[10].mxu1  ;;  %2672 = vmatpush1.bf16.msra.mxu0 %v841_v18  ;;  %v895_v18 = vunpack.c.l.s8.bf16 %v391_v20  ;;  %v7690_v52 = vpack.c.bf16 %v2891_v11, %v2891_v11 }
 0x480   :  { %v2271_v59 = vpop.f32.mrb[11].mxu0  ;;  %v9105_v60 = vpop.f32.mrb[11].mxu1  ;;  %2673 = vmatprep.subr.bf16.mxu0 %v860_v22  ;;  %v7693_v5 = vpack.c.bf16 %v2894_v49, %v2894_v49  ;;  %v7687_v22 = vpack.c.bf16 %v2888_v21, %v2888_v21  ;;  %v410_v49 = vld [vmem:[#allocation7 + $0x358] sm:$0xff]  ;;  %v7695_v39 = vpack.c.bf16 %v2896_v12, %v2896_v12  ;;  %v7704_v31 = vpack.c.bf16 %v2911_v38, %v2911_v38  ;;  %v445_v38 = vld [vmem:[#allocation7 + $0x470] sm:$0xff] }
 0x481   :  { %v7694_v0 = vpack.c.bf16 %v2895_v45, %v2895_v45  ;;  %v7696_v6 = vpack.c.bf16 %v2897_v54, %v2897_v54  ;;  %v932_v40 = vunpack.c.l.s8.bf16 %v410_v49  ;;  %v409_v45 = vld [vmem:[#allocation7 + $0x350] sm:$0xff]  ;;  %v950_v54 = vunpack.c.h.s8.bf16 %v410_v49 }
 0x482   :  { %v931_v15 = vunpack.c.l.s8.bf16 %v409_v45  ;;  %v949_v13 = vunpack.c.h.s8.bf16 %v409_v45  ;;  %v1003_v49 = vunpack.c.l.s8.bf16 %v445_v38  ;;  %v482_v45 = vld [vmem:[#allocation7 + $0x598] sm:$0xff] }
 0x483   :  { %3091 = vmatprep.subr.bf16.mxu1 %v7694_v0  ;;  %2674 = vmatpush1.bf16.msra.mxu0 %v859_v41  ;;  %v2890_v41 = vmul.f32 %v9131_v35, %v9004_v24  ;;  %v2910_v0 = vmul.f32 %v9053_v30, %v9014_v29  ;;  %v2904_v29 = vmul.f32 %v9068_v62, %v8984_v43 }
 0x484   :  { %3092 = vmatpush1.bf16.xpose.msra.mxu1 %v7693_v5  ;;  %2675 = vmatprep.subr.bf16.mxu0 %v878_v61  ;;  %v2905_v61 = vmul.f32 %v9043_v23, %v8988_v50  ;;  %v2913_v5 = vmul.f32 %v9086_v42, %v2271_v59  ;;  %v986_v50 = vunpack.c.h.s8.bf16 %v428_v2  ;;  %v2907_v23 = vmul.f32 %v9072_v63, %v8990_v51  ;;  %v446_v42 = vld [vmem:[#allocation7 + $0x478] sm:$0xff]  ;;  %v464_v63 = vld [vmem:[#allocation7 + $0x508] sm:$0xff] }
 0x485   :  { %3131 = vmatprep.subr.bf16.mxu1 %v7696_v6  ;;  %v427_v6 = vld [vmem:[#allocation7 + $0x3e0] sm:$0xff]  ;;  %v7703_v21 = vpack.c.bf16 %v2910_v0, %v2910_v0  ;;  %v2912_v30 = vmul.f32 %v9082_v16, %v9101_v56  ;;  %v2915_v59 = vmul.f32 %v9090_v17, %v9105_v60  ;;  %v1022_v51 = vunpack.c.h.s8.bf16 %v446_v42 }
 0x486   :  { %v7698_v20 = vpack.c.bf16 %v2905_v61, %v2905_v61  ;;  %v7706_v11 = vpack.c.bf16 %v2913_v5, %v2913_v5  ;;  %v967_v24 = vunpack.c.l.s8.bf16 %v427_v6  ;;  %v985_v12 = vunpack.c.h.s8.bf16 %v427_v6  ;;  %v463_v56 = vld [vmem:[#allocation7 + $0x500] sm:$0xff] }
 0x487   :  { %2676 = vmatpush1.bf16.msra.mxu0 %v877_v7  ;;  %v7689_v7 = vpack.c.bf16 %v2890_v41, %v2890_v41  ;;  %v7705_v43 = vpack.c.bf16 %v2912_v30, %v2912_v30  ;;  %v7708_v62 = vpack.c.bf16 %v2915_v59, %v2915_v59  ;;  %v1021_v16 = vunpack.c.h.s8.bf16 %v445_v38  ;;  %v499_v0 = vld [vmem:[#allocation7 + $0x620] sm:$0xff]  ;;  %v553_v59 = vld [vmem:[#allocation7 + $0x7d0] sm:$0xff] }
 0x488   :  { %2677 = vmatprep.subr.bf16.mxu0 %v896_v9  ;;  %v968_v9 = vunpack.c.l.s8.bf16 %v428_v2  ;;  %v1040_v17 = vunpack.c.l.s8.bf16 %v464_v63  ;;  %v2906_v60 = vmul.f32 %v9109_v25, %v8986_v47  ;;  %v1057_v41 = vunpack.c.h.s8.bf16 %v463_v56 }
 0x489   :  { %v1076_v47 = vunpack.c.l.s8.bf16 %v482_v45  ;;  %v1094_v25 = vunpack.c.h.s8.bf16 %v482_v45  ;;  %v1111_v5 = vunpack.c.l.s8.bf16 %v499_v0  ;;  %v1129_v6 = vunpack.c.h.s8.bf16 %v499_v0  ;;  %v662_v0 = vld [vmem:[#allocation7 + $0xb38] sm:$0xff] }
 0x48b   :  { %3124 = vmatmul.mubr.bf16.vlgmr.msra.gmra.mrb[16].mxu1 %v7687_v22  ;;  %2678 = vmatpush1.bf16.msra.mxu0 %v895_v18  ;;  %v7697_v18 = vpack.c.bf16 %v2904_v29, %v2904_v29  ;;  %v1004_v22 = vunpack.c.l.s8.bf16 %v446_v42 }
 0x48c   :  { %3132 = vmatpush1.bf16.xpose.msra.mxu1 %v7695_v39  ;;  %3163 = vmatprep.mubr.bf16.mxu1 %v7690_v52  ;;  %v2909_v52 = vmul.f32 %v9113_v4, %v9016_v34  ;;  %v2914_v39 = vmul.f32 %v9117_v36, %v9103_v57  ;;  %v481_v34 = vld [vmem:[#allocation7 + $0x590] sm:$0xff]  ;;  %v2908_v4 = vmul.f32 %v9131_v35, %v9012_v46  ;;  %v500_v36 = vld [vmem:[#allocation7 + $0x628] sm:$0xff] }
 0x48d   :  { %3195 = vmatprep.subr.bf16.mxu1 %v7704_v31  ;;  %2679 = vmatprep.subr.bf16.mxu0 %v914_v37  ;;  %v7700_v37 = vpack.c.bf16 %v2907_v23, %v2907_v23  ;;  %v1039_v31 = vunpack.c.l.s8.bf16 %v463_v56  ;;  %v1075_v57 = vunpack.c.l.s8.bf16 %v481_v34  ;;  %v1112_v61 = vunpack.c.l.s8.bf16 %v500_v36  ;;  %v554_v23 = vld [vmem:[#allocation7 + $0x7d8] sm:$0xff] }
 0x48e   :  { %v7701_v2 = vpack.c.bf16 %v2908_v4, %v2908_v4  ;;  %v1220_v42 = vunpack.c.l.s8.bf16 %v554_v23  ;;  %v1238_v38 = vunpack.c.h.s8.bf16 %v554_v23 }
 0x48f   :  { %2680 = vmatpush1.bf16.msra.mxu0 %v913_v27  ;;  %v7699_v27 = vpack.c.bf16 %v2906_v60, %v2906_v60 }
 0x490   :  { %2681 = vmatprep.subr.bf16.mxu0 %v932_v40  ;;  %v1058_v40 = vunpack.c.h.s8.bf16 %v464_v63 }
 0x493   :  { %2682 = vmatpush1.bf16.msra.mxu0 %v931_v15  ;;  %v7702_v15 = vpack.c.bf16 %v2909_v52, %v2909_v52  ;;  %v608_v52 = vld [vmem:[#allocation7 + $0x988] sm:$0xff] }
 0x494   :  { %2683 = vmatprep.subr.bf16.mxu0 %v950_v54  ;;  %v7707_v54 = vpack.c.bf16 %v2914_v39, %v2914_v39  ;;  %v1346_v45 = vunpack.c.h.s8.bf16 %v608_v52 }
 0x497   :  { %3164 = vmatmul.mubr.bf16.vlgmr.msra.gmra.mrb[16].mxu1 %v7689_v7  ;;  %2684 = vmatpush1.bf16.msra.mxu0 %v949_v13  ;;  %v1130_v13 = vunpack.c.h.s8.bf16 %v500_v36 }
 0x498   :  { %3196 = vmatpush1.bf16.xpose.msra.mxu1 %v7703_v21  ;;  %3227 = vmatprep.mubr.bf16.mxu1 %v7698_v20  ;;  %v536_v20 = vld [vmem:[#allocation7 + $0x748] sm:$0xff] }
 0x499   :  { %3235 = vmatprep.subr.bf16.mxu1 %v7706_v11  ;;  %2685 = vmatprep.subr.bf16.mxu0 %v968_v9  ;;  %v517_v9 = vld [vmem:[#allocation7 + $0x6b0] sm:$0xff]  ;;  %v1184_v11 = vunpack.c.l.s8.bf16 %v536_v20  ;;  %v1202_v29 = vunpack.c.h.s8.bf16 %v536_v20 }
 0x49a   :  { %v1147_v46 = vunpack.c.l.s8.bf16 %v517_v9  ;;  %v1165_v21 = vunpack.c.h.s8.bf16 %v517_v9 }
 0x49b   :  { %2686 = vmatpush1.bf16.msra.mxu0 %v967_v24  ;;  %v535_v24 = vld [vmem:[#allocation7 + $0x740] sm:$0xff] }
 0x49c   :  { %2687 = vmatprep.subr.bf16.mxu0 %v986_v50  ;;  %v1183_v50 = vunpack.c.l.s8.bf16 %v535_v24  ;;  %v1201_v30 = vunpack.c.h.s8.bf16 %v535_v24 }
 0x49f   :  { %3228 = vmatmul.mubr.bf16.vlgmr.msra.gmra.mrb[20].mxu1 %v7697_v18  ;;  %2688 = vmatpush1.bf16.msra.mxu0 %v985_v12  ;;  %v1219_v12 = vunpack.c.l.s8.bf16 %v553_v59  ;;  %v572_v18 = vld [vmem:[#allocation7 + $0x868] sm:$0xff] }
 0x4a0   :  { %3236 = vmatpush1.bf16.xpose.msra.mxu1 %v7705_v43  ;;  %3267 = vmatprep.mubr.bf16.mxu1 %v7700_v37  ;;  %v1256_v37 = vunpack.c.l.s8.bf16 %v572_v18  ;;  %v571_v43 = vld [vmem:[#allocation7 + $0x860] sm:$0xff] }
 0x4a1   :  { %3275 = vmatprep.subr.bf16.mxu1 %v7708_v62  ;;  %2689 = vmatprep.subr.bf16.mxu0 %v1004_v22  ;;  %v1237_v22 = vunpack.c.h.s8.bf16 %v553_v59  ;;  %v1255_v62 = vunpack.c.l.s8.bf16 %v571_v43  ;;  %v1273_v63 = vunpack.c.h.s8.bf16 %v571_v43 }
 0x4a3   :  { %2690 = vmatpush1.bf16.msra.mxu0 %v1003_v49  ;;  %v1274_v49 = vunpack.c.h.s8.bf16 %v572_v18 }
 0x4a4   :  { %2691 = vmatprep.subr.bf16.mxu0 %v1022_v51  ;;  %v590_v51 = vld [vmem:[#allocation7 + $0x8f8] sm:$0xff] }
 0x4a5   :  { %v1310_v60 = vunpack.c.h.s8.bf16 %v590_v51 }
 0x4a7   :  { %2692 = vmatpush1.bf16.msra.mxu0 %v1021_v16  ;;  %v1292_v16 = vunpack.c.l.s8.bf16 %v590_v51 }
 0x4a8   :  { %2704 = vmatprep.subr.bf16.mxu0 %v1040_v17  ;;  %v589_v17 = vld [vmem:[#allocation7 + $0x8f0] sm:$0xff] }
 0x4a9   :  { %v1291_v56 = vunpack.c.l.s8.bf16 %v589_v17  ;;  %v1309_v39 = vunpack.c.h.s8.bf16 %v589_v17  ;;  %v2851_v17 = vrot.slane %v9078_v10, %v9096_v48 }
 0x4aa   :  { %2694 = vmatmul.mubr.bf16.vlgmr.msra.gmra.mrb[16].mxu0 %v8926_v44  ;;  %v1093_v44 = vunpack.c.h.s8.bf16 %v481_v34 }
 0x4ab   :  { %3268 = vmatmul.mubr.bf16.vlgmr.msra.gmra.mrb[20].mxu1 %v7699_v27  ;;  %2705 = vmatpush1.bf16.msra.mxu0 %v1039_v31  ;;  %v1328_v31 = vunpack.c.l.s8.bf16 %v608_v52  ;;  %v607_v27 = vld [vmem:[#allocation7 + $0x980] sm:$0xff] }
 0x4ac   :  { %3276 = vmatpush1.bf16.xpose.msra.mxu1 %v7707_v54  ;;  %3307 = vmatprep.mubr.bf16.mxu1 %v7702_v15  ;;  %v626_v15 = vld [vmem:[#allocation7 + $0xa18] sm:$0xff]  ;;  %v1345_v54 = vunpack.c.h.s8.bf16 %v607_v27 }
 0x4ad   :  { %2706 = vmatprep.subr.bf16.mxu0 %v1058_v40  ;;  %2736 = vmatprep.mubr.bf16.mxu0 %v8934_v53  ;;  %v518_v53 = vld [vmem:[#allocation7 + $0x6b8] sm:$0xff]  ;;  %v1327_v40 = vunpack.c.l.s8.bf16 %v607_v27 }
 0x4ae   :  { %v1148_v7 = vunpack.c.l.s8.bf16 %v518_v53  ;;  %v1166_v35 = vunpack.c.h.s8.bf16 %v518_v53  ;;  %v1454_v53 = vunpack.c.h.s8.bf16 %v662_v0 }
 0x4af   :  { %2707 = vmatpush1.bf16.msra.mxu0 %v1057_v41  ;;  %v1364_v41 = vunpack.c.l.s8.bf16 %v626_v15 }
 0x4b0   :  { %2708 = vmatprep.subr.bf16.mxu0 %v1076_v47  ;;  %v625_v47 = vld [vmem:[#allocation7 + $0xa10] sm:$0xff] }
 0x4b1   :  { %v1363_v34 = vunpack.c.l.s8.bf16 %v625_v47  ;;  %v1381_v4 = vunpack.c.h.s8.bf16 %v625_v47 }
 0x4b3   :  { %2709 = vmatpush1.bf16.msra.mxu0 %v1075_v57  ;;  %v1382_v57 = vunpack.c.h.s8.bf16 %v626_v15 }
 0x4b4   :  { %2710 = vmatprep.subr.bf16.mxu0 %v1094_v25  ;;  %v644_v25 = vld [vmem:[#allocation7 + $0xaa8] sm:$0xff] }
 0x4b5   :  { %v1400_v36 = vunpack.c.l.s8.bf16 %v644_v25 }
 0x4b7   :  { %3308 = vmatmul.mubr.bf16.vlgmr.msra.gmra.mrb[20].mxu1 %v7701_v2  ;;  %2711 = vmatpush1.bf16.msra.mxu0 %v1093_v44  ;;  %v643_v44 = vld [vmem:[#allocation7 + $0xaa0] sm:$0xff]  ;;  %v1436_v2 = vunpack.c.l.s8.bf16 %v662_v0 }
 0x4b8   :  { %2712 = vmatprep.subr.bf16.mxu0 %v1112_v61  ;;  %v1399_v61 = vunpack.c.l.s8.bf16 %v643_v44 }
 0x4bb   :  { %2713 = vmatpush1.bf16.msra.mxu0 %v1111_v5  ;;  %v661_v5 = vld [vmem:[#allocation7 + $0xb30] sm:$0xff] }
 0x4bc   :  { %2714 = vmatprep.subr.bf16.mxu0 %v1130_v13  ;;  %v1435_v13 = vunpack.c.l.s8.bf16 %v661_v5 }
 0x4bf   :  { %2715 = vmatpush1.bf16.msra.mxu0 %v1129_v6  ;;  %v680_v6 = vld [vmem:[#allocation7 + $0xbc8] sm:$0xff] }
 0x4c0   :  { %2716 = vmatprep.subr.bf16.mxu0 %v1148_v7  ;;  %v1453_v7 = vunpack.c.h.s8.bf16 %v661_v5  ;;  %v1472_v9 = vunpack.c.l.s8.bf16 %v680_v6  ;;  %v1490_v20 = vunpack.c.h.s8.bf16 %v680_v6 }
 0x4c3   :  { %2717 = vmatpush1.bf16.msra.mxu0 %v1147_v46  ;;  %v679_v46 = vld [vmem:[#allocation7 + $0xbc0] sm:$0xff] }
 0x4c4   :  { %2718 = vmatprep.subr.bf16.mxu0 %v1166_v35  ;;  %v1471_v35 = vunpack.c.l.s8.bf16 %v679_v46 }
 0x4c7   :  { %2719 = vmatpush1.bf16.msra.mxu0 %v1165_v21  ;;  %v698_v21 = vld [vmem:[#allocation7 + $0xc58] sm:$0xff] }
 0x4c8   :  { %2720 = vmatprep.subr.bf16.mxu0 %v1184_v11  ;;  %v1489_v11 = vunpack.c.h.s8.bf16 %v679_v46  ;;  %v1508_v24 = vunpack.c.l.s8.bf16 %v698_v21  ;;  %v1526_v23 = vunpack.c.h.s8.bf16 %v698_v21 }
 0x4cb   :  { %2721 = vmatpush1.bf16.msra.mxu0 %v1183_v50  ;;  %v697_v50 = vld [vmem:[#allocation7 + $0xc50] sm:$0xff] }
 0x4cc   :  { %2722 = vmatprep.subr.bf16.mxu0 %v1202_v29  ;;  %v1507_v29 = vunpack.c.l.s8.bf16 %v697_v50 }
 0x4cf   :  { %2723 = vmatpush1.bf16.msra.mxu0 %v1201_v30  ;;  %v716_v30 = vld [vmem:[#allocation7 + $0xce8] sm:$0xff] }
 0x4d0   :  { %2724 = vmatprep.subr.bf16.mxu0 %v1220_v42  ;;  %v1525_v42 = vunpack.c.h.s8.bf16 %v697_v50  ;;  %v1544_v59 = vunpack.c.l.s8.bf16 %v716_v30  ;;  %v1562_v18 = vunpack.c.h.s8.bf16 %v716_v30 }
 0x4d3   :  { %2725 = vmatpush1.bf16.msra.mxu0 %v1219_v12  ;;  %v715_v12 = vld [vmem:[#allocation7 + $0xce0] sm:$0xff] }
 0x4d4   :  { %2726 = vmatprep.subr.bf16.mxu0 %v1238_v38  ;;  %v1543_v38 = vunpack.c.l.s8.bf16 %v715_v12 }
 0x4d7   :  { %2727 = vmatpush1.bf16.msra.mxu0 %v1237_v22  ;;  %v734_v22 = vld [vmem:[#allocation7 + $0xd78] sm:$0xff] }
 0x4d8   :  { %2728 = vmatprep.subr.bf16.mxu0 %v1256_v37  ;;  %v1561_v37 = vunpack.c.h.s8.bf16 %v715_v12  ;;  %v1580_v43 = vunpack.c.l.s8.bf16 %v734_v22  ;;  %v1598_v51 = vunpack.c.h.s8.bf16 %v734_v22 }
 0x4db   :  { %2729 = vmatpush1.bf16.msra.mxu0 %v1255_v62  ;;  %v733_v62 = vld [vmem:[#allocation7 + $0xd70] sm:$0xff] }
 0x4dc   :  { %2730 = vmatprep.subr.bf16.mxu0 %v1274_v49  ;;  %v1579_v49 = vunpack.c.l.s8.bf16 %v733_v62 }
 0x4df   :  { %2731 = vmatpush1.bf16.msra.mxu0 %v1273_v63  ;;  %v1597_v63 = vunpack.c.h.s8.bf16 %v733_v62 }
 0x4e0   :  { %2732 = vmatprep.subr.bf16.mxu0 %v1292_v16  ;;  %v2847_v16 = vrot.slane %v9078_v10, %v9127_v26 }
 0x4e3   :  { %2733 = vmatpush1.bf16.msra.mxu0 %v1291_v56  ;;  %v2859_v56 = vrot.slane %v9078_v10, %v2826_v8 }
 0x4e4   :  { %2734 = vmatprep.subr.bf16.mxu0 %v1310_v60 }
 0x4e7   :  { %2735 = vmatpush1.bf16.msra.mxu0 %v1309_v39 }
 0x4e8   :  { %2747 = vmatprep.subr.bf16.mxu0 %v1328_v31 }
 0x4ea   :  { %2737 = vmatmul.mubr.bf16.vlgmr.msra.gmra.mrb[16].mxu0 %v8942_v19  ;;  %v1418_v19 = vunpack.c.h.s8.bf16 %v644_v25 }
 0x4eb   :  { %2748 = vmatpush1.bf16.msra.mxu0 %v1327_v40  ;;  %2779 = vmatprep.mubr.bf16.mxu0 %v8950_v28  ;;  %v1417_v28 = vunpack.c.h.s8.bf16 %v643_v44  ;;  %v8570_v44 = vmov 1966171168  }
 0x4ec   :  { %2749 = vmatprep.subr.bf16.mxu0 %v1346_v45 }
 0x4ef   :  { %2750 = vmatpush1.bf16.msra.mxu0 %v1345_v54 }
 0x4f0   :  { %2751 = vmatprep.subr.bf16.mxu0 %v1364_v41 }
 0x4f3   :  { %2752 = vmatpush1.bf16.msra.mxu0 %v1363_v34 }
 0x4f4   :  { %2753 = vmatprep.subr.bf16.mxu0 %v1382_v57 }
 0x4f7   :  { %2754 = vmatpush1.bf16.msra.mxu0 %v1381_v4 }
 0x4f8   :  { %2755 = vmatprep.subr.bf16.mxu0 %v1400_v36 }
 0x4fb   :  { %2756 = vmatpush1.bf16.msra.mxu0 %v1399_v61  ;;  %v3004_v61 = vunpack.c.l.s4 %v8570_v44 }
 0x4fc   :  { %2757 = vmatprep.subr.bf16.mxu0 %v1418_v19 }
 0x4fd   :  { %v3005_v19 = vunpack.c.0.s8 %v3004_v61  ;;  %v3655_v61 = vld [vmem:[#allocation10 + $0x70] sm:$0xff] }
 0x4ff   :  { %2758 = vmatpush1.bf16.msra.mxu0 %v1417_v28  ;;  %v3008_v0 = vsub.s32 %v3005_v19, %v9028_v3  ;;  %v7587_v28 = vld.sshfl [vmem:[#allocation2] sm:$0x11 pattern:$0x75316420]  ;;  %v3811_v19 = vunpack.c.l.s8.bf16 %v3655_v61 }
 0x500   :  { %2759 = vmatprep.subr.bf16.mxu0 %v1436_v2 }
 0x501   :  { %v3009_v2 = vrot.slane %v7587_v28, %v3008_v0 }
 0x503   :  { %2760 = vmatpush1.bf16.msra.mxu0 %v1435_v13  ;;  %v3020_v5 = vrot.slane %v3009_v2, %v9056_v55  ;;  %v9198_v2 = vld [vmem:[#allocation10 + $0xa8] sm:$0xff] }
 0x504   :  { %2761 = vmatprep.subr.bf16.mxu0 %v1454_v53 }
 0x507   :  { %2762 = vmatpush1.bf16.msra.mxu0 %v1453_v7 }
 0x508   :  { %2763 = vmatprep.subr.bf16.mxu0 %v1472_v9 }
 0x50b   :  { %2764 = vmatpush1.bf16.msra.mxu0 %v1471_v35  ;;  %v3002_v35 = vcombine.high %v7587_v28, %v7587_v28  ;;  %v3817_v28 = vunpack.c.h.s8.bf16 %v3655_v61  ;;  %v3660_v61 = vld [vmem:[#allocation10 + $0x98] sm:$0xff] }
 0x50c   :  { %2765 = vmatprep.subr.bf16.mxu0 %v1490_v20 }
 0x50d   :  { %v3016_v20 = vrot.slane %v3002_v35, %v3008_v0 }
 0x50f   :  { %2766 = vmatpush1.bf16.msra.mxu0 %v1489_v11  ;;  %v3024_v21 = vrot.slane %v3016_v20, %v9056_v55 }
 0x510   :  { %2767 = vmatprep.subr.bf16.mxu0 %v1508_v24 }
 0x513   :  { %2768 = vmatpush1.bf16.msra.mxu0 %v1507_v29 }
 0x514   :  { %2769 = vmatprep.subr.bf16.mxu0 %v1526_v23 }
 0x517   :  { %2770 = vmatpush1.bf16.msra.mxu0 %v1525_v42 }
 0x518   :  { %2771 = vmatprep.subr.bf16.mxu0 %v1544_v59 }
 0x51b   :  { %2772 = vmatpush1.bf16.msra.mxu0 %v1543_v38 }
 0x51c   :  { %2773 = vmatprep.subr.bf16.mxu0 %v1562_v18 }
 0x51f   :  { %2774 = vmatpush1.bf16.msra.mxu0 %v1561_v37 }
 0x520   :  { %2775 = vmatprep.subr.bf16.mxu0 %v1580_v43 }
 0x523   :  { %2776 = vmatpush1.bf16.msra.mxu0 %v1579_v49 }
 0x524   :  { %2777 = vmatprep.subr.bf16.mxu0 %v1598_v51 }
 0x527   :  { %2778 = vmatpush1.bf16.msra.mxu0 %v1597_v63 }
 0x52a   :  { %2780 = vmatmul.mubr.bf16.vlgmr.msra.gmra.mrb[16].mxu0 %v8958_v1 }
 0x53d   :  { %v2523_v60 = vpop.f32.mrb[12].mxu0  ;;  %v9168_v52 = vpop.f32.mrb[12].mxu1 }
 0x53e   :  { %v2898_v39 = vmul.f32 %v2847_v16, %v2523_v60  ;;  %v2525_v31 = vpop.f32.mrb[13].mxu0  ;;  %v2654_v27 = vpop.f32.mrb[13].mxu1  ;;  %v3644_v60 = vld [vmem:[#allocation10 + $0x18] sm:$0xff] }
 0x53f   :  { %v2899_v40 = vmul.f32 %v2851_v17, %v2525_v31  ;;  %v2901_v45 = vmul.f32 %v2859_v56, %v2654_v27  ;;  %v9170_v1 = vpop.f32.mrb[14].mxu1  ;;  %v2527_v15 = vpop.f32.mrb[14].mxu0  ;;  %v3643_v31 = vld [vmem:[#allocation10 + $0x10] sm:$0xff] }
 0x540   :  { %v7709_v54 = vpack.c.bf16 %v2898_v39, %v2898_v39  ;;  %v2658_v41 = vpop.f32.mrb[15].mxu1  ;;  %v9172_v47 = vmul.f32 %v2847_v16, %v2527_v15  ;;  %v2529_v34 = vpop.f32.mrb[15].mxu0  ;;  %v8571_v16 = vmov 0   ;;  %v3788_v39 = vunpack.c.l.s8.bf16 %v3644_v60  ;;  %v3650_v15 = vld [vmem:[#allocation10 + $0x48] sm:$0xff] }
 0x541   :  { %v7710_v57 = vpack.c.bf16 %v2899_v40, %v2899_v40  ;;  %v9174_v25 = vmul.f32 %v2859_v56, %v2658_v41  ;;  %v9176_v8 = vmul.f32 %v2851_v17, %v2529_v34  ;;  %v7712_v36 = vpack.c.bf16 %v2901_v45, %v2901_v45  ;;  %3400 = vmatprep.mubr.bf16.mxu1 %v8571_v16  ;;  %v3649_v41 = vld [vmem:[#allocation10 + $0x40] sm:$0xff] }
 0x542   :  { %v3351_v4 = vsel %vm3349_vm0, %v7709_v54, 0  ;;  %v3787_v27 = vunpack.c.l.s8.bf16 %v3643_v31  ;;  %v3794_v40 = vunpack.c.h.s8.bf16 %v3644_v60  ;;  %4208 = vmatprep.subr.bf16.mxu0 %v3788_v39  ;;  %v3793_v45 = vunpack.c.h.s8.bf16 %v3643_v31 }
 0x543   :  { %7618 = vmatprep.subr.msk.bf16.mxu1 %vm3349_vm0, %v7710_v57  ;;  %v3800_v54 = vunpack.c.l.s8.bf16 %v3650_v15  ;;  %v3799_v34 = vunpack.c.l.s8.bf16 %v3649_v41  ;;  %v3806_v57 = vunpack.c.h.s8.bf16 %v3650_v15  ;;  %v3647_v15 = vld [vmem:[#allocation10 + $0x30] sm:$0xff] }
 0x544   :  { %3369 = vmatpush1.bf16.msra.mxu1 %v3351_v4  ;;  %4209 = vmatpush1.bf16.msra.mxu0 %v3787_v27  ;;  %v3805_v4 = vunpack.c.h.s8.bf16 %v3649_v41  ;;  %v3648_v27 = vld [vmem:[#allocation10 + $0x38] sm:$0xff] }
 0x545   :  { %7620 = vmatprep.subr.msk.bf16.mxu1 %vm3349_vm0, %v7712_v36  ;;  %4210 = vmatprep.subr.bf16.mxu0 %v3794_v40  ;;  %v3656_v36 = vld [vmem:[#allocation10 + $0x78] sm:$0xff]  ;;  %v3804_v41 = vunpack.c.h.s8.bf16 %v3648_v27 }
 0x546   :  { %v3812_v44 = vunpack.c.l.s8.bf16 %v3656_v36  ;;  %v3818_v0 = vunpack.c.h.s8.bf16 %v3656_v36 }
 0x548   :  { %4211 = vmatpush1.bf16.msra.mxu0 %v3793_v45  ;;  %v3798_v45 = vunpack.c.l.s8.bf16 %v3648_v27 }
 0x549   :  { %4212 = vmatprep.subr.bf16.mxu0 %v3800_v54  ;;  %v3797_v54 = vunpack.c.l.s8.bf16 %v3647_v15 }
 0x54c   :  { %4213 = vmatpush1.bf16.msra.mxu0 %v3799_v34  ;;  %v3654_v34 = vld [vmem:[#allocation10 + $0x68] sm:$0xff] }
 0x54d   :  { %4214 = vmatprep.subr.bf16.mxu0 %v3806_v57  ;;  %v3803_v57 = vunpack.c.h.s8.bf16 %v3647_v15 }
 0x550   :  { %4215 = vmatpush1.bf16.msra.mxu0 %v3805_v4  ;;  %v3653_v4 = vld [vmem:[#allocation10 + $0x60] sm:$0xff] }
 0x551   :  { %4216 = vmatprep.subr.bf16.mxu0 %v3812_v44  ;;  %v3809_v36 = vunpack.c.l.s8.bf16 %v3653_v4  ;;  %v3816_v44 = vunpack.c.h.s8.bf16 %v3654_v34 }
 0x554   :  { %4217 = vmatpush1.bf16.msra.mxu0 %v3811_v19  ;;  %v3815_v19 = vunpack.c.h.s8.bf16 %v3653_v4 }
 0x555   :  { %4218 = vmatprep.subr.bf16.mxu0 %v3818_v0  ;;  %v3822_v0 = vunpack.c.l.s8.bf16 %v3660_v61 }
 0x558   :  { %4219 = vmatpush1.bf16.msra.mxu0 %v3817_v28  ;;  %v3659_v28 = vld [vmem:[#allocation10 + $0x90] sm:$0xff] }
 0x56a   :  { %v3165_v13 = vpop.f32.mrb[16].mxu1 }
 0x56b   :  { %v7787_v53 = vadd.f32 %v3165_v13, %v3020_v5  ;;  %v3167_v6 = vpop.f32.mrb[17].mxu1  ;;  %v3824_v5 = vunpack.c.l.s8.bf16 %v9198_v2  ;;  %v9201_v13 = vld [vmem:[#allocation10 + $0xa0] sm:$0xff] }
 0x56c   :  { %v3168_v7 = vpop.f32.mrb[18].mxu1 }
 0x56d   :  { %v3169_v9 = vpop.f32.mrb[19].mxu1  ;;  %v3316_v46 = vsel %vm3315_vm1, %v7787_v53, -inf  ;;  %4220 = vmatprep.subr.bf16.mxu0 %v3824_v5  ;;  %v2855_v7 = vrot.slane %v9078_v10, %v2822_v32  ;;  %v7716_v10 = vpack.c.bf16 %v9176_v8, %v9176_v8  ;;  %v3821_v5 = vunpack.c.l.s8.bf16 %v3659_v28 }
 0x56e   :  { %3317 = vmax.xlane.f32.xlu0 %v3316_v46  ;;  %v2792_v9 = vld [vmem:[#allocation8 + $0x10] sm:$0x3] }
 0x56f   :  { %v2900_v46 = vmul.f32 %v2855_v7, %v9168_v52  ;;  %v2867_v35 = vrot.slane %v2792_v9, %v9034_v14  ;;  %v2918_v8 = vmul.f32 %v2855_v7, %v9170_v1  ;;  %v3642_v1 = vld [vmem:[#allocation10 + $0x8] sm:$0xff]  ;;  %v3827_v7 = vunpack.c.h.s8.bf16 %v3659_v28 }
 0x570   :  { %v3786_v39 = vunpack.c.l.s8.bf16 %v3642_v1  ;;  %v3792_v31 = vunpack.c.h.s8.bf16 %v3642_v1  ;;  %v3679_v1 = vld [vmem:[#allocation10 + $0x130] sm:$0xff] }
 0x58a   :  { %v3309_v11 = vpop.f32.mrb[20].mxu1 }
 0x58b   :  { %v7788_v24 = vadd.f32 %v3309_v11, %v3024_v21  ;;  %v3311_v50 = vpop.f32.mrb[21].mxu1  ;;  %v7711_v21 = vpack.c.bf16 %v2900_v46, %v2900_v46  ;;  %v2863_v11 = vrot.slane %v2792_v9, %v9056_v55  ;;  %v3829_v9 = vunpack.c.h.s8.bf16 %v9201_v13  ;;  %v3666_v46 = vld [vmem:[#allocation10 + $0xc8] sm:$0xff] }
 0x58c   :  { %v3312_v29 = vpop.f32.mrb[22].mxu1 }
 0x58d   :  { %v3313_v23 = vpop.f32.mrb[23].mxu1  ;;  %v3319_v30 = vsel %vm3315_vm1, %v7788_v24, -inf }
 0x58e   :  { %3320 = vmax.xlane.f32.xlu0 %v3319_v30  ;;  %v3357_v23 = vsel %vm3349_vm0, %v7711_v21, 0 }
 0x5fb   :  { %v3318_v42 = vpop.xlane.xlu0 %3317 }
 0x5fc   :  { %v3322_v59 = vsub.f32 %v7787_v53, %v3318_v42  ;;  %v3823_v53 = vunpack.c.l.s8.bf16 %v9201_v13 }
 0x5fd   :  { %v9186_v12 = vpop.f32.mrb[16].mxu0 }
 0x5fe   :  { %v3324_v38 = vmul.f32 1.442695, %v3322_v59  ;;  %v2783_v18 = vpop.f32.mrb[17].mxu0  ;;  %4221 = vmatpush1.bf16.msra.mxu0 %v3823_v53  ;;  %v2902_v30 = vmul.f32 %v2863_v11, %v9186_v12  ;;  %v7715_v59 = vpack.c.bf16 %v9172_v47, %v9172_v47  ;;  %v7718_v12 = vpack.c.bf16 %v9174_v25, %v9174_v25 }
 0x5ff   :  { %v9188_v22 = vpop.f32.mrb[18].mxu0  ;;  %v3828_v53 = vunpack.c.h.s8.bf16 %v3660_v61  ;;  %v3690_v61 = vld [vmem:[#allocation10 + $0x188] sm:$0xff] }
 0x600   :  { %8034 = vpow2.f32 %v3324_v38  ;;  %v9190_v37 = vpop.f32.mrb[19].mxu0  ;;  %v7713_v32 = vpack.c.bf16 %v2902_v30, %v2902_v30  ;;  %v3501_v38 = vsel %vm3349_vm0, %v7715_v59, 0  ;;  %v3671_v59 = vld [vmem:[#allocation10 + $0xf0] sm:$0xff] }
 0x601   :  { %v2921_v47 = vmul.f32 %v2867_v35, %v9190_v37 }
 0x602   :  { %v3363_v52 = vsel %vm3349_vm0, %v7713_v32, 0  ;;  %v3674_v32 = vld [vmem:[#allocation10 + $0x108] sm:$0xff] }
 0x60a   :  { %v8035_v43 = vpop.eup %8034 }
 0x60b   :  { %v3328_v62 = vsel %vm3315_vm1, %v8035_v43, 0.0 }
 0x60c   :  { %3329 = vadd.xlane.f32.xlu1 %v3328_v62  ;;  %v7717_v62 = vpack.c.bf16 %v2918_v8, %v2918_v8 }
 0x61b   :  { %v3321_v49 = vpop.xlane.xlu0 %3320 }
 0x61c   :  { %v3323_v51 = vsub.f32 %v7788_v24, %v3321_v49  ;;  %v2903_v24 = vmul.f32 %v2867_v35, %v2783_v18  ;;  %v3668_v35 = vld [vmem:[#allocation10 + $0xd8] sm:$0xff] }
 0x61d   :  { %v3836_v21 = vunpack.c.l.s8.bf16 %v3668_v35 }
 0x61e   :  { %v3326_v63 = vmul.f32 1.442695, %v3323_v51  ;;  %v7714_v42 = vpack.c.bf16 %v2903_v24, %v2903_v24  ;;  %v3507_v51 = vsel %vm3349_vm0, %v7717_v62, 0  ;;  %v3667_v24 = vld [vmem:[#allocation10 + $0xd0] sm:$0xff]  ;;  %v3851_v62 = vunpack.c.h.s8.bf16 %v3671_v59 }
 0x61f   :  { %v3841_v13 = vunpack.c.h.s8.bf16 %v3667_v24 }
 0x620   :  { %8036 = vpow2.f32 %v3326_v63  ;;  %v2920_v63 = vmul.f32 %v2863_v11, %v9188_v22  ;;  %v3641_v22 = vld [vmem:[#allocation10] sm:$0xff] }
 0x621   :  { %v3791_v40 = vunpack.c.h.s8.bf16 %v3641_v22  ;;  %v3665_v11 = vld [vmem:[#allocation10 + $0xc0] sm:$0xff] }
 0x622   :  { %v7719_v60 = vpack.c.bf16 %v2920_v63, %v2920_v63  ;;  %v3839_v30 = vunpack.c.h.s8.bf16 %v3665_v11 }
 0x624   :  { %v3513_v37 = vsel %vm3349_vm0, %v7719_v60, 0 }
 0x62a   :  { %v9194_v17 = vpop.eup %8036 }
 0x62b   :  { %v3331_v56 = vsel %vm3315_vm1, %v9194_v17, 0.0 }
 0x62c   :  { %3332 = vadd.xlane.f32.xlu1 %v3331_v56  ;;  %v7720_v56 = vpack.c.bf16 %v2921_v47, %v2921_v47 }
 0x699   :  { %v3330_v6 = vpop.xlane.xlu1 %3329 }
 0x69a   :  { %8038 = vrcp.f32 %v3330_v6  ;;  %v3830_v6 = vunpack.c.h.s8.bf16 %v9198_v2  ;;  %v3840_v2 = vunpack.c.h.s8.bf16 %v3666_v46 }
 0x69c   :  { %4222 = vmatprep.subr.bf16.mxu0 %v3830_v6 }
 0x69d   :  { %4223 = vmatpush1.bf16.msra.mxu0 %v3829_v9 }
 0x69e   :  { %4224 = vmatprep.subr.bf16.mxu0 %v3836_v21 }
 0x6a4   :  { %v8039_v20 = vpop.eup %8038 }
 0x6a5   :  { %v3336_v50 = vmul.f32 %v8039_v20, %v8035_v43  ;;  %v3834_v20 = vunpack.c.l.s8.bf16 %v3666_v46 }
 0x6a7   :  { %v3338_v29 = vpack.c.bf16 %v3336_v50, %v3336_v50  ;;  %v3833_v50 = vunpack.c.l.s8.bf16 %v3665_v11 }
 0x6a9   :  { %7619 = vmatmul.mubr.msk.bf16.vlgmr.msra.gmra.mrb[24].mxu1 %vm3315_vm1, %v3338_v29 }
 0x6aa   :  { %3410 = vmatpush1.bf16.msra.mxu1 %v3357_v23  ;;  %3441 = vmatprep.mubr.bf16.mxu1 %v8571_v16  ;;  %v3842_v23 = vunpack.c.h.s8.bf16 %v3668_v35 }
 0x6ab   :  { %7622 = vmatprep.subr.msk.bf16.mxu1 %vm3349_vm0, %v7714_v42  ;;  %v3672_v42 = vld [vmem:[#allocation10 + $0xf8] sm:$0xff] }
 0x6ac   :  { %v3852_v8 = vunpack.c.h.s8.bf16 %v3672_v42 }
 0x6b1   :  { %7621 = vmatmul.mubr.msk.bf16.vlgmr.msra.gmra.mrb[28].mxu1 %vm3315_vm1, %v3338_v29 }
 0x6b2   :  { %3451 = vmatpush1.bf16.msra.mxu1 %v3363_v52  ;;  %3482 = vmatprep.mubr.bf16.mxu1 %v8571_v16  ;;  %v3848_v52 = vunpack.c.l.s8.bf16 %v3674_v32 }
 0x6b3   :  { %7630 = vmatprep.subr.msk.bf16.mxu1 %vm3349_vm0, %v7716_v10  ;;  %v3846_v10 = vunpack.c.l.s8.bf16 %v3672_v42 }
 0x6b9   :  { %v3333_v18 = vpop.xlane.xlu1 %3332  ;;  %7623 = vmatmul.mubr.msk.bf16.vlgmr.msra.gmra.mrb[32].mxu1 %vm3315_vm1, %v3338_v29  ;;  %v3835_v29 = vunpack.c.l.s8.bf16 %v3667_v24 }
 0x6ba   :  { %8040 = vrcp.f32 %v3333_v18  ;;  %3519 = vmatpush1.bf16.msra.mxu1 %v3501_v38  ;;  %3550 = vmatprep.mubr.bf16.mxu1 %v8571_v16  ;;  %v3845_v38 = vunpack.c.l.s8.bf16 %v3671_v59 }
 0x6bb   :  { %7632 = vmatprep.subr.msk.bf16.mxu1 %vm3349_vm0, %v7718_v12  ;;  %4225 = vmatpush1.bf16.msra.mxu0 %v3835_v29  ;;  %v3673_v12 = vld [vmem:[#allocation10 + $0x100] sm:$0xff] }
 0x6bc   :  { %4226 = vmatprep.subr.bf16.mxu0 %v3842_v23  ;;  %v3847_v18 = vunpack.c.l.s8.bf16 %v3673_v12  ;;  %v3853_v47 = vunpack.c.h.s8.bf16 %v3673_v12  ;;  %v3689_v29 = vld [vmem:[#allocation10 + $0x180] sm:$0xff]  ;;  %v3888_v12 = vunpack.c.h.s8.bf16 %v3690_v61 }
 0x6bf   :  { %4227 = vmatpush1.bf16.msra.mxu0 %v3841_v13 }
 0x6c0   :  { %4228 = vmatprep.subr.bf16.mxu0 %v3848_v52 }
 0x6c3   :  { %4229 = vmatpush1.bf16.msra.mxu0 %v3847_v18  ;;  %v3696_v18 = vld [vmem:[#allocation10 + $0x1b8] sm:$0xff] }
 0x6c4   :  { %v8041_v43 = vpop.eup %8040 }
 0x6c5   :  { %v3337_v49 = vmul.f32 %v8041_v43, %v9194_v17  ;;  %v3785_v17 = vunpack.c.l.s8.bf16 %v3641_v22  ;;  %v3854_v43 = vunpack.c.h.s8.bf16 %v3674_v32  ;;  %v3859_v22 = vunpack.c.l.s8.bf16 %v3679_v1 }
 0x6c7   :  { %v3339_v25 = vpack.c.bf16 %v3337_v49, %v3337_v49  ;;  %4230 = vmatprep.subr.bf16.mxu0 %v3854_v43  ;;  %v3678_v49 = vld [vmem:[#allocation10 + $0x128] sm:$0xff]  ;;  %v3887_v43 = vunpack.c.h.s8.bf16 %v3689_v29 }
 0x6c8   :  { %4231 = vmatpush1.bf16.msra.mxu0 %v3853_v47  ;;  %v3864_v60 = vunpack.c.h.s8.bf16 %v3678_v49  ;;  %v3894_v47 = vunpack.c.l.s8.bf16 %v3696_v18 }
 0x6c9   :  { %7631 = vmatmul.mubr.msk.bf16.vlgmr.msra.gmra.mrb[36].mxu1 %vm3315_vm1, %v3339_v25 }
 0x6ca   :  { %3560 = vmatpush1.bf16.msra.mxu1 %v3507_v51  ;;  %3591 = vmatprep.mubr.bf16.mxu1 %v8571_v16  ;;  %v3858_v51 = vunpack.c.l.s8.bf16 %v3678_v49 }
 0x6cb   :  { %7634 = vmatprep.subr.msk.bf16.mxu1 %vm3349_vm0, %v7720_v56  ;;  %v3677_v56 = vld [vmem:[#allocation10 + $0x120] sm:$0xff] }
 0x6cc   :  { %v3863_v27 = vunpack.c.h.s8.bf16 %v3677_v56 }
 0x6d1   :  { %7633 = vmatmul.mubr.msk.bf16.vlgmr.msra.gmra.mrb[40].mxu1 %vm3315_vm1, %v3339_v25 }
 0x6d2   :  { %3601 = vmatpush1.bf16.msra.mxu1 %v3513_v37  ;;  %3632 = vmatprep.mubr.bf16.mxu1 %v8571_v16  ;;  %v3810_v16 = vunpack.c.l.s8.bf16 %v3654_v34  ;;  %v3857_v37 = vunpack.c.l.s8.bf16 %v3677_v56 }
 0x6d3   :  { %4079 = vmatprep.subr.bf16.mxu1 %v3786_v39 }
 0x6d9   :  { %7635 = vmatmul.mubr.msk.bf16.vlgmr.msra.gmra.mrb[44].mxu1 %vm3315_vm1, %v3339_v25  ;;  %v3680_v25 = vld [vmem:[#allocation10 + $0x138] sm:$0xff] }
 0x6da   :  { %4080 = vmatpush1.bf16.msra.mxu1 %v3785_v17  ;;  %v3860_v63 = vunpack.c.l.s8.bf16 %v3680_v25  ;;  %v3866_v39 = vunpack.c.h.s8.bf16 %v3680_v25  ;;  %v3684_v17 = vld [vmem:[#allocation10 + $0x158] sm:$0xff]  ;;  %v3695_v25 = vld [vmem:[#allocation10 + $0x1b0] sm:$0xff] }
 0x6db   :  { %4081 = vmatprep.subr.bf16.mxu1 %v3792_v31  ;;  %v3686_v31 = vld [vmem:[#allocation10 + $0x168] sm:$0xff] }
 0x6dc   :  { %4232 = vmatprep.subr.bf16.mxu0 %v3860_v63  ;;  %v3872_v15 = vunpack.c.l.s8.bf16 %v3686_v31  ;;  %v3878_v4 = vunpack.c.h.s8.bf16 %v3686_v31  ;;  %v3900_v31 = vunpack.c.h.s8.bf16 %v3696_v18  ;;  %v3715_v18 = vld [vmem:[#allocation10 + $0x250] sm:$0xff] }
 0x6dd   :  { %4233 = vmatpush1.bf16.msra.mxu0 %v3859_v22 }
 0x6de   :  { %4082 = vmatpush1.bf16.msra.mxu1 %v3791_v40  ;;  %v3865_v40 = vunpack.c.h.s8.bf16 %v3679_v1  ;;  %4234 = vmatprep.subr.bf16.mxu0 %v3866_v39 }
 0x6df   :  { %4083 = vmatprep.subr.bf16.mxu1 %v3798_v45  ;;  %v3870_v45 = vunpack.c.l.s8.bf16 %v3684_v17 }
 0x6e1   :  { %4235 = vmatpush1.bf16.msra.mxu0 %v3865_v40  ;;  %v3702_v40 = vld [vmem:[#allocation10 + $0x1e8] sm:$0xff] }
 0x6e2   :  { %4084 = vmatpush1.bf16.msra.mxu1 %v3797_v54  ;;  %v3683_v54 = vld [vmem:[#allocation10 + $0x150] sm:$0xff]  ;;  %4236 = vmatprep.subr.bf16.mxu0 %v3872_v15  ;;  %v3899_v15 = vunpack.c.h.s8.bf16 %v3695_v25 }
 0x6e3   :  { %4085 = vmatprep.subr.bf16.mxu1 %v3804_v41  ;;  %v3685_v41 = vld [vmem:[#allocation10 + $0x160] sm:$0xff]  ;;  %v3869_v34 = vunpack.c.l.s8.bf16 %v3683_v54 }
 0x6e6   :  { %4086 = vmatpush1.bf16.msra.mxu1 %v3803_v57  ;;  %v3871_v57 = vunpack.c.l.s8.bf16 %v3685_v41 }
 0x6e7   :  { %4087 = vmatprep.subr.bf16.mxu1 %v3810_v16  ;;  %v3876_v16 = vunpack.c.h.s8.bf16 %v3684_v17 }
 0x6e8   :  { %4237 = vmatpush1.bf16.msra.mxu0 %v3871_v57  ;;  %v3701_v57 = vld [vmem:[#allocation10 + $0x1e0] sm:$0xff] }
 0x6e9   :  { %4238 = vmatprep.subr.bf16.mxu0 %v3878_v4 }
 0x6ea   :  { %4088 = vmatpush1.bf16.msra.mxu1 %v3809_v36  ;;  %v3875_v36 = vunpack.c.h.s8.bf16 %v3683_v54 }
 0x6eb   :  { %4089 = vmatprep.subr.bf16.mxu1 %v3816_v44  ;;  %v3877_v44 = vunpack.c.h.s8.bf16 %v3685_v41  ;;  %v3906_v41 = vunpack.c.l.s8.bf16 %v3702_v40 }
 0x6ed   :  { %4239 = vmatpush1.bf16.msra.mxu0 %v3877_v44 }
 0x6ee   :  { %4090 = vmatpush1.bf16.msra.mxu1 %v3815_v19  ;;  %v3692_v19 = vld [vmem:[#allocation10 + $0x198] sm:$0xff] }
 0x6ef   :  { %4091 = vmatprep.subr.bf16.mxu1 %v3822_v0  ;;  %v3882_v0 = vunpack.c.l.s8.bf16 %v3690_v61  ;;  %v3884_v28 = vunpack.c.l.s8.bf16 %v3692_v19 }
 0x6f1   :  { %4251 = vmatprep.subr.bf16.mxu0 %v3884_v28 }
 0x6f2   :  { %4092 = vmatpush1.bf16.msra.mxu1 %v3821_v5 }
 0x6f3   :  { %4093 = vmatprep.subr.bf16.mxu1 %v3828_v53 }
 0x6f6   :  { %4094 = vmatpush1.bf16.msra.mxu1 %v3827_v7 }
 0x6f7   :  { %4095 = vmatprep.subr.bf16.mxu1 %v3834_v20 }
 0x6fa   :  { %4096 = vmatpush1.bf16.msra.mxu1 %v3833_v50 }
 0x6fb   :  { %4097 = vmatprep.subr.bf16.mxu1 %v3840_v2  ;;  %v3691_v2 = vld [vmem:[#allocation10 + $0x190] sm:$0xff] }
 0x6fc   :  { %v3883_v52 = vunpack.c.l.s8.bf16 %v3691_v2 }
 0x6fe   :  { %4098 = vmatpush1.bf16.msra.mxu1 %v3839_v30 }
 0x6ff   :  { %4099 = vmatprep.subr.bf16.mxu1 %v3846_v10  ;;  %v3881_v10 = vunpack.c.l.s8.bf16 %v3689_v29 }
 0x702   :  { %4100 = vmatpush1.bf16.msra.mxu1 %v3845_v38  ;;  %v3890_v38 = vunpack.c.h.s8.bf16 %v3692_v19 }
 0x703   :  { %4101 = vmatprep.subr.bf16.mxu1 %v3852_v8  ;;  %v3698_v8 = vld [vmem:[#allocation10 + $0x1c8] sm:$0xff] }
 0x704   :  { %v3896_v49 = vunpack.c.l.s8.bf16 %v3698_v8 }
 0x706   :  { %4102 = vmatpush1.bf16.msra.mxu1 %v3851_v62  ;;  %v3889_v62 = vunpack.c.h.s8.bf16 %v3691_v2 }
 0x707   :  { %4103 = vmatprep.subr.bf16.mxu1 %v3858_v51  ;;  %v3697_v51 = vld [vmem:[#allocation10 + $0x1c0] sm:$0xff] }
 0x708   :  { %v3895_v22 = vunpack.c.l.s8.bf16 %v3697_v51  ;;  %v3901_v54 = vunpack.c.h.s8.bf16 %v3697_v51 }
 0x70a   :  { %4104 = vmatpush1.bf16.msra.mxu1 %v3857_v37  ;;  %v3893_v37 = vunpack.c.l.s8.bf16 %v3695_v25  ;;  %v3722_v25 = vld [vmem:[#allocation10 + $0x288] sm:$0xff] }
 0x70b   :  { %4105 = vmatprep.subr.bf16.mxu1 %v3864_v60 }
 0x70e   :  { %4106 = vmatpush1.bf16.msra.mxu1 %v3863_v27  ;;  %v3902_v27 = vunpack.c.h.s8.bf16 %v3698_v8 }
 0x70f   :  { %4107 = vmatprep.subr.bf16.mxu1 %v3870_v45  ;;  %v3704_v45 = vld [vmem:[#allocation10 + $0x1f8] sm:$0xff] }
 0x712   :  { %4108 = vmatpush1.bf16.msra.mxu1 %v3869_v34  ;;  %v3908_v34 = vunpack.c.l.s8.bf16 %v3704_v45 }
 0x713   :  { %4109 = vmatprep.subr.bf16.mxu1 %v3876_v16  ;;  %v3703_v16 = vld [vmem:[#allocation10 + $0x1f0] sm:$0xff] }
 0x714   :  { %v3907_v28 = vunpack.c.l.s8.bf16 %v3703_v16 }
 0x716   :  { %4110 = vmatpush1.bf16.msra.mxu1 %v3875_v36 }
 0x717   :  { %4122 = vmatprep.subr.bf16.mxu1 %v3882_v0  ;;  %v3905_v0 = vunpack.c.l.s8.bf16 %v3701_v57 }
 0x77c   :  { %v3402_v5 = vpop.f32.mrb[24].mxu1 }
 0x77d   :  { %v3404_v53 = vpop.f32.mrb[25].mxu1 }
 0x77e   :  { %v3406_v6 = vpop.f32.mrb[26].mxu1 }
 0x77f   :  { %v3407_v7 = vpop.f32.mrb[27].mxu1  ;;  %v3914_v6 = vunpack.c.h.s8.bf16 %v3704_v45  ;;  %v3726_v45 = vld [vmem:[#allocation10 + $0x2a8] sm:$0xff] }
 0x780   :  { %v3708_v7 = vld [vmem:[#allocation10 + $0x218] sm:$0xff] }
 0x781   :  { %v3924_v2 = vunpack.c.h.s8.bf16 %v3708_v7 }
 0x784   :  { %v3443_v9 = vpop.f32.mrb[28].mxu1 }
 0x785   :  { %v3445_v46 = vpop.f32.mrb[29].mxu1 }
 0x786   :  { %v3447_v35 = vpop.f32.mrb[30].mxu1 }
 0x787   :  { %v3448_v20 = vpop.f32.mrb[31].mxu1  ;;  %v3913_v35 = vunpack.c.h.s8.bf16 %v3703_v16  ;;  %v3725_v16 = vld [vmem:[#allocation10 + $0x2a0] sm:$0xff] }
 0x788   :  { %v3918_v20 = vunpack.c.l.s8.bf16 %v3708_v7 }
 0x78c   :  { %v3484_v21 = vpop.f32.mrb[32].mxu1 }
 0x78d   :  { %v3486_v11 = vpop.f32.mrb[33].mxu1 }
 0x78e   :  { %v3488_v24 = vpop.f32.mrb[34].mxu1 }
 0x78f   :  { %v3489_v50 = vpop.f32.mrb[35].mxu1  ;;  %v3709_v24 = vld [vmem:[#allocation10 + $0x220] sm:$0xff] }
 0x790   :  { %v3919_v29 = vunpack.c.l.s8.bf16 %v3709_v24 }
 0x79c   :  { %v3552_v23 = vpop.f32.mrb[36].mxu1 }
 0x79d   :  { %v9243_v30 = vpack.c.bf16 %v3552_v23, %v3402_v5  ;;  %v3554_v13 = vpop.f32.mrb[37].mxu1 }
 0x79e   :  { %v9245_v42 = vpack.c.bf16 %v3554_v13, %v3404_v53  ;;  %v3556_v32 = vpop.f32.mrb[38].mxu1  ;;  %v3912_v53 = vunpack.c.h.s8.bf16 %v3702_v40  ;;  %v3714_v13 = vld [vmem:[#allocation10 + $0x248] sm:$0xff]  ;;  %v3950_v40 = vunpack.c.h.s8.bf16 %v3722_v25 }
 0x79f   :  { %v3557_v59 = vpop.f32.mrb[39].mxu1  ;;  %v3716_v32 = vld [vmem:[#allocation10 + $0x258] sm:$0xff] }
 0x7a0   :  { %4111 = vmatprep.mubr.bf16.mxu1 %v9245_v42  ;;  %4240 = vmatprep.mubr.bf16.mxu0 %v9245_v42  ;;  %v3930_v59 = vunpack.c.l.s8.bf16 %v3714_v13 }
 0x7a1   :  { %4112 = vmatmul.mubr.bf16.vlgmr.msra.gmra.mrb[48].mxu1 %v9243_v30  ;;  %4241 = vmatmul.mubr.bf16.vlgmr.msra.gmra.mrb[20].mxu0 %v9243_v30 }
 0x7a2   :  { %4123 = vmatpush1.bf16.msra.mxu1 %v3881_v10  ;;  %4252 = vmatpush1.bf16.msra.mxu0 %v3883_v52  ;;  %v3925_v52 = vunpack.c.h.s8.bf16 %v3709_v24 }
 0x7a3   :  { %4124 = vmatprep.subr.bf16.mxu1 %v3888_v12  ;;  %4253 = vmatprep.subr.bf16.mxu0 %v3890_v38  ;;  %v3932_v12 = vunpack.c.l.s8.bf16 %v3716_v32  ;;  %v3713_v38 = vld [vmem:[#allocation10 + $0x240] sm:$0xff] }
 0x7a4   :  { %v3593_v63 = vpop.f32.mrb[40].mxu1  ;;  %v3929_v8 = vunpack.c.l.s8.bf16 %v3713_v38  ;;  %v3935_v51 = vunpack.c.h.s8.bf16 %v3713_v38 }
 0x7a5   :  { %v9251_v56 = vpack.c.bf16 %v3593_v63, %v3443_v9  ;;  %v3595_v1 = vpop.f32.mrb[41].mxu1  ;;  %v3710_v9 = vld [vmem:[#allocation10 + $0x228] sm:$0xff]  ;;  %v3937_v63 = vunpack.c.h.s8.bf16 %v3715_v18 }
 0x7a6   :  { %v9253_v60 = vpack.c.bf16 %v3595_v1, %v3445_v46  ;;  %4125 = vmatpush1.bf16.msra.mxu1 %v3887_v43  ;;  %4254 = vmatpush1.bf16.msra.mxu0 %v3889_v62  ;;  %v3597_v39 = vpop.f32.mrb[42].mxu1  ;;  %v3911_v46 = vunpack.c.h.s8.bf16 %v3701_v57  ;;  %v3926_v23 = vunpack.c.h.s8.bf16 %v3710_v9  ;;  %v3931_v43 = vunpack.c.l.s8.bf16 %v3715_v18 }
 0x7a7   :  { %v3598_v17 = vpop.f32.mrb[43].mxu1  ;;  %4126 = vmatprep.subr.bf16.mxu1 %v3894_v47  ;;  %4255 = vmatprep.subr.bf16.mxu0 %v3896_v49  ;;  %v3936_v62 = vunpack.c.h.s8.bf16 %v3714_v13  ;;  %v3938_v47 = vunpack.c.h.s8.bf16 %v3716_v32  ;;  %v3720_v49 = vld [vmem:[#allocation10 + $0x278] sm:$0xff]  ;;  %v3944_v39 = vunpack.c.l.s8.bf16 %v3722_v25 }
 0x7a8   :  { %4154 = vmatprep.mubr.bf16.mxu1 %v9253_v60  ;;  %4283 = vmatprep.mubr.bf16.mxu0 %v9253_v60  ;;  %v3942_v1 = vunpack.c.l.s8.bf16 %v3720_v49 }
 0x7aa   :  { %4127 = vmatpush1.bf16.msra.mxu1 %v3893_v37  ;;  %4256 = vmatpush1.bf16.msra.mxu0 %v3895_v22  ;;  %v3719_v37 = vld [vmem:[#allocation10 + $0x270] sm:$0xff]  ;;  %v3721_v22 = vld [vmem:[#allocation10 + $0x280] sm:$0xff] }
 0x7ab   :  { %4128 = vmatprep.subr.bf16.mxu1 %v3900_v31  ;;  %4257 = vmatprep.subr.bf16.mxu0 %v3902_v27  ;;  %v3941_v17 = vunpack.c.l.s8.bf16 %v3719_v37  ;;  %v3943_v31 = vunpack.c.l.s8.bf16 %v3721_v22  ;;  %v3948_v27 = vunpack.c.h.s8.bf16 %v3720_v49 }
 0x7ac   :  { %v3634_v4 = vpop.f32.mrb[44].mxu1 }
 0x7ad   :  { %v9257_v36 = vpack.c.bf16 %v3634_v4, %v3484_v21  ;;  %v3636_v44 = vpop.f32.mrb[45].mxu1  ;;  %v3920_v21 = vunpack.c.l.s8.bf16 %v3710_v9  ;;  %v3727_v4 = vld [vmem:[#allocation10 + $0x2b0] sm:$0xff] }
 0x7ae   :  { %v9259_v61 = vpack.c.bf16 %v3636_v44, %v3486_v11  ;;  %4129 = vmatpush1.bf16.msra.mxu1 %v3899_v15  ;;  %4258 = vmatpush1.bf16.msra.mxu0 %v3901_v54  ;;  %v3638_v19 = vpop.f32.mrb[46].mxu1  ;;  %v3707_v11 = vld [vmem:[#allocation10 + $0x210] sm:$0xff]  ;;  %v3728_v15 = vld [vmem:[#allocation10 + $0x2b8] sm:$0xff]  ;;  %v3947_v54 = vunpack.c.h.s8.bf16 %v3719_v37  ;;  %v3953_v44 = vunpack.c.l.s8.bf16 %v3725_v16  ;;  %v3961_v7 = vunpack.c.h.s8.bf16 %v3727_v4 }
 0x7af   :  { %v3639_v5 = vpop.f32.mrb[47].mxu1  ;;  %4130 = vmatprep.subr.bf16.mxu1 %v3906_v41  ;;  %4259 = vmatprep.subr.bf16.mxu0 %v3908_v34  ;;  %v3917_v50 = vunpack.c.l.s8.bf16 %v3707_v11  ;;  %v3923_v10 = vunpack.c.h.s8.bf16 %v3707_v11  ;;  %v3949_v41 = vunpack.c.h.s8.bf16 %v3721_v22  ;;  %v3954_v34 = vunpack.c.l.s8.bf16 %v3726_v45 }
 0x7b0   :  { %v3956_v57 = vunpack.c.l.s8.bf16 %v3728_v15  ;;  %v3955_v19 = vunpack.c.l.s8.bf16 %v3727_v4  ;;  %v3732_v5 = vld [vmem:[#allocation10 + $0x2d8] sm:$0xff] }
 0x7b1   :  { %v3966_v9 = vunpack.c.l.s8.bf16 %v3732_v5  ;;  %v3972_v24 = vunpack.c.h.s8.bf16 %v3732_v5 }
 0x7b2   :  { %4131 = vmatpush1.bf16.msra.mxu1 %v3905_v0  ;;  %4260 = vmatpush1.bf16.msra.mxu0 %v3907_v28  ;;  %v3960_v0 = vunpack.c.h.s8.bf16 %v3726_v45  ;;  %v3962_v28 = vunpack.c.h.s8.bf16 %v3728_v15 }
 0x7b3   :  { %4132 = vmatprep.subr.bf16.mxu1 %v3912_v53  ;;  %4261 = vmatprep.subr.bf16.mxu0 %v3914_v6  ;;  %v3734_v53 = vld [vmem:[#allocation10 + $0x2e8] sm:$0xff]  ;;  %v3959_v6 = vunpack.c.h.s8.bf16 %v3725_v16 }
 0x7b6   :  { %4133 = vmatpush1.bf16.msra.mxu1 %v3911_v46  ;;  %4262 = vmatpush1.bf16.msra.mxu0 %v3913_v35  ;;  %v3968_v46 = vunpack.c.l.s8.bf16 %v3734_v53  ;;  %v3731_v35 = vld [vmem:[#allocation10 + $0x2d0] sm:$0xff] }
 0x7b7   :  { %4134 = vmatprep.subr.bf16.mxu1 %v3918_v20  ;;  %4263 = vmatprep.subr.bf16.mxu0 %v3920_v21  ;;  %v3733_v20 = vld [vmem:[#allocation10 + $0x2e0] sm:$0xff]  ;;  %v3965_v21 = vunpack.c.l.s8.bf16 %v3731_v35 }
 0x7b8   :  { %v3967_v11 = vunpack.c.l.s8.bf16 %v3733_v20  ;;  %v3973_v13 = vunpack.c.h.s8.bf16 %v3733_v20 }
 0x7ba   :  { %4135 = vmatpush1.bf16.msra.mxu1 %v3917_v50  ;;  %4264 = vmatpush1.bf16.msra.mxu0 %v3919_v29  ;;  %v3974_v50 = vunpack.c.h.s8.bf16 %v3734_v53  ;;  %v3738_v29 = vld [vmem:[#allocation10 + $0x308] sm:$0xff] }
 0x7bb   :  { %4136 = vmatprep.subr.bf16.mxu1 %v3924_v2  ;;  %4265 = vmatprep.subr.bf16.mxu0 %v3926_v23  ;;  %v3740_v2 = vld [vmem:[#allocation10 + $0x318] sm:$0xff]  ;;  %v3971_v23 = vunpack.c.h.s8.bf16 %v3731_v35  ;;  %v3978_v32 = vunpack.c.l.s8.bf16 %v3738_v29  ;;  %v3984_v18 = vunpack.c.h.s8.bf16 %v3738_v29 }
 0x7be   :  { %4137 = vmatpush1.bf16.msra.mxu1 %v3923_v10  ;;  %4266 = vmatpush1.bf16.msra.mxu0 %v3925_v52  ;;  %v3980_v10 = vunpack.c.l.s8.bf16 %v3740_v2  ;;  %v3737_v52 = vld [vmem:[#allocation10 + $0x300] sm:$0xff] }
 0x7bf   :  { %4138 = vmatprep.subr.bf16.mxu1 %v3930_v59  ;;  %4267 = vmatprep.subr.bf16.mxu0 %v3932_v12  ;;  %v3739_v59 = vld [vmem:[#allocation10 + $0x310] sm:$0xff]  ;;  %v3977_v12 = vunpack.c.l.s8.bf16 %v3737_v52 }
 0x7c0   :  { %v3979_v38 = vunpack.c.l.s8.bf16 %v3739_v59  ;;  %v3985_v49 = vunpack.c.h.s8.bf16 %v3739_v59 }
 0x7c2   :  { %4139 = vmatpush1.bf16.msra.mxu1 %v3929_v8  ;;  %4268 = vmatpush1.bf16.msra.mxu0 %v3931_v43  ;;  %v3986_v8 = vunpack.c.h.s8.bf16 %v3740_v2  ;;  %v3744_v43 = vld [vmem:[#allocation10 + $0x338] sm:$0xff] }
 0x7c3   :  { %4140 = vmatprep.subr.bf16.mxu1 %v3936_v62  ;;  %4269 = vmatprep.subr.bf16.mxu0 %v3938_v47  ;;  %v3746_v62 = vld [vmem:[#allocation10 + $0x348] sm:$0xff]  ;;  %v3983_v47 = vunpack.c.h.s8.bf16 %v3737_v52  ;;  %v3990_v25 = vunpack.c.l.s8.bf16 %v3744_v43  ;;  %v3996_v22 = vunpack.c.h.s8.bf16 %v3744_v43 }
 0x7c6   :  { %4141 = vmatpush1.bf16.msra.mxu1 %v3935_v51  ;;  %4270 = vmatpush1.bf16.msra.mxu0 %v3937_v63  ;;  %v3743_v51 = vld [vmem:[#allocation10 + $0x330] sm:$0xff]  ;;  %v3992_v63 = vunpack.c.l.s8.bf16 %v3746_v62 }
 0x7c7   :  { %4142 = vmatprep.subr.bf16.mxu1 %v3942_v1  ;;  %4271 = vmatprep.subr.bf16.mxu0 %v3944_v39  ;;  %v3745_v1 = vld [vmem:[#allocation10 + $0x340] sm:$0xff]  ;;  %v3989_v39 = vunpack.c.l.s8.bf16 %v3743_v51 }
 0x7c8   :  { %v3991_v37 = vunpack.c.l.s8.bf16 %v3745_v1  ;;  %v3997_v45 = vunpack.c.h.s8.bf16 %v3745_v1 }
 0x7ca   :  { %4143 = vmatpush1.bf16.msra.mxu1 %v3941_v17  ;;  %4272 = vmatpush1.bf16.msra.mxu0 %v3943_v31  ;;  %v3998_v17 = vunpack.c.h.s8.bf16 %v3746_v62  ;;  %v3750_v31 = vld [vmem:[#allocation10 + $0x368] sm:$0xff] }
 0x7cb   :  { %4144 = vmatprep.subr.bf16.mxu1 %v3948_v27  ;;  %4273 = vmatprep.subr.bf16.mxu0 %v3950_v40  ;;  %v3752_v27 = vld [vmem:[#allocation10 + $0x378] sm:$0xff]  ;;  %v3995_v40 = vunpack.c.h.s8.bf16 %v3743_v51  ;;  %v4002_v15 = vunpack.c.l.s8.bf16 %v3750_v31  ;;  %v4008_v4 = vunpack.c.h.s8.bf16 %v3750_v31 }
 0x7ce   :  { %4145 = vmatpush1.bf16.msra.mxu1 %v3947_v54  ;;  %4274 = vmatpush1.bf16.msra.mxu0 %v3949_v41  ;;  %v3749_v54 = vld [vmem:[#allocation10 + $0x360] sm:$0xff]  ;;  %v4004_v41 = vunpack.c.l.s8.bf16 %v3752_v27 }
 0x7cf   :  { %4146 = vmatprep.subr.bf16.mxu1 %v3954_v34  ;;  %4275 = vmatprep.subr.bf16.mxu0 %v3956_v57  ;;  %v3751_v34 = vld [vmem:[#allocation10 + $0x370] sm:$0xff]  ;;  %v4001_v57 = vunpack.c.l.s8.bf16 %v3749_v54 }
 0x7d0   :  { %v4003_v16 = vunpack.c.l.s8.bf16 %v3751_v34  ;;  %v4009_v5 = vunpack.c.h.s8.bf16 %v3751_v34 }
 0x7d2   :  { %4147 = vmatpush1.bf16.msra.mxu1 %v3953_v44  ;;  %4276 = vmatpush1.bf16.msra.mxu0 %v3955_v19  ;;  %v4010_v44 = vunpack.c.h.s8.bf16 %v3752_v27  ;;  %v3756_v19 = vld [vmem:[#allocation10 + $0x398] sm:$0xff] }
 0x7d3   :  { %4148 = vmatprep.subr.bf16.mxu1 %v3960_v0  ;;  %4277 = vmatprep.subr.bf16.mxu0 %v3962_v28  ;;  %v3758_v0 = vld [vmem:[#allocation10 + $0x3a8] sm:$0xff]  ;;  %v4007_v28 = vunpack.c.h.s8.bf16 %v3749_v54  ;;  %v4014_v53 = vunpack.c.l.s8.bf16 %v3756_v19  ;;  %v4020_v20 = vunpack.c.h.s8.bf16 %v3756_v19 }
 0x7d6   :  { %4149 = vmatpush1.bf16.msra.mxu1 %v3959_v6  ;;  %4278 = vmatpush1.bf16.msra.mxu0 %v3961_v7  ;;  %v3755_v6 = vld [vmem:[#allocation10 + $0x390] sm:$0xff]  ;;  %v4016_v7 = vunpack.c.l.s8.bf16 %v3758_v0 }
 0x7d7   :  { %4150 = vmatprep.subr.bf16.mxu1 %v3966_v9  ;;  %4279 = vmatprep.subr.bf16.mxu0 %v3968_v46  ;;  %v3757_v9 = vld [vmem:[#allocation10 + $0x3a0] sm:$0xff]  ;;  %v4013_v46 = vunpack.c.l.s8.bf16 %v3755_v6 }
 0x7d8   :  { %v4015_v35 = vunpack.c.l.s8.bf16 %v3757_v9  ;;  %v4021_v29 = vunpack.c.h.s8.bf16 %v3757_v9 }
 0x7da   :  { %4151 = vmatpush1.bf16.msra.mxu1 %v3965_v21  ;;  %4280 = vmatpush1.bf16.msra.mxu0 %v3967_v11  ;;  %v4022_v21 = vunpack.c.h.s8.bf16 %v3758_v0  ;;  %v3762_v11 = vld [vmem:[#allocation10 + $0x3c8] sm:$0xff] }
 0x7db   :  { %4152 = vmatprep.subr.bf16.mxu1 %v3972_v24  ;;  %4281 = vmatprep.subr.bf16.mxu0 %v3974_v50  ;;  %v3764_v24 = vld [vmem:[#allocation10 + $0x3d8] sm:$0xff]  ;;  %v4019_v50 = vunpack.c.h.s8.bf16 %v3755_v6  ;;  %v4026_v2 = vunpack.c.l.s8.bf16 %v3762_v11  ;;  %v4032_v59 = vunpack.c.h.s8.bf16 %v3762_v11 }
 0x7de   :  { %4153 = vmatpush1.bf16.msra.mxu1 %v3971_v23  ;;  %4282 = vmatpush1.bf16.msra.mxu0 %v3973_v13  ;;  %v3761_v23 = vld [vmem:[#allocation10 + $0x3c0] sm:$0xff]  ;;  %v4028_v13 = vunpack.c.l.s8.bf16 %v3764_v24 }
 0x7df   :  { %4165 = vmatprep.subr.bf16.mxu1 %v3978_v32  ;;  %4294 = vmatprep.subr.bf16.mxu0 %v3980_v10  ;;  %v3763_v32 = vld [vmem:[#allocation10 + $0x3d0] sm:$0xff]  ;;  %v4025_v10 = vunpack.c.l.s8.bf16 %v3761_v23 }
 0x7e0   :  { %v4027_v52 = vunpack.c.l.s8.bf16 %v3763_v32  ;;  %v4033_v43 = vunpack.c.h.s8.bf16 %v3763_v32  ;;  %v3651_v32 = vld [vmem:[#allocation10 + $0x50] sm:$0xff] }
 0x7e1   :  { %4155 = vmatmul.mubr.bf16.vlgmr.msra.gmra.mrb[48].mxu1 %v9251_v56  ;;  %4284 = vmatmul.mubr.bf16.vlgmr.msra.gmra.mrb[20].mxu0 %v9251_v56 }
 0x7e2   :  { %4166 = vmatpush1.bf16.msra.mxu1 %v3977_v12  ;;  %4197 = vmatprep.mubr.bf16.mxu1 %v9259_v61  ;;  %v4034_v12 = vunpack.c.h.s8.bf16 %v3764_v24  ;;  %v3645_v24 = vld [vmem:[#allocation10 + $0x20] sm:$0xff] }
 0x7e3   :  { %4295 = vmatpush1.bf16.msra.mxu0 %v3979_v38  ;;  %4326 = vmatprep.mubr.bf16.mxu0 %v9259_v61  ;;  %v3768_v38 = vld [vmem:[#allocation10 + $0x3f8] sm:$0xff] }
 0x7e4   :  { %4167 = vmatprep.subr.bf16.mxu1 %v3984_v18  ;;  %4296 = vmatprep.subr.bf16.mxu0 %v3986_v8  ;;  %v3770_v18 = vld [vmem:[#allocation10 + $0x408] sm:$0xff]  ;;  %v4031_v8 = vunpack.c.h.s8.bf16 %v3761_v23  ;;  %v4038_v62 = vunpack.c.l.s8.bf16 %v3768_v38  ;;  %v4044_v1 = vunpack.c.h.s8.bf16 %v3768_v38  ;;  %v3795_v23 = vunpack.c.h.s8.bf16 %v3645_v24 }
 0x7e6   :  { %4168 = vmatpush1.bf16.msra.mxu1 %v3983_v47  ;;  %v3767_v47 = vld [vmem:[#allocation10 + $0x3f0] sm:$0xff] }
 0x7e7   :  { %4297 = vmatpush1.bf16.msra.mxu0 %v3985_v49  ;;  %4169 = vmatprep.subr.bf16.mxu1 %v3990_v25  ;;  %v4040_v49 = vunpack.c.l.s8.bf16 %v3770_v18  ;;  %v3769_v25 = vld [vmem:[#allocation10 + $0x400] sm:$0xff]  ;;  %v4037_v51 = vunpack.c.l.s8.bf16 %v3767_v47 }
 0x7e8   :  { %4298 = vmatprep.subr.bf16.mxu0 %v3992_v63  ;;  %v4039_v63 = vunpack.c.l.s8.bf16 %v3769_v25  ;;  %v4045_v31 = vunpack.c.h.s8.bf16 %v3769_v25 }
 0x7ea   :  { %4170 = vmatpush1.bf16.msra.mxu1 %v3989_v39  ;;  %v4046_v39 = vunpack.c.h.s8.bf16 %v3770_v18  ;;  %v3657_v18 = vld [vmem:[#allocation10 + $0x80] sm:$0xff] }
 0x7eb   :  { %4299 = vmatpush1.bf16.msra.mxu0 %v3991_v37  ;;  %4171 = vmatprep.subr.bf16.mxu1 %v3996_v22  ;;  %v3774_v37 = vld [vmem:[#allocation10 + $0x428] sm:$0xff]  ;;  %v3776_v22 = vld [vmem:[#allocation10 + $0x438] sm:$0xff] }
 0x7ec   :  { %4300 = vmatprep.subr.bf16.mxu0 %v3998_v17  ;;  %v4043_v17 = vunpack.c.h.s8.bf16 %v3767_v47  ;;  %v4050_v27 = vunpack.c.l.s8.bf16 %v3774_v37  ;;  %v4056_v34 = vunpack.c.h.s8.bf16 %v3774_v37  ;;  %v3669_v37 = vld [vmem:[#allocation10 + $0xe0] sm:$0xff] }
 0x7ee   :  { %4172 = vmatpush1.bf16.msra.mxu1 %v3995_v40  ;;  %v3773_v40 = vld [vmem:[#allocation10 + $0x420] sm:$0xff] }
 0x7ef   :  { %4301 = vmatpush1.bf16.msra.mxu0 %v3997_v45  ;;  %4173 = vmatprep.subr.bf16.mxu1 %v4002_v15  ;;  %v4052_v45 = vunpack.c.l.s8.bf16 %v3776_v22  ;;  %v3775_v15 = vld [vmem:[#allocation10 + $0x430] sm:$0xff]  ;;  %v4049_v54 = vunpack.c.l.s8.bf16 %v3773_v40 }
 0x7f0   :  { %4302 = vmatprep.subr.bf16.mxu0 %v4004_v41  ;;  %v4051_v41 = vunpack.c.l.s8.bf16 %v3775_v15  ;;  %v4057_v19 = vunpack.c.h.s8.bf16 %v3775_v15 }
 0x7f2   :  { %4174 = vmatpush1.bf16.msra.mxu1 %v4001_v57  ;;  %v4058_v57 = vunpack.c.h.s8.bf16 %v3776_v22  ;;  %v3837_v22 = vunpack.c.l.s8.bf16 %v3669_v37 }
 0x7f3   :  { %4303 = vmatpush1.bf16.msra.mxu0 %v4003_v16  ;;  %4175 = vmatprep.subr.bf16.mxu1 %v4008_v4  ;;  %v3780_v16 = vld [vmem:[#allocation10 + $0x458] sm:$0xff]  ;;  %v3782_v4 = vld [vmem:[#allocation10 + $0x468] sm:$0xff] }
 0x7f4   :  { %4304 = vmatprep.subr.bf16.mxu0 %v4010_v44  ;;  %v4055_v44 = vunpack.c.h.s8.bf16 %v3773_v40  ;;  %v4062_v0 = vunpack.c.l.s8.bf16 %v3780_v16  ;;  %v4068_v9 = vunpack.c.h.s8.bf16 %v3780_v16  ;;  %v3681_v16 = vld [vmem:[#allocation10 + $0x140] sm:$0xff] }
 0x7f6   :  { %4176 = vmatpush1.bf16.msra.mxu1 %v4007_v28  ;;  %v3779_v28 = vld [vmem:[#allocation10 + $0x450] sm:$0xff] }
 0x7f7   :  { %4305 = vmatpush1.bf16.msra.mxu0 %v4009_v5  ;;  %4177 = vmatprep.subr.bf16.mxu1 %v4014_v53  ;;  %v4064_v5 = vunpack.c.l.s8.bf16 %v3782_v4  ;;  %v3781_v53 = vld [vmem:[#allocation10 + $0x460] sm:$0xff]  ;;  %v4061_v6 = vunpack.c.l.s8.bf16 %v3779_v28 }
 0x7f8   :  { %4306 = vmatprep.subr.bf16.mxu0 %v4016_v7  ;;  %v4063_v7 = vunpack.c.l.s8.bf16 %v3781_v53 }
 0x7fa   :  { %4178 = vmatpush1.bf16.msra.mxu1 %v4013_v46  ;;  %v4070_v46 = vunpack.c.h.s8.bf16 %v3782_v4  ;;  %v3861_v4 = vunpack.c.l.s8.bf16 %v3681_v16 }
 0x7fb   :  { %4307 = vmatpush1.bf16.msra.mxu0 %v4015_v35  ;;  %4179 = vmatprep.subr.bf16.mxu1 %v4020_v20  ;;  %v3646_v35 = vld [vmem:[#allocation10 + $0x28] sm:$0xff]  ;;  %v4067_v20 = vunpack.c.h.s8.bf16 %v3779_v28 }
 0x7fc   :  { %4308 = vmatprep.subr.bf16.mxu0 %v4022_v21  ;;  %v4069_v21 = vunpack.c.h.s8.bf16 %v3781_v53  ;;  %v3790_v11 = vunpack.c.l.s8.bf16 %v3646_v35 }
 0x7fe   :  { %4180 = vmatpush1.bf16.msra.mxu1 %v4019_v50  ;;  %v3789_v50 = vunpack.c.l.s8.bf16 %v3645_v24 }
 0x7ff   :  { %4309 = vmatpush1.bf16.msra.mxu0 %v4021_v29  ;;  %4181 = vmatprep.subr.bf16.mxu1 %v4026_v2  ;;  %v3796_v29 = vunpack.c.h.s8.bf16 %v3646_v35  ;;  %v3652_v2 = vld [vmem:[#allocation10 + $0x58] sm:$0xff]  ;;  %v3693_v35 = vld [vmem:[#allocation10 + $0x1a0] sm:$0xff] }
 0x800   :  { %4310 = vmatprep.subr.bf16.mxu0 %v4028_v13  ;;  %v3802_v13 = vunpack.c.l.s8.bf16 %v3652_v2  ;;  %v3891_v24 = vunpack.c.h.s8.bf16 %v3693_v35 }
 0x802   :  { %4182 = vmatpush1.bf16.msra.mxu1 %v4025_v10  ;;  %v3801_v10 = vunpack.c.l.s8.bf16 %v3651_v32 }
 0x803   :  { %4311 = vmatpush1.bf16.msra.mxu0 %v4027_v52  ;;  %4183 = vmatprep.subr.bf16.mxu1 %v4032_v59  ;;  %v3808_v52 = vunpack.c.h.s8.bf16 %v3652_v2  ;;  %v3658_v59 = vld [vmem:[#allocation10 + $0x88] sm:$0xff] }
 0x804   :  { %4312 = vmatprep.subr.bf16.mxu0 %v4034_v12  ;;  %v3807_v12 = vunpack.c.h.s8.bf16 %v3651_v32  ;;  %v3814_v38 = vunpack.c.l.s8.bf16 %v3658_v59 }
 0x806   :  { %4184 = vmatpush1.bf16.msra.mxu1 %v4031_v8  ;;  %v3813_v8 = vunpack.c.l.s8.bf16 %v3657_v18 }
 0x807   :  { %4313 = vmatpush1.bf16.msra.mxu0 %v4033_v43  ;;  %4185 = vmatprep.subr.bf16.mxu1 %v4038_v62  ;;  %v3820_v43 = vunpack.c.h.s8.bf16 %v3658_v59  ;;  %v3664_v62 = vld [vmem:[#allocation10 + $0xb8] sm:$0xff] }
 0x808   :  { %4314 = vmatprep.subr.bf16.mxu0 %v4040_v49  ;;  %v3826_v47 = vunpack.c.l.s8.bf16 %v3664_v62  ;;  %v3663_v49 = vld [vmem:[#allocation10 + $0xb0] sm:$0xff] }
 0x809   :  { %v3825_v25 = vunpack.c.l.s8.bf16 %v3663_v49 }
 0x80a   :  { %4186 = vmatpush1.bf16.msra.mxu1 %v4037_v51  ;;  %v3832_v51 = vunpack.c.h.s8.bf16 %v3664_v62  ;;  %v3718_v62 = vld [vmem:[#allocation10 + $0x268] sm:$0xff] }
 0x80b   :  { %4315 = vmatpush1.bf16.msra.mxu0 %v4039_v63  ;;  %4187 = vmatprep.subr.bf16.mxu1 %v4044_v1  ;;  %v3670_v63 = vld [vmem:[#allocation10 + $0xe8] sm:$0xff]  ;;  %v3831_v1 = vunpack.c.h.s8.bf16 %v3663_v49  ;;  %v3717_v49 = vld [vmem:[#allocation10 + $0x260] sm:$0xff] }
 0x80c   :  { %4316 = vmatprep.subr.bf16.mxu0 %v4046_v39  ;;  %v3838_v39 = vunpack.c.l.s8.bf16 %v3670_v63 }
 0x80e   :  { %4188 = vmatpush1.bf16.msra.mxu1 %v4043_v17  ;;  %v3844_v17 = vunpack.c.h.s8.bf16 %v3670_v63  ;;  %v3724_v63 = vld [vmem:[#allocation10 + $0x298] sm:$0xff] }
 0x80f   :  { %4317 = vmatpush1.bf16.msra.mxu0 %v4045_v31  ;;  %4189 = vmatprep.subr.bf16.mxu1 %v4050_v27  ;;  %v3676_v31 = vld [vmem:[#allocation10 + $0x118] sm:$0xff]  ;;  %v3843_v27 = vunpack.c.h.s8.bf16 %v3669_v37  ;;  %v3723_v37 = vld [vmem:[#allocation10 + $0x290] sm:$0xff] }
 0x810   :  { %4318 = vmatprep.subr.bf16.mxu0 %v4052_v45  ;;  %v3850_v40 = vunpack.c.l.s8.bf16 %v3676_v31  ;;  %v3675_v45 = vld [vmem:[#allocation10 + $0x110] sm:$0xff] }
 0x811   :  { %v3849_v15 = vunpack.c.l.s8.bf16 %v3675_v45 }
 0x812   :  { %4190 = vmatpush1.bf16.msra.mxu1 %v4049_v54  ;;  %v3856_v54 = vunpack.c.h.s8.bf16 %v3676_v31  ;;  %v3730_v31 = vld [vmem:[#allocation10 + $0x2c8] sm:$0xff] }
 0x813   :  { %4319 = vmatpush1.bf16.msra.mxu0 %v4051_v41  ;;  %4191 = vmatprep.subr.bf16.mxu1 %v4056_v34  ;;  %v3682_v41 = vld [vmem:[#allocation10 + $0x148] sm:$0xff]  ;;  %v3855_v34 = vunpack.c.h.s8.bf16 %v3675_v45  ;;  %v3729_v45 = vld [vmem:[#allocation10 + $0x2c0] sm:$0xff] }
 0x814   :  { %4320 = vmatprep.subr.bf16.mxu0 %v4058_v57  ;;  %v3862_v57 = vunpack.c.l.s8.bf16 %v3682_v41 }
 0x816   :  { %4192 = vmatpush1.bf16.msra.mxu1 %v4055_v44  ;;  %v3868_v44 = vunpack.c.h.s8.bf16 %v3682_v41  ;;  %v3736_v41 = vld [vmem:[#allocation10 + $0x2f8] sm:$0xff] }
 0x817   :  { %4321 = vmatpush1.bf16.msra.mxu0 %v4057_v19  ;;  %4193 = vmatprep.subr.bf16.mxu1 %v4062_v0  ;;  %v3688_v19 = vld [vmem:[#allocation10 + $0x178] sm:$0xff]  ;;  %v3867_v0 = vunpack.c.h.s8.bf16 %v3681_v16  ;;  %v3735_v16 = vld [vmem:[#allocation10 + $0x2f0] sm:$0xff] }
 0x818   :  { %4322 = vmatprep.subr.bf16.mxu0 %v4064_v5  ;;  %v3874_v28 = vunpack.c.l.s8.bf16 %v3688_v19  ;;  %v3687_v5 = vld [vmem:[#allocation10 + $0x170] sm:$0xff] }
 0x819   :  { %v3873_v53 = vunpack.c.l.s8.bf16 %v3687_v5 }
 0x81a   :  { %4194 = vmatpush1.bf16.msra.mxu1 %v4061_v6  ;;  %v3880_v6 = vunpack.c.h.s8.bf16 %v3688_v19  ;;  %v3742_v19 = vld [vmem:[#allocation10 + $0x328] sm:$0xff] }
 0x81b   :  { %4323 = vmatpush1.bf16.msra.mxu0 %v4063_v7  ;;  %4195 = vmatprep.subr.bf16.mxu1 %v4068_v9  ;;  %v3694_v7 = vld [vmem:[#allocation10 + $0x1a8] sm:$0xff]  ;;  %v3879_v9 = vunpack.c.h.s8.bf16 %v3687_v5  ;;  %v3741_v5 = vld [vmem:[#allocation10 + $0x320] sm:$0xff] }
 0x81c   :  { %4324 = vmatprep.subr.bf16.mxu0 %v4070_v46  ;;  %v3886_v46 = vunpack.c.l.s8.bf16 %v3694_v7 }
 0x81e   :  { %4196 = vmatpush1.bf16.msra.mxu1 %v4067_v20  ;;  %v3885_v20 = vunpack.c.l.s8.bf16 %v3693_v35  ;;  %v3747_v35 = vld [vmem:[#allocation10 + $0x350] sm:$0xff] }
 0x81f   :  { %4325 = vmatpush1.bf16.msra.mxu0 %v4069_v21  ;;  %4337 = vmatprep.subr.bf16.mxu1 %v3790_v11  ;;  %v3892_v21 = vunpack.c.h.s8.bf16 %v3694_v7  ;;  %v3700_v11 = vld [vmem:[#allocation10 + $0x1d8] sm:$0xff] }
 0x820   :  { %v3748_v7 = vld [vmem:[#allocation10 + $0x358] sm:$0xff] }
 0x821   :  { %4198 = vmatmul.mubr.bf16.vlgmr.msra.gmra.mrb[48].mxu1 %v9257_v36 }
 0x822   :  { %4327 = vmatmul.mubr.bf16.vlgmr.msra.gmra.mrb[20].mxu0 %v9257_v36  ;;  %4338 = vmatpush1.bf16.msra.mxu1 %v3789_v50  ;;  %v3898_v50 = vunpack.c.l.s8.bf16 %v3700_v11 }
 0x823   :  { %4369 = vmatprep.mubr.bf16.mxu1 %v9245_v42  ;;  %4339 = vmatprep.subr.bf16.mxu1 %v3796_v29  ;;  %v3819_v42 = vunpack.c.h.s8.bf16 %v3657_v18  ;;  %v3699_v29 = vld [vmem:[#allocation10 + $0x1d0] sm:$0xff] }
 0x824   :  { %v3897_v2 = vunpack.c.l.s8.bf16 %v3699_v29  ;;  %v3903_v32 = vunpack.c.h.s8.bf16 %v3699_v29  ;;  %v3711_v18 = vld [vmem:[#allocation10 + $0x230] sm:$0xff]  ;;  %v3753_v29 = vld [vmem:[#allocation10 + $0x380] sm:$0xff] }
 0x826   :  { %4340 = vmatpush1.bf16.msra.mxu1 %v3795_v23  ;;  %v3904_v23 = vunpack.c.h.s8.bf16 %v3700_v11  ;;  %v3754_v11 = vld [vmem:[#allocation10 + $0x388] sm:$0xff] }
 0x827   :  { %4341 = vmatprep.subr.bf16.mxu1 %v3802_v13  ;;  %v3706_v13 = vld [vmem:[#allocation10 + $0x208] sm:$0xff] }
 0x82a   :  { %4342 = vmatpush1.bf16.msra.mxu1 %v3801_v10  ;;  %v3910_v10 = vunpack.c.l.s8.bf16 %v3706_v13 }
 0x82b   :  { %4343 = vmatprep.subr.bf16.mxu1 %v3808_v52  ;;  %v3705_v52 = vld [vmem:[#allocation10 + $0x200] sm:$0xff] }
 0x82c   :  { %v3909_v59 = vunpack.c.l.s8.bf16 %v3705_v52 }
 0x82e   :  { %4344 = vmatpush1.bf16.msra.mxu1 %v3807_v12  ;;  %v3712_v12 = vld [vmem:[#allocation10 + $0x238] sm:$0xff] }
 0x82f   :  { %4345 = vmatprep.subr.bf16.mxu1 %v3814_v38  ;;  %v3922_v38 = vunpack.c.l.s8.bf16 %v3712_v12 }
 0x832   :  { %4346 = vmatpush1.bf16.msra.mxu1 %v3813_v8  ;;  %v3921_v8 = vunpack.c.l.s8.bf16 %v3711_v18 }
 0x833   :  { %4347 = vmatprep.subr.bf16.mxu1 %v3820_v43  ;;  %v3928_v43 = vunpack.c.h.s8.bf16 %v3712_v12 }
 0x836   :  { %4348 = vmatpush1.bf16.msra.mxu1 %v3819_v42  ;;  %v3927_v42 = vunpack.c.h.s8.bf16 %v3711_v18 }
 0x837   :  { %4349 = vmatprep.subr.bf16.mxu1 %v3826_v47  ;;  %v3934_v47 = vunpack.c.l.s8.bf16 %v3718_v62 }
 0x83a   :  { %4350 = vmatpush1.bf16.msra.mxu1 %v3825_v25  ;;  %v3933_v25 = vunpack.c.l.s8.bf16 %v3717_v49 }
 0x83b   :  { %4351 = vmatprep.subr.bf16.mxu1 %v3832_v51  ;;  %v3940_v51 = vunpack.c.h.s8.bf16 %v3718_v62 }
 0x83e   :  { %4352 = vmatpush1.bf16.msra.mxu1 %v3831_v1  ;;  %v3939_v1 = vunpack.c.h.s8.bf16 %v3717_v49 }
 0x83f   :  { %4353 = vmatprep.subr.bf16.mxu1 %v3838_v39  ;;  %v3946_v39 = vunpack.c.l.s8.bf16 %v3724_v63 }
 0x842   :  { %4354 = vmatpush1.bf16.msra.mxu1 %v3837_v22  ;;  %v3945_v22 = vunpack.c.l.s8.bf16 %v3723_v37 }
 0x843   :  { %4355 = vmatprep.subr.bf16.mxu1 %v3844_v17  ;;  %v3952_v17 = vunpack.c.h.s8.bf16 %v3724_v63 }
 0x846   :  { %4356 = vmatpush1.bf16.msra.mxu1 %v3843_v27  ;;  %v3951_v27 = vunpack.c.h.s8.bf16 %v3723_v37 }
 0x847   :  { %4357 = vmatprep.subr.bf16.mxu1 %v3850_v40  ;;  %v3958_v40 = vunpack.c.l.s8.bf16 %v3730_v31 }
 0x84a   :  { %4358 = vmatpush1.bf16.msra.mxu1 %v3849_v15  ;;  %v3957_v15 = vunpack.c.l.s8.bf16 %v3729_v45 }
 0x84b   :  { %4359 = vmatprep.subr.bf16.mxu1 %v3856_v54  ;;  %v3964_v54 = vunpack.c.h.s8.bf16 %v3730_v31 }
 0x84e   :  { %4360 = vmatpush1.bf16.msra.mxu1 %v3855_v34  ;;  %v3963_v34 = vunpack.c.h.s8.bf16 %v3729_v45 }
 0x84f   :  { %4361 = vmatprep.subr.bf16.mxu1 %v3862_v57  ;;  %v3970_v57 = vunpack.c.l.s8.bf16 %v3736_v41 }
 0x852   :  { %4362 = vmatpush1.bf16.msra.mxu1 %v3861_v4  ;;  %v3969_v4 = vunpack.c.l.s8.bf16 %v3735_v16 }
 0x853   :  { %4363 = vmatprep.subr.bf16.mxu1 %v3868_v44  ;;  %v3976_v44 = vunpack.c.h.s8.bf16 %v3736_v41 }
 0x856   :  { %4364 = vmatpush1.bf16.msra.mxu1 %v3867_v0  ;;  %v3975_v0 = vunpack.c.h.s8.bf16 %v3735_v16 }
 0x857   :  { %4365 = vmatprep.subr.bf16.mxu1 %v3874_v28  ;;  %v3982_v28 = vunpack.c.l.s8.bf16 %v3742_v19 }
 0x85a   :  { %4366 = vmatpush1.bf16.msra.mxu1 %v3873_v53  ;;  %v3981_v53 = vunpack.c.l.s8.bf16 %v3741_v5 }
 0x85b   :  { %4367 = vmatprep.subr.bf16.mxu1 %v3880_v6  ;;  %v3988_v6 = vunpack.c.h.s8.bf16 %v3742_v19 }
 0x85e   :  { %4368 = vmatpush1.bf16.msra.mxu1 %v3879_v9  ;;  %v3987_v9 = vunpack.c.h.s8.bf16 %v3741_v5 }
 0x85f   :  { %4380 = vmatprep.subr.bf16.mxu1 %v3886_v46  ;;  %v3994_v46 = vunpack.c.l.s8.bf16 %v3748_v7 }
 0x861   :  { %4370 = vmatmul.mubr.bf16.vlgmr.msra.gmra.mrb[52].mxu1 %v9243_v30  ;;  %v3916_v30 = vunpack.c.h.s8.bf16 %v3706_v13 }
 0x862   :  { %4381 = vmatpush1.bf16.msra.mxu1 %v3885_v20  ;;  %4412 = vmatprep.mubr.bf16.mxu1 %v9253_v60  ;;  %v3915_v60 = vunpack.c.h.s8.bf16 %v3705_v52  ;;  %v3993_v20 = vunpack.c.l.s8.bf16 %v3747_v35 }
 0x863   :  { %4382 = vmatprep.subr.bf16.mxu1 %v3892_v21  ;;  %v4000_v21 = vunpack.c.h.s8.bf16 %v3748_v7 }
 0x866   :  { %4383 = vmatpush1.bf16.msra.mxu1 %v3891_v24  ;;  %v3999_v24 = vunpack.c.h.s8.bf16 %v3747_v35  ;;  %v8075_v35 = vld [vmem:[#allocation5 + $0x18] sm:$0xff] }
 0x867   :  { %4384 = vmatprep.subr.bf16.mxu1 %v3898_v50  ;;  %v4006_v50 = vunpack.c.l.s8.bf16 %v3754_v11 }
 0x86a   :  { %4385 = vmatpush1.bf16.msra.mxu1 %v3897_v2  ;;  %v4005_v2 = vunpack.c.l.s8.bf16 %v3753_v29 }
 0x86b   :  { %4386 = vmatprep.subr.bf16.mxu1 %v3904_v23  ;;  %v3760_v23 = vld [vmem:[#allocation10 + $0x3b8] sm:$0xff] }
 0x86c   :  { %v4018_v13 = vunpack.c.l.s8.bf16 %v3760_v23  ;;  %v4024_v52 = vunpack.c.h.s8.bf16 %v3760_v23 }
 0x86e   :  { %4387 = vmatpush1.bf16.msra.mxu1 %v3903_v32  ;;  %v3759_v32 = vld [vmem:[#allocation10 + $0x3b0] sm:$0xff] }
 0x86f   :  { %4388 = vmatprep.subr.bf16.mxu1 %v3910_v10  ;;  %v4017_v10 = vunpack.c.l.s8.bf16 %v3759_v32 }
 0x872   :  { %4389 = vmatpush1.bf16.msra.mxu1 %v3909_v59  ;;  %v3766_v59 = vld [vmem:[#allocation10 + $0x3e8] sm:$0xff] }
 0x873   :  { %4390 = vmatprep.subr.bf16.mxu1 %v3916_v30  ;;  %v4023_v30 = vunpack.c.h.s8.bf16 %v3759_v32  ;;  %v4030_v12 = vunpack.c.l.s8.bf16 %v3766_v59  ;;  %v4036_v18 = vunpack.c.h.s8.bf16 %v3766_v59 }
 0x876   :  { %4391 = vmatpush1.bf16.msra.mxu1 %v3915_v60  ;;  %v3765_v60 = vld [vmem:[#allocation10 + $0x3e0] sm:$0xff] }
 0x877   :  { %4392 = vmatprep.subr.bf16.mxu1 %v3922_v38  ;;  %v4029_v38 = vunpack.c.l.s8.bf16 %v3765_v60 }
 0x87a   :  { %4393 = vmatpush1.bf16.msra.mxu1 %v3921_v8  ;;  %v3772_v8 = vld [vmem:[#allocation10 + $0x418] sm:$0xff] }
 0x87b   :  { %4394 = vmatprep.subr.bf16.mxu1 %v3928_v43  ;;  %v4035_v43 = vunpack.c.h.s8.bf16 %v3765_v60  ;;  %v4042_v62 = vunpack.c.l.s8.bf16 %v3772_v8  ;;  %v4048_v49 = vunpack.c.h.s8.bf16 %v3772_v8 }
 0x87e   :  { %4395 = vmatpush1.bf16.msra.mxu1 %v3927_v42  ;;  %v3771_v42 = vld [vmem:[#allocation10 + $0x410] sm:$0xff] }
 0x87f   :  { %4396 = vmatprep.subr.bf16.mxu1 %v3934_v47  ;;  %v4041_v47 = vunpack.c.l.s8.bf16 %v3771_v42 }
 0x882   :  { %4397 = vmatpush1.bf16.msra.mxu1 %v3933_v25  ;;  %v3778_v25 = vld [vmem:[#allocation10 + $0x448] sm:$0xff] }
 0x883   :  { %4398 = vmatprep.subr.bf16.mxu1 %v3940_v51  ;;  %v4047_v51 = vunpack.c.h.s8.bf16 %v3771_v42  ;;  %v4054_v63 = vunpack.c.l.s8.bf16 %v3778_v25  ;;  %v4060_v37 = vunpack.c.h.s8.bf16 %v3778_v25  ;;  %v8078_v25 = vld [vmem:[#allocation5 + $0x10] sm:$0xff] }
 0x886   :  { %4399 = vmatpush1.bf16.msra.mxu1 %v3939_v1  ;;  %v3777_v1 = vld [vmem:[#allocation10 + $0x440] sm:$0xff] }
 0x887   :  { %4400 = vmatprep.subr.bf16.mxu1 %v3946_v39  ;;  %v4053_v39 = vunpack.c.l.s8.bf16 %v3777_v1 }
 0x88a   :  { %4401 = vmatpush1.bf16.msra.mxu1 %v3945_v22  ;;  %v3784_v22 = vld [vmem:[#allocation10 + $0x478] sm:$0xff] }
 0x88b   :  { %4402 = vmatprep.subr.bf16.mxu1 %v3952_v17  ;;  %v4059_v17 = vunpack.c.h.s8.bf16 %v3777_v1  ;;  %v4066_v31 = vunpack.c.l.s8.bf16 %v3784_v22  ;;  %v4072_v45 = vunpack.c.h.s8.bf16 %v3784_v22  ;;  %v295_v1 = vunpack.c.h.bf16 %v8078_v25 }
 0x88e   :  { %4403 = vmatpush1.bf16.msra.mxu1 %v3951_v27  ;;  %v3783_v27 = vld [vmem:[#allocation10 + $0x470] sm:$0xff] }
 0x88f   :  { %4404 = vmatprep.subr.bf16.mxu1 %v3958_v40  ;;  %v4065_v40 = vunpack.c.l.s8.bf16 %v3783_v27 }
 0x892   :  { %4405 = vmatpush1.bf16.msra.mxu1 %v3957_v15  ;;  %v4071_v15 = vunpack.c.h.s8.bf16 %v3783_v27 }
 0x893   :  { %4406 = vmatprep.subr.bf16.mxu1 %v3964_v54 }
 0x896   :  { %4407 = vmatpush1.bf16.msra.mxu1 %v3963_v34 }
 0x897   :  { %4408 = vmatprep.subr.bf16.mxu1 %v3970_v57 }
 0x89a   :  { %4409 = vmatpush1.bf16.msra.mxu1 %v3969_v4 }
 0x89b   :  { %4410 = vmatprep.subr.bf16.mxu1 %v3976_v44 }
 0x89e   :  { %4411 = vmatpush1.bf16.msra.mxu1 %v3975_v0  ;;  %v4466_v0 = vld [vmem:[#allocation11] sm:$0x3f] }
 0x89f   :  { %4423 = vmatprep.subr.bf16.mxu1 %v3982_v28  ;;  %v4471_v28 = vrot.slane %v4466_v0, %v9056_v55  ;;  %v4475_v5 = vrot.slane %v4466_v0, %v9034_v14  ;;  %v4487_v8 = vrot.slane %v4466_v0, %v9127_v26 }
 0x8a1   :  { %4413 = vmatmul.mubr.bf16.vlgmr.msra.gmra.mrb[52].mxu1 %v9251_v56  ;;  %v4012_v56 = vunpack.c.h.s8.bf16 %v3754_v11  ;;  %v297_v11 = vunpack.c.h.bf16 %v8075_v35 }
 0x8a2   :  { %4424 = vmatpush1.bf16.msra.mxu1 %v3981_v53  ;;  %4455 = vmatprep.mubr.bf16.mxu1 %v9259_v61  ;;  %v4011_v61 = vunpack.c.h.s8.bf16 %v3753_v29  ;;  %v8074_v53 = vld [vmem:[#allocation5] sm:$0xff] }
 0x8a3   :  { %4425 = vmatprep.subr.bf16.mxu1 %v3988_v6  ;;  %v290_v6 = vunpack.c.l.bf16 %v8074_v53 }
 0x8a6   :  { %4426 = vmatpush1.bf16.msra.mxu1 %v3987_v9  ;;  %v291_v9 = vunpack.c.h.bf16 %v8074_v53 }
 0x8a7   :  { %4427 = vmatprep.subr.bf16.mxu1 %v3994_v46 }
 0x8aa   :  { %4428 = vmatpush1.bf16.msra.mxu1 %v3993_v20  ;;  %v296_v20 = vunpack.c.l.bf16 %v8075_v35 }
 0x8ab   :  { %4429 = vmatprep.subr.bf16.mxu1 %v4000_v21 }
 0x8ae   :  { %4430 = vmatpush1.bf16.msra.mxu1 %v3999_v24 }
 0x8af   :  { %4431 = vmatprep.subr.bf16.mxu1 %v4006_v50 }
 0x8b2   :  { %4432 = vmatpush1.bf16.msra.mxu1 %v4005_v2  ;;  %v4483_v2 = vrot.slane %v4466_v0, %v9059_v58 }
 0x8b3   :  { %4433 = vmatprep.subr.bf16.mxu1 %v4012_v56  ;;  %v8076_v56 = vld [vmem:[#allocation5 + $0x8] sm:$0xff] }
 0x8b4   :  { %v292_v23 = vunpack.c.l.bf16 %v8076_v56 }
 0x8b6   :  { %4434 = vmatpush1.bf16.msra.mxu1 %v4011_v61 }
 0x8b7   :  { %4435 = vmatprep.subr.bf16.mxu1 %v4018_v13 }
 0x8ba   :  { %4436 = vmatpush1.bf16.msra.mxu1 %v4017_v10 }
 0x8bb   :  { %4437 = vmatprep.subr.bf16.mxu1 %v4024_v52  ;;  %v8077_v52 = vld [vmem:[#allocation5 + $0x20] sm:$0xff] }
 0x8bc   :  { %v298_v59 = vunpack.c.l.bf16 %v8077_v52 }
 0x8be   :  { %4438 = vmatpush1.bf16.msra.mxu1 %v4023_v30 }
 0x8bf   :  { %4439 = vmatprep.subr.bf16.mxu1 %v4030_v12  ;;  %v293_v12 = vunpack.c.h.bf16 %v8076_v56 }
 0x8c2   :  { %4440 = vmatpush1.bf16.msra.mxu1 %v4029_v38 }
 0x8c3   :  { %4441 = vmatprep.subr.bf16.mxu1 %v4036_v18 }
 0x8c6   :  { %4442 = vmatpush1.bf16.msra.mxu1 %v4035_v43  ;;  %v299_v43 = vunpack.c.h.bf16 %v8077_v52 }
 0x8c7   :  { %4443 = vmatprep.subr.bf16.mxu1 %v4042_v62  ;;  %v4491_v62 = vrot.slane %v4466_v0, %v9096_v48 }
 0x8ca   :  { %4444 = vmatpush1.bf16.msra.mxu1 %v4041_v47 }
 0x8cb   :  { %4445 = vmatprep.subr.bf16.mxu1 %v4048_v49 }
 0x8ce   :  { %4446 = vmatpush1.bf16.msra.mxu1 %v4047_v51  ;;  %v294_v51 = vunpack.c.l.bf16 %v8078_v25 }
 0x8cf   :  { %4447 = vmatprep.subr.bf16.mxu1 %v4054_v63 }
 0x8d2   :  { %4448 = vmatpush1.bf16.msra.mxu1 %v4053_v39 }
 0x8d3   :  { %4449 = vmatprep.subr.bf16.mxu1 %v4060_v37 }
 0x8d6   :  { %4450 = vmatpush1.bf16.msra.mxu1 %v4059_v17 }
 0x8d7   :  { %4451 = vmatprep.subr.bf16.mxu1 %v4066_v31  ;;  %v8079_v31 = vld [vmem:[#allocation5 + $0x28] sm:$0xff] }
 0x8d8   :  { %v300_v27 = vunpack.c.l.bf16 %v8079_v31 }
 0x8da   :  { %4452 = vmatpush1.bf16.msra.mxu1 %v4065_v40 }
 0x8db   :  { %4453 = vmatprep.subr.bf16.mxu1 %v4072_v45 }
 0x8de   :  { %4454 = vmatpush1.bf16.msra.mxu1 %v4071_v15  ;;  %v301_v15 = vunpack.c.h.bf16 %v8079_v31 }
 0x8e1   :  { %4456 = vmatmul.mubr.bf16.vlgmr.msra.gmra.mrb[52].mxu1 %v9257_v36  ;;  %v4479_v36 = vrot.slane %v4466_v0, %v9093_v33 }
 0x8f4   :  { %v4199_v54 = vpop.f32.mrb[48].mxu1 }
 0x8f5   :  { %v4328_v41 = vpop.f32.mrb[20].mxu0  ;;  %v4201_v34 = vpop.f32.mrb[49].mxu1  ;;  %v4498_v7 = vmul.f32 %v4471_v28, %v4199_v54 }
 0x8f6   :  { %v4330_v57 = vpop.f32.mrb[21].mxu0  ;;  %v4203_v16 = vpop.f32.mrb[50].mxu1  ;;  %v4499_v46 = vmul.f32 %v4475_v5, %v4201_v34  ;;  %v4500_v61 = vmul.f32 %v4479_v36, %v4328_v41 }
 0x8f7   :  { %v4332_v4 = vpop.f32.mrb[22].mxu0  ;;  %v4205_v44 = vpop.f32.mrb[51].mxu1  ;;  %v4504_v21 = vmul.f32 %v4471_v28, %v4203_v16  ;;  %v9276_v50 = vadd.f32 %v4498_v7, %v290_v6  ;;  %v4501_v38 = vmul.f32 %v4483_v2, %v4330_v57 }
 0x8f8   :  { %v4334_v19 = vpop.f32.mrb[23].mxu0  ;;  %v4505_v24 = vmul.f32 %v4475_v5, %v4205_v44  ;;  %v9278_v29 = vadd.f32 %v4499_v46, %v291_v9  ;;  %v4506_v30 = vmul.f32 %v4479_v36, %v4332_v4  ;;  %v9287_v60 = vadd.f32 %v4500_v61, %v292_v23  ;;  %v4684_v9 = vld [vmem:[#allocation13 + $0x8] sm:$0xff]  ;;  %v4686_v46 = vld [vmem:[#allocation13 + $0x18] sm:$0xff]  ;;  %v4683_v36 = vld [vmem:[#allocation13] sm:$0xff] }
 0x8f9   :  { %v9281_v13 = vadd.f32 %v4504_v21, %v296_v20  ;;  %v4507_v49 = vmul.f32 %v4483_v2, %v4334_v19  ;;  %v9296_v39 = vadd.f32 %v4501_v38, %v293_v12  ;;  %v4828_v35 = vunpack.c.l.s8.bf16 %v4684_v9  ;;  %v4690_v23 = vld [vmem:[#allocation13 + $0x38] sm:$0xff]  ;;  %v4692_v61 = vld [vmem:[#allocation13 + $0x48] sm:$0xff]  ;;  %v4689_v12 = vld [vmem:[#allocation13 + $0x30] sm:$0xff] }
 0x8fa   :  { %v9283_v32 = vadd.f32 %v4505_v24, %v297_v11  ;;  %v4524_v10 = vadd.f32 %v9278_v29, %v9276_v50  ;;  %v9294_v47 = vadd.f32 %v4506_v30, %v298_v59  ;;  %v4830_v20 = vunpack.c.l.s8.bf16 %v4686_v46  ;;  %v4685_v11 = vld [vmem:[#allocation13 + $0x10] sm:$0xff]  ;;  %v4691_v38 = vld [vmem:[#allocation13 + $0x40] sm:$0xff] }
 0x8fb   :  { %v9300_v41 = vadd.f32 %v4507_v49, %v299_v43  ;;  %v4827_v21 = vunpack.c.l.s8.bf16 %v4683_v36  ;;  %v4834_v24 = vunpack.c.h.s8.bf16 %v4684_v9  ;;  %v4829_v2 = vunpack.c.l.s8.bf16 %v4685_v11  ;;  %5121 = vmatprep.subr.bf16.mxu0 %v4828_v35  ;;  %v4698_v49 = vld [vmem:[#allocation13 + $0x78] sm:$0xff] }
 0x8fc   :  { %v4531_v18 = vadd.f32 %v9283_v32, %v9281_v13  ;;  %v4525_v42 = vadd.f32 %v4524_v10, %v9287_v60  ;;  %v4836_v56 = vunpack.c.h.s8.bf16 %v4686_v46  ;;  %5250 = vmatprep.subr.bf16.mxu1 %v4830_v20  ;;  %v4833_v10 = vunpack.c.h.s8.bf16 %v4683_v36  ;;  %v4708_v46 = vld [vmem:[#allocation13 + $0xc8] sm:$0xff]  ;;  %v4710_v36 = vld [vmem:[#allocation13 + $0xd8] sm:$0xff] }
 0x8fd   :  { %5122 = vmatpush1.bf16.msra.mxu0 %v4827_v21  ;;  %5251 = vmatpush1.bf16.msra.mxu1 %v4829_v2  ;;  %v4835_v52 = vunpack.c.h.s8.bf16 %v4685_v11  ;;  %v4840_v59 = vunpack.c.l.s8.bf16 %v4690_v23  ;;  %v4842_v30 = vunpack.c.l.s8.bf16 %v4692_v61  ;;  %v4846_v43 = vunpack.c.h.s8.bf16 %v4690_v23  ;;  %v4709_v2 = vld [vmem:[#allocation13 + $0xd0] sm:$0xff] }
 0x8fe   :  { %v4532_v37 = vadd.f32 %v4531_v18, %v9294_v47  ;;  %v4526_v54 = vadd.f32 %v4525_v42, %v9296_v39  ;;  %5123 = vmatprep.subr.bf16.mxu0 %v4834_v24  ;;  %5252 = vmatprep.subr.bf16.mxu1 %v4836_v56  ;;  %v4839_v18 = vunpack.c.l.s8.bf16 %v4689_v12  ;;  %v4696_v42 = vld [vmem:[#allocation13 + $0x68] sm:$0xff]  ;;  %v4845_v25 = vunpack.c.h.s8.bf16 %v4689_v12  ;;  %v4707_v24 = vld [vmem:[#allocation13 + $0xc0] sm:$0xff] }
 0x8ff   :  { %v4876_v21 = vunpack.c.l.s8.bf16 %v4708_v46  ;;  %v4878_v11 = vunpack.c.l.s8.bf16 %v4710_v36  ;;  %v4875_v56 = vunpack.c.l.s8.bf16 %v4707_v24  ;;  %v4877_v23 = vunpack.c.l.s8.bf16 %v4709_v2 }
 0x900   :  { %v4533_v19 = vadd.f32 %v4532_v37, %v9300_v41  ;;  %v4695_v37 = vld [vmem:[#allocation13 + $0x60] sm:$0xff] }
 0x901   :  { %5124 = vmatpush1.bf16.msra.mxu0 %v4833_v10  ;;  %5253 = vmatpush1.bf16.msra.mxu1 %v4835_v52  ;;  %v4884_v10 = vunpack.c.h.s8.bf16 %v4710_v36  ;;  %v4881_v52 = vunpack.c.h.s8.bf16 %v4707_v24 }
 0x902   :  { %5125 = vmatprep.subr.bf16.mxu0 %v4840_v59  ;;  %5254 = vmatprep.subr.bf16.mxu1 %v4842_v30  ;;  %v4883_v59 = vunpack.c.h.s8.bf16 %v4709_v2  ;;  %v4720_v2 = vld [vmem:[#allocation13 + $0x128] sm:$0xff] }
 0x905   :  { %5126 = vmatpush1.bf16.msra.mxu0 %v4839_v18 }
 0x906   :  { %5127 = vmatprep.subr.bf16.mxu0 %v4846_v43 }
 0x909   :  { %5128 = vmatpush1.bf16.msra.mxu0 %v4845_v25 }
 0x9b4   :  { %v4457_v63 = vpop.f32.mrb[52].mxu1 }
 0x9b5   :  { %v4502_v22 = vmul.f32 %v4487_v8, %v4457_v63  ;;  %v4459_v17 = vpop.f32.mrb[53].mxu1  ;;  %v4852_v63 = vunpack.c.l.s8.bf16 %v4696_v42 }
 0x9b6   :  { %v4503_v40 = vmul.f32 %v4491_v62, %v4459_v17  ;;  %v4461_v45 = vpop.f32.mrb[54].mxu1  ;;  %v4851_v17 = vunpack.c.l.s8.bf16 %v4695_v37 }
 0x9b7   :  { %v9302_v34 = vadd.f32 %v4502_v22, %v294_v51  ;;  %v4508_v57 = vmul.f32 %v4487_v8, %v4461_v45  ;;  %v4463_v16 = vpop.f32.mrb[55].mxu1  ;;  %v4841_v8 = vunpack.c.l.s8.bf16 %v4691_v38  ;;  %v4847_v51 = vunpack.c.h.s8.bf16 %v4691_v38  ;;  %v4697_v22 = vld [vmem:[#allocation13 + $0x70] sm:$0xff]  ;;  %5129 = vmatprep.subr.bf16.mxu0 %v4852_v63  ;;  %v4702_v45 = vld [vmem:[#allocation13 + $0x98] sm:$0xff] }
 0x9b8   :  { %v9304_v4 = vadd.f32 %v4503_v40, %v295_v1  ;;  %v4509_v44 = vmul.f32 %v4491_v62, %v4463_v16  ;;  %v4848_v62 = vunpack.c.h.s8.bf16 %v4692_v61  ;;  %v4854_v1 = vunpack.c.l.s8.bf16 %v4698_v49  ;;  %5130 = vmatpush1.bf16.msra.mxu0 %v4851_v17 }
 0x9b9   :  { %v9307_v0 = vadd.f32 %v4508_v57, %v300_v27  ;;  %v4527_v28 = vadd.f32 %v4526_v54, %v9302_v34  ;;  %5255 = vmatpush1.bf16.msra.mxu1 %v4841_v8  ;;  %v4853_v31 = vunpack.c.l.s8.bf16 %v4697_v22  ;;  %v4858_v27 = vunpack.c.h.s8.bf16 %v4696_v42 }
 0x9ba   :  { %v9310_v5 = vadd.f32 %v4509_v44, %v301_v15  ;;  %5256 = vmatprep.subr.bf16.mxu1 %v4848_v62  ;;  %v4860_v40 = vunpack.c.h.s8.bf16 %v4698_v49  ;;  %v4704_v15 = vld [vmem:[#allocation13 + $0xa8] sm:$0xff]  ;;  %v4857_v54 = vunpack.c.h.s8.bf16 %v4695_v37  ;;  %v4859_v57 = vunpack.c.h.s8.bf16 %v4697_v22 }
 0x9bb   :  { %v4528_v53 = vadd.f32 %v4527_v28, %v9304_v4  ;;  %v4534_v6 = vadd.f32 %v4533_v19, %v9307_v0  ;;  %5131 = vmatprep.subr.bf16.mxu0 %v4858_v27  ;;  %v4864_v16 = vunpack.c.l.s8.bf16 %v4702_v45  ;;  %v4866_v44 = vunpack.c.l.s8.bf16 %v4704_v15  ;;  %v4701_v19 = vld [vmem:[#allocation13 + $0x90] sm:$0xff]  ;;  %v4703_v28 = vld [vmem:[#allocation13 + $0xa0] sm:$0xff] }
 0x9bc   :  { %5132 = vmatpush1.bf16.msra.mxu0 %v4857_v54  ;;  %v4872_v9 = vunpack.c.h.s8.bf16 %v4704_v15  ;;  %v4869_v35 = vunpack.c.h.s8.bf16 %v4701_v19  ;;  %v4871_v20 = vunpack.c.h.s8.bf16 %v4703_v28  ;;  %v4882_v61 = vunpack.c.h.s8.bf16 %v4708_v46  ;;  %v4715_v46 = vld [vmem:[#allocation13 + $0x100] sm:$0xff] }
 0x9bd   :  { %4529 = vadd.xlane.f32.xlu0 %v4528_v53  ;;  %v4535_v7 = vadd.f32 %v4534_v6, %v9310_v5  ;;  %5257 = vmatpush1.bf16.msra.mxu1 %v4847_v51  ;;  %v4863_v53 = vunpack.c.l.s8.bf16 %v4701_v19  ;;  %v4865_v6 = vunpack.c.l.s8.bf16 %v4703_v28  ;;  %v4714_v28 = vld [vmem:[#allocation13 + $0xf8] sm:$0xff]  ;;  %v4895_v24 = vunpack.c.h.s8.bf16 %v4715_v46 }
 0x9be   :  { %5258 = vmatprep.subr.bf16.mxu1 %v4854_v1  ;;  %5133 = vmatprep.subr.bf16.mxu0 %v4864_v16 }
 0x9bf   :  { %4536 = vadd.xlane.f32.xlu1 %v4535_v7  ;;  %v4870_v7 = vunpack.c.h.s8.bf16 %v4702_v45 }
 0x9c0   :  { %5134 = vmatpush1.bf16.msra.mxu0 %v4863_v53  ;;  %v4716_v53 = vld [vmem:[#allocation13 + $0x108] sm:$0xff] }
 0x9c1   :  { %5259 = vmatpush1.bf16.msra.mxu1 %v4853_v31  ;;  %5135 = vmatprep.subr.bf16.mxu0 %v4870_v7  ;;  %v4890_v7 = vunpack.c.l.s8.bf16 %v4716_v53 }
 0x9c2   :  { %5260 = vmatprep.subr.bf16.mxu1 %v4860_v40 }
 0x9c4   :  { %5136 = vmatpush1.bf16.msra.mxu0 %v4869_v35  ;;  %v4889_v35 = vunpack.c.l.s8.bf16 %v4715_v46 }
 0x9c5   :  { %5261 = vmatpush1.bf16.msra.mxu1 %v4859_v57  ;;  %5137 = vmatprep.subr.bf16.mxu0 %v4876_v21  ;;  %v4896_v21 = vunpack.c.h.s8.bf16 %v4716_v53  ;;  %v4522_v53 = vld [vmem:[#allocation22] sm:$0x3f] }
 0x9c6   :  { %5262 = vmatprep.subr.bf16.mxu1 %v4866_v44  ;;  %v4609_v46 = vrot.slane %v4522_v53, %v9093_v33 }
 0x9c8   :  { %5138 = vmatpush1.bf16.msra.mxu0 %v4875_v56  ;;  %v4722_v56 = vld [vmem:[#allocation13 + $0x138] sm:$0xff] }
 0x9c9   :  { %5263 = vmatpush1.bf16.msra.mxu1 %v4865_v6  ;;  %5139 = vmatprep.subr.bf16.mxu0 %v4882_v61  ;;  %v4888_v6 = vunpack.c.l.s8.bf16 %v4714_v28  ;;  %v4900_v61 = vunpack.c.l.s8.bf16 %v4720_v2 }
 0x9ca   :  { %5264 = vmatprep.subr.bf16.mxu1 %v4872_v9  ;;  %v4713_v9 = vld [vmem:[#allocation13 + $0xf0] sm:$0xff] }
 0x9cb   :  { %v4887_v36 = vunpack.c.l.s8.bf16 %v4713_v9 }
 0x9cc   :  { %5140 = vmatpush1.bf16.msra.mxu0 %v4881_v52  ;;  %v4721_v52 = vld [vmem:[#allocation13 + $0x130] sm:$0xff] }
 0x9cd   :  { %5265 = vmatpush1.bf16.msra.mxu1 %v4871_v20  ;;  %5141 = vmatprep.subr.bf16.mxu0 %v4888_v6  ;;  %v4894_v20 = vunpack.c.h.s8.bf16 %v4714_v28  ;;  %v4523_v6 = vld [vmem:[#allocation23] sm:$0x3f] }
 0x9ce   :  { %5266 = vmatprep.subr.bf16.mxu1 %v4878_v11  ;;  %v4893_v11 = vunpack.c.h.s8.bf16 %v4713_v9  ;;  %v4601_v9 = vrot.slane %v4522_v53, %v9056_v55 }
 0x9d0   :  { %5142 = vmatpush1.bf16.msra.mxu0 %v4887_v36 }
 0x9d1   :  { %5267 = vmatpush1.bf16.msra.mxu1 %v4877_v23  ;;  %v4719_v23 = vld [vmem:[#allocation13 + $0x120] sm:$0xff]  ;;  %5143 = vmatprep.subr.bf16.mxu0 %v4894_v20  ;;  %v4621_v20 = vrot.slane %v4522_v53, %v9096_v48 }
 0x9d2   :  { %5268 = vmatprep.subr.bf16.mxu1 %v4884_v10  ;;  %v4902_v10 = vunpack.c.l.s8.bf16 %v4722_v56 }
 0x9d4   :  { %5144 = vmatpush1.bf16.msra.mxu0 %v4893_v11 }
 0x9d5   :  { %5269 = vmatpush1.bf16.msra.mxu1 %v4883_v59  ;;  %v4899_v59 = vunpack.c.l.s8.bf16 %v4719_v23  ;;  %5145 = vmatprep.subr.bf16.mxu0 %v4900_v61 }
 0x9d6   :  { %5270 = vmatprep.subr.bf16.mxu1 %v4890_v7  ;;  %v4605_v7 = vrot.slane %v4522_v53, %v9034_v14 }
 0x9d8   :  { %5146 = vmatpush1.bf16.msra.mxu0 %v4899_v59 }
 0x9d9   :  { %5271 = vmatpush1.bf16.msra.mxu1 %v4889_v35  ;;  %v4613_v35 = vrot.slane %v4522_v53, %v9059_v58 }
 0x9da   :  { %5272 = vmatprep.subr.bf16.mxu1 %v4896_v21 }
 0x9dd   :  { %5273 = vmatpush1.bf16.msra.mxu1 %v4895_v24 }
 0x9de   :  { %5274 = vmatprep.subr.bf16.mxu1 %v4902_v10  ;;  %v4656_v10 = vrot.slane %v4523_v6, %v9059_v58 }
 0xa4a   :  { %v4530_v30 = vpop.xlane.xlu0 %4529 }
 0xa4b   :  { %v4539_v12 = vmul.f32 0.0013020834, %v4530_v30  ;;  %v4901_v30 = vunpack.c.l.s8.bf16 %v4721_v52 }
 0xa4c   :  { %v4537_v38 = vpop.xlane.xlu1 %4536 }
 0xa4d   :  { %v4540_v18 = vmul.f32 0.0013020834, %v4537_v38  ;;  %v9316_v8 = vsub.f32 %v9276_v50, %v4539_v12  ;;  %v9319_v43 = vsub.f32 %v9278_v29, %v4539_v12  ;;  %v9322_v62 = vsub.f32 %v9287_v60, %v4539_v12  ;;  %5275 = vmatpush1.bf16.msra.mxu1 %v4901_v30 }
 0xa4e   :  { %v9325_v42 = vsub.f32 %v9296_v39, %v4539_v12  ;;  %v9338_v29 = vsub.f32 %v9302_v34, %v4539_v12  ;;  %v9353_v37 = vsub.f32 %v9304_v4, %v4539_v12  ;;  %v4906_v12 = vunpack.c.h.s8.bf16 %v4720_v2 }
 0xa4f   :  { %v4553_v49 = vmul.f32 %v9316_v8, %v9316_v8  ;;  %v4554_v25 = vmul.f32 %v9319_v43, %v9319_v43  ;;  %v9332_v51 = vsub.f32 %v9281_v13, %v4540_v18  ;;  %v9335_v50 = vsub.f32 %v9283_v32, %v4540_v18 }
 0xa50   :  { %v4555_v60 = vmul.f32 %v9322_v62, %v9322_v62  ;;  %v9343_v63 = vsub.f32 %v9294_v47, %v4540_v18  ;;  %v9346_v1 = vsub.f32 %v9300_v41, %v4540_v18  ;;  %v4556_v34 = vmul.f32 %v9325_v42, %v9325_v42  ;;  %5147 = vmatprep.subr.bf16.mxu0 %v4906_v12 }
 0xa51   :  { %v4565_v39 = vadd.f32 %v4554_v25, %v4553_v49  ;;  %v4559_v13 = vmul.f32 %v9332_v51, %v9332_v51  ;;  %v4560_v32 = vmul.f32 %v9335_v50, %v9335_v50  ;;  %v9358_v17 = vsub.f32 %v9307_v0, %v4540_v18  ;;  %v4728_v49 = vld [vmem:[#allocation13 + $0x168] sm:$0xff] }
 0xa52   :  { %v4561_v47 = vmul.f32 %v9343_v63, %v9343_v63  ;;  %v4557_v31 = vmul.f32 %v9338_v29, %v9338_v29  ;;  %v9365_v40 = vsub.f32 %v9310_v5, %v4540_v18  ;;  %v4562_v4 = vmul.f32 %v9346_v1, %v9346_v1  ;;  %v4726_v18 = vld [vmem:[#allocation13 + $0x158] sm:$0xff] }
 0xa53   :  { %v4566_v22 = vadd.f32 %v4565_v39, %v4555_v60  ;;  %v4572_v41 = vadd.f32 %v4560_v32, %v4559_v13  ;;  %v4558_v15 = vmul.f32 %v9353_v37, %v9353_v37  ;;  %v4563_v54 = vmul.f32 %v9358_v17, %v9358_v17  ;;  %v4725_v32 = vld [vmem:[#allocation13 + $0x150] sm:$0xff] }
 0xa54   :  { %v4564_v44 = vmul.f32 %v9365_v40, %v9365_v40  ;;  %v4908_v38 = vunpack.c.h.s8.bf16 %v4722_v56  ;;  %v4905_v25 = vunpack.c.h.s8.bf16 %v4719_v23  ;;  %v4907_v60 = vunpack.c.h.s8.bf16 %v4721_v52 }
 0xa55   :  { %v4567_v27 = vadd.f32 %v4566_v22, %v4556_v34  ;;  %v4573_v45 = vadd.f32 %v4572_v41, %v4561_v47  ;;  %v4912_v39 = vunpack.c.l.s8.bf16 %v4726_v18  ;;  %v4914_v13 = vunpack.c.l.s8.bf16 %v4728_v49  ;;  %v4727_v34 = vld [vmem:[#allocation13 + $0x160] sm:$0xff] }
 0xa56   :  { %5276 = vmatprep.subr.bf16.mxu1 %v4908_v38  ;;  %5148 = vmatpush1.bf16.msra.mxu0 %v4905_v25  ;;  %v4911_v22 = vunpack.c.l.s8.bf16 %v4725_v32  ;;  %v4913_v47 = vunpack.c.l.s8.bf16 %v4727_v34  ;;  %v4918_v41 = vunpack.c.h.s8.bf16 %v4726_v18  ;;  %v4652_v2 = vrot.slane %v4523_v6, %v9093_v33 }
 0xa57   :  { %v4568_v0 = vadd.f32 %v4567_v27, %v4557_v31  ;;  %v4574_v57 = vadd.f32 %v4573_v45, %v4562_v4  ;;  %5277 = vmatpush1.bf16.msra.mxu1 %v4907_v60  ;;  %5149 = vmatprep.subr.bf16.mxu0 %v4912_v39  ;;  %v4920_v31 = vunpack.c.h.s8.bf16 %v4728_v49  ;;  %v4917_v27 = vunpack.c.h.s8.bf16 %v4725_v32  ;;  %v9375_v45 = vld [vmem:[#allocation13 + $0x188] sm:$0xff] }
 0xa58   :  { %5278 = vmatprep.subr.bf16.mxu1 %v4914_v13  ;;  %v4919_v4 = vunpack.c.h.s8.bf16 %v4727_v34  ;;  %v4648_v56 = vrot.slane %v4523_v6, %v9034_v14  ;;  %v4644_v23 = vrot.slane %v4523_v6, %v9056_v55  ;;  %v4617_v60 = vrot.slane %v4522_v53, %v9127_v26 }
 0xa59   :  { %v4569_v16 = vadd.f32 %v4568_v0, %v4558_v15  ;;  %v4575_v19 = vadd.f32 %v4574_v57, %v4563_v54  ;;  %v9377_v15 = vld [vmem:[#allocation13 + $0x198] sm:$0xff]  ;;  %v4924_v0 = vunpack.c.l.s8.bf16 %v9375_v45 }
 0xa5a   :  { %5150 = vmatpush1.bf16.msra.mxu0 %v4911_v22  ;;  %v4926_v54 = vunpack.c.l.s8.bf16 %v9377_v15  ;;  %v4932_v53 = vunpack.c.h.s8.bf16 %v9377_v15 }
 0xa5b   :  { %4570 = vadd.xlane.f32.xlu0 %v4569_v16  ;;  %v4576_v5 = vadd.f32 %v4575_v19, %v4564_v44  ;;  %5279 = vmatpush1.bf16.msra.mxu1 %v4913_v47 }
 0xa5c   :  { %5151 = vmatprep.subr.bf16.mxu0 %v4918_v41  ;;  %5280 = vmatprep.subr.bf16.mxu1 %v4920_v31 }
 0xa5d   :  { %4577 = vadd.xlane.f32.xlu1 %v4576_v5 }
 0xa5e   :  { %5152 = vmatpush1.bf16.msra.mxu0 %v4917_v27 }
 0xa5f   :  { %5281 = vmatpush1.bf16.msra.mxu1 %v4919_v4  ;;  %5164 = vmatprep.subr.bf16.mxu0 %v4924_v0 }
 0xa60   :  { %5293 = vmatprep.subr.bf16.mxu1 %v4926_v54  ;;  %v4660_v54 = vrot.slane %v4523_v6, %v9127_v26 }
 0xae8   :  { %v4571_v57 = vpop.xlane.xlu0 %4570 }
 0xae9   :  { %v4579_v16 = vmul.f32 0.0013020834, %v4571_v57 }
 0xaea   :  { %v4578_v19 = vpop.xlane.xlu1 %4577 }
 0xaeb   :  { %v4581_v44 = vadd.f32 1e-05, %v4579_v16  ;;  %v4580_v5 = vmul.f32 0.0013020834, %v4578_v19 }
 0xaed   :  { %8042 = vrsqrt.f32 %v4581_v44  ;;  %v4582_v28 = vadd.f32 1e-05, %v4580_v5 }
 0xaef   :  { %8044 = vrsqrt.f32 %v4582_v28  ;;  %v4930_v28 = vunpack.c.h.s8.bf16 %v9375_v45 }
 0xaf7   :  { %v8043_v36 = vpop.eup %8042 }
 0xaf8   :  { %v4586_v21 = vmul.f32 %v8043_v36, %v9319_v43  ;;  %v4585_v11 = vmul.f32 %v8043_v36, %v9316_v8  ;;  %v4587_v24 = vmul.f32 %v8043_v36, %v9322_v62  ;;  %v4588_v61 = vmul.f32 %v8043_v36, %v9325_v42 }
 0xaf9   :  { %v8045_v52 = vpop.eup %8044  ;;  %v4590_v43 = vmul.f32 %v8043_v36, %v9353_v37  ;;  %v4664_v42 = vrot.slane %v4523_v6, %v9096_v48  ;;  %v4589_v25 = vmul.f32 %v8043_v36, %v9338_v29  ;;  %v4738_v6 = vld [vmem:[#allocation13 + $0x1b8] sm:$0xff] }
 0xafa   :  { %v4629_v59 = vmul.f32 %v4605_v7, %v4586_v21  ;;  %v4628_v30 = vmul.f32 %v4601_v9, %v4585_v11  ;;  %v4630_v12 = vmul.f32 %v4609_v46, %v4587_v24  ;;  %v4592_v8 = vmul.f32 %v8045_v52, %v9335_v50  ;;  %v4731_v50 = vld [vmem:[#allocation13 + $0x180] sm:$0xff]  ;;  %v4737_v11 = vld [vmem:[#allocation13 + $0x1b0] sm:$0xff] }
 0xafb   :  { %v4591_v62 = vmul.f32 %v8045_v52, %v9332_v51  ;;  %v4594_v38 = vmul.f32 %v8045_v52, %v9346_v1  ;;  %v4593_v18 = vmul.f32 %v8045_v52, %v9343_v63  ;;  %v4733_v51 = vld [vmem:[#allocation13 + $0x190] sm:$0xff]  ;;  %v4631_v22 = vmul.f32 %v4613_v35, %v4588_v61  ;;  %v4739_v24 = vld [vmem:[#allocation13 + $0x1c0] sm:$0xff] }
 0xafc   :  { %v9399_v49 = vadd.f32 %v4652_v2, %v4630_v12  ;;  %v4635_v39 = vmul.f32 %v4605_v7, %v4592_v8  ;;  %v9404_v34 = vadd.f32 %v4648_v56, %v4629_v59  ;;  %v4596_v1 = vmul.f32 %v8045_v52, %v9365_v40  ;;  %v4740_v7 = vld [vmem:[#allocation13 + $0x1c8] sm:$0xff]  ;;  %v4746_v59 = vld [vmem:[#allocation13 + $0x1f8] sm:$0xff] }
 0xafd   :  { %v4634_v13 = vmul.f32 %v4601_v9, %v4591_v62  ;;  %v4637_v32 = vmul.f32 %v4613_v35, %v4594_v38  ;;  %v4636_v37 = vmul.f32 %v4609_v46, %v4593_v18  ;;  %v4633_v63 = vmul.f32 %v4621_v20, %v4590_v43  ;;  %v4743_v62 = vld [vmem:[#allocation13 + $0x1e0] sm:$0xff]  ;;  %v4745_v38 = vld [vmem:[#allocation13 + $0x1f0] sm:$0xff] }
 0xafe   :  { %v9407_v47 = vadd.f32 %v4648_v56, %v4635_v39  ;;  %v9409_v41 = vadd.f32 %v4644_v23, %v4628_v30  ;;  %v4639_v4 = vmul.f32 %v4621_v20, %v4596_v1  ;;  %v4923_v16 = vunpack.c.l.s8.bf16 %v4731_v50  ;;  %v4750_v39 = vld [vmem:[#allocation13 + $0x218] sm:$0xff]  ;;  %v4751_v1 = vld [vmem:[#allocation13 + $0x220] sm:$0xff] }
 0xaff   :  { %v9411_v31 = vadd.f32 %v4644_v23, %v4634_v13  ;;  %v9413_v29 = vadd.f32 %v4652_v2, %v4636_v37  ;;  %v9415_v27 = vadd.f32 %v4656_v10, %v4637_v32  ;;  %v9417_v0 = vadd.f32 %v4664_v42, %v4633_v63  ;;  %v4752_v13 = vld [vmem:[#allocation13 + $0x228] sm:$0xff] }
 0xb00   :  { %v9422_v57 = vpack.c.bf16 %v9407_v47, %v9404_v34  ;;  %v4925_v44 = vunpack.c.l.s8.bf16 %v4733_v51  ;;  %v9428_v19 = vadd.f32 %v4656_v10, %v4631_v22  ;;  %v9430_v5 = vadd.f32 %v4664_v42, %v4639_v4  ;;  %v4749_v22 = vld [vmem:[#allocation13 + $0x210] sm:$0xff] }
 0xb01   :  { %v9426_v40 = vpack.c.bf16 %v9411_v31, %v9409_v41  ;;  %v4595_v9 = vmul.f32 %v8045_v52, %v9358_v17  ;;  %v4632_v46 = vmul.f32 %v4617_v60, %v4589_v25  ;;  %v4929_v35 = vunpack.c.h.s8.bf16 %v4731_v50  ;;  %v4744_v52 = vld [vmem:[#allocation13 + $0x1e8] sm:$0xff] }
 0xb02   :  { %5153 = vmatprep.mubr.bf16.mxu0 %v9422_v57  ;;  %5282 = vmatprep.mubr.bf16.mxu1 %v9422_v57  ;;  %v9441_v36 = vpack.c.bf16 %v9415_v27, %v9428_v19  ;;  %v4931_v20 = vunpack.c.h.s8.bf16 %v4733_v51  ;;  %v4936_v17 = vunpack.c.l.s8.bf16 %v4738_v6  ;;  %v4938_v15 = vunpack.c.l.s8.bf16 %v4740_v7 }
 0xb03   :  { %5154 = vmatmul.mubr.bf16.vlgmr.msra.gmra.mrb[24].mxu0 %v9426_v40  ;;  %5283 = vmatmul.mubr.bf16.vlgmr.msra.gmra.mrb[56].mxu1 %v9426_v40  ;;  %v4638_v45 = vmul.f32 %v4617_v60, %v4595_v9  ;;  %v9443_v21 = vadd.f32 %v4660_v54, %v4632_v46  ;;  %v4935_v56 = vunpack.c.l.s8.bf16 %v4737_v11  ;;  %v4937_v23 = vunpack.c.l.s8.bf16 %v4739_v24  ;;  %v4755_v46 = vld [vmem:[#allocation13 + $0x240] sm:$0xff] }
 0xb04   :  { %5165 = vmatpush1.bf16.msra.mxu0 %v4923_v16  ;;  %5294 = vmatpush1.bf16.msra.mxu1 %v4925_v44  ;;  %v4942_v61 = vunpack.c.h.s8.bf16 %v4738_v6  ;;  %v4944_v10 = vunpack.c.h.s8.bf16 %v4740_v7  ;;  %v4941_v30 = vunpack.c.h.s8.bf16 %v4737_v11  ;;  %v4943_v12 = vunpack.c.h.s8.bf16 %v4739_v24  ;;  %v4756_v44 = vld [vmem:[#allocation13 + $0x248] sm:$0xff]  ;;  %v4762_v11 = vld [vmem:[#allocation13 + $0x278] sm:$0xff] }
 0xb05   :  { %5196 = vmatprep.mubr.bf16.mxu0 %v9441_v36  ;;  %5325 = vmatprep.mubr.bf16.mxu1 %v9441_v36  ;;  %v9447_v2 = vadd.f32 %v4660_v54, %v4638_v45  ;;  %v4948_v43 = vunpack.c.l.s8.bf16 %v4744_v52  ;;  %v4950_v8 = vunpack.c.l.s8.bf16 %v4746_v59  ;;  %v4947_v18 = vunpack.c.l.s8.bf16 %v4743_v62  ;;  %v4764_v24 = vld [vmem:[#allocation13 + $0x288] sm:$0xff] }
 0xb06   :  { %5166 = vmatprep.subr.bf16.mxu0 %v4930_v28  ;;  %5295 = vmatprep.subr.bf16.mxu1 %v4932_v53  ;;  %v4949_v42 = vunpack.c.l.s8.bf16 %v4745_v38  ;;  %v4954_v25 = vunpack.c.h.s8.bf16 %v4744_v52  ;;  %v4956_v60 = vunpack.c.h.s8.bf16 %v4746_v59  ;;  %v4953_v32 = vunpack.c.h.s8.bf16 %v4743_v62  ;;  %v4758_v28 = vld [vmem:[#allocation13 + $0x258] sm:$0xff]  ;;  %v4761_v52 = vld [vmem:[#allocation13 + $0x270] sm:$0xff]  ;;  %v4763_v59 = vld [vmem:[#allocation13 + $0x280] sm:$0xff] }
 0xb07   :  { %v4955_v37 = vunpack.c.h.s8.bf16 %v4745_v38  ;;  %v4960_v50 = vunpack.c.l.s8.bf16 %v4750_v39  ;;  %v4962_v51 = vunpack.c.l.s8.bf16 %v4752_v13  ;;  %v4959_v63 = vunpack.c.l.s8.bf16 %v4749_v22  ;;  %v4768_v62 = vld [vmem:[#allocation13 + $0x2a8] sm:$0xff]  ;;  %v4770_v38 = vld [vmem:[#allocation13 + $0x2b8] sm:$0xff] }
 0xb08   :  { %5167 = vmatpush1.bf16.msra.mxu0 %v4929_v35  ;;  %5296 = vmatpush1.bf16.msra.mxu1 %v4931_v20  ;;  %v4961_v4 = vunpack.c.l.s8.bf16 %v4751_v1  ;;  %v4966_v54 = vunpack.c.h.s8.bf16 %v4750_v39  ;;  %v4968_v16 = vunpack.c.h.s8.bf16 %v4752_v13  ;;  %v4965_v53 = vunpack.c.h.s8.bf16 %v4749_v22  ;;  %v4757_v35 = vld [vmem:[#allocation13 + $0x250] sm:$0xff]  ;;  %v4767_v39 = vld [vmem:[#allocation13 + $0x2a0] sm:$0xff]  ;;  %v4774_v22 = vld [vmem:[#allocation13 + $0x2d8] sm:$0xff] }
 0xb09   :  { %5168 = vmatprep.subr.bf16.mxu0 %v4936_v17  ;;  %5297 = vmatprep.subr.bf16.mxu1 %v4938_v15  ;;  %v4967_v6 = vunpack.c.h.s8.bf16 %v4751_v1  ;;  %v4972_v7 = vunpack.c.l.s8.bf16 %v4756_v44  ;;  %v4974_v9 = vunpack.c.l.s8.bf16 %v4758_v28  ;;  %v4971_v20 = vunpack.c.l.s8.bf16 %v4755_v46  ;;  %v4769_v13 = vld [vmem:[#allocation13 + $0x2b0] sm:$0xff]  ;;  %v4776_v1 = vld [vmem:[#allocation13 + $0x2e8] sm:$0xff] }
 0xb0a   :  { %v4973_v45 = vunpack.c.l.s8.bf16 %v4757_v35  ;;  %v4978_v17 = vunpack.c.h.s8.bf16 %v4756_v44  ;;  %v4980_v15 = vunpack.c.h.s8.bf16 %v4758_v28  ;;  %v4773_v44 = vld [vmem:[#allocation13 + $0x2d0] sm:$0xff]  ;;  %v4775_v28 = vld [vmem:[#allocation13 + $0x2e0] sm:$0xff] }
 0xb0c   :  { %5169 = vmatpush1.bf16.msra.mxu0 %v4935_v56  ;;  %5298 = vmatpush1.bf16.msra.mxu1 %v4937_v23  ;;  %v4977_v56 = vunpack.c.h.s8.bf16 %v4755_v46  ;;  %v4979_v23 = vunpack.c.h.s8.bf16 %v4757_v35  ;;  %v4780_v46 = vld [vmem:[#allocation13 + $0x308] sm:$0xff]  ;;  %v4782_v35 = vld [vmem:[#allocation13 + $0x318] sm:$0xff] }
 0xb0d   :  { %5170 = vmatprep.subr.bf16.mxu0 %v4942_v61  ;;  %5299 = vmatprep.subr.bf16.mxu1 %v4944_v10  ;;  %v4984_v61 = vunpack.c.l.s8.bf16 %v4762_v11  ;;  %v4986_v10 = vunpack.c.l.s8.bf16 %v4764_v24 }
 0xb10   :  { %5171 = vmatpush1.bf16.msra.mxu0 %v4941_v30  ;;  %5300 = vmatpush1.bf16.msra.mxu1 %v4943_v12  ;;  %v4983_v30 = vunpack.c.l.s8.bf16 %v4761_v52  ;;  %v4985_v12 = vunpack.c.l.s8.bf16 %v4763_v59 }
 0xb11   :  { %5172 = vmatprep.subr.bf16.mxu0 %v4948_v43  ;;  %5301 = vmatprep.subr.bf16.mxu1 %v4950_v8  ;;  %v4990_v43 = vunpack.c.h.s8.bf16 %v4762_v11  ;;  %v4992_v8 = vunpack.c.h.s8.bf16 %v4764_v24  ;;  %v4779_v11 = vld [vmem:[#allocation13 + $0x300] sm:$0xff]  ;;  %v4781_v24 = vld [vmem:[#allocation13 + $0x310] sm:$0xff] }
 0xb14   :  { %5173 = vmatpush1.bf16.msra.mxu0 %v4947_v18  ;;  %5302 = vmatpush1.bf16.msra.mxu1 %v4949_v42  ;;  %v4989_v18 = vunpack.c.h.s8.bf16 %v4761_v52  ;;  %v4991_v42 = vunpack.c.h.s8.bf16 %v4763_v59  ;;  %v5026_v52 = vunpack.c.h.s8.bf16 %v4780_v46  ;;  %v5028_v59 = vunpack.c.h.s8.bf16 %v4782_v35 }
 0xb15   :  { %5174 = vmatprep.subr.bf16.mxu0 %v4954_v25  ;;  %5303 = vmatprep.subr.bf16.mxu1 %v4956_v60  ;;  %v4996_v25 = vunpack.c.l.s8.bf16 %v4768_v62  ;;  %v4998_v60 = vunpack.c.l.s8.bf16 %v4770_v38 }
 0xb18   :  { %5175 = vmatpush1.bf16.msra.mxu0 %v4953_v32  ;;  %5304 = vmatpush1.bf16.msra.mxu1 %v4955_v37  ;;  %v4995_v32 = vunpack.c.l.s8.bf16 %v4767_v39  ;;  %v4997_v37 = vunpack.c.l.s8.bf16 %v4769_v13 }
 0xb19   :  { %5176 = vmatprep.subr.bf16.mxu0 %v4960_v50  ;;  %5305 = vmatprep.subr.bf16.mxu1 %v4962_v51  ;;  %v5002_v50 = vunpack.c.h.s8.bf16 %v4768_v62  ;;  %v5004_v51 = vunpack.c.h.s8.bf16 %v4770_v38  ;;  %v4785_v38 = vld [vmem:[#allocation13 + $0x330] sm:$0xff] }
 0xb1c   :  { %5177 = vmatpush1.bf16.msra.mxu0 %v4959_v63  ;;  %5306 = vmatpush1.bf16.msra.mxu1 %v4961_v4  ;;  %v5001_v63 = vunpack.c.h.s8.bf16 %v4767_v39  ;;  %v5003_v4 = vunpack.c.h.s8.bf16 %v4769_v13 }
 0xb1d   :  { %5178 = vmatprep.subr.bf16.mxu0 %v4966_v54  ;;  %5307 = vmatprep.subr.bf16.mxu1 %v4968_v16  ;;  %v5008_v54 = vunpack.c.l.s8.bf16 %v4774_v22  ;;  %v5010_v16 = vunpack.c.l.s8.bf16 %v4776_v1 }
 0xb20   :  { %5179 = vmatpush1.bf16.msra.mxu0 %v4965_v53  ;;  %5308 = vmatpush1.bf16.msra.mxu1 %v4967_v6  ;;  %v5007_v53 = vunpack.c.l.s8.bf16 %v4773_v44  ;;  %v5009_v6 = vunpack.c.l.s8.bf16 %v4775_v28 }
 0xb21   :  { %5180 = vmatprep.subr.bf16.mxu0 %v4972_v7  ;;  %5309 = vmatprep.subr.bf16.mxu1 %v4974_v9  ;;  %v5014_v7 = vunpack.c.h.s8.bf16 %v4774_v22  ;;  %v5016_v9 = vunpack.c.h.s8.bf16 %v4776_v1  ;;  %v4791_v1 = vld [vmem:[#allocation13 + $0x360] sm:$0xff] }
 0xb24   :  { %5181 = vmatpush1.bf16.msra.mxu0 %v4971_v20  ;;  %5310 = vmatpush1.bf16.msra.mxu1 %v4973_v45  ;;  %v5013_v20 = vunpack.c.h.s8.bf16 %v4773_v44  ;;  %v5015_v45 = vunpack.c.h.s8.bf16 %v4775_v28 }
 0xb25   :  { %5182 = vmatprep.subr.bf16.mxu0 %v4978_v17  ;;  %5311 = vmatprep.subr.bf16.mxu1 %v4980_v15  ;;  %v5020_v17 = vunpack.c.l.s8.bf16 %v4780_v46  ;;  %v5022_v15 = vunpack.c.l.s8.bf16 %v4782_v35  ;;  %v4797_v35 = vld [vmem:[#allocation13 + $0x390] sm:$0xff] }
 0xb28   :  { %5183 = vmatpush1.bf16.msra.mxu0 %v4977_v56  ;;  %5312 = vmatpush1.bf16.msra.mxu1 %v4979_v23  ;;  %v5019_v56 = vunpack.c.l.s8.bf16 %v4779_v11  ;;  %v9451_v23 = vpack.c.bf16 %v9413_v29, %v9399_v49 }
 0xb29   :  { %5184 = vmatprep.subr.bf16.mxu0 %v4984_v61  ;;  %5313 = vmatprep.subr.bf16.mxu1 %v4986_v10  ;;  %v5021_v61 = vunpack.c.l.s8.bf16 %v4781_v24  ;;  %v9455_v10 = vpack.c.bf16 %v9430_v5, %v9417_v0 }
 0xb2c   :  { %5185 = vmatpush1.bf16.msra.mxu0 %v4983_v30  ;;  %5314 = vmatpush1.bf16.msra.mxu1 %v4985_v12  ;;  %v4786_v30 = vld [vmem:[#allocation13 + $0x338] sm:$0xff]  ;;  %v4788_v12 = vld [vmem:[#allocation13 + $0x348] sm:$0xff] }
 0xb2d   :  { %5186 = vmatprep.subr.bf16.mxu0 %v4990_v43  ;;  %5315 = vmatprep.subr.bf16.mxu1 %v4992_v8  ;;  %v5025_v43 = vunpack.c.h.s8.bf16 %v4779_v11  ;;  %v5027_v8 = vunpack.c.h.s8.bf16 %v4781_v24  ;;  %v5032_v62 = vunpack.c.l.s8.bf16 %v4786_v30  ;;  %v5038_v39 = vunpack.c.h.s8.bf16 %v4786_v30 }
 0xb2e   :  { %v5040_v13 = vunpack.c.h.s8.bf16 %v4788_v12 }
 0xb30   :  { %5187 = vmatpush1.bf16.msra.mxu0 %v4989_v18  ;;  %5316 = vmatpush1.bf16.msra.mxu1 %v4991_v42  ;;  %v5034_v18 = vunpack.c.l.s8.bf16 %v4788_v12  ;;  %v4787_v42 = vld [vmem:[#allocation13 + $0x340] sm:$0xff] }
 0xb31   :  { %5188 = vmatprep.subr.bf16.mxu0 %v4996_v25  ;;  %5317 = vmatprep.subr.bf16.mxu1 %v4998_v60  ;;  %v5031_v25 = vunpack.c.l.s8.bf16 %v4785_v38  ;;  %v5033_v60 = vunpack.c.l.s8.bf16 %v4787_v42  ;;  %v4803_v12 = vld [vmem:[#allocation13 + $0x3c0] sm:$0xff] }
 0xb34   :  { %5189 = vmatpush1.bf16.msra.mxu0 %v4995_v32  ;;  %5318 = vmatpush1.bf16.msra.mxu1 %v4997_v37  ;;  %v4792_v32 = vld [vmem:[#allocation13 + $0x368] sm:$0xff]  ;;  %v4794_v37 = vld [vmem:[#allocation13 + $0x378] sm:$0xff] }
 0xb35   :  { %5190 = vmatprep.subr.bf16.mxu0 %v5002_v50  ;;  %5319 = vmatprep.subr.bf16.mxu1 %v5004_v51  ;;  %v5037_v50 = vunpack.c.h.s8.bf16 %v4785_v38  ;;  %v5039_v51 = vunpack.c.h.s8.bf16 %v4787_v42  ;;  %v5044_v22 = vunpack.c.l.s8.bf16 %v4792_v32  ;;  %v5050_v44 = vunpack.c.h.s8.bf16 %v4792_v32 }
 0xb36   :  { %v5052_v28 = vunpack.c.h.s8.bf16 %v4794_v37 }
 0xb38   :  { %5191 = vmatpush1.bf16.msra.mxu0 %v5001_v63  ;;  %5320 = vmatpush1.bf16.msra.mxu1 %v5003_v4  ;;  %v5046_v63 = vunpack.c.l.s8.bf16 %v4794_v37  ;;  %v4793_v4 = vld [vmem:[#allocation13 + $0x370] sm:$0xff] }
 0xb39   :  { %5192 = vmatprep.subr.bf16.mxu0 %v5008_v54  ;;  %5321 = vmatprep.subr.bf16.mxu1 %v5010_v16  ;;  %v5043_v54 = vunpack.c.l.s8.bf16 %v4791_v1  ;;  %v5045_v16 = vunpack.c.l.s8.bf16 %v4793_v4  ;;  %v4809_v37 = vld [vmem:[#allocation13 + $0x3f0] sm:$0xff] }
 0xb3c   :  { %5193 = vmatpush1.bf16.msra.mxu0 %v5007_v53  ;;  %5322 = vmatpush1.bf16.msra.mxu1 %v5009_v6  ;;  %v4798_v53 = vld [vmem:[#allocation13 + $0x398] sm:$0xff]  ;;  %v4800_v6 = vld [vmem:[#allocation13 + $0x3a8] sm:$0xff] }
 0xb3d   :  { %5194 = vmatprep.subr.bf16.mxu0 %v5014_v7  ;;  %5323 = vmatprep.subr.bf16.mxu1 %v5016_v9  ;;  %v5049_v7 = vunpack.c.h.s8.bf16 %v4791_v1  ;;  %v5051_v9 = vunpack.c.h.s8.bf16 %v4793_v4  ;;  %v5056_v46 = vunpack.c.l.s8.bf16 %v4798_v53  ;;  %v5062_v11 = vunpack.c.h.s8.bf16 %v4798_v53 }
 0xb3e   :  { %v5064_v24 = vunpack.c.h.s8.bf16 %v4800_v6 }
 0xb40   :  { %5195 = vmatpush1.bf16.msra.mxu0 %v5013_v20  ;;  %5324 = vmatpush1.bf16.msra.mxu1 %v5015_v45  ;;  %v5058_v20 = vunpack.c.l.s8.bf16 %v4800_v6  ;;  %v4799_v45 = vld [vmem:[#allocation13 + $0x3a0] sm:$0xff] }
 0xb41   :  { %5207 = vmatprep.subr.bf16.mxu0 %v5020_v17  ;;  %5336 = vmatprep.subr.bf16.mxu1 %v5022_v15  ;;  %v5055_v17 = vunpack.c.l.s8.bf16 %v4797_v35  ;;  %v5057_v15 = vunpack.c.l.s8.bf16 %v4799_v45  ;;  %v4815_v6 = vld [vmem:[#allocation13 + $0x420] sm:$0xff] }
 0xb43   :  { %5197 = vmatmul.mubr.bf16.vlgmr.msra.gmra.mrb[24].mxu0 %v9451_v23  ;;  %5326 = vmatmul.mubr.bf16.vlgmr.msra.gmra.mrb[56].mxu1 %v9451_v23 }
 0xb44   :  { %5208 = vmatpush1.bf16.msra.mxu0 %v5019_v56  ;;  %5239 = vmatprep.mubr.bf16.mxu0 %v9455_v10  ;;  %v4804_v56 = vld [vmem:[#allocation13 + $0x3c8] sm:$0xff] }
 0xb45   :  { %5337 = vmatpush1.bf16.msra.mxu1 %v5021_v61  ;;  %5368 = vmatprep.mubr.bf16.mxu1 %v9455_v10  ;;  %v4806_v61 = vld [vmem:[#allocation13 + $0x3d8] sm:$0xff]  ;;  %v5068_v30 = vunpack.c.l.s8.bf16 %v4804_v56 }
 0xb46   :  { %5209 = vmatprep.subr.bf16.mxu0 %v5026_v52  ;;  %5338 = vmatprep.subr.bf16.mxu1 %v5028_v59  ;;  %v5061_v52 = vunpack.c.h.s8.bf16 %v4797_v35  ;;  %v5063_v59 = vunpack.c.h.s8.bf16 %v4799_v45  ;;  %v5076_v42 = vunpack.c.h.s8.bf16 %v4806_v61 }
 0xb48   :  { %5210 = vmatpush1.bf16.msra.mxu0 %v5025_v43  ;;  %v5070_v43 = vunpack.c.l.s8.bf16 %v4806_v61  ;;  %v4821_v61 = vld [vmem:[#allocation13 + $0x450] sm:$0xff] }
 0xb49   :  { %5339 = vmatpush1.bf16.msra.mxu1 %v5027_v8  ;;  %5211 = vmatprep.subr.bf16.mxu0 %v5032_v62  ;;  %v4805_v8 = vld [vmem:[#allocation13 + $0x3d0] sm:$0xff]  ;;  %v5067_v62 = vunpack.c.l.s8.bf16 %v4803_v12 }
 0xb4a   :  { %5340 = vmatprep.subr.bf16.mxu1 %v5034_v18  ;;  %v5069_v38 = vunpack.c.l.s8.bf16 %v4805_v8  ;;  %v5074_v18 = vunpack.c.h.s8.bf16 %v4804_v56 }
 0xb4c   :  { %5212 = vmatpush1.bf16.msra.mxu0 %v5031_v25  ;;  %v4810_v25 = vld [vmem:[#allocation13 + $0x3f8] sm:$0xff] }
 0xb4d   :  { %5341 = vmatpush1.bf16.msra.mxu1 %v5033_v60  ;;  %5213 = vmatprep.subr.bf16.mxu0 %v5038_v39  ;;  %v4812_v60 = vld [vmem:[#allocation13 + $0x408] sm:$0xff]  ;;  %v5073_v39 = vunpack.c.h.s8.bf16 %v4803_v12  ;;  %v5080_v32 = vunpack.c.l.s8.bf16 %v4810_v25 }
 0xb4e   :  { %5342 = vmatprep.subr.bf16.mxu1 %v5040_v13  ;;  %v5075_v13 = vunpack.c.h.s8.bf16 %v4805_v8  ;;  %v5088_v4 = vunpack.c.h.s8.bf16 %v4812_v60 }
 0xb50   :  { %5214 = vmatpush1.bf16.msra.mxu0 %v5037_v50  ;;  %v5082_v50 = vunpack.c.l.s8.bf16 %v4812_v60 }
 0xb51   :  { %5343 = vmatpush1.bf16.msra.mxu1 %v5039_v51  ;;  %5215 = vmatprep.subr.bf16.mxu0 %v5044_v22  ;;  %v4811_v51 = vld [vmem:[#allocation13 + $0x400] sm:$0xff]  ;;  %v5079_v22 = vunpack.c.l.s8.bf16 %v4809_v37 }
 0xb52   :  { %5344 = vmatprep.subr.bf16.mxu1 %v5046_v63  ;;  %v5081_v1 = vunpack.c.l.s8.bf16 %v4811_v51  ;;  %v5086_v63 = vunpack.c.h.s8.bf16 %v4810_v25  ;;  %v4687_v25 = vld [vmem:[#allocation13 + $0x20] sm:$0xff] }
 0xb53   :  { %v4831_v60 = vunpack.c.l.s8.bf16 %v4687_v25 }
 0xb54   :  { %5216 = vmatpush1.bf16.msra.mxu0 %v5043_v54  ;;  %v4816_v54 = vld [vmem:[#allocation13 + $0x428] sm:$0xff] }
 0xb55   :  { %5345 = vmatpush1.bf16.msra.mxu1 %v5045_v16  ;;  %5217 = vmatprep.subr.bf16.mxu0 %v5050_v44  ;;  %v4818_v16 = vld [vmem:[#allocation13 + $0x438] sm:$0xff]  ;;  %v5085_v44 = vunpack.c.h.s8.bf16 %v4809_v37  ;;  %v5092_v53 = vunpack.c.l.s8.bf16 %v4816_v54  ;;  %v4837_v37 = vunpack.c.h.s8.bf16 %v4687_v25 }
 0xb56   :  { %5346 = vmatprep.subr.bf16.mxu1 %v5052_v28  ;;  %v5087_v28 = vunpack.c.h.s8.bf16 %v4811_v51  ;;  %v5100_v45 = vunpack.c.h.s8.bf16 %v4818_v16  ;;  %v4693_v51 = vld [vmem:[#allocation13 + $0x50] sm:$0xff] }
 0xb58   :  { %5218 = vmatpush1.bf16.msra.mxu0 %v5049_v7  ;;  %v5094_v7 = vunpack.c.l.s8.bf16 %v4818_v16  ;;  %v4699_v16 = vld [vmem:[#allocation13 + $0x80] sm:$0xff] }
 0xb59   :  { %5347 = vmatpush1.bf16.msra.mxu1 %v5051_v9  ;;  %5219 = vmatprep.subr.bf16.mxu0 %v5056_v46  ;;  %v4817_v9 = vld [vmem:[#allocation13 + $0x430] sm:$0xff]  ;;  %v5091_v46 = vunpack.c.l.s8.bf16 %v4815_v6 }
 0xb5a   :  { %5348 = vmatprep.subr.bf16.mxu1 %v5058_v20  ;;  %v5093_v35 = vunpack.c.l.s8.bf16 %v4817_v9  ;;  %v5098_v20 = vunpack.c.h.s8.bf16 %v4816_v54 }
 0xb5c   :  { %5220 = vmatpush1.bf16.msra.mxu0 %v5055_v17  ;;  %v4822_v17 = vld [vmem:[#allocation13 + $0x458] sm:$0xff] }
 0xb5d   :  { %5349 = vmatpush1.bf16.msra.mxu1 %v5057_v15  ;;  %5221 = vmatprep.subr.bf16.mxu0 %v5062_v11  ;;  %v4824_v15 = vld [vmem:[#allocation13 + $0x468] sm:$0xff]  ;;  %v5097_v11 = vunpack.c.h.s8.bf16 %v4815_v6  ;;  %v5104_v56 = vunpack.c.l.s8.bf16 %v4822_v17 }
 0xb5e   :  { %5350 = vmatprep.subr.bf16.mxu1 %v5064_v24  ;;  %v5099_v24 = vunpack.c.h.s8.bf16 %v4817_v9  ;;  %v5112_v8 = vunpack.c.h.s8.bf16 %v4824_v15 }
 0xb60   :  { %5222 = vmatpush1.bf16.msra.mxu0 %v5061_v52  ;;  %v5106_v52 = vunpack.c.l.s8.bf16 %v4824_v15 }
 0xb61   :  { %5351 = vmatpush1.bf16.msra.mxu1 %v5063_v59  ;;  %5223 = vmatprep.subr.bf16.mxu0 %v5068_v30  ;;  %v4823_v59 = vld [vmem:[#allocation13 + $0x460] sm:$0xff]  ;;  %v5103_v30 = vunpack.c.l.s8.bf16 %v4821_v61 }
 0xb62   :  { %5352 = vmatprep.subr.bf16.mxu1 %v5070_v43  ;;  %v5105_v12 = vunpack.c.l.s8.bf16 %v4823_v59  ;;  %v5110_v43 = vunpack.c.h.s8.bf16 %v4822_v17  ;;  %v4711_v17 = vld [vmem:[#allocation13 + $0xe0] sm:$0xff] }
 0xb63   :  { %v4879_v15 = vunpack.c.l.s8.bf16 %v4711_v17 }
 0xb64   :  { %5224 = vmatpush1.bf16.msra.mxu0 %v5067_v62  ;;  %v4688_v62 = vld [vmem:[#allocation13 + $0x28] sm:$0xff] }
 0xb65   :  { %5353 = vmatpush1.bf16.msra.mxu1 %v5069_v38  ;;  %5225 = vmatprep.subr.bf16.mxu0 %v5074_v18  ;;  %v5109_v38 = vunpack.c.h.s8.bf16 %v4821_v61  ;;  %v5111_v18 = vunpack.c.h.s8.bf16 %v4823_v59 }
 0xb66   :  { %5354 = vmatprep.subr.bf16.mxu1 %v5076_v42  ;;  %v4832_v42 = vunpack.c.l.s8.bf16 %v4688_v62 }
 0xb68   :  { %5226 = vmatpush1.bf16.msra.mxu0 %v5073_v39  ;;  %v9463_v39 = vpack.c.bf16 %v9447_v2, %v9443_v21 }
 0xb69   :  { %5355 = vmatpush1.bf16.msra.mxu1 %v5075_v13  ;;  %5227 = vmatprep.subr.bf16.mxu0 %v5080_v32  ;;  %v4838_v13 = vunpack.c.h.s8.bf16 %v4688_v62  ;;  %v4694_v32 = vld [vmem:[#allocation13 + $0x58] sm:$0xff]  ;;  %v4723_v62 = vld [vmem:[#allocation13 + $0x140] sm:$0xff] }
 0xb6a   :  { %5356 = vmatprep.subr.bf16.mxu1 %v5082_v50  ;;  %v4844_v50 = vunpack.c.l.s8.bf16 %v4694_v32  ;;  %v4909_v25 = vunpack.c.h.s8.bf16 %v4723_v62 }
 0xb6c   :  { %5228 = vmatpush1.bf16.msra.mxu0 %v5079_v22  ;;  %v4843_v22 = vunpack.c.l.s8.bf16 %v4693_v51 }
 0xb6d   :  { %5357 = vmatpush1.bf16.msra.mxu1 %v5081_v1  ;;  %5229 = vmatprep.subr.bf16.mxu0 %v5086_v63  ;;  %v4850_v1 = vunpack.c.h.s8.bf16 %v4694_v32  ;;  %v4700_v63 = vld [vmem:[#allocation13 + $0x88] sm:$0xff] }
 0xb6e   :  { %5358 = vmatprep.subr.bf16.mxu1 %v5088_v4  ;;  %v4849_v4 = vunpack.c.h.s8.bf16 %v4693_v51  ;;  %v4856_v54 = vunpack.c.l.s8.bf16 %v4700_v63  ;;  %v4736_v51 = vld [vmem:[#allocation13 + $0x1a8] sm:$0xff] }
 0xb70   :  { %5230 = vmatpush1.bf16.msra.mxu0 %v5085_v44  ;;  %v4855_v44 = vunpack.c.l.s8.bf16 %v4699_v16 }
 0xb71   :  { %5359 = vmatpush1.bf16.msra.mxu1 %v5087_v28  ;;  %5231 = vmatprep.subr.bf16.mxu0 %v5092_v53  ;;  %v4862_v28 = vunpack.c.h.s8.bf16 %v4700_v63  ;;  %v4706_v53 = vld [vmem:[#allocation13 + $0xb8] sm:$0xff]  ;;  %v5704_v63 = vld [vmem:[#allocation17] sm:$0xff] }
 0xb72   :  { %5360 = vmatprep.subr.bf16.mxu1 %v5094_v7  ;;  %v4868_v6 = vunpack.c.l.s8.bf16 %v4706_v53  ;;  %v4705_v7 = vld [vmem:[#allocation13 + $0xb0] sm:$0xff] }
 0xb73   :  { %v4867_v9 = vunpack.c.l.s8.bf16 %v4705_v7 }
 0xb74   :  { %5232 = vmatpush1.bf16.msra.mxu0 %v5091_v46  ;;  %v4874_v46 = vunpack.c.h.s8.bf16 %v4706_v53  ;;  %v5854_v53 = vunpack.c.h.s8.bf16 %v5704_v63 }
 0xb75   :  { %5361 = vmatpush1.bf16.msra.mxu1 %v5093_v35  ;;  %5233 = vmatprep.subr.bf16.mxu0 %v5098_v20  ;;  %v4712_v35 = vld [vmem:[#allocation13 + $0xe8] sm:$0xff]  ;;  %v4873_v20 = vunpack.c.h.s8.bf16 %v4705_v7 }
 0xb76   :  { %5362 = vmatprep.subr.bf16.mxu1 %v5100_v45  ;;  %v4880_v45 = vunpack.c.l.s8.bf16 %v4712_v35  ;;  %v5711_v7 = vld [vmem:[#allocation17 + $0x38] sm:$0xff] }
 0xb78   :  { %5234 = vmatpush1.bf16.msra.mxu0 %v5097_v11  ;;  %v4886_v11 = vunpack.c.h.s8.bf16 %v4712_v35  ;;  %v5861_v35 = vunpack.c.l.s8.bf16 %v5711_v7 }
 0xb79   :  { %5363 = vmatpush1.bf16.msra.mxu1 %v5099_v24  ;;  %5235 = vmatprep.subr.bf16.mxu0 %v5104_v56  ;;  %v4718_v24 = vld [vmem:[#allocation13 + $0x118] sm:$0xff]  ;;  %v4885_v56 = vunpack.c.h.s8.bf16 %v4711_v17 }
 0xb7a   :  { %5364 = vmatprep.subr.bf16.mxu1 %v5106_v52  ;;  %v4892_v61 = vunpack.c.l.s8.bf16 %v4718_v24  ;;  %v4717_v52 = vld [vmem:[#allocation13 + $0x110] sm:$0xff] }
 0xb7b   :  { %v4891_v59 = vunpack.c.l.s8.bf16 %v4717_v52 }
 0xb7c   :  { %5236 = vmatpush1.bf16.msra.mxu0 %v5103_v30  ;;  %v4898_v30 = vunpack.c.h.s8.bf16 %v4718_v24 }
 0xb7d   :  { %5365 = vmatpush1.bf16.msra.mxu1 %v5105_v12  ;;  %5237 = vmatprep.subr.bf16.mxu0 %v5110_v43  ;;  %v4724_v12 = vld [vmem:[#allocation13 + $0x148] sm:$0xff]  ;;  %v4897_v43 = vunpack.c.h.s8.bf16 %v4717_v52 }
 0xb7e   :  { %5366 = vmatprep.subr.bf16.mxu1 %v5112_v8  ;;  %v4904_v8 = vunpack.c.l.s8.bf16 %v4724_v12  ;;  %v5716_v52 = vld [vmem:[#allocation17 + $0x60] sm:$0xff] }
 0xb80   :  { %5238 = vmatpush1.bf16.msra.mxu0 %v5109_v38  ;;  %v4903_v38 = vunpack.c.l.s8.bf16 %v4723_v62  ;;  %v5878_v62 = vunpack.c.h.s8.bf16 %v5716_v52 }
 0xb81   :  { %5367 = vmatpush1.bf16.msra.mxu1 %v5111_v18  ;;  %5379 = vmatprep.subr.bf16.mxu0 %v4832_v42  ;;  %v4910_v18 = vunpack.c.h.s8.bf16 %v4724_v12  ;;  %v4730_v42 = vld [vmem:[#allocation13 + $0x178] sm:$0xff] }
 0xb83   :  { %5240 = vmatmul.mubr.bf16.vlgmr.msra.gmra.mrb[24].mxu0 %v9463_v39 }
 0xb84   :  { %5369 = vmatmul.mubr.bf16.vlgmr.msra.gmra.mrb[56].mxu1 %v9463_v39  ;;  %5380 = vmatpush1.bf16.msra.mxu0 %v4831_v60  ;;  %v4916_v60 = vunpack.c.l.s8.bf16 %v4730_v42 }
 0xb85   :  { %5411 = vmatprep.mubr.bf16.mxu0 %v9422_v57  ;;  %5381 = vmatprep.subr.bf16.mxu0 %v4838_v13  ;;  %v4861_v57 = vunpack.c.h.s8.bf16 %v4699_v16  ;;  %v4729_v13 = vld [vmem:[#allocation13 + $0x170] sm:$0xff]  ;;  %v5848_v16 = vunpack.c.l.s8.bf16 %v5704_v63  ;;  %v4760_v63 = vld [vmem:[#allocation13 + $0x268] sm:$0xff] }
 0xb86   :  { %v4915_v32 = vunpack.c.l.s8.bf16 %v4729_v13 }
 0xb88   :  { %5382 = vmatpush1.bf16.msra.mxu0 %v4837_v37  ;;  %v4922_v37 = vunpack.c.h.s8.bf16 %v4730_v42 }
 0xb89   :  { %5383 = vmatprep.subr.bf16.mxu0 %v4844_v50  ;;  %v5705_v50 = vld [vmem:[#allocation17 + $0x8] sm:$0xff] }
 0xb8c   :  { %5384 = vmatpush1.bf16.msra.mxu0 %v4843_v22  ;;  %v5849_v22 = vunpack.c.l.s8.bf16 %v5705_v50 }
 0xb8d   :  { %5385 = vmatprep.subr.bf16.mxu0 %v4850_v1  ;;  %v4921_v1 = vunpack.c.h.s8.bf16 %v4729_v13  ;;  %v4754_v13 = vld [vmem:[#allocation13 + $0x238] sm:$0xff] }
 0xb8e   :  { %6142 = vmatprep.subr.bf16.mxu1 %v5849_v22 }
 0xb8f   :  { %6143 = vmatpush1.bf16.msra.mxu1 %v5848_v16  ;;  %v4976_v16 = vunpack.c.l.s8.bf16 %v4760_v63 }
 0xb90   :  { %5386 = vmatpush1.bf16.msra.mxu0 %v4849_v4  ;;  %v4928_v4 = vunpack.c.l.s8.bf16 %v4736_v51 }
 0xb91   :  { %5387 = vmatprep.subr.bf16.mxu0 %v4856_v54  ;;  %v4735_v54 = vld [vmem:[#allocation13 + $0x1a0] sm:$0xff] }
 0xb94   :  { %5388 = vmatpush1.bf16.msra.mxu0 %v4855_v44  ;;  %v5855_v44 = vunpack.c.h.s8.bf16 %v5705_v50  ;;  %v4964_v50 = vunpack.c.l.s8.bf16 %v4754_v13 }
 0xb95   :  { %5389 = vmatprep.subr.bf16.mxu0 %v4862_v28  ;;  %v4927_v28 = vunpack.c.l.s8.bf16 %v4735_v54 }
 0xb96   :  { %6144 = vmatprep.subr.bf16.mxu1 %v5855_v44  ;;  %v4759_v44 = vld [vmem:[#allocation13 + $0x260] sm:$0xff] }
 0xb97   :  { %6145 = vmatpush1.bf16.msra.mxu1 %v5854_v53  ;;  %v5729_v53 = vld [vmem:[#allocation17 + $0xc8] sm:$0xff] }
 0xb98   :  { %5390 = vmatpush1.bf16.msra.mxu0 %v4861_v57  ;;  %v4934_v57 = vunpack.c.h.s8.bf16 %v4736_v51  ;;  %6146 = vmatprep.subr.bf16.mxu1 %v5861_v35  ;;  %v4753_v51 = vld [vmem:[#allocation13 + $0x230] sm:$0xff]  ;;  %v4766_v35 = vld [vmem:[#allocation13 + $0x298] sm:$0xff] }
 0xb99   :  { %5391 = vmatprep.subr.bf16.mxu0 %v4868_v6  ;;  %v4742_v6 = vld [vmem:[#allocation13 + $0x1d8] sm:$0xff]  ;;  %v4963_v22 = vunpack.c.l.s8.bf16 %v4753_v51 }
 0xb9a   :  { %v4940_v17 = vunpack.c.l.s8.bf16 %v4742_v6 }
 0xb9c   :  { %5392 = vmatpush1.bf16.msra.mxu0 %v4867_v9  ;;  %v5710_v9 = vld [vmem:[#allocation17 + $0x30] sm:$0xff] }
 0xb9d   :  { %5393 = vmatprep.subr.bf16.mxu0 %v4874_v46  ;;  %v4933_v46 = vunpack.c.h.s8.bf16 %v4735_v54 }
 0xba0   :  { %5394 = vmatpush1.bf16.msra.mxu0 %v4873_v20  ;;  %v5860_v20 = vunpack.c.l.s8.bf16 %v5710_v9 }
 0xba1   :  { %5395 = vmatprep.subr.bf16.mxu0 %v4880_v45  ;;  %v5867_v45 = vunpack.c.h.s8.bf16 %v5711_v7  ;;  %v5728_v7 = vld [vmem:[#allocation17 + $0xc0] sm:$0xff] }
 0xba2   :  { %6147 = vmatpush1.bf16.msra.mxu1 %v5860_v20  ;;  %v4981_v20 = vunpack.c.h.s8.bf16 %v4759_v44 }
 0xba3   :  { %6148 = vmatprep.subr.bf16.mxu1 %v5867_v45  ;;  %v5903_v45 = vunpack.c.h.s8.bf16 %v5729_v53 }
 0xba4   :  { %5396 = vmatpush1.bf16.msra.mxu0 %v4879_v15  ;;  %v4741_v15 = vld [vmem:[#allocation13 + $0x1d0] sm:$0xff] }
 0xba5   :  { %5397 = vmatprep.subr.bf16.mxu0 %v4886_v11  ;;  %v5866_v11 = vunpack.c.h.s8.bf16 %v5710_v9  ;;  %v4939_v24 = vunpack.c.l.s8.bf16 %v4741_v15  ;;  %v4982_v9 = vunpack.c.h.s8.bf16 %v4760_v63  ;;  %v5746_v63 = vld [vmem:[#allocation17 + $0x150] sm:$0xff] }
 0xba7   :  { %6149 = vmatpush1.bf16.msra.mxu1 %v5866_v11  ;;  %v5902_v11 = vunpack.c.h.s8.bf16 %v5728_v7 }
 0xba8   :  { %5398 = vmatpush1.bf16.msra.mxu0 %v4885_v56  ;;  %v4946_v56 = vunpack.c.h.s8.bf16 %v4742_v6  ;;  %v5897_v6 = vunpack.c.l.s8.bf16 %v5729_v53 }
 0xba9   :  { %5399 = vmatprep.subr.bf16.mxu0 %v4892_v61 }
 0xbac   :  { %5400 = vmatpush1.bf16.msra.mxu0 %v4891_v59  ;;  %v4748_v59 = vld [vmem:[#allocation13 + $0x208] sm:$0xff] }
 0xbad   :  { %5401 = vmatprep.subr.bf16.mxu0 %v4898_v30  ;;  %v4945_v30 = vunpack.c.h.s8.bf16 %v4741_v15  ;;  %v4958_v42 = vunpack.c.h.s8.bf16 %v4748_v59  ;;  %v4765_v15 = vld [vmem:[#allocation13 + $0x290] sm:$0xff] }
 0xbb0   :  { %5402 = vmatpush1.bf16.msra.mxu0 %v4897_v43  ;;  %v4952_v43 = vunpack.c.l.s8.bf16 %v4748_v59  ;;  %v4994_v59 = vunpack.c.h.s8.bf16 %v4766_v35 }
 0xbb1   :  { %5403 = vmatprep.subr.bf16.mxu0 %v4904_v8  ;;  %v4747_v8 = vld [vmem:[#allocation13 + $0x200] sm:$0xff] }
 0xbb4   :  { %5404 = vmatpush1.bf16.msra.mxu0 %v4903_v38  ;;  %v4951_v38 = vunpack.c.l.s8.bf16 %v4747_v8 }
 0xbb5   :  { %5405 = vmatprep.subr.bf16.mxu0 %v4910_v18  ;;  %v5723_v18 = vld [vmem:[#allocation17 + $0x98] sm:$0xff] }
 0xbb6   :  { %v5891_v54 = vunpack.c.h.s8.bf16 %v5723_v18 }
 0xbb8   :  { %5406 = vmatpush1.bf16.msra.mxu0 %v4909_v25  ;;  %v5885_v25 = vunpack.c.l.s8.bf16 %v5723_v18 }
 0xbb9   :  { %5407 = vmatprep.subr.bf16.mxu0 %v4916_v60  ;;  %v5722_v60 = vld [vmem:[#allocation17 + $0x90] sm:$0xff] }
 0xbbc   :  { %5408 = vmatpush1.bf16.msra.mxu0 %v4915_v32  ;;  %v5884_v32 = vunpack.c.l.s8.bf16 %v5722_v60 }
 0xbbd   :  { %5409 = vmatprep.subr.bf16.mxu0 %v4922_v37  ;;  %v4957_v37 = vunpack.c.h.s8.bf16 %v4747_v8  ;;  %v4993_v8 = vunpack.c.h.s8.bf16 %v4765_v15 }
 0xbc0   :  { %5410 = vmatpush1.bf16.msra.mxu0 %v4921_v1  ;;  %v4970_v1 = vunpack.c.h.s8.bf16 %v4754_v13 }
 0xbc1   :  { %5422 = vmatprep.subr.bf16.mxu0 %v4928_v4  ;;  %v4969_v4 = vunpack.c.h.s8.bf16 %v4753_v51 }
 0xbc3   :  { %5412 = vmatmul.mubr.bf16.vlgmr.msra.gmra.mrb[28].mxu0 %v9426_v40  ;;  %v5717_v40 = vld [vmem:[#allocation17 + $0x68] sm:$0xff] }
 0xbc4   :  { %5423 = vmatpush1.bf16.msra.mxu0 %v4927_v28  ;;  %5454 = vmatprep.mubr.bf16.mxu0 %v9441_v36  ;;  %v5873_v61 = vunpack.c.l.s8.bf16 %v5717_v40  ;;  %v5872_v36 = vunpack.c.l.s8.bf16 %v5716_v52  ;;  %v5879_v12 = vunpack.c.h.s8.bf16 %v5717_v40  ;;  %v5890_v28 = vunpack.c.h.s8.bf16 %v5722_v60 }
 0xbc5   :  { %5424 = vmatprep.subr.bf16.mxu0 %v4934_v57  ;;  %v4975_v57 = vunpack.c.l.s8.bf16 %v4759_v44  ;;  %v4987_v40 = vunpack.c.l.s8.bf16 %v4765_v15  ;;  %v4790_v15 = vld [vmem:[#allocation13 + $0x358] sm:$0xff] }
 0xbc6   :  { %6150 = vmatprep.subr.bf16.mxu1 %v5873_v61  ;;  %v5734_v61 = vld [vmem:[#allocation17 + $0xf0] sm:$0xff] }
 0xbc7   :  { %6151 = vmatpush1.bf16.msra.mxu1 %v5872_v36  ;;  %v5908_v36 = vunpack.c.l.s8.bf16 %v5734_v61 }
 0xbc8   :  { %5425 = vmatpush1.bf16.msra.mxu0 %v4933_v46  ;;  %6152 = vmatprep.subr.bf16.mxu1 %v5879_v12  ;;  %v5896_v46 = vunpack.c.l.s8.bf16 %v5728_v7  ;;  %v4772_v12 = vld [vmem:[#allocation13 + $0x2c8] sm:$0xff] }
 0xbc9   :  { %5426 = vmatprep.subr.bf16.mxu0 %v4940_v17  ;;  %v4988_v17 = vunpack.c.l.s8.bf16 %v4766_v35  ;;  %v5000_v18 = vunpack.c.l.s8.bf16 %v4772_v12  ;;  %v9470_v35 = vld [vmem:[#allocation17 + $0x188] sm:$0xff] }
 0xbcb   :  { %6153 = vmatpush1.bf16.msra.mxu1 %v5878_v62 }
 0xbcc   :  { %5427 = vmatpush1.bf16.msra.mxu0 %v4939_v24  ;;  %6154 = vmatprep.subr.bf16.mxu1 %v5885_v25  ;;  %v5735_v24 = vld [vmem:[#allocation17 + $0xf8] sm:$0xff] }
 0xbcd   :  { %5428 = vmatprep.subr.bf16.mxu0 %v4946_v56  ;;  %v5909_v56 = vunpack.c.l.s8.bf16 %v5735_v24  ;;  %v5915_v52 = vunpack.c.h.s8.bf16 %v5735_v24  ;;  %v5036_v24 = vunpack.c.l.s8.bf16 %v4790_v15 }
 0xbcf   :  { %6155 = vmatpush1.bf16.msra.mxu1 %v5884_v32  ;;  %v5006_v32 = vunpack.c.h.s8.bf16 %v4772_v12 }
 0xbd0   :  { %5429 = vmatpush1.bf16.msra.mxu0 %v4945_v30  ;;  %6156 = vmatprep.subr.bf16.mxu1 %v5891_v54  ;;  %v5741_v30 = vld [vmem:[#allocation17 + $0x128] sm:$0xff] }
 0xbd1   :  { %5430 = vmatprep.subr.bf16.mxu0 %v4952_v43  ;;  %v5914_v43 = vunpack.c.h.s8.bf16 %v5734_v61  ;;  %v5921_v62 = vunpack.c.l.s8.bf16 %v5741_v30  ;;  %v5927_v13 = vunpack.c.h.s8.bf16 %v5741_v30  ;;  %v4777_v54 = vld [vmem:[#allocation13 + $0x2f0] sm:$0xff]  ;;  %v5042_v61 = vunpack.c.h.s8.bf16 %v4790_v15  ;;  %v4795_v30 = vld [vmem:[#allocation13 + $0x380] sm:$0xff] }
 0xbd2   :  { %v5011_v44 = vunpack.c.l.s8.bf16 %v4777_v54  ;;  %v5017_v7 = vunpack.c.h.s8.bf16 %v4777_v54  ;;  %v5047_v12 = vunpack.c.l.s8.bf16 %v4795_v30  ;;  %v4820_v54 = vld [vmem:[#allocation13 + $0x448] sm:$0xff] }
 0xbd3   :  { %6157 = vmatpush1.bf16.msra.mxu1 %v5890_v28 }
 0xbd4   :  { %5431 = vmatpush1.bf16.msra.mxu0 %v4951_v38  ;;  %6158 = vmatprep.subr.bf16.mxu1 %v5897_v6  ;;  %v5740_v38 = vld [vmem:[#allocation17 + $0x120] sm:$0xff]  ;;  %v5938_v6 = vunpack.c.h.s8.bf16 %v5746_v63 }
 0xbd5   :  { %5432 = vmatprep.subr.bf16.mxu0 %v4958_v42  ;;  %v4771_v42 = vld [vmem:[#allocation13 + $0x2c0] sm:$0xff]  ;;  %v5920_v25 = vunpack.c.l.s8.bf16 %v5740_v38  ;;  %v5926_v51 = vunpack.c.h.s8.bf16 %v5740_v38 }
 0xbd6   :  { %v4999_v60 = vunpack.c.l.s8.bf16 %v4771_v42 }
 0xbd7   :  { %6159 = vmatpush1.bf16.msra.mxu1 %v5896_v46  ;;  %v4783_v46 = vld [vmem:[#allocation13 + $0x320] sm:$0xff] }
 0xbd8   :  { %5433 = vmatpush1.bf16.msra.mxu0 %v4957_v37  ;;  %6160 = vmatprep.subr.bf16.mxu1 %v5903_v45  ;;  %v5747_v37 = vld [vmem:[#allocation17 + $0x158] sm:$0xff]  ;;  %v5023_v45 = vunpack.c.l.s8.bf16 %v4783_v46 }
 0xbd9   :  { %5434 = vmatprep.subr.bf16.mxu0 %v4964_v50  ;;  %v4778_v50 = vld [vmem:[#allocation13 + $0x2f8] sm:$0xff]  ;;  %v5939_v28 = vunpack.c.h.s8.bf16 %v5747_v37 }
 0xbda   :  { %v5018_v53 = vunpack.c.h.s8.bf16 %v4778_v50 }
 0xbdb   :  { %6161 = vmatpush1.bf16.msra.mxu1 %v5902_v11  ;;  %v5029_v11 = vunpack.c.h.s8.bf16 %v4783_v46  ;;  %v4825_v46 = vld [vmem:[#allocation13 + $0x470] sm:$0xff] }
 0xbdc   :  { %5435 = vmatpush1.bf16.msra.mxu0 %v4963_v22  ;;  %6162 = vmatprep.subr.bf16.mxu1 %v5909_v56  ;;  %v5005_v22 = vunpack.c.h.s8.bf16 %v4771_v42  ;;  %v4808_v42 = vld [vmem:[#allocation13 + $0x3e8] sm:$0xff]  ;;  %v5113_v15 = vunpack.c.h.s8.bf16 %v4825_v46 }
 0xbdd   :  { %5436 = vmatprep.subr.bf16.mxu0 %v4970_v1  ;;  %v5933_v1 = vunpack.c.l.s8.bf16 %v5747_v37  ;;  %v5078_v37 = vunpack.c.h.s8.bf16 %v4808_v42 }
 0xbdf   :  { %6163 = vmatpush1.bf16.msra.mxu1 %v5908_v36 }
 0xbe0   :  { %5437 = vmatpush1.bf16.msra.mxu0 %v4969_v4  ;;  %6164 = vmatprep.subr.bf16.mxu1 %v5915_v52  ;;  %v5012_v4 = vunpack.c.l.s8.bf16 %v4778_v50  ;;  %v4796_v52 = vld [vmem:[#allocation13 + $0x388] sm:$0xff]  ;;  %v4814_v50 = vld [vmem:[#allocation13 + $0x418] sm:$0xff] }
 0xbe1   :  { %5438 = vmatprep.subr.bf16.mxu0 %v4976_v16  ;;  %v5932_v16 = vunpack.c.l.s8.bf16 %v5746_v63  ;;  %v5048_v36 = vunpack.c.l.s8.bf16 %v4796_v52 }
 0xbe3   :  { %6165 = vmatpush1.bf16.msra.mxu1 %v5914_v43  ;;  %v4802_v43 = vld [vmem:[#allocation13 + $0x3b8] sm:$0xff] }
 0xbe4   :  { %5439 = vmatpush1.bf16.msra.mxu0 %v4975_v57  ;;  %6166 = vmatprep.subr.bf16.mxu1 %v5921_v62  ;;  %v4784_v57 = vld [vmem:[#allocation13 + $0x328] sm:$0xff]  ;;  %v4801_v62 = vld [vmem:[#allocation13 + $0x3b0] sm:$0xff] }
 0xbe5   :  { %5440 = vmatprep.subr.bf16.mxu0 %v4982_v9  ;;  %v5024_v9 = vunpack.c.l.s8.bf16 %v4784_v57  ;;  %v5059_v38 = vunpack.c.l.s8.bf16 %v4801_v62 }
 0xbe7   :  { %6167 = vmatpush1.bf16.msra.mxu1 %v5920_v25  ;;  %v5065_v25 = vunpack.c.h.s8.bf16 %v4801_v62 }
 0xbe8   :  { %5441 = vmatpush1.bf16.msra.mxu0 %v4981_v20  ;;  %6168 = vmatprep.subr.bf16.mxu1 %v5927_v13  ;;  %v5945_v20 = vunpack.c.l.s8.bf16 %v9470_v35  ;;  %v4807_v13 = vld [vmem:[#allocation13 + $0x3e0] sm:$0xff] }
 0xbe9   :  { %5442 = vmatprep.subr.bf16.mxu0 %v4988_v17  ;;  %v5030_v17 = vunpack.c.h.s8.bf16 %v4784_v57  ;;  %v5102_v57 = vunpack.c.h.s8.bf16 %v4820_v54 }
 0xbeb   :  { %6169 = vmatpush1.bf16.msra.mxu1 %v5926_v51  ;;  %v5077_v51 = vunpack.c.h.s8.bf16 %v4807_v13 }
 0xbec   :  { %5443 = vmatpush1.bf16.msra.mxu0 %v4987_v40  ;;  %6170 = vmatprep.subr.bf16.mxu1 %v5933_v1  ;;  %v4789_v40 = vld [vmem:[#allocation13 + $0x350] sm:$0xff] }
 0xbed   :  { %5444 = vmatprep.subr.bf16.mxu0 %v4994_v59  ;;  %v5035_v56 = vunpack.c.l.s8.bf16 %v4789_v40  ;;  %v5041_v59 = vunpack.c.h.s8.bf16 %v4789_v40  ;;  %v4813_v1 = vld [vmem:[#allocation13 + $0x410] sm:$0xff] }
 0xbee   :  { %v5083_v63 = vunpack.c.l.s8.bf16 %v4813_v1 }
 0xbef   :  { %6171 = vmatpush1.bf16.msra.mxu1 %v5932_v16  ;;  %v5089_v16 = vunpack.c.h.s8.bf16 %v4813_v1 }
 0xbf0   :  { %5445 = vmatpush1.bf16.msra.mxu0 %v4993_v8  ;;  %6172 = vmatprep.subr.bf16.mxu1 %v5939_v28  ;;  %v5060_v8 = vunpack.c.l.s8.bf16 %v4802_v43  ;;  %v4819_v28 = vld [vmem:[#allocation13 + $0x440] sm:$0xff] }
 0xbf1   :  { %5446 = vmatprep.subr.bf16.mxu0 %v5000_v18  ;;  %v5066_v18 = vunpack.c.h.s8.bf16 %v4802_v43 }
 0xbf3   :  { %6173 = vmatpush1.bf16.msra.mxu1 %v5938_v6  ;;  %v4826_v6 = vld [vmem:[#allocation13 + $0x478] sm:$0xff] }
 0xbf4   :  { %5447 = vmatpush1.bf16.msra.mxu0 %v4999_v60  ;;  %6185 = vmatprep.subr.bf16.mxu1 %v5945_v20  ;;  %v5072_v60 = vunpack.c.l.s8.bf16 %v4808_v42  ;;  %v5107_v20 = vunpack.c.l.s8.bf16 %v4825_v46  ;;  %v5725_v42 = vld [vmem:[#allocation17 + $0xa8] sm:$0xff] }
 0xbf5   :  { %5448 = vmatprep.subr.bf16.mxu0 %v5006_v32  ;;  %v5071_v32 = vunpack.c.l.s8.bf16 %v4807_v13  ;;  %v5887_v1 = vunpack.c.l.s8.bf16 %v5725_v42 }
 0xbf8   :  { %5449 = vmatpush1.bf16.msra.mxu0 %v5005_v22  ;;  %v5084_v22 = vunpack.c.l.s8.bf16 %v4814_v50 }
 0xbf9   :  { %5450 = vmatprep.subr.bf16.mxu0 %v5012_v4  ;;  %v5090_v4 = vunpack.c.h.s8.bf16 %v4814_v50  ;;  %v9488_v50 = vld [vmem:[#allocation17 + $0xd8] sm:$0xff] }
 0xbfa   :  { %v5899_v46 = vunpack.c.l.s8.bf16 %v9488_v50 }
 0xbfc   :  { %5451 = vmatpush1.bf16.msra.mxu0 %v5011_v44  ;;  %v5096_v44 = vunpack.c.l.s8.bf16 %v4820_v54 }
 0xbfd   :  { %5452 = vmatprep.subr.bf16.mxu0 %v5018_v53  ;;  %v5095_v53 = vunpack.c.l.s8.bf16 %v4819_v28 }
 0xc00   :  { %5453 = vmatpush1.bf16.msra.mxu0 %v5017_v7  ;;  %v5101_v7 = vunpack.c.h.s8.bf16 %v4819_v28 }
 0xc01   :  { %5465 = vmatprep.subr.bf16.mxu0 %v5024_v9  ;;  %v5108_v9 = vunpack.c.l.s8.bf16 %v4826_v6 }
 0xc03   :  { %5455 = vmatmul.mubr.bf16.vlgmr.msra.gmra.mrb[28].mxu0 %v9451_v23  ;;  %v5054_v23 = vunpack.c.h.s8.bf16 %v4796_v52 }
 0xc04   :  { %5466 = vmatpush1.bf16.msra.mxu0 %v5023_v45  ;;  %5497 = vmatprep.mubr.bf16.mxu0 %v9455_v10  ;;  %v5053_v10 = vunpack.c.h.s8.bf16 %v4795_v30  ;;  %v5114_v45 = vunpack.c.h.s8.bf16 %v4826_v6 }
 0xc05   :  { %5467 = vmatprep.subr.bf16.mxu0 %v5030_v17  ;;  %v5707_v17 = vld [vmem:[#allocation17 + $0x18] sm:$0xff] }
 0xc08   :  { %5468 = vmatpush1.bf16.msra.mxu0 %v5029_v11  ;;  %v5851_v11 = vunpack.c.l.s8.bf16 %v5707_v17 }
 0xc09   :  { %5469 = vmatprep.subr.bf16.mxu0 %v5036_v24  ;;  %v5706_v24 = vld [vmem:[#allocation17 + $0x10] sm:$0xff] }
 0xc0a   :  { %v5850_v40 = vunpack.c.l.s8.bf16 %v5706_v24  ;;  %v5856_v52 = vunpack.c.h.s8.bf16 %v5706_v24  ;;  %v5905_v24 = vunpack.c.h.s8.bf16 %v9488_v50 }
 0xc0c   :  { %5470 = vmatpush1.bf16.msra.mxu0 %v5035_v56  ;;  %v5857_v56 = vunpack.c.h.s8.bf16 %v5707_v17 }
 0xc0d   :  { %5471 = vmatprep.subr.bf16.mxu0 %v5042_v61  ;;  %v5713_v61 = vld [vmem:[#allocation17 + $0x48] sm:$0xff] }
 0xc10   :  { %5472 = vmatpush1.bf16.msra.mxu0 %v5041_v59  ;;  %v5863_v59 = vunpack.c.l.s8.bf16 %v5713_v61 }
 0xc11   :  { %5473 = vmatprep.subr.bf16.mxu0 %v5048_v36  ;;  %v5712_v36 = vld [vmem:[#allocation17 + $0x40] sm:$0xff] }
 0xc12   :  { %v5862_v30 = vunpack.c.l.s8.bf16 %v5712_v36  ;;  %v5868_v43 = vunpack.c.h.s8.bf16 %v5712_v36 }
 0xc14   :  { %5474 = vmatpush1.bf16.msra.mxu0 %v5047_v12  ;;  %v5869_v12 = vunpack.c.h.s8.bf16 %v5713_v61 }
 0xc15   :  { %5475 = vmatprep.subr.bf16.mxu0 %v5054_v23  ;;  %v5719_v23 = vld [vmem:[#allocation17 + $0x78] sm:$0xff] }
 0xc18   :  { %5476 = vmatpush1.bf16.msra.mxu0 %v5053_v10  ;;  %v5875_v10 = vunpack.c.l.s8.bf16 %v5719_v23 }
 0xc19   :  { %5477 = vmatprep.subr.bf16.mxu0 %v5060_v8  ;;  %v5718_v8 = vld [vmem:[#allocation17 + $0x70] sm:$0xff] }
 0xc1a   :  { %v5874_v62 = vunpack.c.l.s8.bf16 %v5718_v8 }
 0xc1c   :  { %5478 = vmatpush1.bf16.msra.mxu0 %v5059_v38  ;;  %v9476_v38 = vld [vmem:[#allocation14] sm:$0x3f] }
 0xc1d   :  { %5479 = vmatprep.subr.bf16.mxu0 %v5066_v18  ;;  %v9478_v18 = vld [vmem:[#allocation16] sm:$0x3f]  ;;  %v5521_v13 = vrot.slane %v9476_v38, %v9093_v33 }
 0xc1e   :  { %v5565_v54 = vrot.slane %v9478_v18, %v9093_v33 }
 0xc20   :  { %5480 = vmatpush1.bf16.msra.mxu0 %v5065_v25  ;;  %v5513_v25 = vrot.slane %v9476_v38, %v9056_v55 }
 0xc21   :  { %5481 = vmatprep.subr.bf16.mxu0 %v5072_v60  ;;  %v9482_v60 = vld [vmem:[#allocation17 + $0xa0] sm:$0xff] }
 0xc22   :  { %v5886_v28 = vunpack.c.l.s8.bf16 %v9482_v60 }
 0xc24   :  { %5482 = vmatpush1.bf16.msra.mxu0 %v5071_v32  ;;  %v5517_v32 = vrot.slane %v9476_v38, %v9034_v14 }
 0xc25   :  { %5483 = vmatprep.subr.bf16.mxu0 %v5078_v37  ;;  %v5880_v37 = vunpack.c.h.s8.bf16 %v5718_v8 }
 0xc28   :  { %5484 = vmatpush1.bf16.msra.mxu0 %v5077_v51  ;;  %v5557_v51 = vrot.slane %v9478_v18, %v9056_v55 }
 0xc29   :  { %5485 = vmatprep.subr.bf16.mxu0 %v5084_v22  ;;  %v5525_v22 = vrot.slane %v9476_v38, %v9059_v58 }
 0xc2c   :  { %5486 = vmatpush1.bf16.msra.mxu0 %v5083_v63  ;;  %v9494_v63 = vld [vmem:[#allocation17 + $0xd0] sm:$0xff] }
 0xc2d   :  { %5487 = vmatprep.subr.bf16.mxu0 %v5090_v4  ;;  %v5904_v36 = vunpack.c.h.s8.bf16 %v9494_v63 }
 0xc30   :  { %5488 = vmatpush1.bf16.msra.mxu0 %v5089_v16  ;;  %v5561_v16 = vrot.slane %v9478_v18, %v9034_v14 }
 0xc31   :  { %5489 = vmatprep.subr.bf16.mxu0 %v5096_v44  ;;  %v5569_v44 = vrot.slane %v9478_v18, %v9059_v58 }
 0xc34   :  { %5490 = vmatpush1.bf16.msra.mxu0 %v5095_v53 }
 0xc35   :  { %5491 = vmatprep.subr.bf16.mxu0 %v5102_v57 }
 0xc38   :  { %5492 = vmatpush1.bf16.msra.mxu0 %v5101_v7  ;;  %v5893_v7 = vunpack.c.h.s8.bf16 %v5725_v42 }
 0xc39   :  { %5493 = vmatprep.subr.bf16.mxu0 %v5108_v9  ;;  %v5892_v9 = vunpack.c.h.s8.bf16 %v9482_v60 }
 0xc3c   :  { %5494 = vmatpush1.bf16.msra.mxu0 %v5107_v20 }
 0xc3d   :  { %5495 = vmatprep.subr.bf16.mxu0 %v5114_v45 }
 0xc40   :  { %5496 = vmatpush1.bf16.msra.mxu0 %v5113_v15 }
 0xc41   :  { %6271 = vmatprep.subr.bf16.mxu0 %v5851_v11  ;;  %v5898_v11 = vunpack.c.l.s8.bf16 %v9494_v63 }
 0xc43   :  { %5498 = vmatmul.mubr.bf16.vlgmr.msra.gmra.mrb[28].mxu0 %v9463_v39  ;;  %v5881_v39 = vunpack.c.h.s8.bf16 %v5719_v23 }
 0xc44   :  { %6272 = vmatpush1.bf16.msra.mxu0 %v5850_v40 }
 0xc45   :  { %6273 = vmatprep.subr.bf16.mxu0 %v5857_v56 }
 0xc48   :  { %6274 = vmatpush1.bf16.msra.mxu0 %v5856_v52 }
 0xc49   :  { %6275 = vmatprep.subr.bf16.mxu0 %v5863_v59 }
 0xc4c   :  { %6276 = vmatpush1.bf16.msra.mxu0 %v5862_v30 }
 0xc4d   :  { %6277 = vmatprep.subr.bf16.mxu0 %v5869_v12 }
 0xc50   :  { %6278 = vmatpush1.bf16.msra.mxu0 %v5868_v43 }
 0xc51   :  { %6279 = vmatprep.subr.bf16.mxu0 %v5875_v10 }
 0xc54   :  { %6280 = vmatpush1.bf16.msra.mxu0 %v5874_v62 }
 0xc55   :  { %6281 = vmatprep.subr.bf16.mxu0 %v5881_v39 }
 0xc56   :  { %v5241_v4 = vpop.f32.mrb[24].mxu0 }
 0xc57   :  { %v5540_v53 = vmul.f32 %v5513_v25, %v5241_v4  ;;  %v5370_v57 = vpop.f32.mrb[56].mxu1  ;;  %v5243_v6 = vpop.f32.mrb[25].mxu0 }
 0xc58   :  { %v5542_v20 = vmul.f32 %v5521_v13, %v5370_v57  ;;  %v5541_v45 = vmul.f32 %v5517_v32, %v5243_v6  ;;  %v5372_v17 = vpop.f32.mrb[57].mxu1  ;;  %v5245_v15 = vpop.f32.mrb[26].mxu0  ;;  %6282 = vmatpush1.bf16.msra.mxu0 %v5880_v37 }
 0xc59   :  { %v9507_v40 = vadd.f32 %v5557_v51, %v5540_v53  ;;  %v5543_v56 = vmul.f32 %v5525_v22, %v5372_v17  ;;  %v5546_v61 = vmul.f32 %v5513_v25, %v5245_v15  ;;  %v5374_v52 = vpop.f32.mrb[58].mxu1  ;;  %v5247_v59 = vpop.f32.mrb[27].mxu0  ;;  %6283 = vmatprep.subr.bf16.mxu0 %v5887_v1 }
 0xc5a   :  { %v9510_v30 = vadd.f32 %v5565_v54, %v5542_v20  ;;  %v9512_v12 = vadd.f32 %v5561_v16, %v5541_v45  ;;  %v5548_v23 = vmul.f32 %v5521_v13, %v5374_v52  ;;  %v5547_v43 = vmul.f32 %v5517_v32, %v5247_v59  ;;  %v5376_v10 = vpop.f32.mrb[59].mxu1  ;;  %v5737_v59 = vld [vmem:[#allocation17 + $0x108] sm:$0xff] }
 0xc5b   :  { %v5596_v8 = vmul.f32 %v9507_v40, %v9507_v40  ;;  %v9516_v62 = vadd.f32 %v5569_v44, %v5543_v56  ;;  %v9518_v39 = vadd.f32 %v5557_v51, %v5546_v61  ;;  %v5549_v42 = vmul.f32 %v5525_v22, %v5376_v10 }
 0xc5c   :  { %v5598_v25 = vmul.f32 %v9510_v30, %v9510_v30  ;;  %v5597_v60 = vmul.f32 %v9512_v12, %v9512_v12  ;;  %v9524_v37 = vadd.f32 %v5565_v54, %v5548_v23  ;;  %v9526_v1 = vadd.f32 %v5561_v16, %v5547_v43  ;;  %6284 = vmatpush1.bf16.msra.mxu0 %v5886_v28 }
 0xc5d   :  { %v5608_v13 = vmul.f32 %v5596_v8, %v9507_v40  ;;  %v5599_v32 = vmul.f32 %v9516_v62, %v9516_v62  ;;  %v5602_v51 = vmul.f32 %v9518_v39, %v9518_v39  ;;  %v9533_v22 = vadd.f32 %v5569_v44, %v5549_v42  ;;  %6285 = vmatprep.subr.bf16.mxu0 %v5893_v7 }
 0xc5e   :  { %v5610_v4 = vmul.f32 %v5598_v25, %v9510_v30  ;;  %v5609_v53 = vmul.f32 %v5597_v60, %v9512_v12  ;;  %v5604_v54 = vmul.f32 %v9524_v37, %v9524_v37  ;;  %v5603_v16 = vmul.f32 %v9526_v1, %v9526_v1 }
 0xc5f   :  { %v5620_v28 = vmul.f32 0.044715, %v5608_v13  ;;  %v5611_v57 = vmul.f32 %v5599_v32, %v9516_v62  ;;  %v5614_v6 = vmul.f32 %v5602_v51, %v9518_v39  ;;  %v5605_v44 = vmul.f32 %v9533_v22, %v9533_v22 }
 0xc60   :  { %v5622_v20 = vmul.f32 0.044715, %v5610_v4  ;;  %v5621_v7 = vmul.f32 0.044715, %v5609_v53  ;;  %v5616_v45 = vmul.f32 %v5604_v54, %v9524_v37  ;;  %v5615_v17 = vmul.f32 %v5603_v16, %v9526_v1  ;;  %6286 = vmatpush1.bf16.msra.mxu0 %v5892_v9  ;;  %v5736_v16 = vld [vmem:[#allocation17 + $0x100] sm:$0xff] }
 0xc61   :  { %v5632_v15 = vadd.f32 %v5620_v28, %v9507_v40  ;;  %v5623_v56 = vmul.f32 0.044715, %v5611_v57  ;;  %v5626_v61 = vmul.f32 0.044715, %v5614_v6  ;;  %v5617_v52 = vmul.f32 %v5605_v44, %v9533_v22  ;;  %6287 = vmatprep.subr.bf16.mxu0 %v5899_v46 }
 0xc62   :  { %v5634_v23 = vadd.f32 %v5622_v20, %v9510_v30  ;;  %v5633_v43 = vadd.f32 %v5621_v7, %v9512_v12  ;;  %v5628_v10 = vmul.f32 0.044715, %v5616_v45  ;;  %v5627_v8 = vmul.f32 0.044715, %v5615_v17  ;;  %v5743_v7 = vld [vmem:[#allocation17 + $0x138] sm:$0xff]  ;;  %v5742_v45 = vld [vmem:[#allocation17 + $0x130] sm:$0xff] }
 0xc63   :  { %v5644_v42 = vmul.f32 0.7978846, %v5632_v15  ;;  %v5635_v25 = vadd.f32 %v5623_v56, %v9516_v62  ;;  %v5638_v60 = vadd.f32 %v5626_v61, %v9518_v39  ;;  %v5629_v9 = vmul.f32 0.044715, %v5617_v52 }
 0xc64   :  { %v5646_v13 = vmul.f32 0.7978846, %v5634_v23  ;;  %v5640_v32 = vadd.f32 %v5628_v10, %v9524_v37  ;;  %v5639_v51 = vadd.f32 %v5627_v8, %v9526_v1  ;;  %6288 = vmatpush1.bf16.msra.mxu0 %v5898_v11  ;;  %v5911_v46 = vunpack.c.l.s8.bf16 %v5737_v59  ;;  %v5749_v23 = vld [vmem:[#allocation17 + $0x168] sm:$0xff] }
 0xc65   :  { %8046 = vtanh.f32 %v5644_v42  ;;  %v5645_v4 = vmul.f32 0.7978846, %v5633_v43  ;;  %v5650_v53 = vmul.f32 0.7978846, %v5638_v60  ;;  %v5641_v54 = vadd.f32 %v5629_v9, %v9533_v22  ;;  %6289 = vmatprep.subr.bf16.mxu0 %v5905_v24 }
 0xc66   :  { %8048 = vtanh.f32 %v5646_v13  ;;  %v5652_v28 = vmul.f32 0.7978846, %v5640_v32  ;;  %v5651_v57 = vmul.f32 0.7978846, %v5639_v51  ;;  %v5647_v6 = vmul.f32 0.7978846, %v5635_v25 }
 0xc67   :  { %8050 = vtanh.f32 %v5650_v53  ;;  %v5653_v44 = vmul.f32 0.7978846, %v5641_v54  ;;  %v5910_v11 = vunpack.c.l.s8.bf16 %v5736_v16  ;;  %v5917_v20 = vunpack.c.h.s8.bf16 %v5737_v59  ;;  %v5748_v53 = vld [vmem:[#allocation17 + $0x160] sm:$0xff] }
 0xc68   :  { %8052 = vtanh.f32 %v5652_v28  ;;  %6290 = vmatpush1.bf16.msra.mxu0 %v5904_v36  ;;  %v5916_v50 = vunpack.c.h.s8.bf16 %v5736_v16  ;;  %v5923_v24 = vunpack.c.l.s8.bf16 %v5743_v7  ;;  %v5922_v56 = vunpack.c.l.s8.bf16 %v5742_v45 }
 0xc69   :  { %6291 = vmatprep.subr.bf16.mxu0 %v5911_v46  ;;  %8054 = vtanh.f32 %v5645_v4  ;;  %v5929_v36 = vunpack.c.h.s8.bf16 %v5743_v7  ;;  %v5928_v9 = vunpack.c.h.s8.bf16 %v5742_v45  ;;  %v5935_v4 = vunpack.c.l.s8.bf16 %v5749_v23  ;;  %v5752_v45 = vld [vmem:[#allocation17 + $0x180] sm:$0xff] }
 0xc6a   :  { %8056 = vtanh.f32 %v5651_v57 }
 0xc6b   :  { %8058 = vtanh.f32 %v5647_v6 }
 0xc6c   :  { %6292 = vmatpush1.bf16.msra.mxu0 %v5910_v11  ;;  %8060 = vtanh.f32 %v5653_v44 }
 0xc6d   :  { %6293 = vmatprep.subr.bf16.mxu0 %v5917_v20 }
 0xc6f   :  { %v8047_v17 = vpop.eup %8046 }
 0xc70   :  { %v8049_v15 = vpop.eup %8048  ;;  %6294 = vmatpush1.bf16.msra.mxu0 %v5916_v50  ;;  %v5668_v61 = vadd.f32 1.0, %v8047_v17  ;;  %v5934_v17 = vunpack.c.l.s8.bf16 %v5748_v53 }
 0xc71   :  { %v8051_v63 = vpop.eup %8050  ;;  %6295 = vmatprep.subr.bf16.mxu0 %v5923_v24  ;;  %v5670_v52 = vadd.f32 1.0, %v8049_v15 }
 0xc72   :  { %v8053_v59 = vpop.eup %8052  ;;  %v5674_v43 = vadd.f32 1.0, %v8051_v63  ;;  %v5680_v10 = vmul.f32 0.5, %v5668_v61  ;;  %v5941_v63 = vunpack.c.h.s8.bf16 %v5749_v23 }
 0xc73   :  { %v8055_v8 = vpop.eup %8054  ;;  %v5676_v42 = vadd.f32 1.0, %v8053_v59  ;;  %v5682_v25 = vmul.f32 0.5, %v5670_v52 }
 0xc74   :  { %v8057_v60 = vpop.eup %8056  ;;  %6296 = vmatpush1.bf16.msra.mxu0 %v5922_v56  ;;  %v5669_v13 = vadd.f32 1.0, %v8055_v8  ;;  %v5686_v32 = vmul.f32 0.5, %v5674_v43  ;;  %v5692_v57 = vmul.f32 %v5680_v10, %v9507_v40  ;;  %v5951_v43 = vunpack.c.h.s8.bf16 %v9470_v35  ;;  %v5754_v8 = vld [vmem:[#allocation17 + $0x190] sm:$0xff] }
 0xc75   :  { %v8059_v51 = vpop.eup %8058  ;;  %6297 = vmatprep.subr.bf16.mxu0 %v5929_v36  ;;  %v5675_v46 = vadd.f32 1.0, %v8057_v60  ;;  %v5688_v54 = vmul.f32 0.5, %v5676_v42  ;;  %v5694_v7 = vmul.f32 %v5682_v25, %v9510_v30  ;;  %v5755_v36 = vld [vmem:[#allocation17 + $0x198] sm:$0xff]  ;;  %v5944_v30 = vunpack.c.l.s8.bf16 %v5752_v45  ;;  %v5761_v60 = vld [vmem:[#allocation17 + $0x1c8] sm:$0xff] }
 0xc76   :  { %v8061_v16 = vpop.eup %8060  ;;  %v5681_v28 = vmul.f32 0.5, %v5669_v13  ;;  %v5698_v6 = vmul.f32 %v5686_v32, %v9518_v39  ;;  %v5671_v44 = vadd.f32 1.0, %v8059_v51  ;;  %v5940_v10 = vunpack.c.h.s8.bf16 %v5748_v53  ;;  %v5765_v51 = vld [vmem:[#allocation17 + $0x1e8] sm:$0xff] }
 0xc77   :  { %v5687_v11 = vmul.f32 0.5, %v5675_v46  ;;  %v5677_v20 = vadd.f32 1.0, %v8061_v16  ;;  %v5700_v50 = vmul.f32 %v5688_v54, %v9524_v37  ;;  %v5947_v23 = vunpack.c.l.s8.bf16 %v5755_v36  ;;  %v5764_v16 = vld [vmem:[#allocation17 + $0x1e0] sm:$0xff] }
 0xc78   :  { %6298 = vmatpush1.bf16.msra.mxu0 %v5928_v9  ;;  %v9564_v24 = vpack.c.bf16 %v5698_v6, %v5692_v57  ;;  %v5683_v15 = vmul.f32 0.5, %v5671_v44  ;;  %v5693_v56 = vmul.f32 %v5681_v28, %v9512_v12  ;;  %v5946_v42 = vunpack.c.l.s8.bf16 %v5754_v8  ;;  %v5767_v6 = vld [vmem:[#allocation17 + $0x1f8] sm:$0xff] }
 0xc79   :  { %v5699_v61 = vmul.f32 %v5687_v11, %v9526_v1  ;;  %6299 = vmatprep.subr.bf16.mxu0 %v5935_v4  ;;  %v5689_v40 = vmul.f32 0.5, %v5677_v20  ;;  %v9568_v39 = vpack.c.bf16 %v5700_v50, %v5694_v7  ;;  %v5759_v1 = vld [vmem:[#allocation17 + $0x1b8] sm:$0xff]  ;;  %v5953_v25 = vunpack.c.h.s8.bf16 %v5755_v36  ;;  %v5760_v4 = vld [vmem:[#allocation17 + $0x1c0] sm:$0xff] }
 0xc7a   :  { %v5695_v37 = vmul.f32 %v5683_v15, %v9516_v62  ;;  %v5950_v62 = vunpack.c.h.s8.bf16 %v5752_v45  ;;  %v5957_v35 = vunpack.c.l.s8.bf16 %v5759_v1  ;;  %v5963_v13 = vunpack.c.h.s8.bf16 %v5759_v1  ;;  %v5771_v7 = vld [vmem:[#allocation17 + $0x218] sm:$0xff]  ;;  %v5766_v45 = vld [vmem:[#allocation17 + $0x1f0] sm:$0xff] }
 0xc7b   :  { %v9570_v52 = vpack.c.bf16 %v5699_v61, %v5693_v56  ;;  %v5701_v59 = vmul.f32 %v5689_v40, %v9533_v22  ;;  %v5758_v22 = vld [vmem:[#allocation17 + $0x1b0] sm:$0xff]  ;;  %v5952_v32 = vunpack.c.h.s8.bf16 %v5754_v8  ;;  %v5959_v46 = vunpack.c.l.s8.bf16 %v5761_v60  ;;  %v5776_v8 = vld [vmem:[#allocation17 + $0x240] sm:$0xff] }
 0xc7c   :  { %6300 = vmatpush1.bf16.msra.mxu0 %v5934_v17  ;;  %v5956_v9 = vunpack.c.l.s8.bf16 %v5758_v22  ;;  %v5962_v53 = vunpack.c.h.s8.bf16 %v5758_v22  ;;  %v5969_v54 = vunpack.c.l.s8.bf16 %v5765_v51  ;;  %v5958_v28 = vunpack.c.l.s8.bf16 %v5760_v4  ;;  %v5770_v56 = vld [vmem:[#allocation17 + $0x210] sm:$0xff]  ;;  %v5779_v22 = vld [vmem:[#allocation17 + $0x258] sm:$0xff] }
 0xc7d   :  { %6174 = vmatprep.mubr.bf16.mxu1 %v9570_v52  ;;  %6303 = vmatprep.mubr.bf16.mxu0 %v9570_v52  ;;  %v9577_v12 = vpack.c.bf16 %v5701_v59, %v5695_v37  ;;  %v5965_v57 = vunpack.c.h.s8.bf16 %v5761_v60  ;;  %v5968_v44 = vunpack.c.l.s8.bf16 %v5764_v16  ;;  %v5975_v11 = vunpack.c.h.s8.bf16 %v5765_v51  ;;  %v5777_v59 = vld [vmem:[#allocation17 + $0x248] sm:$0xff] }
 0xc7e   :  { %6175 = vmatmul.mubr.bf16.vlgmr.msra.gmra.mrb[60].mxu1 %v9564_v24  ;;  %6301 = vmatprep.subr.bf16.mxu0 %v5941_v63  ;;  %v5964_v20 = vunpack.c.h.s8.bf16 %v5760_v4  ;;  %v5971_v50 = vunpack.c.l.s8.bf16 %v5767_v6  ;;  %v5974_v17 = vunpack.c.h.s8.bf16 %v5764_v16  ;;  %v5981_v15 = vunpack.c.l.s8.bf16 %v5771_v7  ;;  %v5773_v63 = vld [vmem:[#allocation17 + $0x228] sm:$0xff]  ;;  %v5782_v4 = vld [vmem:[#allocation17 + $0x270] sm:$0xff] }
 0xc7f   :  { %6186 = vmatpush1.bf16.msra.mxu1 %v5944_v30  ;;  %6217 = vmatprep.mubr.bf16.mxu1 %v9577_v12  ;;  %v5970_v61 = vunpack.c.l.s8.bf16 %v5766_v45  ;;  %v5977_v40 = vunpack.c.h.s8.bf16 %v5767_v6  ;;  %v5980_v36 = vunpack.c.l.s8.bf16 %v5770_v56  ;;  %v5987_v30 = vunpack.c.h.s8.bf16 %v5771_v7  ;;  %v5785_v16 = vld [vmem:[#allocation17 + $0x288] sm:$0xff] }
 0xc80   :  { %6187 = vmatprep.subr.bf16.mxu1 %v5951_v43  ;;  %6302 = vmatpush1.bf16.msra.mxu0 %v5940_v10  ;;  %v5976_v37 = vunpack.c.h.s8.bf16 %v5766_v45  ;;  %v5983_v43 = vunpack.c.l.s8.bf16 %v5773_v63  ;;  %v5772_v10 = vld [vmem:[#allocation17 + $0x220] sm:$0xff]  ;;  %v5986_v1 = vunpack.c.h.s8.bf16 %v5770_v56  ;;  %v5998_v51 = vunpack.c.h.s8.bf16 %v5776_v8  ;;  %v5791_v56 = vld [vmem:[#allocation17 + $0x2b8] sm:$0xff] }
 0xc81   :  { %6314 = vmatprep.subr.bf16.mxu0 %v5947_v23  ;;  %v5993_v23 = vunpack.c.l.s8.bf16 %v5777_v59  ;;  %v5988_v60 = vunpack.c.h.s8.bf16 %v5772_v10  ;;  %v6010_v7 = vunpack.c.h.s8.bf16 %v5782_v4  ;;  %v5788_v45 = vld [vmem:[#allocation17 + $0x2a0] sm:$0xff] }
 0xc83   :  { %6188 = vmatpush1.bf16.msra.mxu1 %v5950_v62  ;;  %6304 = vmatmul.mubr.bf16.vlgmr.msra.gmra.mrb[32].mxu0 %v9564_v24  ;;  %v5982_v62 = vunpack.c.l.s8.bf16 %v5772_v10  ;;  %v5794_v10 = vld [vmem:[#allocation17 + $0x2d0] sm:$0xff] }
 0xc84   :  { %6189 = vmatprep.subr.bf16.mxu1 %v5957_v35  ;;  %6315 = vmatpush1.bf16.msra.mxu0 %v5946_v42  ;;  %v5989_v35 = vunpack.c.h.s8.bf16 %v5773_v63  ;;  %v5992_v42 = vunpack.c.l.s8.bf16 %v5776_v8  ;;  %v5797_v8 = vld [vmem:[#allocation17 + $0x2e8] sm:$0xff] }
 0xc85   :  { %6346 = vmatprep.mubr.bf16.mxu0 %v9577_v12  ;;  %6316 = vmatprep.subr.bf16.mxu0 %v5953_v25  ;;  %v5999_v25 = vunpack.c.h.s8.bf16 %v5777_v59  ;;  %v6022_v59 = vunpack.c.h.s8.bf16 %v5788_v45 }
 0xc87   :  { %6190 = vmatpush1.bf16.msra.mxu1 %v5956_v9  ;;  %v5783_v9 = vld [vmem:[#allocation17 + $0x278] sm:$0xff] }
 0xc88   :  { %6191 = vmatprep.subr.bf16.mxu1 %v5963_v13  ;;  %6317 = vmatpush1.bf16.msra.mxu0 %v5952_v32  ;;  %v5995_v13 = vunpack.c.l.s8.bf16 %v5779_v22  ;;  %v5778_v32 = vld [vmem:[#allocation17 + $0x250] sm:$0xff] }
 0xc89   :  { %6318 = vmatprep.subr.bf16.mxu0 %v5959_v46  ;;  %v6005_v46 = vunpack.c.l.s8.bf16 %v5783_v9  ;;  %v6000_v6 = vunpack.c.h.s8.bf16 %v5778_v32 }
 0xc8b   :  { %6192 = vmatpush1.bf16.msra.mxu1 %v5962_v53  ;;  %v5994_v53 = vunpack.c.l.s8.bf16 %v5778_v32 }
 0xc8c   :  { %6193 = vmatprep.subr.bf16.mxu1 %v5969_v54  ;;  %6319 = vmatpush1.bf16.msra.mxu0 %v5958_v28  ;;  %v6001_v54 = vunpack.c.h.s8.bf16 %v5779_v22  ;;  %v6004_v28 = vunpack.c.l.s8.bf16 %v5782_v4  ;;  %v5803_v4 = vld [vmem:[#allocation17 + $0x318] sm:$0xff] }
 0xc8d   :  { %6320 = vmatprep.subr.bf16.mxu0 %v5965_v57  ;;  %v6011_v57 = vunpack.c.h.s8.bf16 %v5783_v9  ;;  %v6034_v9 = vunpack.c.h.s8.bf16 %v5794_v10 }
 0xc8f   :  { %6194 = vmatpush1.bf16.msra.mxu1 %v5968_v44  ;;  %v5789_v44 = vld [vmem:[#allocation17 + $0x2a8] sm:$0xff] }
 0xc90   :  { %6195 = vmatprep.subr.bf16.mxu1 %v5975_v11  ;;  %6321 = vmatpush1.bf16.msra.mxu0 %v5964_v20  ;;  %v6007_v11 = vunpack.c.l.s8.bf16 %v5785_v16  ;;  %v5784_v20 = vld [vmem:[#allocation17 + $0x280] sm:$0xff] }
 0xc91   :  { %6322 = vmatprep.subr.bf16.mxu0 %v5971_v50  ;;  %v6017_v50 = vunpack.c.l.s8.bf16 %v5789_v44  ;;  %v6012_v63 = vunpack.c.h.s8.bf16 %v5784_v20 }
 0xc93   :  { %6196 = vmatpush1.bf16.msra.mxu1 %v5974_v17  ;;  %v6006_v17 = vunpack.c.l.s8.bf16 %v5784_v20 }
 0xc94   :  { %6197 = vmatprep.subr.bf16.mxu1 %v5981_v15  ;;  %6323 = vmatpush1.bf16.msra.mxu0 %v5970_v61  ;;  %v6013_v15 = vunpack.c.h.s8.bf16 %v5785_v16  ;;  %v6016_v61 = vunpack.c.l.s8.bf16 %v5788_v45  ;;  %v5809_v45 = vld [vmem:[#allocation17 + $0x348] sm:$0xff] }
 0xc95   :  { %6324 = vmatprep.subr.bf16.mxu0 %v5977_v40  ;;  %v6023_v40 = vunpack.c.h.s8.bf16 %v5789_v44 }
 0xc97   :  { %6198 = vmatpush1.bf16.msra.mxu1 %v5980_v36  ;;  %v5795_v36 = vld [vmem:[#allocation17 + $0x2d8] sm:$0xff] }
 0xc98   :  { %6199 = vmatprep.subr.bf16.mxu1 %v5987_v30  ;;  %6325 = vmatpush1.bf16.msra.mxu0 %v5976_v37  ;;  %v6019_v30 = vunpack.c.l.s8.bf16 %v5791_v56  ;;  %v5790_v37 = vld [vmem:[#allocation17 + $0x2b0] sm:$0xff] }
 0xc99   :  { %6326 = vmatprep.subr.bf16.mxu0 %v5983_v43  ;;  %v6029_v43 = vunpack.c.l.s8.bf16 %v5795_v36  ;;  %v6024_v22 = vunpack.c.h.s8.bf16 %v5790_v37 }
 0xc9b   :  { %6200 = vmatpush1.bf16.msra.mxu1 %v5986_v1  ;;  %v6018_v1 = vunpack.c.l.s8.bf16 %v5790_v37 }
 0xc9c   :  { %6201 = vmatprep.subr.bf16.mxu1 %v5993_v23  ;;  %6327 = vmatpush1.bf16.msra.mxu0 %v5982_v62  ;;  %v6025_v23 = vunpack.c.h.s8.bf16 %v5791_v56  ;;  %v6028_v62 = vunpack.c.l.s8.bf16 %v5794_v10  ;;  %v5815_v10 = vld [vmem:[#allocation17 + $0x378] sm:$0xff] }
 0xc9d   :  { %6328 = vmatprep.subr.bf16.mxu0 %v5989_v35  ;;  %v6035_v35 = vunpack.c.h.s8.bf16 %v5795_v36 }
 0xc9f   :  { %6202 = vmatpush1.bf16.msra.mxu1 %v5992_v42  ;;  %v6031_v42 = vunpack.c.l.s8.bf16 %v5797_v8 }
 0xca0   :  { %6203 = vmatprep.subr.bf16.mxu1 %v5999_v25  ;;  %6329 = vmatpush1.bf16.msra.mxu0 %v5988_v60  ;;  %v5796_v25 = vld [vmem:[#allocation17 + $0x2e0] sm:$0xff]  ;;  %v5801_v60 = vld [vmem:[#allocation17 + $0x308] sm:$0xff] }
 0xca1   :  { %6330 = vmatprep.subr.bf16.mxu0 %v5995_v13  ;;  %v6030_v13 = vunpack.c.l.s8.bf16 %v5796_v25  ;;  %v6041_v32 = vunpack.c.l.s8.bf16 %v5801_v60  ;;  %v6047_v16 = vunpack.c.h.s8.bf16 %v5801_v60 }
 0xca3   :  { %6204 = vmatpush1.bf16.msra.mxu1 %v5998_v51  ;;  %v5800_v51 = vld [vmem:[#allocation17 + $0x300] sm:$0xff] }
 0xca4   :  { %6205 = vmatprep.subr.bf16.mxu1 %v6005_v46  ;;  %6331 = vmatpush1.bf16.msra.mxu0 %v5994_v53  ;;  %v6037_v46 = vunpack.c.h.s8.bf16 %v5797_v8  ;;  %v6040_v53 = vunpack.c.l.s8.bf16 %v5800_v51  ;;  %v6046_v44 = vunpack.c.h.s8.bf16 %v5800_v51 }
 0xca5   :  { %6332 = vmatprep.subr.bf16.mxu0 %v6001_v54  ;;  %v6036_v54 = vunpack.c.h.s8.bf16 %v5796_v25 }
 0xca7   :  { %6206 = vmatpush1.bf16.msra.mxu1 %v6004_v28  ;;  %v6043_v28 = vunpack.c.l.s8.bf16 %v5803_v4 }
 0xca8   :  { %6207 = vmatprep.subr.bf16.mxu1 %v6011_v57  ;;  %6333 = vmatpush1.bf16.msra.mxu0 %v6000_v6  ;;  %v5802_v57 = vld [vmem:[#allocation17 + $0x310] sm:$0xff]  ;;  %v5807_v6 = vld [vmem:[#allocation17 + $0x338] sm:$0xff] }
 0xca9   :  { %6334 = vmatprep.subr.bf16.mxu0 %v6007_v11  ;;  %v6042_v11 = vunpack.c.l.s8.bf16 %v5802_v57  ;;  %v6053_v20 = vunpack.c.l.s8.bf16 %v5807_v6  ;;  %v6059_v56 = vunpack.c.h.s8.bf16 %v5807_v6 }
 0xcab   :  { %6208 = vmatpush1.bf16.msra.mxu1 %v6010_v7  ;;  %v5806_v7 = vld [vmem:[#allocation17 + $0x330] sm:$0xff] }
 0xcac   :  { %6209 = vmatprep.subr.bf16.mxu1 %v6017_v50  ;;  %6335 = vmatpush1.bf16.msra.mxu0 %v6006_v17  ;;  %v6049_v50 = vunpack.c.h.s8.bf16 %v5803_v4  ;;  %v6052_v17 = vunpack.c.l.s8.bf16 %v5806_v7  ;;  %v6058_v36 = vunpack.c.h.s8.bf16 %v5806_v7 }
 0xcad   :  { %6336 = vmatprep.subr.bf16.mxu0 %v6013_v15  ;;  %v6048_v15 = vunpack.c.h.s8.bf16 %v5802_v57 }
 0xcaf   :  { %6210 = vmatpush1.bf16.msra.mxu1 %v6016_v61  ;;  %v6055_v61 = vunpack.c.l.s8.bf16 %v5809_v45 }
 0xcb0   :  { %6211 = vmatprep.subr.bf16.mxu1 %v6023_v40  ;;  %6337 = vmatpush1.bf16.msra.mxu0 %v6012_v63  ;;  %v5808_v40 = vld [vmem:[#allocation17 + $0x340] sm:$0xff]  ;;  %v5813_v63 = vld [vmem:[#allocation17 + $0x368] sm:$0xff] }
 0xcb1   :  { %6338 = vmatprep.subr.bf16.mxu0 %v6019_v30  ;;  %v6054_v30 = vunpack.c.l.s8.bf16 %v5808_v40  ;;  %v6065_v37 = vunpack.c.l.s8.bf16 %v5813_v63  ;;  %v6071_v8 = vunpack.c.h.s8.bf16 %v5813_v63 }
 0xcb3   :  { %6212 = vmatpush1.bf16.msra.mxu1 %v6022_v59  ;;  %v5812_v59 = vld [vmem:[#allocation17 + $0x360] sm:$0xff] }
 0xcb4   :  { %6213 = vmatprep.subr.bf16.mxu1 %v6029_v43  ;;  %6339 = vmatpush1.bf16.msra.mxu0 %v6018_v1  ;;  %v6061_v43 = vunpack.c.h.s8.bf16 %v5809_v45  ;;  %v6064_v1 = vunpack.c.l.s8.bf16 %v5812_v59 }
 0xcb5   :  { %6340 = vmatprep.subr.bf16.mxu0 %v6025_v23  ;;  %v6060_v23 = vunpack.c.h.s8.bf16 %v5808_v40 }
 0xcb7   :  { %6214 = vmatpush1.bf16.msra.mxu1 %v6028_v62  ;;  %v6067_v62 = vunpack.c.l.s8.bf16 %v5815_v10 }
 0xcb8   :  { %6215 = vmatprep.subr.bf16.mxu1 %v6035_v35  ;;  %6341 = vmatpush1.bf16.msra.mxu0 %v6024_v22  ;;  %v5814_v35 = vld [vmem:[#allocation17 + $0x370] sm:$0xff]  ;;  %v5819_v22 = vld [vmem:[#allocation17 + $0x398] sm:$0xff] }
 0xcb9   :  { %6342 = vmatprep.subr.bf16.mxu0 %v6031_v42  ;;  %v6070_v42 = vunpack.c.h.s8.bf16 %v5812_v59  ;;  %v6066_v25 = vunpack.c.l.s8.bf16 %v5814_v35  ;;  %v6077_v60 = vunpack.c.l.s8.bf16 %v5819_v22  ;;  %v6083_v4 = vunpack.c.h.s8.bf16 %v5819_v22 }
 0xcbb   :  { %6216 = vmatpush1.bf16.msra.mxu1 %v6034_v9  ;;  %v5818_v9 = vld [vmem:[#allocation17 + $0x390] sm:$0xff] }
 0xcbc   :  { %6343 = vmatpush1.bf16.msra.mxu0 %v6030_v13  ;;  %6228 = vmatprep.subr.bf16.mxu1 %v6041_v32  ;;  %v6073_v13 = vunpack.c.h.s8.bf16 %v5815_v10  ;;  %v5821_v32 = vld [vmem:[#allocation17 + $0x3a8] sm:$0xff]  ;;  %v6076_v51 = vunpack.c.l.s8.bf16 %v5818_v9 }
 0xcbd   :  { %6344 = vmatprep.subr.bf16.mxu0 %v6037_v46  ;;  %v6072_v46 = vunpack.c.h.s8.bf16 %v5814_v35 }
 0xcbe   :  { %6218 = vmatmul.mubr.bf16.vlgmr.msra.gmra.mrb[60].mxu1 %v9568_v39 }
 0xcbf   :  { %6229 = vmatpush1.bf16.msra.mxu1 %v6040_v53  ;;  %v6079_v53 = vunpack.c.l.s8.bf16 %v5821_v32 }
 0xcc0   :  { %6345 = vmatpush1.bf16.msra.mxu0 %v6036_v54  ;;  %6230 = vmatprep.subr.bf16.mxu1 %v6047_v16  ;;  %v5820_v54 = vld [vmem:[#allocation17 + $0x3a0] sm:$0xff]  ;;  %v5825_v16 = vld [vmem:[#allocation17 + $0x3c8] sm:$0xff] }
 0xcc1   :  { %6357 = vmatprep.subr.bf16.mxu0 %v6043_v28  ;;  %v6082_v28 = vunpack.c.h.s8.bf16 %v5818_v9  ;;  %v6078_v57 = vunpack.c.l.s8.bf16 %v5820_v54  ;;  %v6089_v6 = vunpack.c.l.s8.bf16 %v5825_v16  ;;  %v6095_v45 = vunpack.c.h.s8.bf16 %v5825_v16 }
 0xcc3   :  { %6347 = vmatmul.mubr.bf16.vlgmr.msra.gmra.mrb[32].mxu0 %v9568_v39  ;;  %6231 = vmatpush1.bf16.msra.mxu1 %v6046_v44  ;;  %v5824_v44 = vld [vmem:[#allocation17 + $0x3c0] sm:$0xff] }
 0xcc4   :  { %6358 = vmatpush1.bf16.msra.mxu0 %v6042_v11  ;;  %6232 = vmatprep.subr.bf16.mxu1 %v6053_v20  ;;  %v6085_v11 = vunpack.c.h.s8.bf16 %v5821_v32  ;;  %v5827_v20 = vld [vmem:[#allocation17 + $0x3d8] sm:$0xff]  ;;  %v6088_v7 = vunpack.c.l.s8.bf16 %v5824_v44 }
 0xcc5   :  { %6359 = vmatprep.subr.bf16.mxu0 %v6049_v50  ;;  %v6084_v50 = vunpack.c.h.s8.bf16 %v5820_v54 }
 0xcc7   :  { %6233 = vmatpush1.bf16.msra.mxu1 %v6052_v17  ;;  %v6091_v17 = vunpack.c.l.s8.bf16 %v5827_v20 }
 0xcc8   :  { %6360 = vmatpush1.bf16.msra.mxu0 %v6048_v15  ;;  %6234 = vmatprep.subr.bf16.mxu1 %v6059_v56  ;;  %v5826_v15 = vld [vmem:[#allocation17 + $0x3d0] sm:$0xff]  ;;  %v5831_v56 = vld [vmem:[#allocation17 + $0x3f8] sm:$0xff] }
 0xcc9   :  { %6361 = vmatprep.subr.bf16.mxu0 %v6055_v61  ;;  %v6094_v61 = vunpack.c.h.s8.bf16 %v5824_v44  ;;  %v6090_v40 = vunpack.c.l.s8.bf16 %v5826_v15  ;;  %v6101_v63 = vunpack.c.l.s8.bf16 %v5831_v56  ;;  %v6107_v10 = vunpack.c.h.s8.bf16 %v5831_v56 }
 0xccb   :  { %6235 = vmatpush1.bf16.msra.mxu1 %v6058_v36  ;;  %v5830_v36 = vld [vmem:[#allocation17 + $0x3f0] sm:$0xff] }
 0xccc   :  { %6362 = vmatpush1.bf16.msra.mxu0 %v6054_v30  ;;  %6236 = vmatprep.subr.bf16.mxu1 %v6065_v37  ;;  %v6097_v30 = vunpack.c.h.s8.bf16 %v5827_v20  ;;  %v5833_v37 = vld [vmem:[#allocation17 + $0x408] sm:$0xff]  ;;  %v6100_v59 = vunpack.c.l.s8.bf16 %v5830_v36 }
 0xccd   :  { %6363 = vmatprep.subr.bf16.mxu0 %v6061_v43  ;;  %v6096_v43 = vunpack.c.h.s8.bf16 %v5826_v15 }
 0xccf   :  { %6237 = vmatpush1.bf16.msra.mxu1 %v6064_v1  ;;  %v6103_v1 = vunpack.c.l.s8.bf16 %v5833_v37 }
 0xcd0   :  { %6364 = vmatpush1.bf16.msra.mxu0 %v6060_v23  ;;  %6238 = vmatprep.subr.bf16.mxu1 %v6071_v8  ;;  %v5832_v23 = vld [vmem:[#allocation17 + $0x400] sm:$0xff]  ;;  %v5837_v8 = vld [vmem:[#allocation17 + $0x428] sm:$0xff] }
 0xcd1   :  { %6365 = vmatprep.subr.bf16.mxu0 %v6067_v62  ;;  %v6106_v62 = vunpack.c.h.s8.bf16 %v5830_v36  ;;  %v6102_v35 = vunpack.c.l.s8.bf16 %v5832_v23  ;;  %v6113_v22 = vunpack.c.l.s8.bf16 %v5837_v8  ;;  %v6119_v32 = vunpack.c.h.s8.bf16 %v5837_v8 }
 0xcd2   :  { %v5533_v36 = vrot.slane %v9476_v38, %v9096_v48 }
 0xcd3   :  { %6239 = vmatpush1.bf16.msra.mxu1 %v6070_v42  ;;  %v5836_v42 = vld [vmem:[#allocation17 + $0x420] sm:$0xff] }
 0xcd4   :  { %6366 = vmatpush1.bf16.msra.mxu0 %v6066_v25  ;;  %6240 = vmatprep.subr.bf16.mxu1 %v6077_v60  ;;  %v6109_v25 = vunpack.c.h.s8.bf16 %v5833_v37  ;;  %v5839_v60 = vld [vmem:[#allocation17 + $0x438] sm:$0xff]  ;;  %v6112_v9 = vunpack.c.l.s8.bf16 %v5836_v42 }
 0xcd5   :  { %6367 = vmatprep.subr.bf16.mxu0 %v6073_v13  ;;  %v6108_v13 = vunpack.c.h.s8.bf16 %v5832_v23 }
 0xcd7   :  { %6241 = vmatpush1.bf16.msra.mxu1 %v6076_v51  ;;  %v6115_v51 = vunpack.c.l.s8.bf16 %v5839_v60 }
 0xcd8   :  { %6368 = vmatpush1.bf16.msra.mxu0 %v6072_v46  ;;  %6242 = vmatprep.subr.bf16.mxu1 %v6083_v4  ;;  %v5838_v46 = vld [vmem:[#allocation17 + $0x430] sm:$0xff]  ;;  %v5843_v4 = vld [vmem:[#allocation17 + $0x458] sm:$0xff] }
 0xcd9   :  { %6369 = vmatprep.subr.bf16.mxu0 %v6079_v53  ;;  %v6118_v53 = vunpack.c.h.s8.bf16 %v5836_v42  ;;  %v6114_v54 = vunpack.c.l.s8.bf16 %v5838_v46  ;;  %v6125_v16 = vunpack.c.l.s8.bf16 %v5843_v4  ;;  %v6131_v20 = vunpack.c.h.s8.bf16 %v5843_v4 }
 0xcdb   :  { %6243 = vmatpush1.bf16.msra.mxu1 %v6082_v28  ;;  %v5842_v28 = vld [vmem:[#allocation17 + $0x450] sm:$0xff] }
 0xcdc   :  { %6370 = vmatpush1.bf16.msra.mxu0 %v6078_v57  ;;  %6244 = vmatprep.subr.bf16.mxu1 %v6089_v6  ;;  %v6121_v57 = vunpack.c.h.s8.bf16 %v5839_v60  ;;  %v5845_v6 = vld [vmem:[#allocation17 + $0x468] sm:$0xff]  ;;  %v6124_v44 = vunpack.c.l.s8.bf16 %v5842_v28 }
 0xcdd   :  { %6371 = vmatprep.subr.bf16.mxu0 %v6085_v11  ;;  %v6120_v11 = vunpack.c.h.s8.bf16 %v5838_v46 }
 0xcdf   :  { %6245 = vmatpush1.bf16.msra.mxu1 %v6088_v7  ;;  %v6127_v7 = vunpack.c.l.s8.bf16 %v5845_v6 }
 0xce0   :  { %6372 = vmatpush1.bf16.msra.mxu0 %v6084_v50  ;;  %6246 = vmatprep.subr.bf16.mxu1 %v6095_v45  ;;  %v5844_v50 = vld [vmem:[#allocation17 + $0x460] sm:$0xff]  ;;  %v9585_v45 = vld [vmem:[#allocation17 + $0x28] sm:$0xff] }
 0xce1   :  { %6373 = vmatprep.subr.bf16.mxu0 %v6091_v17  ;;  %v6130_v17 = vunpack.c.h.s8.bf16 %v5842_v28  ;;  %v6126_v15 = vunpack.c.l.s8.bf16 %v5844_v50  ;;  %v5853_v56 = vunpack.c.l.s8.bf16 %v9585_v45 }
 0xce3   :  { %6247 = vmatpush1.bf16.msra.mxu1 %v6094_v61  ;;  %v6133_v61 = vunpack.c.h.s8.bf16 %v5845_v6 }
 0xce4   :  { %6374 = vmatpush1.bf16.msra.mxu0 %v6090_v40  ;;  %6248 = vmatprep.subr.bf16.mxu1 %v6101_v63  ;;  %v6132_v40 = vunpack.c.h.s8.bf16 %v5844_v50  ;;  %v5529_v63 = vrot.slane %v9476_v38, %v9127_v26 }
 0xce5   :  { %6375 = vmatprep.subr.bf16.mxu0 %v6097_v30  ;;  %v5573_v30 = vrot.slane %v9478_v18, %v9127_v26 }
 0xce7   :  { %6249 = vmatpush1.bf16.msra.mxu1 %v6100_v59  ;;  %v5577_v59 = vrot.slane %v9478_v18, %v9096_v48 }
 0xce8   :  { %6376 = vmatpush1.bf16.msra.mxu0 %v6096_v43  ;;  %6250 = vmatprep.subr.bf16.mxu1 %v6107_v10 }
 0xce9   :  { %6377 = vmatprep.subr.bf16.mxu0 %v6103_v1 }
 0xceb   :  { %6251 = vmatpush1.bf16.msra.mxu1 %v6106_v62 }
 0xcec   :  { %6378 = vmatpush1.bf16.msra.mxu0 %v6102_v35  ;;  %6252 = vmatprep.subr.bf16.mxu1 %v6113_v22 }
 0xced   :  { %6379 = vmatprep.subr.bf16.mxu0 %v6109_v25 }
 0xcef   :  { %6253 = vmatpush1.bf16.msra.mxu1 %v6112_v9 }
 0xcf0   :  { %6380 = vmatpush1.bf16.msra.mxu0 %v6108_v13  ;;  %6254 = vmatprep.subr.bf16.mxu1 %v6119_v32 }
 0xcf1   :  { %6381 = vmatprep.subr.bf16.mxu0 %v6115_v51 }
 0xcf3   :  { %6255 = vmatpush1.bf16.msra.mxu1 %v6118_v53 }
 0xcf4   :  { %6382 = vmatpush1.bf16.msra.mxu0 %v6114_v54  ;;  %6256 = vmatprep.subr.bf16.mxu1 %v6125_v16 }
 0xcf5   :  { %6383 = vmatprep.subr.bf16.mxu0 %v6121_v57 }
 0xcf7   :  { %6257 = vmatpush1.bf16.msra.mxu1 %v6124_v44 }
 0xcf8   :  { %6384 = vmatpush1.bf16.msra.mxu0 %v6120_v11  ;;  %6258 = vmatprep.subr.bf16.mxu1 %v6131_v20 }
 0xcf9   :  { %6385 = vmatprep.subr.bf16.mxu0 %v6127_v7 }
 0xcfb   :  { %6259 = vmatpush1.bf16.msra.mxu1 %v6130_v17 }
 0xcfc   :  { %6386 = vmatpush1.bf16.msra.mxu0 %v6126_v15  ;;  %6400 = vmatprep.subr.bf16.mxu1 %v5853_v56 }
 0xcfd   :  { %6387 = vmatprep.subr.bf16.mxu0 %v6133_v61 }
 0xd00   :  { %6388 = vmatpush1.bf16.msra.mxu0 %v6132_v40 }
 0xd16   :  { %v5499_v37 = vpop.f32.mrb[28].mxu0 }
 0xd17   :  { %v5544_v43 = vmul.f32 %v5529_v63, %v5499_v37  ;;  %v5501_v10 = vpop.f32.mrb[29].mxu0 }
 0xd18   :  { %v5545_v1 = vmul.f32 %v5533_v36, %v5501_v10  ;;  %v5503_v23 = vpop.f32.mrb[30].mxu0 }
 0xd19   :  { %v5588_v8 = vadd.f32 %v5573_v30, %v5544_v43  ;;  %v5550_v62 = vmul.f32 %v5529_v63, %v5503_v23  ;;  %v5505_v35 = vpop.f32.mrb[31].mxu0 }
 0xd1a   :  { %v5589_v22 = vadd.f32 %v5577_v59, %v5545_v1  ;;  %v5551_v42 = vmul.f32 %v5533_v36, %v5505_v35  ;;  %v5708_v35 = vld [vmem:[#allocation17 + $0x20] sm:$0xff] }
 0xd1b   :  { %v5600_v25 = vmul.f32 %v5588_v8, %v5588_v8  ;;  %v5594_v60 = vadd.f32 %v5573_v30, %v5550_v62 }
 0xd1c   :  { %v5601_v9 = vmul.f32 %v5589_v22, %v5589_v22  ;;  %v5595_v38 = vadd.f32 %v5577_v59, %v5551_v42 }
 0xd1d   :  { %v5612_v13 = vmul.f32 %v5600_v25, %v5588_v8  ;;  %v5606_v32 = vmul.f32 %v5594_v60, %v5594_v60 }
 0xd1e   :  { %v5613_v51 = vmul.f32 %v5601_v9, %v5589_v22  ;;  %v5607_v46 = vmul.f32 %v5595_v38, %v5595_v38 }
 0xd1f   :  { %v5624_v4 = vmul.f32 0.044715, %v5612_v13  ;;  %v5618_v53 = vmul.f32 %v5606_v32, %v5594_v60  ;;  %v5852_v32 = vunpack.c.l.s8.bf16 %v5708_v35 }
 0xd20   :  { %v5625_v18 = vmul.f32 0.044715, %v5613_v51  ;;  %v5619_v54 = vmul.f32 %v5607_v46, %v5595_v38  ;;  %v5859_v51 = vunpack.c.h.s8.bf16 %v9585_v45  ;;  %v5715_v46 = vld [vmem:[#allocation17 + $0x58] sm:$0xff] }
 0xd21   :  { %v5636_v16 = vadd.f32 %v5624_v4, %v5588_v8  ;;  %v5630_v28 = vmul.f32 0.044715, %v5618_v53  ;;  %v5871_v45 = vunpack.c.h.s8.bf16 %v5715_v46  ;;  %v5721_v4 = vld [vmem:[#allocation17 + $0x88] sm:$0xff] }
 0xd22   :  { %v5637_v57 = vadd.f32 %v5625_v18, %v5589_v22  ;;  %v5631_v6 = vmul.f32 0.044715, %v5619_v54  ;;  %v5877_v18 = vunpack.c.l.s8.bf16 %v5721_v4  ;;  %v5720_v54 = vld [vmem:[#allocation17 + $0x80] sm:$0xff] }
 0xd23   :  { %v5648_v44 = vmul.f32 0.7978846, %v5636_v16  ;;  %v5642_v11 = vadd.f32 %v5630_v28, %v5594_v60  ;;  %v5876_v16 = vunpack.c.l.s8.bf16 %v5720_v54  ;;  %v5883_v28 = vunpack.c.h.s8.bf16 %v5721_v4 }
 0xd24   :  { %v5649_v20 = vmul.f32 0.7978846, %v5637_v57  ;;  %v5643_v7 = vadd.f32 %v5631_v6, %v5595_v38  ;;  %v5727_v57 = vld [vmem:[#allocation17 + $0xb8] sm:$0xff] }
 0xd25   :  { %8062 = vtanh.f32 %v5648_v44  ;;  %v5654_v50 = vmul.f32 0.7978846, %v5642_v11  ;;  %v5889_v6 = vunpack.c.l.s8.bf16 %v5727_v57  ;;  %v5726_v44 = vld [vmem:[#allocation17 + $0xb0] sm:$0xff] }
 0xd26   :  { %v5655_v17 = vmul.f32 0.7978846, %v5643_v7  ;;  %8064 = vtanh.f32 %v5649_v20  ;;  %v5888_v11 = vunpack.c.l.s8.bf16 %v5726_v44  ;;  %v5895_v20 = vunpack.c.h.s8.bf16 %v5727_v57  ;;  %v5733_v7 = vld [vmem:[#allocation17 + $0xe8] sm:$0xff] }
 0xd27   :  { %8066 = vtanh.f32 %v5654_v50  ;;  %v5894_v50 = vunpack.c.h.s8.bf16 %v5726_v44 }
 0xd28   :  { %8068 = vtanh.f32 %v5655_v17  ;;  %v5901_v17 = vunpack.c.l.s8.bf16 %v5733_v7 }
 0xd2f   :  { %v8063_v15 = vpop.eup %8062 }
 0xd30   :  { %v8065_v56 = vpop.eup %8064  ;;  %v5672_v61 = vadd.f32 1.0, %v8063_v15  ;;  %v5732_v15 = vld [vmem:[#allocation17 + $0xe0] sm:$0xff] }
 0xd31   :  { %v8067_v40 = vpop.eup %8066  ;;  %v5673_v63 = vadd.f32 1.0, %v8065_v56  ;;  %v5900_v56 = vunpack.c.l.s8.bf16 %v5732_v15 }
 0xd32   :  { %v8069_v36 = vpop.eup %8068  ;;  %v5678_v30 = vadd.f32 1.0, %v8067_v40  ;;  %v5684_v37 = vmul.f32 0.5, %v5672_v61  ;;  %v5907_v61 = vunpack.c.h.s8.bf16 %v5733_v7  ;;  %v5739_v40 = vld [vmem:[#allocation17 + $0x118] sm:$0xff] }
 0xd33   :  { %v5679_v59 = vadd.f32 1.0, %v8069_v36  ;;  %v5685_v43 = vmul.f32 0.5, %v5673_v63  ;;  %v5906_v63 = vunpack.c.h.s8.bf16 %v5732_v15  ;;  %v5913_v36 = vunpack.c.l.s8.bf16 %v5739_v40  ;;  %v5774_v15 = vld [vmem:[#allocation17 + $0x230] sm:$0xff] }
 0xd34   :  { %v5690_v10 = vmul.f32 0.5, %v5678_v30  ;;  %v5696_v23 = vmul.f32 %v5684_v37, %v5588_v8  ;;  %v5858_v8 = vunpack.c.h.s8.bf16 %v5708_v35  ;;  %v5738_v30 = vld [vmem:[#allocation17 + $0x110] sm:$0xff] }
 0xd35   :  { %v5691_v1 = vmul.f32 0.5, %v5679_v59  ;;  %v5697_v42 = vmul.f32 %v5685_v43, %v5589_v22  ;;  %v5865_v22 = vunpack.c.l.s8.bf16 %v5715_v46  ;;  %v5912_v37 = vunpack.c.l.s8.bf16 %v5738_v30  ;;  %v5745_v43 = vld [vmem:[#allocation17 + $0x148] sm:$0xff] }
 0xd36   :  { %v5702_v62 = vmul.f32 %v5690_v10, %v5594_v60  ;;  %v5714_v60 = vld [vmem:[#allocation17 + $0x50] sm:$0xff]  ;;  %v5919_v59 = vunpack.c.h.s8.bf16 %v5739_v40  ;;  %v5918_v10 = vunpack.c.h.s8.bf16 %v5738_v30  ;;  %v5931_v35 = vunpack.c.h.s8.bf16 %v5745_v43  ;;  %v5781_v40 = vld [vmem:[#allocation17 + $0x268] sm:$0xff]  ;;  %v5780_v30 = vld [vmem:[#allocation17 + $0x260] sm:$0xff] }
 0xd37   :  { %v5703_v25 = vmul.f32 %v5691_v1, %v5595_v38  ;;  %v5864_v38 = vunpack.c.l.s8.bf16 %v5714_v60  ;;  %v5870_v53 = vunpack.c.h.s8.bf16 %v5714_v60  ;;  %v5925_v1 = vunpack.c.l.s8.bf16 %v5745_v43  ;;  %v5787_v43 = vld [vmem:[#allocation17 + $0x298] sm:$0xff] }
 0xd38   :  { %v9596_v9 = vpack.c.bf16 %v5702_v62, %v5696_v23  ;;  %v5744_v23 = vld [vmem:[#allocation17 + $0x140] sm:$0xff] }
 0xd39   :  { %v9598_v13 = vpack.c.bf16 %v5703_v25, %v5697_v42  ;;  %v5924_v62 = vunpack.c.l.s8.bf16 %v5744_v23  ;;  %v5751_v42 = vld [vmem:[#allocation17 + $0x178] sm:$0xff]  ;;  %v5930_v25 = vunpack.c.h.s8.bf16 %v5744_v23  ;;  %v5786_v23 = vld [vmem:[#allocation17 + $0x290] sm:$0xff] }
 0xd3b   :  { %6260 = vmatprep.mubr.bf16.mxu1 %v9598_v13  ;;  %6389 = vmatprep.mubr.bf16.mxu0 %v9598_v13 }
 0xd3c   :  { %6261 = vmatmul.mubr.bf16.vlgmr.msra.gmra.mrb[60].mxu1 %v9596_v9  ;;  %6390 = vmatmul.mubr.bf16.vlgmr.msra.gmra.mrb[32].mxu0 %v9596_v9 }
 0xd3d   :  { %6401 = vmatpush1.bf16.msra.mxu1 %v5852_v32  ;;  %6432 = vmatprep.mubr.bf16.mxu1 %v9570_v52  ;;  %v5882_v52 = vunpack.c.h.s8.bf16 %v5720_v54  ;;  %v5937_v32 = vunpack.c.l.s8.bf16 %v5751_v42 }
 0xd3e   :  { %6402 = vmatprep.subr.bf16.mxu1 %v5859_v51  ;;  %v5750_v51 = vld [vmem:[#allocation17 + $0x170] sm:$0xff] }
 0xd3f   :  { %v5936_v46 = vunpack.c.l.s8.bf16 %v5750_v51  ;;  %v5942_v60 = vunpack.c.h.s8.bf16 %v5750_v51  ;;  %v5792_v51 = vld [vmem:[#allocation17 + $0x2c0] sm:$0xff] }
 0xd41   :  { %6403 = vmatpush1.bf16.msra.mxu1 %v5858_v8  ;;  %v5943_v8 = vunpack.c.h.s8.bf16 %v5751_v42  ;;  %v5793_v42 = vld [vmem:[#allocation17 + $0x2c8] sm:$0xff] }
 0xd42   :  { %6404 = vmatprep.subr.bf16.mxu1 %v5865_v22  ;;  %v5757_v22 = vld [vmem:[#allocation17 + $0x1a8] sm:$0xff] }
 0xd45   :  { %6405 = vmatpush1.bf16.msra.mxu1 %v5864_v38  ;;  %v5949_v38 = vunpack.c.l.s8.bf16 %v5757_v22 }
 0xd46   :  { %6406 = vmatprep.subr.bf16.mxu1 %v5871_v45  ;;  %v5756_v45 = vld [vmem:[#allocation17 + $0x1a0] sm:$0xff] }
 0xd47   :  { %v5948_v4 = vunpack.c.l.s8.bf16 %v5756_v45  ;;  %v5954_v54 = vunpack.c.h.s8.bf16 %v5756_v45  ;;  %v5798_v45 = vld [vmem:[#allocation17 + $0x2f0] sm:$0xff] }
 0xd49   :  { %6407 = vmatpush1.bf16.msra.mxu1 %v5870_v53  ;;  %v5955_v53 = vunpack.c.h.s8.bf16 %v5757_v22  ;;  %v5799_v22 = vld [vmem:[#allocation17 + $0x2f8] sm:$0xff] }
 0xd4a   :  { %6408 = vmatprep.subr.bf16.mxu1 %v5877_v18  ;;  %v5763_v18 = vld [vmem:[#allocation17 + $0x1d8] sm:$0xff] }
 0xd4d   :  { %6409 = vmatpush1.bf16.msra.mxu1 %v5876_v16  ;;  %v5961_v16 = vunpack.c.l.s8.bf16 %v5763_v18 }
 0xd4e   :  { %6410 = vmatprep.subr.bf16.mxu1 %v5883_v28  ;;  %v5762_v28 = vld [vmem:[#allocation17 + $0x1d0] sm:$0xff] }
 0xd4f   :  { %v5960_v57 = vunpack.c.l.s8.bf16 %v5762_v28  ;;  %v5966_v44 = vunpack.c.h.s8.bf16 %v5762_v28  ;;  %v5804_v28 = vld [vmem:[#allocation17 + $0x320] sm:$0xff] }
 0xd51   :  { %6411 = vmatpush1.bf16.msra.mxu1 %v5882_v52  ;;  %v5967_v52 = vunpack.c.h.s8.bf16 %v5763_v18  ;;  %v5805_v18 = vld [vmem:[#allocation17 + $0x328] sm:$0xff] }
 0xd52   :  { %6412 = vmatprep.subr.bf16.mxu1 %v5889_v6  ;;  %v5769_v6 = vld [vmem:[#allocation17 + $0x208] sm:$0xff] }
 0xd55   :  { %6413 = vmatpush1.bf16.msra.mxu1 %v5888_v11  ;;  %v5973_v11 = vunpack.c.l.s8.bf16 %v5769_v6 }
 0xd56   :  { %6414 = vmatprep.subr.bf16.mxu1 %v5895_v20  ;;  %v5768_v20 = vld [vmem:[#allocation17 + $0x200] sm:$0xff] }
 0xd57   :  { %v5972_v7 = vunpack.c.l.s8.bf16 %v5768_v20 }
 0xd59   :  { %6415 = vmatpush1.bf16.msra.mxu1 %v5894_v50  ;;  %v5775_v50 = vld [vmem:[#allocation17 + $0x238] sm:$0xff] }
 0xd5a   :  { %6416 = vmatprep.subr.bf16.mxu1 %v5901_v17  ;;  %v5985_v17 = vunpack.c.l.s8.bf16 %v5775_v50 }
 0xd5d   :  { %6417 = vmatpush1.bf16.msra.mxu1 %v5900_v56  ;;  %v5984_v56 = vunpack.c.l.s8.bf16 %v5774_v15 }
 0xd5e   :  { %6418 = vmatprep.subr.bf16.mxu1 %v5907_v61  ;;  %v5991_v61 = vunpack.c.h.s8.bf16 %v5775_v50  ;;  %v5817_v50 = vld [vmem:[#allocation17 + $0x388] sm:$0xff] }
 0xd61   :  { %6419 = vmatpush1.bf16.msra.mxu1 %v5906_v63  ;;  %v5990_v63 = vunpack.c.h.s8.bf16 %v5774_v15  ;;  %v5816_v15 = vld [vmem:[#allocation17 + $0x380] sm:$0xff] }
 0xd62   :  { %6420 = vmatprep.subr.bf16.mxu1 %v5913_v36  ;;  %v5997_v36 = vunpack.c.l.s8.bf16 %v5781_v40 }
 0xd65   :  { %6421 = vmatpush1.bf16.msra.mxu1 %v5912_v37  ;;  %v5996_v37 = vunpack.c.l.s8.bf16 %v5780_v30 }
 0xd66   :  { %6422 = vmatprep.subr.bf16.mxu1 %v5919_v59  ;;  %v6003_v59 = vunpack.c.h.s8.bf16 %v5781_v40 }
 0xd69   :  { %6423 = vmatpush1.bf16.msra.mxu1 %v5918_v10  ;;  %v6002_v10 = vunpack.c.h.s8.bf16 %v5780_v30 }
 0xd6a   :  { %6424 = vmatprep.subr.bf16.mxu1 %v5925_v1  ;;  %v6009_v1 = vunpack.c.l.s8.bf16 %v5787_v43 }
 0xd6d   :  { %6425 = vmatpush1.bf16.msra.mxu1 %v5924_v62  ;;  %v6008_v62 = vunpack.c.l.s8.bf16 %v5786_v23 }
 0xd6e   :  { %6426 = vmatprep.subr.bf16.mxu1 %v5931_v35  ;;  %v6015_v35 = vunpack.c.h.s8.bf16 %v5787_v43 }
 0xd71   :  { %6427 = vmatpush1.bf16.msra.mxu1 %v5930_v25  ;;  %v6014_v25 = vunpack.c.h.s8.bf16 %v5786_v23 }
 0xd72   :  { %6428 = vmatprep.subr.bf16.mxu1 %v5937_v32  ;;  %v6021_v32 = vunpack.c.l.s8.bf16 %v5793_v42 }
 0xd75   :  { %6429 = vmatpush1.bf16.msra.mxu1 %v5936_v46  ;;  %v6020_v46 = vunpack.c.l.s8.bf16 %v5792_v51 }
 0xd76   :  { %6430 = vmatprep.subr.bf16.mxu1 %v5943_v8  ;;  %v6027_v8 = vunpack.c.h.s8.bf16 %v5793_v42 }
 0xd79   :  { %6431 = vmatpush1.bf16.msra.mxu1 %v5942_v60  ;;  %v6026_v60 = vunpack.c.h.s8.bf16 %v5792_v51 }
 0xd7a   :  { %6443 = vmatprep.subr.bf16.mxu1 %v5949_v38  ;;  %v6033_v38 = vunpack.c.l.s8.bf16 %v5799_v22 }
 0xd7c   :  { %6433 = vmatmul.mubr.bf16.vlgmr.msra.gmra.mrb[64].mxu1 %v9564_v24  ;;  %v5979_v24 = vunpack.c.h.s8.bf16 %v5769_v6  ;;  %v5811_v6 = vld [vmem:[#allocation17 + $0x358] sm:$0xff] }
 0xd7d   :  { %6444 = vmatpush1.bf16.msra.mxu1 %v5948_v4  ;;  %6475 = vmatprep.mubr.bf16.mxu1 %v9577_v12  ;;  %v5978_v12 = vunpack.c.h.s8.bf16 %v5768_v20  ;;  %v6032_v4 = vunpack.c.l.s8.bf16 %v5798_v45  ;;  %v5810_v20 = vld [vmem:[#allocation17 + $0x350] sm:$0xff] }
 0xd7e   :  { %6445 = vmatprep.subr.bf16.mxu1 %v5955_v53  ;;  %v6039_v53 = vunpack.c.h.s8.bf16 %v5799_v22 }
 0xd81   :  { %6446 = vmatpush1.bf16.msra.mxu1 %v5954_v54  ;;  %v6038_v54 = vunpack.c.h.s8.bf16 %v5798_v45 }
 0xd82   :  { %6447 = vmatprep.subr.bf16.mxu1 %v5961_v16  ;;  %v6045_v16 = vunpack.c.l.s8.bf16 %v5805_v18 }
 0xd85   :  { %6448 = vmatpush1.bf16.msra.mxu1 %v5960_v57  ;;  %v6044_v57 = vunpack.c.l.s8.bf16 %v5804_v28 }
 0xd86   :  { %6449 = vmatprep.subr.bf16.mxu1 %v5967_v52  ;;  %v6051_v52 = vunpack.c.h.s8.bf16 %v5805_v18 }
 0xd89   :  { %6450 = vmatpush1.bf16.msra.mxu1 %v5966_v44  ;;  %v6050_v44 = vunpack.c.h.s8.bf16 %v5804_v28 }
 0xd8a   :  { %6451 = vmatprep.subr.bf16.mxu1 %v5973_v11  ;;  %v6057_v11 = vunpack.c.l.s8.bf16 %v5811_v6 }
 0xd8d   :  { %6452 = vmatpush1.bf16.msra.mxu1 %v5972_v7  ;;  %v6056_v7 = vunpack.c.l.s8.bf16 %v5810_v20 }
 0xd8e   :  { %6453 = vmatprep.subr.bf16.mxu1 %v5979_v24  ;;  %v6063_v24 = vunpack.c.h.s8.bf16 %v5811_v6 }
 0xd91   :  { %6454 = vmatpush1.bf16.msra.mxu1 %v5978_v12  ;;  %v6062_v12 = vunpack.c.h.s8.bf16 %v5810_v20 }
 0xd92   :  { %6455 = vmatprep.subr.bf16.mxu1 %v5985_v17  ;;  %v6069_v17 = vunpack.c.l.s8.bf16 %v5817_v50 }
 0xd95   :  { %6456 = vmatpush1.bf16.msra.mxu1 %v5984_v56  ;;  %v6068_v56 = vunpack.c.l.s8.bf16 %v5816_v15 }
 0xd96   :  { %6457 = vmatprep.subr.bf16.mxu1 %v5991_v61  ;;  %v5823_v61 = vld [vmem:[#allocation17 + $0x3b8] sm:$0xff] }
 0xd97   :  { %v6081_v40 = vunpack.c.l.s8.bf16 %v5823_v61  ;;  %v6087_v30 = vunpack.c.h.s8.bf16 %v5823_v61 }
 0xd99   :  { %6458 = vmatpush1.bf16.msra.mxu1 %v5990_v63  ;;  %v5822_v63 = vld [vmem:[#allocation17 + $0x3b0] sm:$0xff] }
 0xd9a   :  { %6459 = vmatprep.subr.bf16.mxu1 %v5997_v36  ;;  %v6080_v36 = vunpack.c.l.s8.bf16 %v5822_v63 }
 0xd9d   :  { %6460 = vmatpush1.bf16.msra.mxu1 %v5996_v37  ;;  %v5829_v37 = vld [vmem:[#allocation17 + $0x3e8] sm:$0xff] }
 0xd9e   :  { %6461 = vmatprep.subr.bf16.mxu1 %v6003_v59  ;;  %v6086_v59 = vunpack.c.h.s8.bf16 %v5822_v63  ;;  %v6093_v43 = vunpack.c.l.s8.bf16 %v5829_v37  ;;  %v6099_v23 = vunpack.c.h.s8.bf16 %v5829_v37 }
 0xda1   :  { %6462 = vmatpush1.bf16.msra.mxu1 %v6002_v10  ;;  %v5828_v10 = vld [vmem:[#allocation17 + $0x3e0] sm:$0xff] }
 0xda2   :  { %6463 = vmatprep.subr.bf16.mxu1 %v6009_v1  ;;  %v6092_v1 = vunpack.c.l.s8.bf16 %v5828_v10 }
 0xda5   :  { %6464 = vmatpush1.bf16.msra.mxu1 %v6008_v62  ;;  %v5835_v62 = vld [vmem:[#allocation17 + $0x418] sm:$0xff] }
 0xda6   :  { %6465 = vmatprep.subr.bf16.mxu1 %v6015_v35  ;;  %v6098_v35 = vunpack.c.h.s8.bf16 %v5828_v10  ;;  %v6105_v42 = vunpack.c.l.s8.bf16 %v5835_v62  ;;  %v6111_v51 = vunpack.c.h.s8.bf16 %v5835_v62 }
 0xda9   :  { %6466 = vmatpush1.bf16.msra.mxu1 %v6014_v25  ;;  %v5834_v25 = vld [vmem:[#allocation17 + $0x410] sm:$0xff] }
 0xdaa   :  { %6467 = vmatprep.subr.bf16.mxu1 %v6021_v32  ;;  %v6104_v32 = vunpack.c.l.s8.bf16 %v5834_v25 }
 0xdad   :  { %6468 = vmatpush1.bf16.msra.mxu1 %v6020_v46  ;;  %v5841_v46 = vld [vmem:[#allocation17 + $0x448] sm:$0xff] }
 0xdae   :  { %6469 = vmatprep.subr.bf16.mxu1 %v6027_v8  ;;  %v6110_v8 = vunpack.c.h.s8.bf16 %v5834_v25  ;;  %v6117_v22 = vunpack.c.l.s8.bf16 %v5841_v46  ;;  %v6123_v45 = vunpack.c.h.s8.bf16 %v5841_v46 }
 0xdb1   :  { %6470 = vmatpush1.bf16.msra.mxu1 %v6026_v60  ;;  %v5840_v60 = vld [vmem:[#allocation17 + $0x440] sm:$0xff] }
 0xdb2   :  { %6471 = vmatprep.subr.bf16.mxu1 %v6033_v38  ;;  %v6116_v38 = vunpack.c.l.s8.bf16 %v5840_v60 }
 0xdb5   :  { %6472 = vmatpush1.bf16.msra.mxu1 %v6032_v4  ;;  %v5847_v4 = vld [vmem:[#allocation17 + $0x478] sm:$0xff] }
 0xdb6   :  { %6473 = vmatprep.subr.bf16.mxu1 %v6039_v53  ;;  %v6122_v53 = vunpack.c.h.s8.bf16 %v5840_v60  ;;  %v6129_v18 = vunpack.c.l.s8.bf16 %v5847_v4  ;;  %v6135_v28 = vunpack.c.h.s8.bf16 %v5847_v4 }
 0xdb9   :  { %6474 = vmatpush1.bf16.msra.mxu1 %v6038_v54  ;;  %v5846_v54 = vld [vmem:[#allocation17 + $0x470] sm:$0xff] }
 0xdba   :  { %6486 = vmatprep.subr.bf16.mxu1 %v6045_v16  ;;  %v6128_v16 = vunpack.c.l.s8.bf16 %v5846_v54 }
 0xdbc   :  { %6476 = vmatmul.mubr.bf16.vlgmr.msra.gmra.mrb[64].mxu1 %v9568_v39  ;;  %v6075_v39 = vunpack.c.h.s8.bf16 %v5817_v50 }
 0xdbd   :  { %6487 = vmatpush1.bf16.msra.mxu1 %v6044_v57  ;;  %6518 = vmatprep.mubr.bf16.mxu1 %v9598_v13  ;;  %v6074_v13 = vunpack.c.h.s8.bf16 %v5816_v15  ;;  %v6134_v57 = vunpack.c.h.s8.bf16 %v5846_v54 }
 0xdbe   :  { %6488 = vmatprep.subr.bf16.mxu1 %v6051_v52 }
 0xdc1   :  { %6489 = vmatpush1.bf16.msra.mxu1 %v6050_v44 }
 0xdc2   :  { %6490 = vmatprep.subr.bf16.mxu1 %v6057_v11 }
 0xdc5   :  { %6491 = vmatpush1.bf16.msra.mxu1 %v6056_v7 }
 0xdc6   :  { %6492 = vmatprep.subr.bf16.mxu1 %v6063_v24 }
 0xdc9   :  { %6493 = vmatpush1.bf16.msra.mxu1 %v6062_v12  ;;  %v6529_v12 = vld [vmem:[#allocation19] sm:$0x3f] }
 0xdca   :  { %6494 = vmatprep.subr.bf16.mxu1 %v6069_v17  ;;  %v6534_v17 = vrot.slane %v6529_v12, %v9056_v55  ;;  %v6538_v15 = vrot.slane %v6529_v12, %v9034_v14  ;;  %v6546_v10 = vrot.slane %v6529_v12, %v9059_v58  ;;  %v6554_v4 = vrot.slane %v6529_v12, %v9096_v48 }
 0xdcd   :  { %6495 = vmatpush1.bf16.msra.mxu1 %v6068_v56  ;;  %v6573_v56 = vld [vmem:[#allocation20] sm:$0x3f] }
 0xdce   :  { %6496 = vmatprep.subr.bf16.mxu1 %v6075_v39  ;;  %v6578_v61 = vrot.slane %v6573_v56, %v9056_v55  ;;  %v6590_v25 = vrot.slane %v6573_v56, %v9059_v58 }
 0xdd1   :  { %6497 = vmatpush1.bf16.msra.mxu1 %v6074_v13 }
 0xdd2   :  { %6498 = vmatprep.subr.bf16.mxu1 %v6081_v40  ;;  %v6542_v40 = vrot.slane %v6529_v12, %v9093_v33 }
 0xdd5   :  { %6499 = vmatpush1.bf16.msra.mxu1 %v6080_v36 }
 0xdd6   :  { %6500 = vmatprep.subr.bf16.mxu1 %v6087_v30 }
 0xdd9   :  { %6501 = vmatpush1.bf16.msra.mxu1 %v6086_v59  ;;  %v6586_v59 = vrot.slane %v6573_v56, %v9093_v33 }
 0xdda   :  { %6502 = vmatprep.subr.bf16.mxu1 %v6093_v43 }
 0xddd   :  { %6503 = vmatpush1.bf16.msra.mxu1 %v6092_v1 }
 0xdde   :  { %6504 = vmatprep.subr.bf16.mxu1 %v6099_v23 }
 0xde1   :  { %6505 = vmatpush1.bf16.msra.mxu1 %v6098_v35 }
 0xde2   :  { %6506 = vmatprep.subr.bf16.mxu1 %v6105_v42 }
 0xde5   :  { %6507 = vmatpush1.bf16.msra.mxu1 %v6104_v32 }
 0xde6   :  { %6508 = vmatprep.subr.bf16.mxu1 %v6111_v51 }
 0xde9   :  { %6509 = vmatpush1.bf16.msra.mxu1 %v6110_v8 }
 0xdea   :  { %6510 = vmatprep.subr.bf16.mxu1 %v6117_v22 }
 0xded   :  { %6511 = vmatpush1.bf16.msra.mxu1 %v6116_v38 }
 0xdee   :  { %6512 = vmatprep.subr.bf16.mxu1 %v6123_v45  ;;  %v6550_v45 = vrot.slane %v6529_v12, %v9127_v26 }
 0xdf1   :  { %6513 = vmatpush1.bf16.msra.mxu1 %v6122_v53 }
 0xdf2   :  { %6514 = vmatprep.subr.bf16.mxu1 %v6129_v18  ;;  %v6594_v18 = vrot.slane %v6573_v56, %v9127_v26 }
 0xdf5   :  { %6515 = vmatpush1.bf16.msra.mxu1 %v6128_v16  ;;  %v6598_v16 = vrot.slane %v6573_v56, %v9096_v48 }
 0xdf6   :  { %6516 = vmatprep.subr.bf16.mxu1 %v6135_v28 }
 0xdf9   :  { %6517 = vmatpush1.bf16.msra.mxu1 %v6134_v57 }
 0xdfc   :  { %6519 = vmatmul.mubr.bf16.vlgmr.msra.gmra.mrb[64].mxu1 %v9596_v9  ;;  %v6582_v9 = vrot.slane %v6573_v56, %v9034_v14 }
 0xe0f   :  { %v6262_v52 = vpop.f32.mrb[60].mxu1  ;;  %v6391_v6 = vpop.f32.mrb[32].mxu0 }
 0xe10   :  { %v6264_v44 = vpop.f32.mrb[61].mxu1  ;;  %v6393_v11 = vpop.f32.mrb[33].mxu0  ;;  %v6561_v39 = vmul.f32 %v6534_v17, %v6262_v52  ;;  %v6563_v43 = vmul.f32 %v6542_v40, %v6391_v6 }
 0xe11   :  { %v6266_v20 = vpop.f32.mrb[62].mxu1  ;;  %v6395_v7 = vpop.f32.mrb[34].mxu0  ;;  %v6562_v13 = vmul.f32 %v6538_v15, %v6264_v44  ;;  %v6564_v51 = vmul.f32 %v6546_v10, %v6393_v11 }
 0xe12   :  { %v6268_v24 = vpop.f32.mrb[63].mxu1  ;;  %v6397_v50 = vpop.f32.mrb[35].mxu0  ;;  %v6567_v63 = vmul.f32 %v6534_v17, %v6266_v20  ;;  %v6605_v30 = vadd.f32 %v6578_v61, %v6561_v39  ;;  %v6569_v42 = vmul.f32 %v6542_v40, %v6395_v7  ;;  %v6607_v32 = vadd.f32 %v6586_v59, %v6563_v43 }
 0xe13   :  { %v6568_v36 = vmul.f32 %v6538_v15, %v6268_v24  ;;  %v6606_v37 = vadd.f32 %v6582_v9, %v6562_v13  ;;  %v6570_v38 = vmul.f32 %v6546_v10, %v6397_v50  ;;  %v6608_v53 = vadd.f32 %v6590_v25, %v6564_v51 }
 0xe14   :  { %v6611_v1 = vadd.f32 %v6578_v61, %v6567_v63  ;;  %v6617_v62 = vadd.f32 %v6605_v30, %v9409_v41  ;;  %v6613_v60 = vadd.f32 %v6586_v59, %v6569_v42  ;;  %v6619_v41 = vadd.f32 %v6607_v32, %v9399_v49 }
 0xe15   :  { %v6612_v23 = vadd.f32 %v6582_v9, %v6568_v36  ;;  %v6618_v35 = vadd.f32 %v6606_v37, %v9404_v34  ;;  %v6614_v28 = vadd.f32 %v6590_v25, %v6570_v38  ;;  %v6620_v11 = vadd.f32 %v6608_v53, %v9428_v19 }
 0xe16   :  { %v6623_v46 = vadd.f32 %v6611_v1, %v9411_v31  ;;  %v6625_v31 = vadd.f32 %v6613_v60, %v9413_v29 }
 0xe17   :  { %v6624_v8 = vadd.f32 %v6612_v23, %v9407_v47  ;;  %v6631_v22 = vadd.f32 %v6618_v35, %v6617_v62  ;;  %v6626_v17 = vadd.f32 %v6614_v28, %v9415_v27 }
 0xe19   :  { %v6638_v34 = vadd.f32 %v6624_v8, %v6623_v46  ;;  %v6632_v52 = vadd.f32 %v6631_v22, %v6619_v41 }
 0xe1b   :  { %v6639_v24 = vadd.f32 %v6638_v34, %v6625_v31  ;;  %v6633_v29 = vadd.f32 %v6632_v52, %v6620_v11 }
 0xe1d   :  { %v6640_v40 = vadd.f32 %v6639_v24, %v6626_v17  ;;  %v7989_v24 = vld [vmem:[#allocation28 + $0x8] sm:$0xff]  }
 0xecf   :  { %v6520_v54 = vpop.f32.mrb[64].mxu1 }
 0xed0   :  { %v6565_v47 = vmul.f32 %v6550_v45, %v6520_v54  ;;  %v6522_v57 = vpop.f32.mrb[65].mxu1 }
 0xed1   :  { %v6566_v6 = vmul.f32 %v6554_v4, %v6522_v57  ;;  %v6524_v44 = vpop.f32.mrb[66].mxu1 }
 0xed2   :  { %v6609_v20 = vadd.f32 %v6594_v18, %v6565_v47  ;;  %v6571_v7 = vmul.f32 %v6550_v45, %v6524_v44  ;;  %v6526_v49 = vpop.f32.mrb[67].mxu1 }
 0xed3   :  { %v6610_v50 = vadd.f32 %v6598_v16, %v6566_v6  ;;  %v6572_v12 = vmul.f32 %v6554_v4, %v6526_v49  ;;  %v7988_v49 = vld [vmem:[#allocation28 + $0x48] sm:$0xff]  }
 0xed4   :  { %v6621_v15 = vadd.f32 %v6609_v20, %v9443_v21  ;;  %v6615_v56 = vadd.f32 %v6594_v18, %v6571_v7  ;;  %v7986_v20 = vld [vmem:[#allocation28 + $0x40] sm:$0xff]  }
 0xed5   :  { %v6616_v39 = vadd.f32 %v6598_v16, %v6572_v12  ;;  %v6622_v61 = vadd.f32 %v6610_v50, %v9417_v0  ;;  %v7987_v7 = vld [vmem:[#allocation28] sm:$0xff]   ;;  %7721 = vmatprep.subr.bf16.mxu0 %v7986_v20  ;;  %v7990_v50 = vld [vmem:[#allocation28 + $0x50] sm:$0xff]  }
 0xed6   :  { %v6627_v13 = vadd.f32 %v6615_v56, %v9447_v2  ;;  %v6634_v9 = vadd.f32 %v6633_v29, %v6621_v15  ;;  %7722 = vmatpush3.bf16.msra.mxu0 %v7987_v7  ;;  %v7991_v12 = vld [vmem:[#allocation28 + $0x10] sm:$0xff]   ;;  %v7994_v56 = vld [vmem:[#allocation28 + $0x60] sm:$0xff]  }
 0xed7   :  { %v6628_v19 = vadd.f32 %v6616_v39, %v9430_v5  ;;  %7723 = vmatprep.subr.bf16.mxu0 %v7988_v49  ;;  %v7995_v29 = vld [vmem:[#allocation28 + $0x20] sm:$0xff]   ;;  %v7996_v39 = vld [vmem:[#allocation28 + $0x68] sm:$0xff]  }
 0xed8   :  { %v6635_v63 = vadd.f32 %v6634_v9, %v6622_v61  ;;  %v6641_v36 = vadd.f32 %v6640_v40, %v6627_v13  ;;  %v7999_v9 = vld [vmem:[#allocation28 + $0x30] sm:$0xff]   ;;  %v8000_v40 = vld [vmem:[#allocation28 + $0x78] sm:$0xff]  }
 0xeda   :  { %6636 = vadd.xlane.f32.xlu1 %v6635_v63  ;;  %v6642_v30 = vadd.f32 %v6641_v36, %v6628_v19  ;;  %7724 = vmatpush3.bf16.msra.mxu0 %v7989_v24  ;;  %v8002_v63 = vld [vmem:[#allocation28 + $0xc0] sm:$0xff]  }
 0xedb   :  { %7725 = vmatprep.subr.bf16.mxu0 %v7990_v50 }
 0xedc   :  { %6643 = vadd.xlane.f32.xlu0 %v6642_v30 }
 0xede   :  { %7726 = vmatpush3.bf16.msra.mxu0 %v7991_v12 }
 0xf67   :  { %v6637_v37 = vpop.xlane.xlu1 %6636 }
 0xf68   :  { %v6645_v27 = vmul.f32 0.0013020834, %v6637_v37 }
 0xf69   :  { %v6644_v59 = vpop.xlane.xlu0 %6643 }
 0xf6a   :  { %v6646_v21 = vmul.f32 0.0013020834, %v6644_v59  ;;  %v9635_v43 = vsub.f32 %v6617_v62, %v6645_v27  ;;  %v9637_v10 = vsub.f32 %v6618_v35, %v6645_v27  ;;  %v9639_v0 = vsub.f32 %v6619_v41, %v6645_v27 }
 0xf6b   :  { %v9641_v2 = vsub.f32 %v6620_v11, %v6645_v27  ;;  %v9651_v25 = vsub.f32 %v6621_v15, %v6645_v27  ;;  %v7993_v15 = vld [vmem:[#allocation28 + $0x18] sm:$0xff]  }
 0xf6c   :  { %v6659_v5 = vmul.f32 %v9635_v43, %v9635_v43  ;;  %v6660_v1 = vmul.f32 %v9637_v10, %v9637_v10  ;;  %v9647_v23 = vsub.f32 %v6623_v46, %v6646_v21  ;;  %v9649_v42 = vsub.f32 %v6624_v8, %v6646_v21 }
 0xf6d   :  { %v6661_v62 = vmul.f32 %v9639_v0, %v9639_v0  ;;  %v9655_v32 = vsub.f32 %v6625_v31, %v6646_v21  ;;  %v9657_v51 = vsub.f32 %v6626_v17, %v6646_v21  ;;  %v9663_v46 = vsub.f32 %v6622_v61, %v6645_v27  ;;  %v7992_v17 = vld [vmem:[#allocation28 + $0x58] sm:$0xff]   ;;  %v7997_v61 = vld [vmem:[#allocation28 + $0x28] sm:$0xff]  }
 0xf6e   :  { %v6671_v35 = vadd.f32 %v6660_v1, %v6659_v5  ;;  %v6665_v22 = vmul.f32 %v9647_v23, %v9647_v23  ;;  %v6666_v60 = vmul.f32 %v9649_v42, %v9649_v42  ;;  %v6662_v8 = vmul.f32 %v9641_v2, %v9641_v2  ;;  %7727 = vmatprep.subr.bf16.mxu0 %v7992_v17  ;;  %v9683_v5 = vld [vmem:[#allocation25] sm:$0x3f]  ;;  %v9685_v1 = vld [vmem:[#allocation26] sm:$0x3f] }
 0xf6f   :  { %v9667_v45 = vsub.f32 %v6627_v13, %v6646_v21  ;;  %v6667_v4 = vmul.f32 %v9655_v32, %v9655_v32  ;;  %v6663_v53 = vmul.f32 %v9651_v25, %v9651_v25  ;;  %v9673_v18 = vsub.f32 %v6628_v19, %v6646_v21  ;;  %7728 = vmatpush3.bf16.msra.mxu0 %v7993_v15  ;;  %v7998_v13 = vld [vmem:[#allocation28 + $0x70] sm:$0xff]   ;;  %v8001_v19 = vld [vmem:[#allocation28 + $0x38] sm:$0xff]  }
 0xf70   :  { %v6672_v38 = vadd.f32 %v6671_v35, %v6661_v62  ;;  %v6678_v41 = vadd.f32 %v6666_v60, %v6665_v22  ;;  %v6668_v54 = vmul.f32 %v9657_v51, %v9657_v51  ;;  %v6664_v31 = vmul.f32 %v9663_v46, %v9663_v46  ;;  %7729 = vmatprep.subr.bf16.mxu0 %v7994_v56 }
 0xf71   :  { %v6669_v47 = vmul.f32 %v9667_v45, %v9667_v45  ;;  %v6670_v6 = vmul.f32 %v9673_v18, %v9673_v18  ;;  %v6711_v62 = vrot.slane %v9683_v5, %v9034_v14  ;;  %v6707_v35 = vrot.slane %v9683_v5, %v9056_v55 }
 0xf72   :  { %v6673_v34 = vadd.f32 %v6672_v38, %v6662_v8  ;;  %v6679_v16 = vadd.f32 %v6678_v41, %v6667_v4  ;;  %v6719_v22 = vrot.slane %v9683_v5, %v9059_v58  ;;  %v6754_v8 = vrot.slane %v9685_v1, %v9034_v14 }
 0xf73   :  { %7730 = vmatpush3.bf16.msra.mxu0 %v7995_v29  ;;  %v6750_v38 = vrot.slane %v9685_v1, %v9056_v55  ;;  %v6715_v50 = vrot.slane %v9683_v5, %v9093_v33 }
 0xf74   :  { %v6674_v28 = vadd.f32 %v6673_v34, %v6663_v53  ;;  %v6680_v57 = vadd.f32 %v6679_v16, %v6668_v54  ;;  %7731 = vmatprep.subr.bf16.mxu0 %v7996_v39  ;;  %v6762_v34 = vrot.slane %v9685_v1, %v9059_v58 }
 0xf76   :  { %v6675_v52 = vadd.f32 %v6674_v28, %v6664_v31  ;;  %v6681_v44 = vadd.f32 %v6680_v57, %v6669_v47 }
 0xf77   :  { %7732 = vmatpush3.bf16.msra.mxu0 %v7997_v61 }
 0xf78   :  { %6676 = vadd.xlane.f32.xlu1 %v6675_v52  ;;  %v6682_v11 = vadd.f32 %v6681_v44, %v6670_v6  ;;  %7733 = vmatprep.subr.bf16.mxu0 %v7998_v13 }
 0xf7a   :  { %6683 = vadd.xlane.f32.xlu0 %v6682_v11 }
 0xf7b   :  { %7734 = vmatpush3.bf16.msra.mxu0 %v7999_v9 }
 0xf7c   :  { %7735 = vmatprep.subr.bf16.mxu0 %v8000_v40 }
 0xf7f   :  { %7736 = vmatpush3.bf16.msra.mxu0 %v8001_v19  ;;  %v6758_v19 = vrot.slane %v9685_v1, %v9093_v33  ;;  %v6770_v33 = vrot.slane %v9685_v1, %v9096_v48 }
 0xf80   :  { %7743 = vmatprep.subr.bf16.mxu0 %v8002_v63 }
0x1005   :  { %v6677_v36 = vpop.xlane.xlu1 %6676 }
0x1006   :  { %v6685_v30 = vmul.f32 0.0013020834, %v6677_v36 }
0x1007   :  { %v6684_v27 = vpop.xlane.xlu0 %6683 }
0x1008   :  { %v6687_v37 = vadd.f32 1e-05, %v6685_v30  ;;  %v6686_v59 = vmul.f32 0.0013020834, %v6684_v27 }
0x100a   :  { %8070 = vrsqrt.f32 %v6687_v37  ;;  %v6688_v21 = vadd.f32 1e-05, %v6686_v59  ;;  %v6727_v37 = vrot.slane %v9683_v5, %v9096_v48 }
0x100c   :  { %8072 = vrsqrt.f32 %v6688_v21 }
0x1014   :  { %v9693_v60 = vpop.eup %8070 }
0x1015   :  { %v6692_v4 = vmul.f32 %v9693_v60, %v9637_v10  ;;  %v6691_v41 = vmul.f32 %v9693_v60, %v9635_v43  ;;  %v6694_v53 = vmul.f32 %v9693_v60, %v9641_v2  ;;  %v6693_v15 = vmul.f32 %v9693_v60, %v9639_v0 }
0x1016   :  { %v9707_v54 = vpop.eup %8072  ;;  %v6696_v48 = vmul.f32 %v9693_v60, %v9663_v46 }
0x1017   :  { %v6735_v16 = vmul.f32 %v6711_v62, %v6692_v4  ;;  %v6734_v31 = vmul.f32 %v6707_v35, %v6691_v41  ;;  %v6737_v14 = vmul.f32 %v6719_v22, %v6694_v53  ;;  %v6698_v55 = vmul.f32 %v9707_v54, %v9649_v42 }
0x1018   :  { %v6697_v10 = vmul.f32 %v9707_v54, %v9647_v23  ;;  %v6700_v43 = vmul.f32 %v9707_v54, %v9657_v51  ;;  %v6699_v23 = vmul.f32 %v9707_v54, %v9655_v32  ;;  %v6736_v21 = vmul.f32 %v6715_v50, %v6693_v15 }
0x1019   :  { %v9715_v28 = vadd.f32 %v6754_v8, %v6735_v16  ;;  %v9717_v2 = vadd.f32 %v6750_v38, %v6734_v31  ;;  %v9719_v47 = vadd.f32 %v6762_v34, %v6737_v14  ;;  %v6741_v58 = vmul.f32 %v6711_v62, %v6698_v55 }
0x101a   :  { %v6740_v57 = vmul.f32 %v6707_v35, %v6697_v10  ;;  %v6743_v52 = vmul.f32 %v6719_v22, %v6700_v43  ;;  %v6742_v61 = vmul.f32 %v6715_v50, %v6699_v23  ;;  %v9753_v10 = vadd.f32 %v6758_v19, %v6736_v21 }
0x101b   :  { %v6795_v6 = vrot.slane %v9715_v28, 4  ;;  %v6789_v44 = vrot.slane %v9717_v2, 4  ;;  %v6807_v42 = vrot.slane %v9719_v47, 4  ;;  %v9726_v11 = vadd.f32 %v6754_v8, %v6741_v58 }
0x101c   :  { %v9728_v51 = vadd.f32 %v6750_v38, %v6740_v57  ;;  %v9730_v20 = vadd.f32 %v6762_v34, %v6743_v52  ;;  %v9749_v8 = vadd.f32 %v6758_v19, %v6742_v61  ;;  %v6702_v46 = vmul.f32 %v9707_v54, %v9673_v18 }
0x101d   :  { %v6796_v7 = vadd.f32 %v6795_v6, %v9715_v28  ;;  %v6790_v49 = vadd.f32 %v6789_v44, %v9717_v2  ;;  %v6808_v24 = vadd.f32 %v6807_v42, %v9719_v47  ;;  %v6831_v12 = vrot.slane %v9726_v11, 4 }
0x101e   :  { %v6825_v17 = vrot.slane %v9728_v51, 4  ;;  %v6843_v32 = vrot.slane %v9730_v20, 4  ;;  %v6837_v52 = vrot.slane %v9749_v8, 4 }
0x101f   :  { %v6797_v56 = vrot.slane %v6796_v7, 2  ;;  %v6791_v29 = vrot.slane %v6790_v49, 2  ;;  %v6809_v39 = vrot.slane %v6808_v24, 2  ;;  %v6832_v13 = vadd.f32 %v6831_v12, %v9726_v11 }
0x1020   :  { %v6826_v9 = vadd.f32 %v6825_v17, %v9728_v51  ;;  %v6844_v40 = vadd.f32 %v6843_v32, %v9730_v20 }
0x1021   :  { %v6798_v63 = vadd.f32 %v6797_v56, %v6796_v7  ;;  %v6792_v36 = vadd.f32 %v6791_v29, %v6790_v49  ;;  %v6810_v30 = vadd.f32 %v6809_v39, %v6808_v24  ;;  %v6833_v0 = vrot.slane %v6832_v13, 2 }
0x1022   :  { %v6827_v27 = vrot.slane %v6826_v9, 2  ;;  %v6845_v59 = vrot.slane %v6844_v40, 2  ;;  %v6723_v49 = vrot.slane %v9683_v5, %v9127_v26  ;;  %v8572_v24 = vmov 1983009808  }
0x1023   :  { %v6799_v62 = vrot.slane %v6798_v63, 1  ;;  %v6793_v35 = vrot.slane %v6792_v36, 1  ;;  %v6811_v22 = vrot.slane %v6810_v30, 1  ;;  %v6834_v38 = vadd.f32 %v6833_v0, %v6832_v13 }
0x1024   :  { %v6828_v4 = vadd.f32 %v6827_v27, %v6826_v9  ;;  %v6846_v41 = vadd.f32 %v6845_v59, %v6844_v40  ;;  %v6900_v50 = vunpack.c.l.s4 %v8572_v24  ;;  %v6801_v56 = vrot.slane %v9753_v10, 4 }
0x1025   :  { %v6800_v53 = vadd.f32 %v6799_v62, %v6798_v63  ;;  %v6794_v34 = vadd.f32 %v6793_v35, %v6792_v36  ;;  %v6812_v16 = vadd.f32 %v6811_v22, %v6810_v30  ;;  %v6835_v31 = vrot.slane %v6834_v38, 1 }
0x1026   :  { %v6829_v14 = vrot.slane %v6828_v4, 1  ;;  %v6847_v55 = vrot.slane %v6846_v41, 1  ;;  %v6838_v29 = vadd.f32 %v6837_v52, %v9749_v8  ;;  %v6766_v5 = vrot.slane %v9685_v1, %v9127_v26 }
0x1027   :  { %v6862_v43 = vsub.f32 %v6800_v53, %v9715_v28  ;;  %v6861_v58 = vsub.f32 %v6794_v34, %v9717_v2  ;;  %v6864_v57 = vsub.f32 %v6812_v16, %v9719_v47  ;;  %v6836_v6 = vadd.f32 %v6835_v31, %v6834_v38 }
0x1028   :  { %v6830_v44 = vadd.f32 %v6829_v14, %v6828_v4  ;;  %v6848_v42 = vadd.f32 %v6847_v55, %v6846_v41  ;;  %v6739_v9 = vmul.f32 %v6727_v37, %v6696_v48  ;;  %v6695_v63 = vmul.f32 %v9693_v60, %v9651_v25 }
0x1029   :  { %v6874_v23 = vmul.f32 0.14285715, %v6862_v43  ;;  %v6873_v7 = vmul.f32 0.14285715, %v6861_v58  ;;  %v6868_v12 = vsub.f32 %v6836_v6, %v9726_v11  ;;  %v6876_v15 = vmul.f32 0.14285715, %v6864_v57 }
0x102a   :  { %v6867_v17 = vsub.f32 %v6830_v44, %v9728_v51  ;;  %v6870_v32 = vsub.f32 %v6848_v42, %v9730_v20  ;;  %v6901_v36 = vunpack.c.0.s8 %v6900_v50  ;;  %v6802_v21 = vadd.f32 %v6801_v56, %v9753_v10  ;;  %v8003_v6 = vld [vmem:[#allocation28 + $0x80] sm:$0xff]   ;;  %v8004_v42 = vld [vmem:[#allocation28 + $0xc8] sm:$0xff]  }
0x102b   :  { %v6880_v39 = vmul.f32 0.14285715, %v6868_v12  ;;  %v6972_v40 = vpack.c.bf16 %v6874_v23, %v6874_v23  ;;  %v6971_v19 = vpack.c.bf16 %v6873_v7, %v6873_v7  ;;  %v6974_v27 = vpack.c.bf16 %v6876_v15, %v6876_v15  ;;  %v8005_v15 = vld [vmem:[#allocation28 + $0x88] sm:$0xff]  }
0x102c   :  { %v6879_v61 = vmul.f32 0.14285715, %v6867_v17  ;;  %v6882_v13 = vmul.f32 0.14285715, %v6870_v32  ;;  %v6839_v18 = vrot.slane %v6838_v29, 2  ;;  %v6745_v62 = vmul.f32 %v6727_v37, %v6702_v46 }
0x102d   :  { %v6978_v30 = vpack.c.bf16 %v6880_v39, %v6880_v39  ;;  %v9775_v35 = vadd.f32 %v6770_v33, %v6739_v9  ;;  %v6701_v38 = vmul.f32 %v9707_v54, %v9667_v45  ;;  %v7099_v4 = vunpack.c.l.b16 %v6972_v40 }
0x102e   :  { %v6977_v0 = vpack.c.bf16 %v6879_v61, %v6879_v61  ;;  %v6980_v59 = vpack.c.bf16 %v6882_v13, %v6882_v13  ;;  %v7098_v41 = vunpack.c.l.b16 %v6971_v19  ;;  %v9779_v25 = vadd.f32 %v6770_v33, %v6745_v62 }
0x102f   :  { %v7105_v26 = vunpack.c.l.b16 %v6978_v30  ;;  %v6819_v60 = vrot.slane %v9775_v35, 4  ;;  %v7101_v16 = vunpack.c.l.b16 %v6974_v27  ;;  %v6840_v14 = vadd.f32 %v6839_v18, %v6838_v29 }
0x1030   :  { %v7104_v1 = vunpack.c.l.b16 %v6977_v0  ;;  %v7107_v22 = vunpack.c.l.b16 %v6980_v59  ;;  %v6855_v55 = vrot.slane %v9779_v25, 4  ;;  %v6738_v43 = vmul.f32 %v6723_v49, %v6695_v63 }
0x1031   :  { %v7112_v53 = vrot.slane %v7105_v26, 7  ;;  %v6820_v37 = vadd.f32 %v6819_v60, %v9775_v35  ;;  %v6744_v33 = vmul.f32 %v6723_v49, %v6701_v38  ;;  %v6803_v44 = vrot.slane %v6802_v21, 2  ;;  %v8009_v26 = vld [vmem:[#allocation28 + $0x98] sm:$0xff]  }
0x1032   :  { %v7110_v34 = vrot.slane %v7104_v1, 7  ;;  %v7116_v31 = vrot.slane %v7107_v22, 7  ;;  %v6856_v23 = vadd.f32 %v6855_v55, %v9779_v25  ;;  %v6841_v24 = vrot.slane %v6840_v14, 1 }
0x1033   :  { %v7113_v58 = vsel %vm6952_vm2, %v7112_v53, %v7099_v4  ;;  %v6821_v48 = vrot.slane %v6820_v37, 2  ;;  %v6904_v50 = vsub.s32 %v6901_v36, %v9028_v3  ;;  %v9789_v17 = vadd.f32 %v6766_v5, %v6738_v43  ;;  %v8006_v3 = vld [vmem:[#allocation28 + $0xd0] sm:$0xff]   ;;  %v8008_v36 = vld [vmem:[#allocation28 + $0xd8] sm:$0xff]   ;;  %v8010_v4 = vld [vmem:[#allocation28 + $0xe0] sm:$0xff]  }
0x1034   :  { %v7111_v45 = vsel %vm6952_vm2, %v7110_v34, %v7098_v41  ;;  %v7117_v54 = vsel %vm6952_vm2, %v7116_v31, %v7101_v16  ;;  %v7123_v57 = vpack.c.b16 %v7113_v58, %v7113_v58  ;;  %v6857_v12 = vrot.slane %v6856_v23, 2  ;;  %v8011_v31 = vld [vmem:[#allocation28 + $0xa0] sm:$0xff]   ;;  %v8012_v43 = vld [vmem:[#allocation28 + $0xe8] sm:$0xff]  }
0x1035   :  { %v7122_v52 = vpack.c.b16 %v7111_v45, %v7111_v45  ;;  %v7125_v7 = vpack.c.b16 %v7117_v54, %v7117_v54  ;;  %v9791_v32 = vadd.f32 %v6766_v5, %v6744_v33  ;;  %v6922_v49 = vcombine.low %v9728_v51, %v9726_v11 }
0x1036   :  { %7454 = vmatprep.mubr.bf16.mxu0 %v7123_v57  ;;  %v6804_v56 = vadd.f32 %v6803_v44, %v6802_v21  ;;  %v6897_v29 = vcombine.low %v9717_v2, %v9715_v28  ;;  %v6898_v46 = vcombine.low %v9753_v10, %v9719_v47  ;;  %v6822_v39 = vadd.f32 %v6821_v48, %v6820_v37  ;;  %v8007_v28 = vld [vmem:[#allocation28 + $0x90] sm:$0xff]  }
0x1037   :  { %7455 = vmatmul.mubr.bf16.vlgmr.msra.gmra.mrb[36].mxu0 %v7122_v52  ;;  %v6858_v61 = vadd.f32 %v6857_v12, %v6856_v23  ;;  %v6842_v13 = vadd.f32 %v6841_v24, %v6840_v14  ;;  %v6923_v5 = vcombine.low %v9749_v8, %v9730_v20  ;;  %v6930_v9 = vrot.slane %v6922_v49, %v6904_v50  ;;  %v8016_v12 = vld [vmem:[#allocation28 + $0xf8] sm:$0xff]  }
0x1038   :  { %7744 = vmatpush3.bf16.msra.mxu0 %v8003_v6  ;;  %7494 = vmatprep.mubr.bf16.mxu0 %v7125_v7  ;;  %v6914_v51 = vcombine.low %v9789_v17, %v9775_v35  ;;  %v6939_v40 = vcombine.low %v9791_v32, %v9779_v25  ;;  %v6805_v2 = vrot.slane %v6804_v56, 1  ;;  %v6905_v47 = vrot.slane %v6897_v29, %v6904_v50  ;;  %v8013_v6 = vld [vmem:[#allocation28 + $0xa8] sm:$0xff]  }
0x1039   :  { %7745 = vmatprep.subr.bf16.mxu0 %v8004_v42  ;;  %v6859_v11 = vrot.slane %v6858_v61, 1  ;;  %v6912_v19 = vrot.slane %v6898_v46, %v6904_v50  ;;  %v6937_v63 = vrot.slane %v6923_v5, %v6904_v50  ;;  %v6823_v30 = vrot.slane %v6822_v39, 1  ;;  %v8014_v42 = vld [vmem:[#allocation28 + $0xf0] sm:$0xff]   ;;  %v8017_v46 = vld [vmem:[#allocation28 + $0xb8] sm:$0xff]  }
0x103a   :  { %v6946_v27 = vrot.slane %v6939_v40, %v6904_v50  ;;  %v6869_v20 = vsub.f32 %v6842_v13, %v9749_v8  ;;  %v6921_v18 = vrot.slane %v6914_v51, %v6904_v50  ;;  %v6806_v1 = vadd.f32 %v6805_v2, %v6804_v56  ;;  %v8019_v51 = vld [vmem:[#allocation28 + $0x100] sm:$0xff]   ;;  %v8020_v2 = vld [vmem:[#allocation28 + $0x148] sm:$0xff]  }
0x103b   :  { %v6860_v0 = vadd.f32 %v6859_v11, %v6858_v61  ;;  %v6938_v59 = vcombine.low %v6930_v9, %v6937_v63  ;;  %v6913_v22 = vcombine.low %v6905_v47, %v6912_v19  ;;  %v6824_v41 = vadd.f32 %v6823_v30, %v6822_v39  ;;  %v8018_v61 = vld [vmem:[#allocation28 + $0x140] sm:$0xff]   ;;  %v8021_v63 = vld [vmem:[#allocation28 + $0x108] sm:$0xff]   ;;  %v8022_v30 = vld [vmem:[#allocation28 + $0x150] sm:$0xff]  }
0x103c   :  { %7746 = vmatpush3.bf16.msra.mxu0 %v8005_v15  ;;  %v6962_v62 = vrot.slane %v6946_v27, 7  ;;  %v6881_v53 = vmul.f32 0.14285715, %v6869_v20  ;;  %v6863_v14 = vsub.f32 %v6806_v1, %v9753_v10  ;;  %v6849_v57 = vrot.slane %v9791_v32, 4  ;;  %v8023_v27 = vld [vmem:[#allocation28 + $0x110] sm:$0xff]  }
0x103d   :  { %7747 = vmatprep.subr.bf16.mxu0 %v8006_v3  ;;  %v6872_v21 = vsub.f32 %v6860_v0, %v9779_v25  ;;  %v6951_v38 = vrot.slane %v6938_v59, 7  ;;  %v6866_v58 = vsub.f32 %v6824_v41, %v9775_v35  ;;  %v8015_v35 = vld [vmem:[#allocation28 + $0xb0] sm:$0xff]   ;;  %v6813_v50 = vrot.slane %v9789_v17, 4  ;;  %v8024_v59 = vld [vmem:[#allocation28 + $0x158] sm:$0xff]  }
0x103e   :  { %v6963_v60 = vsel %vm6952_vm2, %v6962_v62, %v6921_v18  ;;  %v6979_v33 = vpack.c.bf16 %v6881_v53, %v6881_v53  ;;  %v6875_v44 = vmul.f32 0.14285715, %v6863_v14  ;;  %v6850_v23 = vadd.f32 %v6849_v57, %v9791_v32  ;;  %v8025_v18 = vld [vmem:[#allocation28 + $0x118] sm:$0xff]  }
0x103f   :  { %v6953_v8 = vsel %vm6952_vm2, %v6951_v38, %v6913_v22  ;;  %v6964_v25 = vsel %vm6954_vm3, %v6962_v62, %v6963_v60  ;;  %v6884_v34 = vmul.f32 0.14285715, %v6872_v21  ;;  %v6878_v10 = vmul.f32 0.14285715, %v6866_v58  ;;  %v8027_v22 = vld [vmem:[#allocation28 + $0x120] sm:$0xff]   ;;  %v8029_v60 = vld [vmem:[#allocation28 + $0x128] sm:$0xff]  }
0x1040   :  { %7748 = vmatpush3.bf16.msra.mxu0 %v8007_v28  ;;  %v6955_v16 = vsel %vm6954_vm3, %v6951_v38, %v6953_v8  ;;  %v6965_v55 = vsel %vm6956_vm4, %v6962_v62, %v6964_v25  ;;  %v7106_v48 = vunpack.c.l.b16 %v6979_v33  ;;  %v6973_v24 = vpack.c.bf16 %v6875_v44, %v6875_v44  ;;  %v8030_v8 = vld [vmem:[#allocation28 + $0x170] sm:$0xff]   ;;  %v8033_v14 = vld [vmem:[#allocation28 + $0x138] sm:$0xff]  }
0x1041   :  { %7749 = vmatprep.subr.bf16.mxu0 %v8008_v36  ;;  %v6957_v37 = vsel %vm6956_vm4, %v6951_v38, %v6955_v16  ;;  %v6966_v54 = vsel %vm6958_vm5, %v6962_v62, %v6965_v55  ;;  %v6982_v52 = vpack.c.bf16 %v6884_v34, %v6884_v34  ;;  %v6976_v49 = vpack.c.bf16 %v6878_v10, %v6878_v10  ;;  %v8032_v16 = vld [vmem:[#allocation28 + $0x178] sm:$0xff]  }
0x1042   :  { %v6959_v45 = vsel %vm6958_vm5, %v6951_v38, %v6957_v37  ;;  %6970 = vst [vmem:[#allocation32 + $0x8] sm:$0xf] %v6966_v54  ;;  %v7114_v15 = vrot.slane %v7106_v48, 7  ;;  %v6851_v56 = vrot.slane %v6850_v23, 2  ;;  %v7100_v3 = vunpack.c.l.b16 %v6973_v24 }
0x1043   :  { %6969 = vst [vmem:[#allocation32] sm:$0xff] %v6959_v45  ;;  %v7109_v7 = vunpack.c.l.b16 %v6982_v52  ;;  %v6814_v39 = vadd.f32 %v6813_v50, %v9789_v17  ;;  %v7103_v13 = vunpack.c.l.b16 %v6976_v49 }
0x1044   :  { %7750 = vmatpush3.bf16.msra.mxu0 %v8009_v26  ;;  %v7115_v5 = vsel %vm6952_vm2, %v7114_v15, %v7100_v3  ;;  %v6852_v9 = vadd.f32 %v6851_v56, %v6850_v23  ;;  %v8026_v26 = vld [vmem:[#allocation28 + $0x160] sm:$0xff]  }
0x1045   :  { %7751 = vmatprep.subr.bf16.mxu0 %v8010_v4  ;;  %v7120_v29 = vrot.slane %v7109_v7, 7  ;;  %v6815_v40 = vrot.slane %v6814_v39, 2  ;;  %v7124_v28 = vpack.c.b16 %v7115_v5, %v7115_v5  ;;  %v8028_v4 = vld [vmem:[#allocation28 + $0x168] sm:$0xff]  }
0x1046   :  { %v6853_v19 = vrot.slane %v6852_v9, 1 }
0x1047   :  { %v7121_v11 = vsel %vm6952_vm2, %v7120_v29, %v7103_v13  ;;  %v6816_v36 = vadd.f32 %v6815_v40, %v6814_v39 }
0x1048   :  { %7752 = vmatpush3.bf16.msra.mxu0 %v8011_v31  ;;  %v7127_v47 = vpack.c.b16 %v7121_v11, %v7121_v11  ;;  %v6854_v0 = vadd.f32 %v6853_v19, %v6852_v9 }
0x1049   :  { %7753 = vmatprep.subr.bf16.mxu0 %v8012_v43  ;;  %v6817_v20 = vrot.slane %v6816_v36, 1 }
0x104a   :  { %v6871_v21 = vsub.f32 %v6854_v0, %v9791_v32  ;;  %v8031_v32 = vld [vmem:[#allocation28 + $0x130] sm:$0xff]  }
0x104b   :  { %v6818_v62 = vadd.f32 %v6817_v20, %v6816_v36 }
0x104c   :  { %7754 = vmatpush3.bf16.msra.mxu0 %v8013_v6  ;;  %v6883_v1 = vmul.f32 0.14285715, %v6871_v21 }
0x104d   :  { %7755 = vmatprep.subr.bf16.mxu0 %v8014_v42  ;;  %v6865_v38 = vsub.f32 %v6818_v62, %v9789_v17 }
0x104e   :  { %v6981_v41 = vpack.c.bf16 %v6883_v1, %v6883_v1 }
0x104f   :  { %v6877_v53 = vmul.f32 0.14285715, %v6865_v38 }
0x1050   :  { %7756 = vmatpush3.bf16.msra.mxu0 %v8015_v35  ;;  %v7108_v25 = vunpack.c.l.b16 %v6981_v41 }
0x1051   :  { %7757 = vmatprep.subr.bf16.mxu0 %v8016_v12  ;;  %v6975_v34 = vpack.c.bf16 %v6877_v53, %v6877_v53 }
0x1052   :  { %v7118_v31 = vrot.slane %v7108_v25, 7 }
0x1053   :  { %v7102_v37 = vunpack.c.l.b16 %v6975_v34 }
0x1054   :  { %7758 = vmatpush3.bf16.msra.mxu0 %v8017_v46 }
0x1055   :  { %7765 = vmatprep.subr.bf16.mxu0 %v8018_v61  ;;  %v7119_v17 = vsel %vm6952_vm2, %v7118_v31, %v7102_v37 }
0x1056   :  { %v7126_v55 = vpack.c.b16 %v7119_v17, %v7119_v17 }
0x1057   :  { %7495 = vmatmul.mubr.bf16.vlgmr.msra.gmra.mrb[40].mxu0 %v7124_v28 }
0x1058   :  { %7766 = vmatpush3.bf16.msra.mxu0 %v8019_v51  ;;  %7534 = vmatprep.mubr.bf16.mxu0 %v7127_v47 }
0x1059   :  { %7767 = vmatprep.subr.bf16.mxu0 %v8020_v2 }
0x105c   :  { %7768 = vmatpush3.bf16.msra.mxu0 %v8021_v63 }
0x105d   :  { %7769 = vmatprep.subr.bf16.mxu0 %v8022_v30 }
0x1060   :  { %7770 = vmatpush3.bf16.msra.mxu0 %v8023_v27 }
0x1061   :  { %7771 = vmatprep.subr.bf16.mxu0 %v8024_v59 }
0x1064   :  { %7772 = vmatpush3.bf16.msra.mxu0 %v8025_v18 }
0x1065   :  { %7773 = vmatprep.subr.bf16.mxu0 %v8026_v26 }
0x1068   :  { %7774 = vmatpush3.bf16.msra.mxu0 %v8027_v22 }
0x1069   :  { %7775 = vmatprep.subr.bf16.mxu0 %v8028_v4 }
0x106c   :  { %7776 = vmatpush3.bf16.msra.mxu0 %v8029_v60 }
0x106d   :  { %7777 = vmatprep.subr.bf16.mxu0 %v8030_v8 }
0x1070   :  { %7778 = vmatpush3.bf16.msra.mxu0 %v8031_v32 }
0x1071   :  { %7779 = vmatprep.subr.bf16.mxu0 %v8032_v16 }
0x1074   :  { %7780 = vmatpush3.bf16.msra.mxu0 %v8033_v14 }
0x1077   :  { %7535 = vmatmul.mubr.bf16.vlgmr.msra.gmra.mrb[44].mxu0 %v7126_v55 }
0x1078   :  { %8487 = shalt.err (!%p8484_p8)
}
0x1079   :  { %s9885_s27 = sld [smem:[#allocation52_spill]] }
0x107f   :  { %s8488_s8 = scalar_lea.hbm %s9885_s27, 192 }
0x1080   :  { %p8489_p9 = scmp.ne.s32.totalorder %s9885_s27, %s8488_s8  ;;  %p8492_p10 = scmp.lt.u32.totalorder %s8488_s8, %s9885_s27 }
0x1082   :  { %p8494_p11 = pnand %p8492_p10, %p8489_p9 }
0x1084   :  { %8497 = shalt.err (!%p8494_p11)
}
0x1085   :  { %7562 = dma.vmem_to_hbm [thread:$0]  %s7560_s12, 192, %s9885_s27, [#allocation33]   ;;  %v7636_v57 = vld [vmem:[#allocation29] ss:$0 sm:$0xff] }
0x1086   :  { %s8574_s14 = smov [#allocation31]  }
0x1087   :  { %s7549_s0 = sshll.u32 %s8574_s14, 4  ;;  %s7550_s0 = int_to_ptr.vmem [resolvable:$true] %s7549_s0 }
0x1088   :  { %s8498_s3 = scalar_lea.vmem %s7550_s0, 32  ;;  %p8503_p13 = scmp.lt.s32.totalorder %s7550_s0, %s7550_s0 }
0x1089   :  { %p8499_p12 = scmp.ne.s32.totalorder %s7550_s0, %s8498_s3  ;;  %p8504_p0 = scmp.lt.s32.totalorder %s8498_s3, %s8498_s3 }
0x108b   :  { %p8505_p1 = por %p8504_p0, %p8503_p13 }
0x108d   :  { %p8506_p2 = pnand %p8505_p1, %p8499_p12 }
0x110a   :  { %v7737_v43 = vpop.f32.mrb[36].mxu0 }
0x110b   :  { %v7738_v58 = vpop.f32.mrb[37].mxu0 }
0x110c   :  { %v7739_v45 = vadd.f32 %v7738_v58, %v7737_v43  ;;  %v7740_v54 = vpop.f32.mrb[38].mxu0 }
0x110d   :  { %v7741_v33 = vpop.f32.mrb[39].mxu0 }
0x110e   :  { %v7457_v44 = vadd.f32 %v7739_v45, %v7636_v57 }
0x112a   :  { %v7759_v52 = vpop.f32.mrb[40].mxu0 }
0x112b   :  { %v7760_v6 = vpop.f32.mrb[41].mxu0 }
0x112c   :  { %v7761_v42 = vadd.f32 %v7760_v6, %v7759_v52  ;;  %v7762_v10 = vpop.f32.mrb[42].mxu0 }
0x112d   :  { %v7763_v48 = vpop.f32.mrb[43].mxu0 }
0x112e   :  { %v7497_v23 = vadd.f32 %v7761_v42, %v7457_v44 }
0x114a   :  { %v7781_v7 = vpop.f32.mrb[44].mxu0 }
0x114b   :  { %v7782_v35 = vpop.f32.mrb[45].mxu0 }
0x114c   :  { %v7783_v24 = vadd.f32 %v7782_v35, %v7781_v7  ;;  %v7784_v50 = vpop.f32.mrb[46].mxu0 }
0x114d   :  { %v7785_v12 = vpop.f32.mrb[47].mxu0 }
0x114e   :  { %v7537_v49 = vadd.f32 %v7783_v24, %v7497_v23 }
0x1150   :  { %7542 = vst [vmem:[#allocation31] sm:$0x3] %v7537_v49 }
0x1151   :  { %8509 = shalt.err (!%p8506_p2)
}
0x1152   :  { %s9886_s9 = sld [smem:[#allocation51_spill]] }
0x1158   :  { %s8510_s2 = scalar_lea.hbm %s9886_s9, 32 }
0x1159   :  { %p8511_p3 = scmp.ne.s32.totalorder %s9886_s9, %s8510_s2  ;;  %p8514_p4 = scmp.lt.u32.totalorder %s8510_s2, %s9886_s9 }
0x115b   :  { %p8516_p5 = pnand %p8514_p4, %p8511_p3 }
0x115d   :  { %8519 = shalt.err (!%p8516_p5)
}
0x115e   :  { %7552 = dma.vmem_to_hbm [thread:$0]  %s7550_s0, 32, %s9886_s9, [#allocation4]  }
0x115f   :  { %8540 = dma.done.wait [#allocation4], 32  }
0x1160   :  { %8541 = vsyncadd [#allocation4], 4294967264 }
0x1161   :  { %8542 = dma.done.wait [#allocation33], 192  }
0x1162   :  { %8543 = vsyncadd [#allocation33], 4294967104 }
0x1163   :  { %7569 = vsyncpa [#allocation3], 1 }
0x1164   :  { %7570 = vsyncpa [#allocation6], 1 }
0x1165   :  { %7571 = vsyncpa [#allocation9], 1 }
0x1166   :  { %7572 = vsyncpa [#allocation12], 1 }
0x1167   :  { %7573 = vsyncpa [#allocation15], 1 }
0x1168   :  { %7574 = vsyncpa [#allocation18], 1 }
0x1169   :  { %7575 = vsyncpa [#allocation21], 1 }
0x116a   :  { %7576 = vsyncpa [#allocation24], 1 }
0x116b   :  { %7577 = vsyncpa [#allocation27], 1 }
0x116c   :  { %7578 = vsyncpa [#allocation30], 1 }
0x116d   :  { %7579 = vsyncpa [#allocation4], 1 }
0x116e   :  { %7580 = vsyncpa [#allocation33], 1 }

</bundles_post_ra>
